<compile_context>
chip_gen: v6e
topology: v6e:2x2x1
jax: 0.10.0
libtpu: 0.0.40
codegen_flags: <defaults>
</compile_context>

<pallas_src>
import jax
import jax.numpy as jnp
from jax.experimental import pallas as pl
from jax.experimental.pallas import tpu as pltpu


def resblock_kernel(x_ref, w1_ref, b1_ref, w2_ref, b2_ref, o_ref,
                    pad_ref, cols_ref):
    # x_ref   : (Nb, H, W, C)       raw (un-activated) NHWC input block
    # w1/w2   : (9*C, C)            flattened 3x3 HWIO weights (im2col layout)
    # b1/b2   : (1, C)
    # o_ref   : (Nb, H, W, C)
    # pad_ref : (Nb, H+2, W+2, C)   VMEM scratch: zero-padded activations
    # cols_ref: (Nb*H*W, 9*C)       VMEM scratch: im2col buffer
    Nb, H, W, C = o_ref.shape
    M = Nb * H * W

    # Zero only the 1-pixel border of the padded scratch; the interior is
    # fully overwritten below, so no full-array zero fill is needed.
    pad_ref[:, 0:1, :, :] = jnp.zeros((Nb, 1, W + 2, C), jnp.float32)
    pad_ref[:, H + 1:H + 2, :, :] = jnp.zeros((Nb, 1, W + 2, C), jnp.float32)
    pad_ref[:, 1:H + 1, 0:1, :] = jnp.zeros((Nb, H, 1, C), jnp.float32)
    pad_ref[:, 1:H + 1, W + 1:W + 2, :] = jnp.zeros((Nb, H, 1, C), jnp.float32)

    def conv3x3(w_ref, b_ref):
        # Build the im2col buffer (M, 9C) once in VMEM, then a single MXU
        # matmul with contraction dim 9*C.
        padded = pad_ref[...]                               # (Nb, H+2, W+2, C)
        for t in range(9):
            ki, kj = divmod(t, 3)
            tap = padded[:, ki:ki + H, kj:kj + W, :]        # (Nb, H, W, C)
            cols_ref[:, t * C:(t + 1) * C] = tap.reshape(M, C)
        out = jnp.dot(cols_ref[...], w_ref[...],
                      preferred_element_type=jnp.float32)   # (M, C)
        return out + b_ref[...]

    # ---- conv1 on relu(x_in); relu commutes with zero padding ----
    pad_ref[:, 1:H + 1, 1:W + 1, :] = jnp.maximum(
        x_ref[...].astype(jnp.float32), 0.0)
    h = jnp.maximum(conv3x3(w1_ref, b1_ref), 0.0)           # (M, C)

    # ---- conv2 on relu(conv1(.)): reuse the same padded scratch ----
    pad_ref[:, 1:H + 1, 1:W + 1, :] = h.reshape(Nb, H, W, C)
    y = conv3x3(w2_ref, b2_ref)                             # (M, C)

    # ---- residual add: x_in + conv2(...) ----
    res = x_ref[...].astype(jnp.float32).reshape(M, C) + y
    o_ref[...] = res.reshape(Nb, H, W, C).astype(o_ref.dtype)


def resblock_forward(x_nchw, w1, b1, w2, b2, *, max_images_per_step=8):
    """x_nchw: (N, C, H, W) float32. w*: (3, 3, C, C) HWIO. b*: (C,)."""
    N, C, H, W = x_nchw.shape
    x = jnp.transpose(x_nchw, (0, 2, 3, 1))                 # NHWC
    w1f = w1.reshape(9 * C, C)                              # im2col weights
    w2f = w2.reshape(9 * C, C)
    b1_2d = b1.reshape(1, C)
    b2_2d = b2.reshape(1, C)

    # Images per grid step: largest divisor of N within the cap.  Keeps the
    # double-buffered in/out blocks plus the padded and im2col scratches well
    # under the VMEM budget (v7x: 64 MiB physical) while amortizing the
    # per-grid-step overhead.  For large production H, add a row-tile grid
    # axis with a 1-row halo instead of growing Nb.
    nb = 1
    for d in range(1, min(N, max_images_per_step) + 1):
        if N % d == 0:
            nb = d

    out_nhwc = pl.pallas_call(
        resblock_kernel,
        out_shape=jax.ShapeDtypeStruct((N, H, W, C), x.dtype),
        grid_spec=pltpu.PrefetchScalarGridSpec(
            num_scalar_prefetch=0,
            grid=(N // nb,),
            in_specs=[
                pl.BlockSpec((nb, H, W, C), lambda n: (n, 0, 0, 0)),
                pl.BlockSpec((9 * C, C), lambda n: (0, 0)),
                pl.BlockSpec((1, C), lambda n: (0, 0)),
                pl.BlockSpec((9 * C, C), lambda n: (0, 0)),
                pl.BlockSpec((1, C), lambda n: (0, 0)),
            ],
            out_specs=pl.BlockSpec((nb, H, W, C), lambda n: (n, 0, 0, 0)),
            scratch_shapes=[
                pltpu.VMEM((nb, H + 2, W + 2, C), jnp.float32),
                pltpu.VMEM((nb * H * W, 9 * C), jnp.float32),
            ],
        ),
        compiler_params=pltpu.CompilerParams(
            dimension_semantics=("parallel",)),
    )(x, w1f, b1_2d, w2f, b2_2d)

    return jnp.transpose(out_nhwc, (0, 3, 1, 2))            # back to NCHW


def resblock_reference(x_nchw, w1, b1, w2, b2):
    """Pure-JAX reference (NHWC convs), returns NCHW."""
    x = jnp.transpose(x_nchw, (0, 2, 3, 1))
    dn = jax.lax.conv_dimension_numbers(x.shape, w1.shape,
                                        ("NHWC", "HWIO", "NHWC"))
    h = jax.nn.relu(x)
    h = jax.lax.conv_general_dilated(h, w1, (1, 1), "SAME",
                                     dimension_numbers=dn) + b1
    h = jax.nn.relu(h)
    y = jax.lax.conv_general_dilated(h, w2, (1, 1), "SAME",
                                     dimension_numbers=dn) + b2
    return jnp.transpose(x + y, (0, 3, 1, 2))


if __name__ == "__main__":
    # Small deterministic example: batch=2, channels=4, spatial=16x16 (NCHW).
    key = jax.random.PRNGKey(0)
    k_x, k_w1, k_b1, k_w2, k_b2 = jax.random.split(key, 5)

    N, C, H, W = 2, 4, 16, 16
    x = jax.random.normal(k_x, (N, C, H, W), dtype=jnp.float32)

    # Deterministic synthetic parameters (nn.Conv2d(C, C, 3, 1, 1) shapes),
    # stored HWIO = (3, 3, in_C, out_C) for the NHWC kernel.
    w1 = jax.random.normal(k_w1, (3, 3, C, C), dtype=jnp.float32) * 0.1
    b1 = jax.random.normal(k_b1, (C,), dtype=jnp.float32) * 0.1
    w2 = jax.random.normal(k_w2, (3, 3, C, C), dtype=jnp.float32) * 0.1
    b2 = jax.random.normal(k_b2, (C,), dtype=jnp.float32) * 0.1

    out = jax.block_until_ready(resblock_forward(x, w1, b1, w2, b2))
    ref = jax.block_until_ready(resblock_reference(x, w1, b1, w2, b2))

    assert out.shape == (N, C, H, W)
    assert jnp.allclose(out, ref, atol=1e-4, rtol=1e-4), \
        f"max abs err {jnp.max(jnp.abs(out - ref))}"

    print("KERNEL_OK")
</pallas_src>

<mosaic_0001>
module attributes {stable_mosaic.version = 11 : i64} {
  func.func @resblock_kernel(%arg0: i32, %arg1: memref<2x16x16x4xf32, #tpu.memory_space<vmem>>, %arg2: memref<36x4xf32, #tpu.memory_space<vmem>>, %arg3: memref<1x4xf32, #tpu.memory_space<vmem>>, %arg4: memref<36x4xf32, #tpu.memory_space<vmem>>, %arg5: memref<1x4xf32, #tpu.memory_space<vmem>>, %arg6: memref<2x16x16x4xf32, #tpu.memory_space<vmem>>, %arg7: memref<2x18x18x4xf32, #tpu.memory_space<vmem>>, %arg8: memref<512x36xf32, #tpu.memory_space<vmem>>) attributes {dimension_semantics = [#tpu.dimension_semantics<parallel>], iteration_bounds = array<i64: 1>, scalar_prefetch = 0 : i64, scratch_operands = 2 : i64, tpu.core_type = #tpu.core_type<tc>, window_params = [{transform_indices = @transform_0, window_bounds = array<i64: 2, 16, 16, 4>}, {pipeline_mode = #tpu.pipeline_mode<synchronous>, transform_indices = @transform_1, window_bounds = array<i64: 36, 4>}, {pipeline_mode = #tpu.pipeline_mode<synchronous>, transform_indices = @transform_2, window_bounds = array<i64: 1, 4>}, {pipeline_mode = #tpu.pipeline_mode<synchronous>, transform_indices = @transform_3, window_bounds = array<i64: 36, 4>}, {pipeline_mode = #tpu.pipeline_mode<synchronous>, transform_indices = @transform_4, window_bounds = array<i64: 1, 4>}, {transform_indices = @transform_5, window_bounds = array<i64: 2, 16, 16, 4>}]} {
    %cst = arith.constant 0.000000e+00 : f32
    %0 = vector.broadcast %cst : f32 to vector<2x1x18x4xf32>
    %c0 = arith.constant 0 : index
    %c0_0 = arith.constant 0 : index
    %c0_1 = arith.constant 0 : index
    %c0_2 = arith.constant 0 : index
    %1 = vector.load %arg7[%c0, %c0_0, %c0_1, %c0_2] : memref<2x18x18x4xf32, #tpu.memory_space<vmem>>, vector<2x1x18x4xf32>
    tpu.vector_store %arg7[%c0, %c0_0, %c0_1, %c0_2], %0 {strides = array<i32>} : memref<2x18x18x4xf32, #tpu.memory_space<vmem>>, vector<2x1x18x4xf32>,
    %cst_3 = arith.constant 0.000000e+00 : f32
    %2 = vector.broadcast %cst_3 : f32 to vector<2x1x18x4xf32>
    %c0_4 = arith.constant 0 : index
    %c17 = arith.constant 17 : index
    %c0_5 = arith.constant 0 : index
    %c0_6 = arith.constant 0 : index
    %3 = vector.load %arg7[%c0_4, %c17, %c0_5, %c0_6] : memref<2x18x18x4xf32, #tpu.memory_space<vmem>>, vector<2x1x18x4xf32>
    tpu.vector_store %arg7[%c0_4, %c17, %c0_5, %c0_6], %2 {strides = array<i32>} : memref<2x18x18x4xf32, #tpu.memory_space<vmem>>, vector<2x1x18x4xf32>,
    %cst_7 = arith.constant 0.000000e+00 : f32
    %4 = vector.broadcast %cst_7 : f32 to vector<2x16x1x4xf32>
    %c0_8 = arith.constant 0 : index
    %c1 = arith.constant 1 : index
    %c0_9 = arith.constant 0 : index
    %c0_10 = arith.constant 0 : index
    %5 = vector.load %arg7[%c0_8, %c1, %c0_9, %c0_10] : memref<2x18x18x4xf32, #tpu.memory_space<vmem>>, vector<2x16x1x4xf32>
    tpu.vector_store %arg7[%c0_8, %c1, %c0_9, %c0_10], %4 {strides = array<i32>} : memref<2x18x18x4xf32, #tpu.memory_space<vmem>>, vector<2x16x1x4xf32>,
    %cst_11 = arith.constant 0.000000e+00 : f32
    %6 = vector.broadcast %cst_11 : f32 to vector<2x16x1x4xf32>
    %c0_12 = arith.constant 0 : index
    %c1_13 = arith.constant 1 : index
    %c17_14 = arith.constant 17 : index
    %c0_15 = arith.constant 0 : index
    %7 = vector.load %arg7[%c0_12, %c1_13, %c17_14, %c0_15] : memref<2x18x18x4xf32, #tpu.memory_space<vmem>>, vector<2x16x1x4xf32>
    tpu.vector_store %arg7[%c0_12, %c1_13, %c17_14, %c0_15], %6 {strides = array<i32>} : memref<2x18x18x4xf32, #tpu.memory_space<vmem>>, vector<2x16x1x4xf32>,
    %c0_16 = arith.constant 0 : index
    %c0_17 = arith.constant 0 : index
    %c0_18 = arith.constant 0 : index
    %c0_19 = arith.constant 0 : index
    %8 = vector.load %arg1[%c0_16, %c0_17, %c0_18, %c0_19] : memref<2x16x16x4xf32, #tpu.memory_space<vmem>>, vector<2x16x16x4xf32>
    %cst_20 = arith.constant 0.000000e+00 : f32
    %9 = vector.broadcast %cst_20 : f32 to vector<2x16x16x4xf32>
    %10 = arith.maximumf %8, %9 : vector<2x16x16x4xf32>
    %c0_21 = arith.constant 0 : index
    %c1_22 = arith.constant 1 : index
    %c1_23 = arith.constant 1 : index
    %c0_24 = arith.constant 0 : index
    %11 = vector.load %arg7[%c0_21, %c1_22, %c1_23, %c0_24] : memref<2x18x18x4xf32, #tpu.memory_space<vmem>>, vector<2x16x16x4xf32>
    tpu.vector_store %arg7[%c0_21, %c1_22, %c1_23, %c0_24], %10 {strides = array<i32>} : memref<2x18x18x4xf32, #tpu.memory_space<vmem>>, vector<2x16x16x4xf32>,
    %c0_25 = arith.constant 0 : index
    %c0_26 = arith.constant 0 : index
    %c0_27 = arith.constant 0 : index
    %c0_28 = arith.constant 0 : index
    %12 = vector.load %arg7[%c0_25, %c0_26, %c0_27, %c0_28] : memref<2x18x18x4xf32, #tpu.memory_space<vmem>>, vector<2x18x18x4xf32>
    %13 = vector.extract_strided_slice %12 {offsets = [0, 0, 0, 0], sizes = [2, 16, 16, 4], strides = [1, 1, 1, 1]} : vector<2x18x18x4xf32> to vector<2x16x16x4xf32>
    %14 = vector.shape_cast %13 : vector<2x16x16x4xf32> to vector<512x4xf32>
    %c0_29 = arith.constant 0 : index
    %c0_30 = arith.constant 0 : index
    %15 = vector.load %arg8[%c0_29, %c0_30] : memref<512x36xf32, #tpu.memory_space<vmem>>, vector<512x4xf32>
    tpu.vector_store %arg8[%c0_29, %c0_30], %14 {strides = array<i32>} : memref<512x36xf32, #tpu.memory_space<vmem>>, vector<512x4xf32>,
    %16 = vector.extract_strided_slice %12 {offsets = [0, 0, 1, 0], sizes = [2, 16, 16, 4], strides = [1, 1, 1, 1]} : vector<2x18x18x4xf32> to vector<2x16x16x4xf32>
    %17 = vector.shape_cast %16 : vector<2x16x16x4xf32> to vector<512x4xf32>
    %c0_31 = arith.constant 0 : index
    %c4 = arith.constant 4 : index
    %18 = vector.load %arg8[%c0_31, %c4] : memref<512x36xf32, #tpu.memory_space<vmem>>, vector<512x4xf32>
    tpu.vector_store %arg8[%c0_31, %c4], %17 {strides = array<i32>} : memref<512x36xf32, #tpu.memory_space<vmem>>, vector<512x4xf32>,
    %19 = vector.extract_strided_slice %12 {offsets = [0, 0, 2, 0], sizes = [2, 16, 16, 4], strides = [1, 1, 1, 1]} : vector<2x18x18x4xf32> to vector<2x16x16x4xf32>
    %20 = vector.shape_cast %19 : vector<2x16x16x4xf32> to vector<512x4xf32>
    %c0_32 = arith.constant 0 : index
    %c8 = arith.constant 8 : index
    %21 = vector.load %arg8[%c0_32, %c8] : memref<512x36xf32, #tpu.memory_space<vmem>>, vector<512x4xf32>
    tpu.vector_store %arg8[%c0_32, %c8], %20 {strides = array<i32>} : memref<512x36xf32, #tpu.memory_space<vmem>>, vector<512x4xf32>,
    %22 = vector.extract_strided_slice %12 {offsets = [0, 1, 0, 0], sizes = [2, 16, 16, 4], strides = [1, 1, 1, 1]} : vector<2x18x18x4xf32> to vector<2x16x16x4xf32>
    %23 = vector.shape_cast %22 : vector<2x16x16x4xf32> to vector<512x4xf32>
    %c0_33 = arith.constant 0 : index
    %c12 = arith.constant 12 : index
    %24 = vector.load %arg8[%c0_33, %c12] : memref<512x36xf32, #tpu.memory_space<vmem>>, vector<512x4xf32>
    tpu.vector_store %arg8[%c0_33, %c12], %23 {strides = array<i32>} : memref<512x36xf32, #tpu.memory_space<vmem>>, vector<512x4xf32>,
    %25 = vector.extract_strided_slice %12 {offsets = [0, 1, 1, 0], sizes = [2, 16, 16, 4], strides = [1, 1, 1, 1]} : vector<2x18x18x4xf32> to vector<2x16x16x4xf32>
    %26 = vector.shape_cast %25 : vector<2x16x16x4xf32> to vector<512x4xf32>
    %c0_34 = arith.constant 0 : index
    %c16 = arith.constant 16 : index
    %27 = vector.load %arg8[%c0_34, %c16] : memref<512x36xf32, #tpu.memory_space<vmem>>, vector<512x4xf32>
    tpu.vector_store %arg8[%c0_34, %c16], %26 {strides = array<i32>} : memref<512x36xf32, #tpu.memory_space<vmem>>, vector<512x4xf32>,
    %28 = vector.extract_strided_slice %12 {offsets = [0, 1, 2, 0], sizes = [2, 16, 16, 4], strides = [1, 1, 1, 1]} : vector<2x18x18x4xf32> to vector<2x16x16x4xf32>
    %29 = vector.shape_cast %28 : vector<2x16x16x4xf32> to vector<512x4xf32>
    %c0_35 = arith.constant 0 : index
    %c20 = arith.constant 20 : index
    %30 = vector.load %arg8[%c0_35, %c20] : memref<512x36xf32, #tpu.memory_space<vmem>>, vector<512x4xf32>
    tpu.vector_store %arg8[%c0_35, %c20], %29 {strides = array<i32>} : memref<512x36xf32, #tpu.memory_space<vmem>>, vector<512x4xf32>,
    %31 = vector.extract_strided_slice %12 {offsets = [0, 2, 0, 0], sizes = [2, 16, 16, 4], strides = [1, 1, 1, 1]} : vector<2x18x18x4xf32> to vector<2x16x16x4xf32>
    %32 = vector.shape_cast %31 : vector<2x16x16x4xf32> to vector<512x4xf32>
    %c0_36 = arith.constant 0 : index
    %c24 = arith.constant 24 : index
    %33 = vector.load %arg8[%c0_36, %c24] : memref<512x36xf32, #tpu.memory_space<vmem>>, vector<512x4xf32>
    tpu.vector_store %arg8[%c0_36, %c24], %32 {strides = array<i32>} : memref<512x36xf32, #tpu.memory_space<vmem>>, vector<512x4xf32>,
    %34 = vector.extract_strided_slice %12 {offsets = [0, 2, 1, 0], sizes = [2, 16, 16, 4], strides = [1, 1, 1, 1]} : vector<2x18x18x4xf32> to vector<2x16x16x4xf32>
    %35 = vector.shape_cast %34 : vector<2x16x16x4xf32> to vector<512x4xf32>
    %c0_37 = arith.constant 0 : index
    %c28 = arith.constant 28 : index
    %36 = vector.load %arg8[%c0_37, %c28] : memref<512x36xf32, #tpu.memory_space<vmem>>, vector<512x4xf32>
    tpu.vector_store %arg8[%c0_37, %c28], %35 {strides = array<i32>} : memref<512x36xf32, #tpu.memory_space<vmem>>, vector<512x4xf32>,
    %37 = vector.extract_strided_slice %12 {offsets = [0, 2, 2, 0], sizes = [2, 16, 16, 4], strides = [1, 1, 1, 1]} : vector<2x18x18x4xf32> to vector<2x16x16x4xf32>
    %38 = vector.shape_cast %37 : vector<2x16x16x4xf32> to vector<512x4xf32>
    %c0_38 = arith.constant 0 : index
    %c32 = arith.constant 32 : index
    %39 = vector.load %arg8[%c0_38, %c32] : memref<512x36xf32, #tpu.memory_space<vmem>>, vector<512x4xf32>
    tpu.vector_store %arg8[%c0_38, %c32], %38 {strides = array<i32>} : memref<512x36xf32, #tpu.memory_space<vmem>>, vector<512x4xf32>,
    %c0_39 = arith.constant 0 : index
    %c0_40 = arith.constant 0 : index
    %40 = vector.load %arg8[%c0_39, %c0_40] : memref<512x36xf32, #tpu.memory_space<vmem>>, vector<512x36xf32>
    %c0_41 = arith.constant 0 : index
    %c0_42 = arith.constant 0 : index
    %41 = vector.load %arg2[%c0_41, %c0_42] : memref<36x4xf32, #tpu.memory_space<vmem>>, vector<36x4xf32>
    %cst_43 = arith.constant dense<0.000000e+00> : vector<512x4xf32>
    %42 = tpu.matmul %40, %41, %cst_43 {dimension_numbers = #tpu.dot_dimension_numbers<[1], [0], [0], [1], [0, 0, 1, 1], [], []>} : vector<512x36xf32>, vector<36x4xf32>, vector<512x4xf32> -> vector<512x4xf32>
    %c0_44 = arith.constant 0 : index
    %c0_45 = arith.constant 0 : index
    %43 = vector.load %arg3[%c0_44, %c0_45] : memref<1x4xf32, #tpu.memory_space<vmem>>, vector<1x4xf32>
    %44 = vector.broadcast %43 : vector<1x4xf32> to vector<512x4xf32>
    %45 = arith.addf %42, %44 : vector<512x4xf32>
    %cst_46 = arith.constant 0.000000e+00 : f32
    %46 = vector.broadcast %cst_46 : f32 to vector<512x4xf32>
    %47 = arith.maximumf %45, %46 : vector<512x4xf32>
    %48 = vector.shape_cast %47 : vector<512x4xf32> to vector<2x16x16x4xf32>
    %c0_47 = arith.constant 0 : index
    %c1_48 = arith.constant 1 : index
    %c1_49 = arith.constant 1 : index
    %c0_50 = arith.constant 0 : index
    %49 = vector.load %arg7[%c0_47, %c1_48, %c1_49, %c0_50] : memref<2x18x18x4xf32, #tpu.memory_space<vmem>>, vector<2x16x16x4xf32>
    tpu.vector_store %arg7[%c0_47, %c1_48, %c1_49, %c0_50], %48 {strides = array<i32>} : memref<2x18x18x4xf32, #tpu.memory_space<vmem>>, vector<2x16x16x4xf32>,
    %c0_51 = arith.constant 0 : index
    %c0_52 = arith.constant 0 : index
    %c0_53 = arith.constant 0 : index
    %c0_54 = arith.constant 0 : index
    %50 = vector.load %arg7[%c0_51, %c0_52, %c0_53, %c0_54] : memref<2x18x18x4xf32, #tpu.memory_space<vmem>>, vector<2x18x18x4xf32>
    %51 = vector.extract_strided_slice %50 {offsets = [0, 0, 0, 0], sizes = [2, 16, 16, 4], strides = [1, 1, 1, 1]} : vector<2x18x18x4xf32> to vector<2x16x16x4xf32>
    %52 = vector.shape_cast %51 : vector<2x16x16x4xf32> to vector<512x4xf32>
    %c0_55 = arith.constant 0 : index
    %c0_56 = arith.constant 0 : index
    %53 = vector.load %arg8[%c0_55, %c0_56] : memref<512x36xf32, #tpu.memory_space<vmem>>, vector<512x4xf32>
    tpu.vector_store %arg8[%c0_55, %c0_56], %52 {strides = array<i32>} : memref<512x36xf32, #tpu.memory_space<vmem>>, vector<512x4xf32>,
    %54 = vector.extract_strided_slice %50 {offsets = [0, 0, 1, 0], sizes = [2, 16, 16, 4], strides = [1, 1, 1, 1]} : vector<2x18x18x4xf32> to vector<2x16x16x4xf32>
    %55 = vector.shape_cast %54 : vector<2x16x16x4xf32> to vector<512x4xf32>
    %c0_57 = arith.constant 0 : index
    %c4_58 = arith.constant 4 : index
    %56 = vector.load %arg8[%c0_57, %c4_58] : memref<512x36xf32, #tpu.memory_space<vmem>>, vector<512x4xf32>
    tpu.vector_store %arg8[%c0_57, %c4_58], %55 {strides = array<i32>} : memref<512x36xf32, #tpu.memory_space<vmem>>, vector<512x4xf32>,
    %57 = vector.extract_strided_slice %50 {offsets = [0, 0, 2, 0], sizes = [2, 16, 16, 4], strides = [1, 1, 1, 1]} : vector<2x18x18x4xf32> to vector<2x16x16x4xf32>
    %58 = vector.shape_cast %57 : vector<2x16x16x4xf32> to vector<512x4xf32>
    %c0_59 = arith.constant 0 : index
    %c8_60 = arith.constant 8 : index
    %59 = vector.load %arg8[%c0_59, %c8_60] : memref<512x36xf32, #tpu.memory_space<vmem>>, vector<512x4xf32>
    tpu.vector_store %arg8[%c0_59, %c8_60], %58 {strides = array<i32>} : memref<512x36xf32, #tpu.memory_space<vmem>>, vector<512x4xf32>,
    %60 = vector.extract_strided_slice %50 {offsets = [0, 1, 0, 0], sizes = [2, 16, 16, 4], strides = [1, 1, 1, 1]} : vector<2x18x18x4xf32> to vector<2x16x16x4xf32>
    %61 = vector.shape_cast %60 : vector<2x16x16x4xf32> to vector<512x4xf32>
    %c0_61 = arith.constant 0 : index
    %c12_62 = arith.constant 12 : index
    %62 = vector.load %arg8[%c0_61, %c12_62] : memref<512x36xf32, #tpu.memory_space<vmem>>, vector<512x4xf32>
    tpu.vector_store %arg8[%c0_61, %c12_62], %61 {strides = array<i32>} : memref<512x36xf32, #tpu.memory_space<vmem>>, vector<512x4xf32>,
    %63 = vector.extract_strided_slice %50 {offsets = [0, 1, 1, 0], sizes = [2, 16, 16, 4], strides = [1, 1, 1, 1]} : vector<2x18x18x4xf32> to vector<2x16x16x4xf32>
    %64 = vector.shape_cast %63 : vector<2x16x16x4xf32> to vector<512x4xf32>
    %c0_63 = arith.constant 0 : index
    %c16_64 = arith.constant 16 : index
    %65 = vector.load %arg8[%c0_63, %c16_64] : memref<512x36xf32, #tpu.memory_space<vmem>>, vector<512x4xf32>
    tpu.vector_store %arg8[%c0_63, %c16_64], %64 {strides = array<i32>} : memref<512x36xf32, #tpu.memory_space<vmem>>, vector<512x4xf32>,
    %66 = vector.extract_strided_slice %50 {offsets = [0, 1, 2, 0], sizes = [2, 16, 16, 4], strides = [1, 1, 1, 1]} : vector<2x18x18x4xf32> to vector<2x16x16x4xf32>
    %67 = vector.shape_cast %66 : vector<2x16x16x4xf32> to vector<512x4xf32>
    %c0_65 = arith.constant 0 : index
    %c20_66 = arith.constant 20 : index
    %68 = vector.load %arg8[%c0_65, %c20_66] : memref<512x36xf32, #tpu.memory_space<vmem>>, vector<512x4xf32>
    tpu.vector_store %arg8[%c0_65, %c20_66], %67 {strides = array<i32>} : memref<512x36xf32, #tpu.memory_space<vmem>>, vector<512x4xf32>,
    %69 = vector.extract_strided_slice %50 {offsets = [0, 2, 0, 0], sizes = [2, 16, 16, 4], strides = [1, 1, 1, 1]} : vector<2x18x18x4xf32> to vector<2x16x16x4xf32>
    %70 = vector.shape_cast %69 : vector<2x16x16x4xf32> to vector<512x4xf32>
    %c0_67 = arith.constant 0 : index
    %c24_68 = arith.constant 24 : index
    %71 = vector.load %arg8[%c0_67, %c24_68] : memref<512x36xf32, #tpu.memory_space<vmem>>, vector<512x4xf32>
    tpu.vector_store %arg8[%c0_67, %c24_68], %70 {strides = array<i32>} : memref<512x36xf32, #tpu.memory_space<vmem>>, vector<512x4xf32>,
    %72 = vector.extract_strided_slice %50 {offsets = [0, 2, 1, 0], sizes = [2, 16, 16, 4], strides = [1, 1, 1, 1]} : vector<2x18x18x4xf32> to vector<2x16x16x4xf32>
    %73 = vector.shape_cast %72 : vector<2x16x16x4xf32> to vector<512x4xf32>
    %c0_69 = arith.constant 0 : index
    %c28_70 = arith.constant 28 : index
    %74 = vector.load %arg8[%c0_69, %c28_70] : memref<512x36xf32, #tpu.memory_space<vmem>>, vector<512x4xf32>
    tpu.vector_store %arg8[%c0_69, %c28_70], %73 {strides = array<i32>} : memref<512x36xf32, #tpu.memory_space<vmem>>, vector<512x4xf32>,
    %75 = vector.extract_strided_slice %50 {offsets = [0, 2, 2, 0], sizes = [2, 16, 16, 4], strides = [1, 1, 1, 1]} : vector<2x18x18x4xf32> to vector<2x16x16x4xf32>
    %76 = vector.shape_cast %75 : vector<2x16x16x4xf32> to vector<512x4xf32>
    %c0_71 = arith.constant 0 : index
    %c32_72 = arith.constant 32 : index
    %77 = vector.load %arg8[%c0_71, %c32_72] : memref<512x36xf32, #tpu.memory_space<vmem>>, vector<512x4xf32>
    tpu.vector_store %arg8[%c0_71, %c32_72], %76 {strides = array<i32>} : memref<512x36xf32, #tpu.memory_space<vmem>>, vector<512x4xf32>,
    %c0_73 = arith.constant 0 : index
    %c0_74 = arith.constant 0 : index
    %78 = vector.load %arg8[%c0_73, %c0_74] : memref<512x36xf32, #tpu.memory_space<vmem>>, vector<512x36xf32>
    %c0_75 = arith.constant 0 : index
    %c0_76 = arith.constant 0 : index
    %79 = vector.load %arg4[%c0_75, %c0_76] : memref<36x4xf32, #tpu.memory_space<vmem>>, vector<36x4xf32>
    %cst_77 = arith.constant dense<0.000000e+00> : vector<512x4xf32>
    %80 = tpu.matmul %78, %79, %cst_77 {dimension_numbers = #tpu.dot_dimension_numbers<[1], [0], [0], [1], [0, 0, 1, 1], [], []>} : vector<512x36xf32>, vector<36x4xf32>, vector<512x4xf32> -> vector<512x4xf32>
    %c0_78 = arith.constant 0 : index
    %c0_79 = arith.constant 0 : index
    %81 = vector.load %arg5[%c0_78, %c0_79] : memref<1x4xf32, #tpu.memory_space<vmem>>, vector<1x4xf32>
    %82 = vector.broadcast %81 : vector<1x4xf32> to vector<512x4xf32>
    %83 = arith.addf %80, %82 : vector<512x4xf32>
    %c0_80 = arith.constant 0 : index
    %c0_81 = arith.constant 0 : index
    %c0_82 = arith.constant 0 : index
    %c0_83 = arith.constant 0 : index
    %84 = vector.load %arg1[%c0_80, %c0_81, %c0_82, %c0_83] : memref<2x16x16x4xf32, #tpu.memory_space<vmem>>, vector<2x16x16x4xf32>
    %85 = vector.shape_cast %84 : vector<2x16x16x4xf32> to vector<512x4xf32>
    %86 = arith.addf %85, %83 : vector<512x4xf32>
    %87 = vector.shape_cast %86 : vector<512x4xf32> to vector<2x16x16x4xf32>
    %c0_84 = arith.constant 0 : index
    %c0_85 = arith.constant 0 : index
    %c0_86 = arith.constant 0 : index
    %c0_87 = arith.constant 0 : index
    %88 = vector.load %arg6[%c0_84, %c0_85, %c0_86, %c0_87] : memref<2x16x16x4xf32, #tpu.memory_space<vmem>>, vector<2x16x16x4xf32>
    tpu.vector_store %arg6[%c0_84, %c0_85, %c0_86, %c0_87], %87 {strides = array<i32>} : memref<2x16x16x4xf32, #tpu.memory_space<vmem>>, vector<2x16x16x4xf32>,
    return
  }
  func.func @transform_0(%arg0: i32) -> (i32, i32, i32, i32) {
    %c0_i32 = arith.constant 0 : i32
    %c0_i32_0 = arith.constant 0 : i32
    %c0_i32_1 = arith.constant 0 : i32
    %c0_i32_2 = arith.constant 0 : i32
    return %arg0, %c0_i32, %c0_i32_0, %c0_i32_1 : i32, i32, i32, i32
  }
  func.func @transform_1(%arg0: i32) -> (i32, i32) {
    %c0_i32 = arith.constant 0 : i32
    %c0_i32_0 = arith.constant 0 : i32
    %c0_i32_1 = arith.constant 0 : i32
    return %c0_i32, %c0_i32_0 : i32, i32
  }
  func.func @transform_2(%arg0: i32) -> (i32, i32) {
    %c0_i32 = arith.constant 0 : i32
    %c0_i32_0 = arith.constant 0 : i32
    %c0_i32_1 = arith.constant 0 : i32
    return %c0_i32, %c0_i32_0 : i32, i32
  }
  func.func @transform_3(%arg0: i32) -> (i32, i32) {
    %c0_i32 = arith.constant 0 : i32
    %c0_i32_0 = arith.constant 0 : i32
    %c0_i32_1 = arith.constant 0 : i32
    return %c0_i32, %c0_i32_0 : i32, i32
  }
  func.func @transform_4(%arg0: i32) -> (i32, i32) {
    %c0_i32 = arith.constant 0 : i32
    %c0_i32_0 = arith.constant 0 : i32
    %c0_i32_1 = arith.constant 0 : i32
    return %c0_i32, %c0_i32_0 : i32, i32
  }
  func.func @transform_5(%arg0: i32) -> (i32, i32, i32, i32) {
    %c0_i32 = arith.constant 0 : i32
    %c0_i32_0 = arith.constant 0 : i32
    %c0_i32_1 = arith.constant 0 : i32
    %c0_i32_2 = arith.constant 0 : i32
    return %arg0, %c0_i32, %c0_i32_0, %c0_i32_1 : i32, i32, i32, i32
  }
}

</mosaic_0001>

<bundles_post_ra>
// kernel: tpu_custom_call.1
= control target key start
LH: loop header
LB: loop body
LE: loop exit
PB: predicated region body
PF: predicated region fallthrough
CT: control target
= control target key end

     0   :  { %vm20_vm0 = vcmask 31744   ;;  %vm36_vm1 = vcmask 24576   ;;  %v7835_v0 = vmov 0.0   ;;  %vm561_vm2 = vcmask 1046528   ;;  %s7836_s18 = smov 4   ;;  %s7837_s16 = smov 8   ;;  %s13978_s0 = inlined_call_operand.vmem [shape: f32[2,16,16,4], index: 0, kind: input, shape index: {}]   ;;  %s13979_s1 = inlined_call_operand.vmem [shape: f32[36,4], index: 1, kind: input, shape index: {}]   ;;  %s13980_s2 = inlined_call_operand.vmem [shape: f32[1,4], index: 2, kind: input, shape index: {}]   ;;  %s13981_s3 = inlined_call_operand.vmem [shape: f32[36,4], index: 3, kind: input, shape index: {}]   ;;  %s13982_s4 = inlined_call_operand.vmem [shape: f32[1,4], index: 4, kind: input, shape index: {}]   ;;  %s13983_s5 = inlined_call_operand.vmem [shape: f32[2,16,16,4], index: 5, kind: output, shape index: {}]  }
   0x1   :  { %21 = vst.msk [vmem:[#allocation2] sm:$0xff] %vm20_vm0, %v7835_v0  ;;  %22 = vst.msk [vmem:[#allocation2 + $0x8] sm:$0xff] %vm20_vm0, %v7835_v0  ;;  %v7895_v1 = vld [vmem:[%s13978_s0] sm:$0xff]  ;;  %v7900_v2 = vld [vmem:[%s13978_s0 + $0x8] sm:$0xff]  ;;  %vm23_vm3 = vcmask 25600   ;;  %vm979_vm4 = vcmask 1045504  }
   0x2   :  { %25 = vst.msk [vmem:[#allocation2 + $0x1b0] sm:$0xff] %vm20_vm0, %v7835_v0  ;;  %26 = vst.msk [vmem:[#allocation2 + $0x1b8] sm:$0xff] %vm20_vm0, %v7835_v0  ;;  %v103_v3 = vld [vmem:[%s13978_s0 + $0x10] sm:$0xff]  ;;  %v165_v4 = vmax.f32 %v7895_v1, 0.0  ;;  %v166_v5 = vmax.f32 %v7900_v2, 0.0  ;;  %v104_v6 = vld [vmem:[%s13978_s0 + $0x18] sm:$0xff] }
   0x3   :  { %29 = vst.msk [vmem:[#allocation2 + $0x198] sm:$0xff] %vm20_vm0, %v7835_v0  ;;  %30 = vst.msk [vmem:[#allocation2 + $0x1a0] sm:$0xff] %vm20_vm0, %v7835_v0  ;;  %v167_v7 = vmax.f32 %v103_v3, 0.0  ;;  %v105_v8 = vld [vmem:[%s13978_s0 + $0x20] sm:$0xff]  ;;  %v106_v9 = vld [vmem:[%s13978_s0 + $0x28] sm:$0xff]  ;;  %v168_v10 = vmax.f32 %v104_v6, 0.0 }
   0x4   :  { %32 = vst.msk [vmem:[#allocation2 + $0x348] sm:$0xff] %vm20_vm0, %v7835_v0  ;;  %33 = vst.msk [vmem:[#allocation2 + $0x350] sm:$0xff] %vm20_vm0, %v7835_v0  ;;  %v169_v11 = vmax.f32 %v105_v8, 0.0  ;;  %v170_v12 = vmax.f32 %v106_v9, 0.0  ;;  %v107_v13 = vld [vmem:[%s13978_s0 + $0x30] sm:$0xff]  ;;  %v108_v14 = vld [vmem:[%s13978_s0 + $0x38] sm:$0xff] }
   0x5   :  { %37 = vst.msk [vmem:[#allocation2 + $0x18] sm:$0x1] %vm36_vm1, %v7835_v0  ;;  %38 = vst.msk [vmem:[#allocation2 + $0x30] sm:$0x1] %vm36_vm1, %v7835_v0  ;;  %v109_v15 = vld [vmem:[%s13978_s0 + $0x40] sm:$0xff]  ;;  %v171_v16 = vmax.f32 %v107_v13, 0.0 }
   0x6   :  { %39 = vst.msk [vmem:[#allocation2 + $0x48] sm:$0x1] %vm36_vm1, %v7835_v0  ;;  %40 = vst.msk [vmem:[#allocation2 + $0x60] sm:$0x1] %vm36_vm1, %v7835_v0  ;;  %v172_v17 = vmax.f32 %v108_v14, 0.0  ;;  %v110_v18 = vld [vmem:[%s13978_s0 + $0x48] sm:$0xff] }
   0x7   :  { %41 = vst.msk [vmem:[#allocation2 + $0x78] sm:$0x1] %vm36_vm1, %v7835_v0  ;;  %42 = vst.msk [vmem:[#allocation2 + $0x90] sm:$0x1] %vm36_vm1, %v7835_v0  ;;  %v173_v19 = vmax.f32 %v109_v15, 0.0  ;;  %v111_v20 = vld [vmem:[%s13978_s0 + $0x50] sm:$0xff] }
   0x8   :  { %43 = vst.msk [vmem:[#allocation2 + $0xa8] sm:$0x1] %vm36_vm1, %v7835_v0  ;;  %44 = vst.msk [vmem:[#allocation2 + $0xc0] sm:$0x1] %vm36_vm1, %v7835_v0  ;;  %v112_v21 = vld [vmem:[%s13978_s0 + $0x58] sm:$0xff]  ;;  %v174_v22 = vmax.f32 %v110_v18, 0.0 }
   0x9   :  { %45 = vst.msk [vmem:[#allocation2 + $0xd8] sm:$0x1] %vm36_vm1, %v7835_v0  ;;  %46 = vst.msk [vmem:[#allocation2 + $0xf0] sm:$0x1] %vm36_vm1, %v7835_v0  ;;  %v175_v23 = vmax.f32 %v111_v20, 0.0  ;;  %v176_v24 = vmax.f32 %v112_v21, 0.0 }
   0xa   :  { %47 = vst.msk [vmem:[#allocation2 + $0x108] sm:$0x1] %vm36_vm1, %v7835_v0  ;;  %48 = vst.msk [vmem:[#allocation2 + $0x120] sm:$0x1] %vm36_vm1, %v7835_v0  ;;  %v113_v25 = vld [vmem:[%s13978_s0 + $0x60] sm:$0xff]  ;;  %v114_v26 = vld [vmem:[%s13978_s0 + $0x68] sm:$0xff] }
   0xb   :  { %49 = vst.msk [vmem:[#allocation2 + $0x138] sm:$0x1] %vm36_vm1, %v7835_v0  ;;  %50 = vst.msk [vmem:[#allocation2 + $0x150] sm:$0x1] %vm36_vm1, %v7835_v0  ;;  %v115_v27 = vld [vmem:[%s13978_s0 + $0x70] sm:$0xff]  ;;  %v177_v28 = vmax.f32 %v113_v25, 0.0 }
   0xc   :  { %51 = vst.msk [vmem:[#allocation2 + $0x168] sm:$0x1] %vm36_vm1, %v7835_v0  ;;  %52 = vst.msk [vmem:[#allocation2 + $0x180] sm:$0x1] %vm36_vm1, %v7835_v0  ;;  %v178_v29 = vmax.f32 %v114_v26, 0.0  ;;  %v116_v30 = vld [vmem:[%s13978_s0 + $0x78] sm:$0xff] }
   0xd   :  { %53 = vst.msk [vmem:[#allocation2 + $0x1c8] sm:$0x1] %vm36_vm1, %v7835_v0  ;;  %54 = vst.msk [vmem:[#allocation2 + $0x1e0] sm:$0x1] %vm36_vm1, %v7835_v0  ;;  %v179_v31 = vmax.f32 %v115_v27, 0.0  ;;  %v117_v32 = vld [vmem:[%s13978_s0 + $0x80] sm:$0xff] }
   0xe   :  { %55 = vst.msk [vmem:[#allocation2 + $0x1f8] sm:$0x1] %vm36_vm1, %v7835_v0  ;;  %56 = vst.msk [vmem:[#allocation2 + $0x210] sm:$0x1] %vm36_vm1, %v7835_v0  ;;  %v118_v33 = vld [vmem:[%s13978_s0 + $0x88] sm:$0xff]  ;;  %v180_v34 = vmax.f32 %v116_v30, 0.0 }
   0xf   :  { %57 = vst.msk [vmem:[#allocation2 + $0x228] sm:$0x1] %vm36_vm1, %v7835_v0  ;;  %58 = vst.msk [vmem:[#allocation2 + $0x240] sm:$0x1] %vm36_vm1, %v7835_v0  ;;  %v181_v35 = vmax.f32 %v117_v32, 0.0  ;;  %v182_v36 = vmax.f32 %v118_v33, 0.0 }
  0x10   :  { %59 = vst.msk [vmem:[#allocation2 + $0x258] sm:$0x1] %vm36_vm1, %v7835_v0  ;;  %60 = vst.msk [vmem:[#allocation2 + $0x270] sm:$0x1] %vm36_vm1, %v7835_v0  ;;  %v119_v37 = vld [vmem:[%s13978_s0 + $0x90] sm:$0xff]  ;;  %v120_v38 = vld [vmem:[%s13978_s0 + $0x98] sm:$0xff] }
  0x11   :  { %61 = vst.msk [vmem:[#allocation2 + $0x288] sm:$0x1] %vm36_vm1, %v7835_v0  ;;  %62 = vst.msk [vmem:[#allocation2 + $0x2a0] sm:$0x1] %vm36_vm1, %v7835_v0  ;;  %v121_v39 = vld [vmem:[%s13978_s0 + $0xa0] sm:$0xff]  ;;  %v8105_v41 = vld [vmem:[#allocation2 + $0x8] sm:$0xff] }
  0x12   :  { %63 = vst.msk [vmem:[#allocation2 + $0x2b8] sm:$0x1] %vm36_vm1, %v7835_v0  ;;  %64 = vst.msk [vmem:[#allocation2 + $0x2d0] sm:$0x1] %vm36_vm1, %v7835_v0  ;;  %v8103_v40 = vld [vmem:[#allocation2] sm:$0xff]  ;;  %v183_v42 = vmax.f32 %v119_v37, 0.0 }
  0x13   :  { %65 = vst.msk [vmem:[#allocation2 + $0x2e8] sm:$0x1] %vm36_vm1, %v7835_v0  ;;  %66 = vst.msk [vmem:[#allocation2 + $0x300] sm:$0x1] %vm36_vm1, %v7835_v0  ;;  %v184_v43 = vmax.f32 %v120_v38, 0.0  ;;  %v122_v44 = vld [vmem:[%s13978_s0 + $0xa8] sm:$0xff] }
  0x14   :  { %67 = vst.msk [vmem:[#allocation2 + $0x318] sm:$0x1] %vm36_vm1, %v7835_v0  ;;  %68 = vst.msk [vmem:[#allocation2 + $0x330] sm:$0x1] %vm36_vm1, %v7835_v0  ;;  %v185_v45 = vmax.f32 %v121_v39, 0.0  ;;  %v562_v46 = vrot.slane %v8103_v40, 1 }
  0x15   :  { %69 = vst.msk [vmem:[#allocation2 + $0x29] sm:$0x1] %vm36_vm1, %v7835_v0  ;;  %70 = vst.msk [vmem:[#allocation2 + $0x41] sm:$0x1] %vm36_vm1, %v7835_v0  ;;  %v563_v47 = vrot.slane %v8105_v41, 1  ;;  %v186_v49 = vmax.f32 %v122_v44, 0.0 }
  0x16   :  { %71 = vst.msk [vmem:[#allocation2 + $0x59] sm:$0x1] %vm36_vm1, %v7835_v0  ;;  %72 = vst.msk [vmem:[#allocation2 + $0x71] sm:$0x1] %vm36_vm1, %v7835_v0  ;;  %v123_v50 = vld [vmem:[%s13978_s0 + $0xb0] sm:$0xff]  ;;  %v124_v52 = vld [vmem:[%s13978_s0 + $0xb8] sm:$0xff] }
  0x17   :  { %73 = vst.msk [vmem:[#allocation2 + $0x89] sm:$0x1] %vm36_vm1, %v7835_v0  ;;  %74 = vst.msk [vmem:[#allocation2 + $0xa1] sm:$0x1] %vm36_vm1, %v7835_v0  ;;  %v187_v53 = vmax.f32 %v123_v50, 0.0  ;;  %v125_v54 = vld [vmem:[%s13978_s0 + $0xc0] sm:$0xff]  ;;  %v564_v55 = vsel %vm561_vm2, %v562_v46, %v563_v47 }
  0x18   :  { %75 = vst.msk [vmem:[#allocation2 + $0xb9] sm:$0x1] %vm36_vm1, %v7835_v0  ;;  %76 = vst.msk [vmem:[#allocation2 + $0xd1] sm:$0x1] %vm36_vm1, %v7835_v0  ;;  %v188_v59 = vmax.f32 %v124_v52, 0.0  ;;  %v189_v60 = vmax.f32 %v125_v54, 0.0  ;;  %722 = vrot.lane.b32.xlu0 %v564_v55, %s7836_s18 }
  0x19   :  { %77 = vst.msk [vmem:[#allocation2 + $0xe9] sm:$0x1] %vm36_vm1, %v7835_v0  ;;  %78 = vst.msk [vmem:[#allocation2 + $0x101] sm:$0x1] %vm36_vm1, %v7835_v0  ;;  %v126_v37 = vld [vmem:[%s13978_s0 + $0xc8] sm:$0xff]  ;;  %v128_v52 = vld [vmem:[%s13978_s0 + $0xd8] sm:$0xff] }
  0x1a   :  { %79 = vst.msk [vmem:[#allocation2 + $0x119] sm:$0x1] %vm36_vm1, %v7835_v0  ;;  %80 = vst.msk [vmem:[#allocation2 + $0x131] sm:$0x1] %vm36_vm1, %v7835_v0  ;;  %v130_v54 = vld [vmem:[%s13978_s0 + $0xe8] sm:$0xff]  ;;  %v190_v55 = vmax.f32 %v126_v37, 0.0 }
  0x1b   :  { %81 = vst.msk [vmem:[#allocation2 + $0x149] sm:$0x1] %vm36_vm1, %v7835_v0  ;;  %82 = vst.msk [vmem:[#allocation2 + $0x161] sm:$0x1] %vm36_vm1, %v7835_v0  ;;  %v137_v37 = vld [vmem:[%s13978_s0 + $0x120] sm:$0xff]  ;;  %vm914_vm5 = vcmask 64544  }
  0x1c   :  { %83 = vst.msk [vmem:[#allocation2 + $0x179] sm:$0x1] %vm36_vm1, %v7835_v0  ;;  %84 = vst.msk [vmem:[#allocation2 + $0x191] sm:$0x1] %vm36_vm1, %v7835_v0  ;;  %vm1332_vm6 = vcmask 97344   ;;  %s7838_s26 = smov 12  }
  0x1d   :  { %85 = vst.msk [vmem:[#allocation2 + $0x1d9] sm:$0x1] %vm36_vm1, %v7835_v0  ;;  %86 = vst.msk [vmem:[#allocation2 + $0x1f1] sm:$0x1] %vm36_vm1, %v7835_v0  ;;  %vm1593_vm7 = vcmask 130144   ;;  %s7839_s27 = smov 16  }
  0x1e   :  { %87 = vst.msk [vmem:[#allocation2 + $0x209] sm:$0x1] %vm36_vm1, %v7835_v0  ;;  %88 = vst.msk [vmem:[#allocation2 + $0x221] sm:$0x1] %vm36_vm1, %v7835_v0  ;;  %vm1862_vm8 = vcmask 162944   ;;  %s7840_s28 = smov 20  }
  0x1f   :  { %89 = vst.msk [vmem:[#allocation2 + $0x239] sm:$0x1] %vm36_vm1, %v7835_v0  ;;  %90 = vst.msk [vmem:[#allocation2 + $0x251] sm:$0x1] %vm36_vm1, %v7835_v0  ;;  %vm2129_vm9 = vcmask 195744   ;;  %s7841_s29 = smov 24  }
  0x20   :  { %91 = vst.msk [vmem:[#allocation2 + $0x269] sm:$0x1] %vm36_vm1, %v7835_v0  ;;  %92 = vst.msk [vmem:[#allocation2 + $0x281] sm:$0x1] %vm36_vm1, %v7835_v0  ;;  %vm2390_vm10 = vcmask 228544   ;;  %s7842_s30 = smov 28  }
  0x21   :  { %93 = vst.msk [vmem:[#allocation2 + $0x299] sm:$0x1] %vm36_vm1, %v7835_v0  ;;  %94 = vst.msk [vmem:[#allocation2 + $0x2b1] sm:$0x1] %vm36_vm1, %v7835_v0  ;;  %vm2659_vm11 = vcmask 261344   ;;  %vm3260_vm12 = vcmask 1043456  }
  0x22   :  { %95 = vst.msk [vmem:[#allocation2 + $0x2c9] sm:$0x1] %vm36_vm1, %v7835_v0  ;;  %96 = vst.msk [vmem:[#allocation2 + $0x2e1] sm:$0x1] %vm36_vm1, %v7835_v0  ;;  %s7843_s17 = smov 32   ;;  %vm2926_vm13 = vcmask 294144  }
  0x23   :  { %97 = vst.msk [vmem:[#allocation2 + $0x2f9] sm:$0x1] %vm36_vm1, %v7835_v0  ;;  %98 = vst.msk [vmem:[#allocation2 + $0x311] sm:$0x1] %vm36_vm1, %v7835_v0  ;;  %vm3067_vm14 = vcmask 293888  }
  0x24   :  { %99 = vst.msk [vmem:[#allocation2 + $0x329] sm:$0x1] %vm36_vm1, %v7835_v0  ;;  %100 = vst.msk [vmem:[#allocation2 + $0x341] sm:$0x1] %vm36_vm1, %v7835_v0 }
  0x25   :  { %24 = vst.msk [vmem:[#allocation2 + $0x10] sm:$0x3] %vm23_vm3, %v7835_v0  ;;  %27 = vst.msk [vmem:[#allocation2 + $0x1c0] sm:$0x3] %vm23_vm3, %v7835_v0 }
  0x26   :  { %31 = vst.msk [vmem:[#allocation2 + $0x1a8] sm:$0x3] %vm23_vm3, %v7835_v0  ;;  %34 = vst.msk [vmem:[#allocation2 + $0x358] sm:$0x3] %vm23_vm3, %v7835_v0 }
  0x27   :  { %229 = vst.msk [vmem:[#allocation2 + $0x19] sm:$0xff] %vm20_vm0, %v165_v4  ;;  %230 = vst.msk [vmem:[#allocation2 + $0x21] sm:$0xff] %vm20_vm0, %v166_v5 }
  0x28   :  { %231 = vst.msk [vmem:[#allocation2 + $0x31] sm:$0xff] %vm20_vm0, %v167_v7  ;;  %232 = vst.msk [vmem:[#allocation2 + $0x39] sm:$0xff] %vm20_vm0, %v168_v10 }
  0x29   :  { %233 = vst.msk [vmem:[#allocation2 + $0x49] sm:$0xff] %vm20_vm0, %v169_v11  ;;  %234 = vst.msk [vmem:[#allocation2 + $0x51] sm:$0xff] %vm20_vm0, %v170_v12 }
  0x2a   :  { %235 = vst.msk [vmem:[#allocation2 + $0x61] sm:$0xff] %vm20_vm0, %v171_v16  ;;  %236 = vst.msk [vmem:[#allocation2 + $0x69] sm:$0xff] %vm20_vm0, %v172_v17 }
  0x2b   :  { %237 = vst.msk [vmem:[#allocation2 + $0x79] sm:$0xff] %vm20_vm0, %v173_v19  ;;  %238 = vst.msk [vmem:[#allocation2 + $0x81] sm:$0xff] %vm20_vm0, %v174_v22 }
  0x2c   :  { %239 = vst.msk [vmem:[#allocation2 + $0x91] sm:$0xff] %vm20_vm0, %v175_v23  ;;  %240 = vst.msk [vmem:[#allocation2 + $0x99] sm:$0xff] %vm20_vm0, %v176_v24  ;;  %v8119_v48 = vld [vmem:[#allocation2 + $0x10] sm:$0x3] }
  0x2d   :  { %241 = vst.msk [vmem:[#allocation2 + $0xa9] sm:$0xff] %vm20_vm0, %v177_v28  ;;  %242 = vst.msk [vmem:[#allocation2 + $0xb1] sm:$0xff] %vm20_vm0, %v178_v29  ;;  %v565_v51 = vrot.slane %v8119_v48, 1 }
  0x2e   :  { %243 = vst.msk [vmem:[#allocation2 + $0xc1] sm:$0xff] %vm20_vm0, %v179_v31  ;;  %401 = vst.msk [vmem:[#allocation3] sm:$0xff] %vm20_vm0, %v8103_v40  ;;  %v8138_v56 = vld [vmem:[#allocation2 + $0x18] sm:$0xff]  ;;  %v8140_v57 = vld [vmem:[#allocation2 + $0x20] sm:$0xff] }
  0x2f   :  { %402 = vst.msk [vmem:[#allocation3 + $0x8] sm:$0xff] %vm20_vm0, %v8105_v41  ;;  %244 = vst.msk [vmem:[#allocation2 + $0xc9] sm:$0xff] %vm20_vm0, %v180_v34  ;;  %v298_v58 = vld [vmem:[#allocation2 + $0x28] sm:$0x3]  ;;  %v567_v61 = vrot.slane %v8138_v56, 1  ;;  %v568_v62 = vrot.slane %v8140_v57, 1  ;;  %v566_v3 = vsel %vm561_vm2, %v563_v47, %v565_v51 }
  0x30   :  { %245 = vst.msk [vmem:[#allocation2 + $0xd9] sm:$0xff] %vm20_vm0, %v181_v35  ;;  %246 = vst.msk [vmem:[#allocation2 + $0xe1] sm:$0xff] %vm20_vm0, %v182_v36  ;;  %v570_v63 = vrot.slane %v298_v58, 1  ;;  %v8150_v0 = vld [vmem:[#allocation2 + $0x30] sm:$0xff]  ;;  %v8152_v1 = vld [vmem:[#allocation2 + $0x38] sm:$0xff]  ;;  %724 = vrot.lane.b32.xlu0 %v566_v3, %s7836_s18  ;;  %v192_v3 = vmax.f32 %v128_v52, 0.0 }
  0x31   :  { %247 = vst.msk [vmem:[#allocation2 + $0xf1] sm:$0xff] %vm20_vm0, %v183_v42  ;;  %248 = vst.msk [vmem:[#allocation2 + $0xf9] sm:$0xff] %vm20_vm0, %v184_v43  ;;  %v8154_v2 = vld [vmem:[#allocation2 + $0x48] sm:$0xff]  ;;  %v572_v4 = vrot.slane %v8150_v0, 1  ;;  %v573_v5 = vrot.slane %v8152_v1, 1  ;;  %v8166_v7 = vld [vmem:[#allocation2 + $0x50] sm:$0xff]  ;;  %v8173_v8 = vsel %vm561_vm2, %v567_v61, %v568_v62 }
  0x32   :  { %249 = vst.msk [vmem:[#allocation2 + $0x109] sm:$0xff] %vm20_vm0, %v185_v45  ;;  %250 = vst.msk [vmem:[#allocation2 + $0x111] sm:$0xff] %vm20_vm0, %v186_v49  ;;  %v8164_v6 = vld [vmem:[#allocation2 + $0x40] sm:$0x3]  ;;  %v8179_v10 = vld [vmem:[#allocation2 + $0x68] sm:$0xff]  ;;  %726 = vrot.lane.b32.xlu1 %v8173_v8, %s7836_s18  ;;  %v8191_v12 = vsel %vm561_vm2, %v568_v62, %v570_v63  ;;  %v577_v17 = vrot.slane %v8154_v2, 1 }
  0x33   :  { %403 = vst.msk [vmem:[#allocation3 + $0x10] sm:$0xff] %vm20_vm0, %v8138_v56  ;;  %404 = vst.msk [vmem:[#allocation3 + $0x18] sm:$0xff] %vm20_vm0, %v8140_v57  ;;  %v8177_v9 = vld [vmem:[#allocation2 + $0x60] sm:$0xff]  ;;  %v8187_v11 = vld [vmem:[#allocation2 + $0x78] sm:$0xff]  ;;  %v575_v13 = vrot.slane %v8164_v6, 1  ;;  %v8201_v16 = vsel %vm561_vm2, %v572_v4, %v573_v5  ;;  %v578_v18 = vrot.slane %v8166_v7, 1 }
  0x34   :  { %251 = vst.msk [vmem:[#allocation2 + $0x121] sm:$0xff] %vm20_vm0, %v187_v53  ;;  %405 = vst.msk [vmem:[#allocation3 + $0x20] sm:$0xff] %vm20_vm0, %v8150_v0  ;;  %v8194_v14 = vld [vmem:[#allocation2 + $0x80] sm:$0xff]  ;;  %v8198_v15 = vld [vmem:[#allocation2 + $0x90] sm:$0xff]  ;;  %730 = vrot.lane.b32.xlu0 %v8201_v16, %s7836_s18  ;;  %v582_v31 = vrot.slane %v8177_v9, 1  ;;  %v583_v32 = vrot.slane %v8179_v10, 1 }
  0x35   :  { %406 = vst.msk [vmem:[#allocation3 + $0x28] sm:$0xff] %vm20_vm0, %v8152_v1  ;;  %407 = vst.msk [vmem:[#allocation3 + $0x30] sm:$0xff] %vm20_vm0, %v8154_v2  ;;  %v8205_v19 = vld [vmem:[#allocation2 + $0x58] sm:$0x3]  ;;  %v8213_v21 = vld [vmem:[#allocation2 + $0xa8] sm:$0xff]  ;;  %v8232_v25 = vsel %vm561_vm2, %v573_v5, %v575_v13  ;;  %v8246_v30 = vsel %vm561_vm2, %v577_v17, %v578_v18  ;;  %v587_v50 = vrot.slane %v8187_v11, 1 }
  0x36   :  { %252 = vst.msk [vmem:[#allocation2 + $0x129] sm:$0xff] %vm20_vm0, %v188_v59  ;;  %253 = vst.msk [vmem:[#allocation2 + $0x139] sm:$0xff] %vm20_vm0, %v189_v60  ;;  %v8209_v20 = vld [vmem:[#allocation2 + $0x98] sm:$0xff]  ;;  %v8217_v22 = vld [vmem:[#allocation2 + $0xb0] sm:$0xff]  ;;  %728 = vrot.lane.b32.xlu1 %v8191_v12, %s7836_s18  ;;  %v580_v26 = vrot.slane %v8205_v19, 1  ;;  %v8299_v49 = vsel %vm561_vm2, %v582_v31, %v583_v32  ;;  %v588_v51 = vrot.slane %v8194_v14, 1 }
  0x37   :  { %14608 = vst [vmem:[#allocation4_spill] sm:$0xff] %v8173_v8  ;;  %408 = vst.msk [vmem:[#allocation3 + $0x38] sm:$0xff] %vm20_vm0, %v8166_v7  ;;  %v8225_v23 = vld [vmem:[#allocation2 + $0xc0] sm:$0xff]  ;;  %v8227_v24 = vld [vmem:[#allocation2 + $0xc8] sm:$0xff]  ;;  %v592_v62 = vrot.slane %v8198_v15, 1 }
  0x38   :  { %14609 = vst [vmem:[#allocation5_spill] sm:$0xff] %v8177_v9  ;;  %14610 = vst [vmem:[#allocation6_spill] sm:$0xff] %v8179_v10  ;;  %v8235_v27 = vld [vmem:[#allocation2 + $0x70] sm:$0x3]  ;;  %v8241_v28 = vld [vmem:[#allocation2 + $0xd8] sm:$0xff]  ;;  %734 = vrot.lane.b32.xlu0 %v8246_v30, %s7836_s18  ;;  %v8284_v43 = vsel %vm561_vm2, %v578_v18, %v580_v26  ;;  %v194_v18 = vmax.f32 %v130_v54, 0.0 }
  0x39   :  { %409 = vst.msk [vmem:[#allocation3 + $0x40] sm:$0xff] %vm20_vm0, %v8177_v9  ;;  %410 = vst.msk [vmem:[#allocation3 + $0x48] sm:$0xff] %vm20_vm0, %v8179_v10  ;;  %v8243_v29 = vld [vmem:[#allocation2 + $0xe0] sm:$0xff]  ;;  %v8254_v33 = vld [vmem:[#allocation2 + $0xf0] sm:$0xff]  ;;  %v585_v44 = vrot.slane %v8235_v27, 1 }
  0x3a   :  { %14611 = vst [vmem:[#allocation7_spill] sm:$0xff] %v8187_v11  ;;  %14612 = vst [vmem:[#allocation8_spill] sm:$0xff] %v8191_v12  ;;  %v8256_v34 = vld [vmem:[#allocation2 + $0xf8] sm:$0xff]  ;;  %v8258_v35 = vld [vmem:[#allocation2 + $0x108] sm:$0xff]  ;;  %732 = vrot.lane.b32.xlu1 %v8232_v25, %s7836_s18 }
  0x3b   :  { %14613 = vst [vmem:[#allocation9_spill] sm:$0xff] %v8194_v14  ;;  %411 = vst.msk [vmem:[#allocation3 + $0x50] sm:$0xff] %vm20_vm0, %v8187_v11  ;;  %v8264_v36 = vld [vmem:[#allocation2 + $0x110] sm:$0xff]  ;;  %v8273_v38 = vld [vmem:[#allocation2 + $0x88] sm:$0x3]  ;;  %v8335_v5 = vsel %vm561_vm2, %v583_v32, %v585_v44  ;;  %v8349_v32 = vsel %vm561_vm2, %v587_v50, %v588_v51  ;;  %v201_v44 = vmax.f32 %v137_v37, 0.0 }
  0x3c   :  { %14614 = vst [vmem:[#allocation10_spill] sm:$0xff] %v8198_v15  ;;  %14615 = vst [vmem:[#allocation11_spill] sm:$0xff] %v8201_v16  ;;  %v8277_v39 = vld [vmem:[#allocation2 + $0x120] sm:$0xff]  ;;  %v127_v47 = vld [vmem:[%s13978_s0 + $0xd0] sm:$0xff]  ;;  %v590_v61 = vrot.slane %v8273_v38, 1  ;;  %738 = vrot.lane.b32.xlu0 %v8299_v49, %s7836_s18 }
  0x3d   :  { %412 = vst.msk [vmem:[#allocation3 + $0x58] sm:$0xff] %vm20_vm0, %v8194_v14  ;;  %14616 = vst [vmem:[#allocation12_spill] sm:$0xff] %v8209_v20  ;;  %v8279_v42 = vld [vmem:[#allocation2 + $0x128] sm:$0xff]  ;;  %v8287_v45 = vld [vmem:[#allocation2 + $0xa0] sm:$0x3]  ;;  %v191_v63 = vmax.f32 %v127_v47, 0.0 }
  0x3e   :  { %413 = vst.msk [vmem:[#allocation3 + $0x60] sm:$0xff] %vm20_vm0, %v8198_v15  ;;  %14617 = vst [vmem:[#allocation13_spill] sm:$0xff] %v8213_v21  ;;  %v8293_v46 = vld [vmem:[#allocation2 + $0x138] sm:$0xff]  ;;  %v129_v53 = vld [vmem:[%s13978_s0 + $0xe0] sm:$0xff]  ;;  %736 = vrot.lane.b32.xlu1 %v8284_v43, %s7836_s18 }
  0x3f   :  { %414 = vst.msk [vmem:[#allocation3 + $0x68] sm:$0xff] %vm20_vm0, %v8209_v20  ;;  %14618 = vst [vmem:[#allocation14_spill] sm:$0xff] %v8217_v22  ;;  %v8314_v58 = vld [vmem:[#allocation2 + $0x1b0] sm:$0xff]  ;;  %v8316_v59 = vld [vmem:[#allocation2 + $0x1b8] sm:$0xff]  ;;  %v193_v17 = vmax.f32 %v129_v53, 0.0 }
  0x40   :  { %415 = vst.msk [vmem:[#allocation3 + $0x70] sm:$0xff] %vm20_vm0, %v8213_v21  ;;  %416 = vst.msk [vmem:[#allocation3 + $0x78] sm:$0xff] %vm20_vm0, %v8217_v22  ;;  %v133_v60 = vld [vmem:[%s13978_s0 + $0x100] sm:$0xff]  ;;  %v134_v4 = vld [vmem:[%s13978_s0 + $0x108] sm:$0xff]  ;;  %742 = vrot.lane.b32.xlu0 %v8349_v32, %s7836_s18 }
  0x41   :  { %14619 = vst [vmem:[#allocation15_spill] sm:$0xff] %v8225_v23  ;;  %14620 = vst [vmem:[#allocation16_spill] sm:$0xff] %v8227_v24  ;;  %v135_v26 = vld [vmem:[%s13978_s0 + $0x110] sm:$0xff]  ;;  %v136_v31 = vld [vmem:[%s13978_s0 + $0x118] sm:$0xff]  ;;  %v197_v52 = vmax.f32 %v133_v60, 0.0  ;;  %v198_v50 = vmax.f32 %v134_v4, 0.0 }
  0x42   :  { %14621 = vst [vmem:[#allocation17_spill] sm:$0xff] %v8232_v25  ;;  %14622 = vst [vmem:[#allocation18_spill] sm:$0xff] %v8235_v27  ;;  %v138_v53 = vld [vmem:[%s13978_s0 + $0x128] sm:$0xff]  ;;  %v139_v54 = vld [vmem:[%s13978_s0 + $0x130] sm:$0xff]  ;;  %v200_v47 = vmax.f32 %v136_v31, 0.0  ;;  %740 = vrot.lane.b32.xlu1 %v8335_v5, %s7836_s18  ;;  %v623_v27 = vrot.slane %v8279_v42, 1 }
  0x43   :  { %417 = vst.msk [vmem:[#allocation3 + $0x80] sm:$0xff] %vm20_vm0, %v8225_v23  ;;  %418 = vst.msk [vmem:[#allocation3 + $0x88] sm:$0xff] %vm20_vm0, %v8227_v24  ;;  %v140_v60 = vld [vmem:[%s13978_s0 + $0x138] sm:$0xff]  ;;  %v142_v31 = vld [vmem:[%s13978_s0 + $0x148] sm:$0xff] }
  0x44   :  { %14623 = vst [vmem:[#allocation19_spill] sm:$0xff] %v8241_v28  ;;  %14624 = vst [vmem:[#allocation20_spill] sm:$0xff] %v8243_v29  ;;  %v8375_v4 = vld [vmem:[#allocation2 + $0xb8] sm:$0x3]  ;;  %v143_v37 = vld [vmem:[%s13978_s0 + $0x150] sm:$0xff] }
  0x45   :  { %14625 = vst [vmem:[#allocation21_spill] sm:$0xff] %v8246_v30  ;;  %419 = vst.msk [vmem:[#allocation3 + $0x90] sm:$0xff] %vm20_vm0, %v8241_v28  ;;  %v146_v13 = vld [vmem:[%s13978_s0 + $0x168] sm:$0xff] }
  0x46   :  { %420 = vst.msk [vmem:[#allocation3 + $0x98] sm:$0xff] %vm20_vm0, %v8243_v29  ;;  %14626 = vst [vmem:[#allocation22_spill] sm:$0xff] %v8254_v33  ;;  %v162_v14 = vld [vmem:[%s13978_s0 + $0x1e8] sm:$0xff] }
  0x47   :  { %14627 = vst [vmem:[#allocation23_spill] sm:$0xff] %v8256_v34  ;;  %14628 = vst [vmem:[#allocation24_spill] sm:$0xff] %v8258_v35 }
  0x48   :  { %421 = vst.msk [vmem:[#allocation3 + $0xa0] sm:$0xff] %vm20_vm0, %v8254_v33  ;;  %422 = vst.msk [vmem:[#allocation3 + $0xa8] sm:$0xff] %vm20_vm0, %v8256_v34 }
  0x49   :  { %14629 = vst [vmem:[#allocation25_spill] sm:$0xff] %v8264_v36  ;;  %423 = vst.msk [vmem:[#allocation3 + $0xb0] sm:$0xff] %vm20_vm0, %v8258_v35 }
  0x4a   :  { %14630 = vst [vmem:[#allocation26_spill] sm:$0xff] %v8273_v38  ;;  %424 = vst.msk [vmem:[#allocation3 + $0xb8] sm:$0xff] %vm20_vm0, %v8264_v36  ;;  %v161_v38 = vld [vmem:[%s13978_s0 + $0x1e0] sm:$0xff] }
  0x4b   :  { %14631 = vst [vmem:[#allocation27_spill] sm:$0xff] %v8277_v39  ;;  %14632 = vst [vmem:[#allocation28_spill] sm:$0xff] %v8279_v42 }
  0x4c   :  { %14633 = vst [vmem:[#allocation29_spill] sm:$0xff] %v8284_v43  ;;  %14634 = vst [vmem:[#allocation30_spill] sm:$0xff] %v8287_v45 }
  0x4d   :  { %425 = vst.msk [vmem:[#allocation3 + $0xc0] sm:$0xff] %vm20_vm0, %v8277_v39  ;;  %426 = vst.msk [vmem:[#allocation3 + $0xc8] sm:$0xff] %vm20_vm0, %v8279_v42  ;;  %v226_v42 = vmax.f32 %v162_v14, 0.0 }
  0x4e   :  { %14635 = vst [vmem:[#allocation31_spill] sm:$0xff] %v8299_v49  ;;  %427 = vst.msk [vmem:[#allocation3 + $0xd0] sm:$0xff] %vm20_vm0, %v8293_v46  ;;  %v8527_v49 = vld [vmem:[#allocation2 + $0x100] sm:$0x3] }
  0x4f   :  { %433 = vst.msk [vmem:[#allocation3 + $0x100] sm:$0xff] %vm20_vm0, %v8314_v58  ;;  %434 = vst.msk [vmem:[#allocation3 + $0x108] sm:$0xff] %vm20_vm0, %v8316_v59 }
  0x50   :  { %14636 = vst [vmem:[#allocation32_spill] sm:$0xff] %v8335_v5  ;;  %254 = vst.msk [vmem:[#allocation2 + $0x141] sm:$0xff] %vm20_vm0, %v190_v55  ;;  %v199_v55 = vmax.f32 %v135_v26, 0.0  ;;  %v203_v26 = vmax.f32 %v139_v54, 0.0  ;;  %v207_v54 = vmax.f32 %v143_v37, 0.0  ;;  %v151_v37 = vld [vmem:[%s13978_s0 + $0x190] sm:$0xff] }
  0x51   :  { %14637 = vst [vmem:[#allocation33_spill] sm:$0xff] %v8349_v32  ;;  %255 = vst.msk [vmem:[#allocation2 + $0x151] sm:$0xff] %vm20_vm0, %v191_v63  ;;  %v141_v63 = vld [vmem:[%s13978_s0 + $0x140] sm:$0xff]  ;;  %v8509_v32 = vld [vmem:[#allocation2 + $0xe8] sm:$0x3] }
  0x52   :  { %256 = vst.msk [vmem:[#allocation2 + $0x159] sm:$0xff] %vm20_vm0, %v192_v3  ;;  %257 = vst.msk [vmem:[#allocation2 + $0x169] sm:$0xff] %vm20_vm0, %v193_v17  ;;  %v8372_v3 = vsel %vm561_vm2, %v588_v51, %v590_v61  ;;  %v144_v51 = vld [vmem:[%s13978_s0 + $0x158] sm:$0xff]  ;;  %v204_v61 = vmax.f32 %v140_v60, 0.0  ;;  %v145_v17 = vld [vmem:[%s13978_s0 + $0x160] sm:$0xff]  ;;  %v210_v60 = vmax.f32 %v146_v13, 0.0 }
  0x53   :  { %258 = vst.msk [vmem:[#allocation2 + $0x171] sm:$0xff] %vm20_vm0, %v194_v18  ;;  %14638 = vst [vmem:[#allocation34_spill] sm:$0xff] %v8372_v3  ;;  %v202_v18 = vmax.f32 %v138_v53, 0.0  ;;  %v206_v53 = vmax.f32 %v142_v31, 0.0  ;;  %v148_v31 = vld [vmem:[%s13978_s0 + $0x178] sm:$0xff]  ;;  %744 = vrot.lane.b32.xlu1 %v8372_v3, %s7836_s18  ;;  %v608_v3 = vrot.slane %v8243_v29, 1 }
  0x54   :  { %14639 = vst [vmem:[#allocation35_spill] sm:$0xff] %v8375_v4  ;;  %261 = vst.msk [vmem:[#allocation2 + $0x1c9] sm:$0xff] %vm20_vm0, %v197_v52  ;;  %v205_v52 = vmax.f32 %v141_v63, 0.0  ;;  %v147_v63 = vld [vmem:[%s13978_s0 + $0x170] sm:$0xff] }
  0x55   :  { %262 = vst.msk [vmem:[#allocation2 + $0x1d1] sm:$0xff] %vm20_vm0, %v198_v50  ;;  %263 = vst.msk [vmem:[#allocation2 + $0x1e1] sm:$0xff] %vm20_vm0, %v199_v55  ;;  %v14640_v50 = vrot.slane %v8209_v20, 1  ;;  %v211_v13 = vmax.f32 %v147_v63, 0.0  ;;  %v14643_v63 = vrot.slane %v8209_v20, 1  ;;  %v160_v20 = vld [vmem:[%s13978_s0 + $0x1d8] sm:$0xff] }
  0x56   :  { %264 = vst.msk [vmem:[#allocation2 + $0x1e9] sm:$0xff] %vm20_vm0, %v200_v47  ;;  %265 = vst.msk [vmem:[#allocation2 + $0x1f9] sm:$0xff] %vm20_vm0, %v201_v44  ;;  %v208_v44 = vmax.f32 %v144_v51, 0.0  ;;  %v209_v47 = vmax.f32 %v145_v17, 0.0  ;;  %v212_v17 = vmax.f32 %v148_v31, 0.0  ;;  %v152_v51 = vld [vmem:[%s13978_s0 + $0x198] sm:$0xff] }
  0x57   :  { %v8402_v55 = vsel %vm561_vm2, %v592_v62, %v14640_v50  ;;  %266 = vst.msk [vmem:[#allocation2 + $0x201] sm:$0xff] %vm20_vm0, %v202_v18  ;;  %267 = vst.msk [vmem:[#allocation2 + $0x211] sm:$0xff] %vm20_vm0, %v203_v26  ;;  %v149_v62 = vld [vmem:[%s13978_s0 + $0x180] sm:$0xff]  ;;  %v150_v18 = vld [vmem:[%s13978_s0 + $0x188] sm:$0xff]  ;;  %v14642_v50 = vrot.slane %v8287_v45, 1  ;;  %v224_v9 = vmax.f32 %v160_v20, 0.0 }
  0x58   :  { %14641 = vst [vmem:[#allocation36_spill] sm:$0xff] %v8402_v55  ;;  %268 = vst.msk [vmem:[#allocation2 + $0x219] sm:$0xff] %vm20_vm0, %v204_v61  ;;  %v213_v26 = vmax.f32 %v149_v62, 0.0  ;;  %v8430_v61 = vld [vmem:[#allocation2 + $0x140] sm:$0xff]  ;;  %746 = vrot.lane.b32.xlu0 %v8402_v55, %s7836_s18  ;;  %v600_v62 = vrot.slane %v8375_v4, 1  ;;  %v159_v45 = vld [vmem:[%s13978_s0 + $0x1d0] sm:$0xff] }
  0x59   :  { %269 = vst.msk [vmem:[#allocation2 + $0x229] sm:$0xff] %vm20_vm0, %v205_v52  ;;  %270 = vst.msk [vmem:[#allocation2 + $0x231] sm:$0xff] %vm20_vm0, %v206_v53  ;;  %v214_v52 = vmax.f32 %v150_v18, 0.0  ;;  %v215_v53 = vmax.f32 %v151_v37, 0.0  ;;  %v8442_v31 = vsel %vm561_vm2, %v14643_v63, %v14642_v50  ;;  %v14646_v18 = vrot.slane %v8213_v21, 1  ;;  %v158_v21 = vld [vmem:[%s13978_s0 + $0x1c8] sm:$0xff] }
  0x5a   :  { %271 = vst.msk [vmem:[#allocation2 + $0x241] sm:$0xff] %vm20_vm0, %v207_v54  ;;  %272 = vst.msk [vmem:[#allocation2 + $0x249] sm:$0xff] %vm20_vm0, %v208_v44  ;;  %v216_v54 = vmax.f32 %v152_v51, 0.0  ;;  %v8447_v44 = vld [vmem:[#allocation2 + $0x150] sm:$0xff]  ;;  %v602_v51 = vrot.slane %v8225_v23, 1  ;;  %v603_v50 = vrot.slane %v8227_v24, 1  ;;  %748 = vrot.lane.b32.xlu1 %v8442_v31, %s7836_s18 }
  0x5b   :  { %273 = vst.msk [vmem:[#allocation2 + $0x259] sm:$0xff] %vm20_vm0, %v209_v47  ;;  %274 = vst.msk [vmem:[#allocation2 + $0x261] sm:$0xff] %vm20_vm0, %v210_v60  ;;  %v8449_v47 = vld [vmem:[#allocation2 + $0x158] sm:$0xff]  ;;  %v14645_v60 = vrot.slane %v8217_v22, 1  ;;  %v8463_v63 = vld [vmem:[#allocation2 + $0xd0] sm:$0x3] }
  0x5c   :  { %14644 = vst [vmem:[#allocation37_spill] sm:$0xff] %v8442_v31  ;;  %428 = vst.msk [vmem:[#allocation3 + $0xd8] sm:$0xff] %vm20_vm0, %v8430_v61  ;;  %v8505_v55 = vsel %vm561_vm2, %v602_v51, %v603_v50  ;;  %v617_v23 = vrot.slane %v8258_v35, 1  ;;  %v8601_v4 = vld [vmem:[#allocation2 + $0x118] sm:$0x3]  ;;  %v157_v35 = vld [vmem:[%s13978_s0 + $0x1c0] sm:$0xff] }
  0x5d   :  { %275 = vst.msk [vmem:[#allocation2 + $0x271] sm:$0xff] %vm20_vm0, %v211_v13  ;;  %276 = vst.msk [vmem:[#allocation2 + $0x279] sm:$0xff] %vm20_vm0, %v212_v17  ;;  %v8459_v37 = vsel %vm561_vm2, %v14646_v18, %v14645_v60  ;;  %v8469_v13 = vld [vmem:[#allocation2 + $0x168] sm:$0xff]  ;;  %v8471_v17 = vld [vmem:[#allocation2 + $0x170] sm:$0xff]  ;;  %v605_v18 = vrot.slane %v8463_v63, 1 }
  0x5e   :  { %277 = vst.msk [vmem:[#allocation2 + $0x289] sm:$0xff] %vm20_vm0, %v213_v26  ;;  %14647 = vst [vmem:[#allocation38_spill] sm:$0xff] %v8459_v37  ;;  %v8480_v26 = vld [vmem:[#allocation2 + $0x1c8] sm:$0xff]  ;;  %v8484_v60 = vld [vmem:[#allocation2 + $0x1d0] sm:$0xff]  ;;  %750 = vrot.lane.b32.xlu0 %v8459_v37, %s7836_s18  ;;  %v607_v37 = vrot.slane %v8241_v28, 1 }
  0x5f   :  { %14648 = vst [vmem:[#allocation39_spill] sm:$0xff] %v8463_v63  ;;  %429 = vst.msk [vmem:[#allocation3 + $0xe0] sm:$0xff] %vm20_vm0, %v8447_v44  ;;  %v8500_v31 = vld [vmem:[#allocation2 + $0x1e8] sm:$0xff]  ;;  %v8521_v51 = vld [vmem:[#allocation2 + $0x210] sm:$0xff]  ;;  %v8540_v25 = vsel %vm561_vm2, %v603_v50, %v605_v18  ;;  %v612_v50 = vrot.slane %v8254_v33, 1  ;;  %v613_v18 = vrot.slane %v8256_v34, 1 }
  0x60   :  { %430 = vst.msk [vmem:[#allocation3 + $0xe8] sm:$0xff] %vm20_vm0, %v8449_v47  ;;  %14649 = vst [vmem:[#allocation40_spill] sm:$0xff] %v8469_v13  ;;  %v8523_v5 = vld [vmem:[#allocation2 + $0x218] sm:$0xff]  ;;  %v8533_v43 = vld [vmem:[#allocation2 + $0x228] sm:$0xff]  ;;  %v8554_v29 = vsel %vm561_vm2, %v607_v37, %v608_v3  ;;  %v615_v34 = vrot.slane %v8527_v49, 1 }
  0x61   :  { %14650 = vst [vmem:[#allocation41_spill] sm:$0xff] %v8471_v17  ;;  %278 = vst.msk [vmem:[#allocation2 + $0x291] sm:$0xff] %vm20_vm0, %v214_v52  ;;  %v8488_v52 = vld [vmem:[#allocation2 + $0x1e0] sm:$0xff]  ;;  %v8535_v30 = vld [vmem:[#allocation2 + $0x230] sm:$0xff]  ;;  %v8597_v24 = vsel %vm561_vm2, %v612_v50, %v613_v18 }
  0x62   :  { %279 = vst.msk [vmem:[#allocation2 + $0x2a1] sm:$0xff] %vm20_vm0, %v215_v53  ;;  %280 = vst.msk [vmem:[#allocation2 + $0x2a9] sm:$0xff] %vm20_vm0, %v216_v54  ;;  %v14653_v53 = vrot.slane %v8217_v22, 1  ;;  %754 = vrot.lane.b32.xlu0 %v8505_v55, %s7836_s18  ;;  %v8547_v16 = vld [vmem:[#allocation2 + $0x240] sm:$0xff]  ;;  %v8549_v12 = vld [vmem:[#allocation2 + $0x248] sm:$0xff]  ;;  %v8625_v22 = vsel %vm561_vm2, %v613_v18, %v615_v34  ;;  %v622_v34 = vrot.slane %v8277_v39, 1 }
  0x63   :  { %431 = vst.msk [vmem:[#allocation3 + $0xf0] sm:$0xff] %vm20_vm0, %v8469_v13  ;;  %432 = vst.msk [vmem:[#allocation3 + $0xf8] sm:$0xff] %vm20_vm0, %v8471_v17  ;;  %v8551_v8 = vld [vmem:[#allocation2 + $0x258] sm:$0xff]  ;;  %v155_v50 = vld [vmem:[%s13978_s0 + $0x1b0] sm:$0xff]  ;;  %v223_v39 = vmax.f32 %v159_v45, 0.0  ;;  %v633_v45 = vrot.slane %v8449_v47, 1 }
  0x64   :  { %14651 = vst [vmem:[#allocation42_spill] sm:$0xff] %v8480_v26  ;;  %435 = vst.msk [vmem:[#allocation3 + $0x110] sm:$0xff] %vm20_vm0, %v8480_v26  ;;  %v8495_v54 = vsel %vm561_vm2, %v14653_v53, %v600_v62  ;;  %v8513_v62 = vld [vmem:[#allocation2 + $0x1f8] sm:$0xff]  ;;  %v8515_v53 = vld [vmem:[#allocation2 + $0x200] sm:$0xff]  ;;  %v8672_v14 = vsel %vm561_vm2, %v622_v34, %v623_v27 }
  0x65   :  { %14652 = vst [vmem:[#allocation43_spill] sm:$0xff] %v8488_v52  ;;  %14654 = vst [vmem:[#allocation44_spill] sm:$0xff] %v8495_v54  ;;  %752 = vrot.lane.b32.xlu1 %v8495_v54, %s7836_s18  ;;  %v610_v54 = vrot.slane %v8509_v32, 1  ;;  %v8568_v37 = vld [vmem:[#allocation2 + $0x270] sm:$0xff]  ;;  %v8579_v33 = vld [vmem:[#allocation2 + $0x288] sm:$0xff] }
  0x66   :  { %436 = vst.msk [vmem:[#allocation3 + $0x118] sm:$0xff] %vm20_vm0, %v8484_v60  ;;  %14655 = vst [vmem:[#allocation45_spill] sm:$0xff] %v8500_v31  ;;  %758 = vrot.lane.b32.xlu0 %v8554_v29, %s7836_s18 }
  0x67   :  { %437 = vst.msk [vmem:[#allocation3 + $0x120] sm:$0xff] %vm20_vm0, %v8488_v52  ;;  %14656 = vst [vmem:[#allocation46_spill] sm:$0xff] %v8505_v55  ;;  %v8562_v55 = vld [vmem:[#allocation2 + $0x260] sm:$0xff]  ;;  %v8586_v63 = vsel %vm561_vm2, %v608_v3, %v610_v54  ;;  %v154_v54 = vld [vmem:[%s13978_s0 + $0x1a8] sm:$0xff] }
  0x68   :  { %14657 = vst [vmem:[#allocation47_spill] sm:$0xff] %v8509_v32  ;;  %438 = vst.msk [vmem:[#allocation3 + $0x128] sm:$0xff] %vm20_vm0, %v8500_v31  ;;  %v8570_v32 = vld [vmem:[#allocation2 + $0x278] sm:$0xff]  ;;  %v8581_v28 = vld [vmem:[#allocation2 + $0x290] sm:$0xff]  ;;  %v218_v15 = vmax.f32 %v154_v54, 0.0  ;;  %v222_v54 = vmax.f32 %v158_v21, 0.0 }
  0x69   :  { %439 = vst.msk [vmem:[#allocation3 + $0x130] sm:$0xff] %vm20_vm0, %v8513_v62  ;;  %440 = vst.msk [vmem:[#allocation3 + $0x138] sm:$0xff] %vm20_vm0, %v8515_v53  ;;  %756 = vrot.lane.b32.xlu1 %v8540_v25, %s7836_s18  ;;  %v153_v3 = vld [vmem:[%s13978_s0 + $0x1a0] sm:$0xff]  ;;  %v627_v21 = vrot.slane %v8293_v46, 1 }
  0x6a   :  { %14658 = vst [vmem:[#allocation48_spill] sm:$0xff] %v8527_v49  ;;  %441 = vst.msk [vmem:[#allocation3 + $0x140] sm:$0xff] %vm20_vm0, %v8521_v51  ;;  %v8594_v49 = vld [vmem:[#allocation2 + $0x2a8] sm:$0xff]  ;;  %762 = vrot.lane.b32.xlu0 %v8597_v24, %s7836_s18  ;;  %v217_v18 = vmax.f32 %v153_v3, 0.0  ;;  %v221_v3 = vmax.f32 %v157_v35, 0.0 }
  0x6b   :  { %442 = vst.msk [vmem:[#allocation3 + $0x148] sm:$0xff] %vm20_vm0, %v8523_v5  ;;  %14659 = vst [vmem:[#allocation49_spill] sm:$0xff] %v8540_v25  ;;  %v8592_v25 = vld [vmem:[#allocation2 + $0x2a0] sm:$0xff]  ;;  %v8676_v35 = vld [vmem:[#allocation2 + $0x148] sm:$0x3] }
  0x6c   :  { %443 = vst.msk [vmem:[#allocation3 + $0x150] sm:$0xff] %vm20_vm0, %v8533_v43  ;;  %444 = vst.msk [vmem:[#allocation3 + $0x158] sm:$0xff] %vm20_vm0, %v8535_v30 }
  0x6d   :  { %14660 = vst [vmem:[#allocation50_spill] sm:$0xff] %v8549_v12  ;;  %14661 = vst [vmem:[#allocation51_spill] sm:$0xff] %v8554_v29  ;;  %v618_v29 = vrot.slane %v8264_v36, 1  ;;  %v156_v36 = vld [vmem:[%s13978_s0 + $0x1b8] sm:$0xff]  ;;  %760 = vrot.lane.b32.xlu1 %v8586_v63, %s7836_s18 }
  0x6e   :  { %445 = vst.msk [vmem:[#allocation3 + $0x160] sm:$0xff] %vm20_vm0, %v8547_v16  ;;  %446 = vst.msk [vmem:[#allocation3 + $0x168] sm:$0xff] %vm20_vm0, %v8549_v12  ;;  %v220_v10 = vmax.f32 %v156_v36, 0.0  ;;  %v980_v36 = vrot.slane %v8103_v40, 2  ;;  %v983_v40 = vrot.slane %v8119_v48, 2 }
  0x6f   :  { %14662 = vst [vmem:[#allocation52_spill] sm:$0xff] %v8562_v55  ;;  %447 = vst.msk [vmem:[#allocation3 + $0x170] sm:$0xff] %vm20_vm0, %v8551_v8  ;;  %v8647_v11 = vsel %vm561_vm2, %v617_v23, %v618_v29  ;;  %v225_v23 = vmax.f32 %v161_v38, 0.0 }
  0x70   :  { %448 = vst.msk [vmem:[#allocation3 + $0x178] sm:$0xff] %vm20_vm0, %v8562_v55  ;;  %14663 = vst [vmem:[#allocation53_spill] sm:$0xff] %v8570_v32  ;;  %766 = vrot.lane.b32.xlu0 %v8647_v11, %s7836_s18 }
  0x71   :  { %449 = vst.msk [vmem:[#allocation3 + $0x180] sm:$0xff] %vm20_vm0, %v8568_v37  ;;  %450 = vst.msk [vmem:[#allocation3 + $0x188] sm:$0xff] %vm20_vm0, %v8570_v32  ;;  %764 = vrot.lane.b32.xlu1 %v8625_v22, %s7836_s18 }
  0x72   :  { %14664 = vst [vmem:[#allocation54_spill] sm:$0xff] %v8581_v28  ;;  %14665 = vst [vmem:[#allocation55_spill] sm:$0xff] %v8586_v63  ;;  %v620_v63 = vrot.slane %v8601_v4, 1 }
  0x73   :  { %451 = vst.msk [vmem:[#allocation3 + $0x190] sm:$0xff] %vm20_vm0, %v8579_v33  ;;  %452 = vst.msk [vmem:[#allocation3 + $0x198] sm:$0xff] %vm20_vm0, %v8581_v28 }
  0x74   :  { %14666 = vst [vmem:[#allocation56_spill] sm:$0xff] %v8594_v49  ;;  %14667 = vst [vmem:[#allocation57_spill] sm:$0xff] %v8597_v24  ;;  %v8650_v24 = vld [vmem:[#allocation2 + $0x130] sm:$0x3]  ;;  %770 = vrot.lane.b32.xlu0 %v8672_v14, %s7836_s18 }
  0x75   :  { %14668 = vst [vmem:[#allocation58_spill] sm:$0xff] %v8601_v4  ;;  %453 = vst.msk [vmem:[#allocation3 + $0x1a0] sm:$0xff] %vm20_vm0, %v8592_v25  ;;  %v219_v4 = vmax.f32 %v155_v50, 0.0  ;;  %v625_v20 = vrot.slane %v8650_v24, 1 }
  0x76   :  { %454 = vst.msk [vmem:[#allocation3 + $0x1a8] sm:$0xff] %vm20_vm0, %v8594_v49  ;;  %14669 = vst [vmem:[#allocation59_spill] sm:$0xff] %v8625_v22  ;;  %v349_v22 = vld [vmem:[#allocation2 + $0x1c0] sm:$0x3] }
  0x77   :  { %14670 = vst [vmem:[#allocation60_spill] sm:$0xff] %v8647_v11  ;;  %281 = vst.msk [vmem:[#allocation2 + $0x2b9] sm:$0xff] %vm20_vm0, %v217_v18  ;;  %v8691_v48 = vsel %vm561_vm2, %v623_v27, %v625_v20  ;;  %v643_v11 = vrot.slane %v8316_v59, 1 }
  0x78   :  { %282 = vst.msk [vmem:[#allocation2 + $0x2c1] sm:$0xff] %vm20_vm0, %v218_v15  ;;  %283 = vst.msk [vmem:[#allocation2 + $0x2d1] sm:$0xff] %vm20_vm0, %v219_v4  ;;  %v8662_v15 = vsel %vm561_vm2, %v618_v29, %v620_v63  ;;  %v628_v29 = vrot.slane %v8430_v61, 1  ;;  %v8699_v4 = vld [vmem:[#allocation2 + $0x160] sm:$0x3] }
  0x79   :  { %284 = vst.msk [vmem:[#allocation2 + $0x2d9] sm:$0xff] %vm20_vm0, %v220_v10  ;;  %14671 = vst [vmem:[#allocation61_spill] sm:$0xff] %v8662_v15  ;;  %v981_v10 = vrot.slane %v8105_v41, 2  ;;  %768 = vrot.lane.b32.xlu1 %v8662_v15, %s7836_s18  ;;  %v642_v15 = vrot.slane %v8314_v58, 1 }
  0x7a   :  { %285 = vst.msk [vmem:[#allocation2 + $0x2e9] sm:$0xff] %vm20_vm0, %v221_v3  ;;  %286 = vst.msk [vmem:[#allocation2 + $0x2f1] sm:$0xff] %vm20_vm0, %v222_v54 }
  0x7b   :  { %287 = vst.msk [vmem:[#allocation2 + $0x301] sm:$0xff] %vm20_vm0, %v223_v39  ;;  %288 = vst.msk [vmem:[#allocation2 + $0x309] sm:$0xff] %vm20_vm0, %v224_v9  ;;  %v8681_v38 = vsel %vm979_vm4, %v980_v36, %v981_v10  ;;  %v8684_v41 = vsel %vm979_vm4, %v981_v10, %v983_v40  ;;  %v630_v9 = vrot.slane %v8676_v35, 1  ;;  %v8695_v39 = vsel %vm561_vm2, %v627_v21, %v628_v29 }
  0x7c   :  { %14672 = vst [vmem:[#allocation62_spill] sm:$0xff] %v8672_v14  ;;  %289 = vst.msk [vmem:[#allocation2 + $0x319] sm:$0xff] %vm20_vm0, %v225_v23  ;;  %774 = vrot.lane.b32.xlu0 %v8695_v39, %s7836_s18  ;;  %v635_v23 = vrot.slane %v8699_v4, 1  ;;  %v637_v40 = vrot.slane %v8469_v13, 1  ;;  %v638_v21 = vrot.slane %v8471_v17, 1 }
  0x7d   :  { %290 = vst.msk [vmem:[#allocation2 + $0x321] sm:$0xff] %vm20_vm0, %v226_v42  ;;  %14673 = vst [vmem:[#allocation63_spill] sm:$0xff] %v8691_v48  ;;  %v632_v42 = vrot.slane %v8447_v44, 1  ;;  %772 = vrot.lane.b32.xlu1 %v8691_v48, %s7836_s18  ;;  %v8726_v54 = vsel %vm561_vm2, %v628_v29, %v630_v9  ;;  %v8742_v29 = vld [vmem:[#allocation2 + $0x178] sm:$0x3] }
  0x7e   :  { %14674 = vst [vmem:[#allocation64_spill] sm:$0xff] %v8695_v39  ;;  %v8701_v63 = vld [vmem:[#allocation2 + $0x2b8] sm:$0xff]  ;;  %14679 = vst [vmem:[#allocation69_spill] sm:$0xff] %v8726_v54  ;;  %v640_v48 = vrot.slane %v8742_v29, 1  ;;  %v8765_v14 = vsel %vm561_vm2, %v637_v40, %v638_v21  ;;  %v647_v40 = vrot.slane %v8480_v26, 1 }
  0x7f   :  { %v8703_v50 = vld [vmem:[#allocation2 + $0x2c0] sm:$0xff]  ;;  %455 = vst.msk [vmem:[#allocation3 + $0x1b0] sm:$0xff] %vm20_vm0, %v8701_v63  ;;  %v8709_v27 = vld [vmem:[#allocation2 + $0x2d0] sm:$0xff]  ;;  %v8738_v10 = vsel %vm561_vm2, %v632_v42, %v633_v45  ;;  %14683 = vst [vmem:[#allocation73_spill] sm:$0xff] %v8742_v29  ;;  %v8761_v42 = vsel %vm561_vm2, %v633_v45, %v635_v23  ;;  %v645_v45 = vrot.slane %v349_v22, 1  ;;  %v644_v23 = vsel %vm561_vm2, %v642_v15, %v643_v11 }
  0x80   :  { %14675 = vst [vmem:[#allocation65_spill] sm:$0xff] %v8703_v50  ;;  %456 = vst.msk [vmem:[#allocation3 + $0x1b8] sm:$0xff] %vm20_vm0, %v8703_v50  ;;  %v8711_v34 = vld [vmem:[#allocation2 + $0x2d8] sm:$0xff]  ;;  %778 = vrot.lane.b32.xlu0 %v8738_v10, %s7836_s18  ;;  %v652_v15 = vrot.slane %v8488_v52, 1  ;;  %v8791_v26 = vld [vmem:[#allocation2 + $0x1f0] sm:$0x3] }
  0x81   :  { %14676 = vst [vmem:[#allocation66_spill] sm:$0xff] %v8711_v34  ;;  %457 = vst.msk [vmem:[#allocation3 + $0x1c0] sm:$0xff] %vm20_vm0, %v8709_v27  ;;  %v8719_v18 = vld [vmem:[#allocation2 + $0x2e8] sm:$0xff]  ;;  %v8721_v3 = vld [vmem:[#allocation2 + $0x2f0] sm:$0xff]  ;;  %776 = vrot.lane.b32.xlu1 %v8726_v54, %s7836_s18  ;;  %v648_v54 = vrot.slane %v8484_v60, 1  ;;  %v1060_v52 = vrot.slane %v8314_v58, 2 }
  0x82   :  { %458 = vst.msk [vmem:[#allocation3 + $0x1c8] sm:$0xff] %vm20_vm0, %v8711_v34  ;;  %14677 = vst [vmem:[#allocation67_spill] sm:$0xff] %v8719_v18  ;;  %v8733_v36 = vld [vmem:[#allocation2 + $0x300] sm:$0xff]  ;;  %v8735_v20 = vld [vmem:[#allocation2 + $0x308] sm:$0xff] }
  0x83   :  { %14678 = vst [vmem:[#allocation68_spill] sm:$0xff] %v8721_v3  ;;  %459 = vst.msk [vmem:[#allocation3 + $0x1d0] sm:$0xff] %vm20_vm0, %v8719_v18  ;;  %v8748_v9 = vld [vmem:[#allocation2 + $0x318] sm:$0xff] }
  0x84   :  { %460 = vst.msk [vmem:[#allocation3 + $0x1d8] sm:$0xff] %vm20_vm0, %v8721_v3  ;;  %14680 = vst [vmem:[#allocation70_spill] sm:$0xff] %v8733_v36  ;;  %v8750_v39 = vld [vmem:[#allocation2 + $0x320] sm:$0xff]  ;;  %782 = vrot.lane.b32.xlu0 %v8765_v14, %s7836_s18  ;;  %v8779_v29 = vld [vmem:[#allocation2 + $0x1d8] sm:$0x3] }
  0x85   :  { %14681 = vst [vmem:[#allocation71_spill] sm:$0xff] %v8735_v20  ;;  %14682 = vst [vmem:[#allocation72_spill] sm:$0xff] %v8738_v10  ;;  %780 = vrot.lane.b32.xlu1 %v8761_v42, %s7836_s18  ;;  %v8774_v10 = vsel %vm561_vm2, %v638_v21, %v640_v48  ;;  %v8787_v48 = vsel %vm561_vm2, %v647_v40, %v648_v54  ;;  %v653_v21 = vrot.slane %v8500_v31, 1  ;;  %v657_v40 = vrot.slane %v8513_v62, 1  ;;  %v8805_v31 = vld [vmem:[#allocation2 + $0x208] sm:$0x3] }
  0x86   :  { %461 = vst.msk [vmem:[#allocation3 + $0x1e0] sm:$0xff] %vm20_vm0, %v8733_v36  ;;  %462 = vst.msk [vmem:[#allocation3 + $0x1e8] sm:$0xff] %vm20_vm0, %v8735_v20 }
  0x87   :  { %14684 = vst [vmem:[#allocation74_spill] sm:$0xff] %v8748_v9  ;;  %14685 = vst [vmem:[#allocation75_spill] sm:$0xff] %v8750_v39 }
  0x88   :  { %463 = vst.msk [vmem:[#allocation3 + $0x1f0] sm:$0xff] %vm20_vm0, %v8748_v9  ;;  %464 = vst.msk [vmem:[#allocation3 + $0x1f8] sm:$0xff] %vm20_vm0, %v8750_v39  ;;  %786 = vrot.lane.b32.xlu0 %v644_v23, %s7836_s18 }
  0x89   :  { %14686 = vst [vmem:[#allocation76_spill] sm:$0xff] %v8761_v42  ;;  %14687 = vst [vmem:[#allocation77_spill] sm:$0xff] %v8765_v14  ;;  %784 = vrot.lane.b32.xlu1 %v8774_v10, %s7836_s18  ;;  %v646_v42 = vsel %vm561_vm2, %v643_v11, %v645_v45  ;;  %v650_v14 = vrot.slane %v8779_v29, 1  ;;  %v655_v11 = vrot.slane %v8791_v26, 1  ;;  %v8801_v45 = vsel %vm561_vm2, %v652_v15, %v653_v21 }
  0x8a   :  { %14688 = vst [vmem:[#allocation78_spill] sm:$0xff] %v8774_v10  ;;  %14689 = vst [vmem:[#allocation79_spill] sm:$0xff] %v8779_v29  ;;  %v658_v10 = vrot.slane %v8515_v53, 1  ;;  %v1063_v29 = vrot.slane %v349_v22, 2  ;;  %v662_v22 = vrot.slane %v8521_v51, 1 }
  0x8b   :  { %14690 = vst [vmem:[#allocation80_spill] sm:$0xff] %v8787_v48  ;;  %v8797_v23 = vsel %vm561_vm2, %v648_v54, %v650_v14  ;;  %14692 = vst [vmem:[#allocation82_spill] sm:$0xff] %v8801_v45  ;;  %v8814_v14 = vsel %vm561_vm2, %v653_v21, %v655_v11  ;;  %v660_v54 = vrot.slane %v8805_v31, 1  ;;  %v667_v11 = vrot.slane %v8533_v43, 1 }
  0x8c   :  { %790 = vrot.lane.b32.xlu0 %v8787_v48, %s7836_s18  ;;  %14691 = vst [vmem:[#allocation81_spill] sm:$0xff] %v8797_v23  ;;  %14693 = vst [vmem:[#allocation83_spill] sm:$0xff] %v8814_v14  ;;  %v8824_v58 = vsel %vm561_vm2, %v657_v40, %v658_v10  ;;  %v668_v40 = vrot.slane %v8535_v30, 1 }
  0x8d   :  { %788 = vrot.lane.b32.xlu1 %v646_v42, %s7836_s18  ;;  %v1061_v42 = vrot.slane %v8316_v59, 2  ;;  %14694 = vst [vmem:[#allocation84_spill] sm:$0xff] %v8824_v58  ;;  %v663_v59 = vrot.slane %v8523_v5, 1 }
  0x8f   :  { %v8818_v15 = vsel %vm979_vm4, %v1060_v52, %v1061_v42  ;;  %v8821_v48 = vsel %vm979_vm4, %v1061_v42, %v1063_v29  ;;  %v8835_v52 = vsel %vm561_vm2, %v658_v10, %v660_v54  ;;  %v8839_v21 = vsel %vm561_vm2, %v662_v22, %v663_v59  ;;  %v8843_v42 = vld [vmem:[#allocation2 + $0x238] sm:$0x3] }
  0x90   :  { %794 = vrot.lane.b32.xlu0 %v8801_v45, %s7836_s18  ;;  %14695 = vst [vmem:[#allocation85_spill] sm:$0xff] %v8835_v52  ;;  %14696 = vst [vmem:[#allocation86_spill] sm:$0xff] %v8839_v21  ;;  %v670_v54 = vrot.slane %v8843_v42, 1  ;;  %v8854_v22 = vsel %vm561_vm2, %v667_v11, %v668_v40  ;;  %v8858_v45 = vld [vmem:[#allocation2 + $0x250] sm:$0x3] }
  0x91   :  { %792 = vrot.lane.b32.xlu1 %v8797_v23, %s7836_s18  ;;  %v8828_v23 = vld [vmem:[#allocation2 + $0x220] sm:$0x3]  ;;  %14698 = vst [vmem:[#allocation88_spill] sm:$0xff] %v8854_v22 }
  0x92   :  { %v665_v29 = vrot.slane %v8828_v23, 1 }
  0x94   :  { %798 = vrot.lane.b32.xlu0 %v8824_v58, %s7836_s18  ;;  %v8850_v10 = vsel %vm561_vm2, %v663_v59, %v665_v29  ;;  %v672_v58 = vrot.slane %v8547_v16, 1  ;;  %v8865_v59 = vsel %vm561_vm2, %v668_v40, %v670_v54  ;;  %v675_v29 = vrot.slane %v8858_v45, 1 }
  0x95   :  { %796 = vrot.lane.b32.xlu1 %v8814_v14, %s7836_s18  ;;  %14697 = vst [vmem:[#allocation87_spill] sm:$0xff] %v8850_v10  ;;  %v673_v14 = vrot.slane %v8549_v12, 1  ;;  %14699 = vst [vmem:[#allocation89_spill] sm:$0xff] %v8865_v59  ;;  %v8873_v12 = vld [vmem:[#allocation2 + $0x268] sm:$0x3] }
  0x96   :  { %v680_v54 = vrot.slane %v8873_v12, 1 }
  0x97   :  { %v8869_v11 = vsel %vm561_vm2, %v672_v58, %v673_v14  ;;  %v8880_v40 = vsel %vm561_vm2, %v673_v14, %v675_v29 }
  0x98   :  { %802 = vrot.lane.b32.xlu0 %v8839_v21, %s7836_s18  ;;  %14700 = vst [vmem:[#allocation90_spill] sm:$0xff] %v8869_v11  ;;  %v677_v21 = vrot.slane %v8551_v8, 1  ;;  %14701 = vst [vmem:[#allocation91_spill] sm:$0xff] %v8880_v40 }
  0x99   :  { %800 = vrot.lane.b32.xlu1 %v8835_v52, %s7836_s18  ;;  %v678_v52 = vrot.slane %v8562_v55, 1  ;;  %v8888_v55 = vld [vmem:[#allocation2 + $0x280] sm:$0x3] }
  0x9a   :  { %v685_v29 = vrot.slane %v8888_v55, 1 }
  0x9b   :  { %v8884_v58 = vsel %vm561_vm2, %v677_v21, %v678_v52  ;;  %v8895_v14 = vsel %vm561_vm2, %v678_v52, %v680_v54 }
  0x9c   :  { %806 = vrot.lane.b32.xlu0 %v8854_v22, %s7836_s18  ;;  %14702 = vst [vmem:[#allocation92_spill] sm:$0xff] %v8884_v58  ;;  %v682_v22 = vrot.slane %v8568_v37, 1  ;;  %14703 = vst [vmem:[#allocation93_spill] sm:$0xff] %v8895_v14 }
  0x9d   :  { %804 = vrot.lane.b32.xlu1 %v8850_v10, %s7836_s18  ;;  %v683_v10 = vrot.slane %v8570_v32, 1  ;;  %v8903_v32 = vld [vmem:[#allocation2 + $0x298] sm:$0x3] }
  0x9e   :  { %v690_v54 = vrot.slane %v8903_v32, 1 }
  0x9f   :  { %v8899_v21 = vsel %vm561_vm2, %v682_v22, %v683_v10  ;;  %v8910_v52 = vsel %vm561_vm2, %v683_v10, %v685_v29 }
  0xa0   :  { %810 = vrot.lane.b32.xlu0 %v8869_v11, %s7836_s18  ;;  %14704 = vst [vmem:[#allocation94_spill] sm:$0xff] %v8899_v21  ;;  %v687_v11 = vrot.slane %v8579_v33, 1  ;;  %14705 = vst [vmem:[#allocation95_spill] sm:$0xff] %v8910_v52 }
  0xa1   :  { %808 = vrot.lane.b32.xlu1 %v8865_v59, %s7836_s18  ;;  %v688_v59 = vrot.slane %v8581_v28, 1  ;;  %v8918_v28 = vld [vmem:[#allocation2 + $0x2b0] sm:$0x3] }
  0xa2   :  { %v695_v29 = vrot.slane %v8918_v28, 1 }
  0xa3   :  { %v8914_v22 = vsel %vm561_vm2, %v687_v11, %v688_v59  ;;  %v8925_v10 = vsel %vm561_vm2, %v688_v59, %v690_v54 }
  0xa4   :  { %814 = vrot.lane.b32.xlu0 %v8884_v58, %s7836_s18  ;;  %14706 = vst [vmem:[#allocation96_spill] sm:$0xff] %v8914_v22  ;;  %v692_v58 = vrot.slane %v8592_v25, 1  ;;  %14707 = vst [vmem:[#allocation97_spill] sm:$0xff] %v8925_v10 }
  0xa5   :  { %812 = vrot.lane.b32.xlu1 %v8880_v40, %s7836_s18  ;;  %v693_v40 = vrot.slane %v8594_v49, 1  ;;  %v8933_v49 = vld [vmem:[#allocation2 + $0x2c8] sm:$0x3] }
  0xa6   :  { %v700_v54 = vrot.slane %v8933_v49, 1 }
  0xa7   :  { %v8929_v11 = vsel %vm561_vm2, %v692_v58, %v693_v40  ;;  %v8940_v59 = vsel %vm561_vm2, %v693_v40, %v695_v29 }
  0xa8   :  { %818 = vrot.lane.b32.xlu0 %v8899_v21, %s7836_s18  ;;  %14708 = vst [vmem:[#allocation98_spill] sm:$0xff] %v8929_v11  ;;  %v697_v21 = vrot.slane %v8701_v63, 1  ;;  %14709 = vst [vmem:[#allocation99_spill] sm:$0xff] %v8940_v59 }
  0xa9   :  { %816 = vrot.lane.b32.xlu1 %v8895_v14, %s7836_s18  ;;  %v698_v14 = vrot.slane %v8703_v50, 1  ;;  %v8948_v50 = vld [vmem:[#allocation2 + $0x2e0] sm:$0x3] }
  0xaa   :  { %v705_v29 = vrot.slane %v8948_v50, 1 }
  0xab   :  { %v8944_v58 = vsel %vm561_vm2, %v697_v21, %v698_v14  ;;  %v8955_v40 = vsel %vm561_vm2, %v698_v14, %v700_v54 }
  0xac   :  { %822 = vrot.lane.b32.xlu0 %v8914_v22, %s7836_s18  ;;  %14710 = vst [vmem:[#allocation100_spill] sm:$0xff] %v8944_v58  ;;  %v702_v22 = vrot.slane %v8709_v27, 1  ;;  %14711 = vst [vmem:[#allocation101_spill] sm:$0xff] %v8955_v40 }
  0xad   :  { %820 = vrot.lane.b32.xlu1 %v8910_v52, %s7836_s18  ;;  %v703_v52 = vrot.slane %v8711_v34, 1  ;;  %v8963_v34 = vld [vmem:[#allocation2 + $0x2f8] sm:$0x3] }
  0xae   :  { %v710_v54 = vrot.slane %v8963_v34, 1 }
  0xaf   :  { %v8959_v21 = vsel %vm561_vm2, %v702_v22, %v703_v52  ;;  %v8970_v14 = vsel %vm561_vm2, %v703_v52, %v705_v29  ;;  %v727_v29 = vpop.permute.xlu1 %726 }
  0xb0   :  { %826 = vrot.lane.b32.xlu0 %v8929_v11, %s7836_s18  ;;  %14712 = vst [vmem:[#allocation102_spill] sm:$0xff] %v8959_v21  ;;  %v707_v11 = vrot.slane %v8719_v18, 1  ;;  %14713 = vst [vmem:[#allocation103_spill] sm:$0xff] %v8970_v14  ;;  %v723_v18 = vpop.permute.xlu0 %722 }
  0xb1   :  { %824 = vrot.lane.b32.xlu1 %v8925_v10, %s7836_s18  ;;  %v708_v10 = vrot.slane %v8721_v3, 1  ;;  %v8978_v3 = vld [vmem:[#allocation2 + $0x310] sm:$0x3]  ;;  %915 = vst.msk [vmem:[#allocation3] sm:$0xff] %vm914_vm5, %v723_v18  ;;  %917 = vst.msk [vmem:[#allocation3 + $0x10] sm:$0xff] %vm914_vm5, %v727_v29 }
  0xb3   :  { %v8974_v22 = vsel %vm561_vm2, %v707_v11, %v708_v10  ;;  %v8986_v52 = vsel %vm561_vm2, %v708_v10, %v710_v54  ;;  %v715_v11 = vrot.slane %v8978_v3, 1  ;;  %v729_v54 = vpop.permute.xlu1 %728 }
  0xb4   :  { %830 = vrot.lane.b32.xlu0 %v8944_v58, %s7836_s18  ;;  %14714 = vst [vmem:[#allocation104_spill] sm:$0xff] %v8974_v22  ;;  %v712_v58 = vrot.slane %v8733_v36, 1  ;;  %14715 = vst [vmem:[#allocation105_spill] sm:$0xff] %v8986_v52  ;;  %v8994_v36 = vld [vmem:[#allocation2 + $0x328] sm:$0x3]  ;;  %v725_v18 = vpop.permute.xlu0 %724 }
  0xb5   :  { %828 = vrot.lane.b32.xlu1 %v8940_v59, %s7836_s18  ;;  %v713_v59 = vrot.slane %v8735_v20, 1  ;;  %v718_v20 = vrot.slane %v8750_v39, 1  ;;  %916 = vst.msk [vmem:[#allocation3 + $0x8] sm:$0xff] %vm914_vm5, %v725_v18  ;;  %918 = vst.msk [vmem:[#allocation3 + $0x18] sm:$0xff] %vm914_vm5, %v729_v54  ;;  %v985_v18 = vrot.slane %v8138_v56, 2 }
  0xb7   :  { %v9003_v10 = vsel %vm561_vm2, %v713_v59, %v715_v11  ;;  %v733_v11 = vpop.permute.xlu1 %732 }
  0xb8   :  { %834 = vrot.lane.b32.xlu0 %v8959_v21, %s7836_s18  ;;  %v8990_v21 = vsel %vm561_vm2, %v712_v58, %v713_v59  ;;  %14717 = vst [vmem:[#allocation107_spill] sm:$0xff] %v9003_v10  ;;  %v720_v58 = vrot.slane %v8994_v36, 1  ;;  %v731_v29 = vpop.permute.xlu0 %730  ;;  %920 = vst.msk [vmem:[#allocation3 + $0x28] sm:$0xff] %vm914_vm5, %v733_v11  ;;  %v991_v11 = vrot.slane %v8152_v1, 2 }
  0xb9   :  { %832 = vrot.lane.b32.xlu1 %v8955_v40, %s7836_s18  ;;  %14716 = vst [vmem:[#allocation106_spill] sm:$0xff] %v8990_v21  ;;  %v717_v40 = vrot.slane %v8748_v9, 1  ;;  %919 = vst.msk [vmem:[#allocation3 + $0x20] sm:$0xff] %vm914_vm5, %v731_v29  ;;  %v7808_v29 = vld [vmem:[#allocation2 + $0x28] sm:$0x3] }
  0xba   :  { %v9016_v59 = vsel %vm561_vm2, %v718_v20, %v720_v58 }
  0xbb   :  { %14719 = vst [vmem:[#allocation109_spill] sm:$0xff] %v9016_v59  ;;  %v737_v58 = vpop.permute.xlu1 %736 }
  0xbc   :  { %838 = vrot.lane.b32.xlu0 %v8974_v22, %s7836_s18  ;;  %v9007_v22 = vsel %vm561_vm2, %v717_v40, %v718_v20  ;;  %v986_v40 = vrot.slane %v8140_v57, 2  ;;  %v735_v54 = vpop.permute.xlu0 %734  ;;  %v988_v20 = vrot.slane %v7808_v29, 2  ;;  %922 = vst.msk [vmem:[#allocation3 + $0x38] sm:$0xff] %vm914_vm5, %v737_v58  ;;  %v995_v58 = vrot.slane %v8154_v2, 2 }
  0xbd   :  { %836 = vrot.lane.b32.xlu1 %v8970_v14, %s7836_s18  ;;  %14718 = vst [vmem:[#allocation108_spill] sm:$0xff] %v9007_v22  ;;  %921 = vst.msk [vmem:[#allocation3 + $0x30] sm:$0xff] %vm914_vm5, %v735_v54  ;;  %v14731_v14 = vld [vmem:[#allocation9_spill] sm:$0xff] }
  0xbf   :  { %v741_v54 = vpop.permute.xlu1 %740 }
  0xc0   :  { %842 = vrot.lane.b32.xlu0 %v8990_v21, %s7836_s18  ;;  %v739_v21 = vpop.permute.xlu0 %738  ;;  %924 = vst.msk [vmem:[#allocation3 + $0x48] sm:$0xff] %vm914_vm5, %v741_v54 }
  0xc1   :  { %840 = vrot.lane.b32.xlu1 %v8986_v52, %s7836_s18  ;;  %923 = vst.msk [vmem:[#allocation3 + $0x40] sm:$0xff] %vm914_vm5, %v739_v21  ;;  %v998_v21 = vrot.slane %v8205_v19, 2 }
  0xc4   :  { %846 = vrot.lane.b32.xlu0 %v9007_v22, %s7836_s18  ;;  %v9027_v22 = vsel %vm979_vm4, %v985_v18, %v986_v40  ;;  %v993_v18 = vrot.slane %v8164_v6, 2 }
  0xc5   :  { %844 = vrot.lane.b32.xlu1 %v9003_v10, %s7836_s18  ;;  %14720 = vst [vmem:[#allocation110_spill] sm:$0xff] %v9027_v22  ;;  %v990_v10 = vrot.slane %v8150_v0, 2 }
  0xc6   :  { %v9053_v6 = vsel %vm979_vm4, %v991_v11, %v993_v18 }
  0xc7   :  { %v9042_v29 = vsel %vm979_vm4, %v990_v10, %v991_v11  ;;  %14723 = vst [vmem:[#allocation113_spill] sm:$0xff] %v9053_v6  ;;  %v745_v10 = vpop.permute.xlu1 %744  ;;  %v14728_v11 = vld [vmem:[#allocation18_spill] sm:$0xff] }
  0xc8   :  { %1140 = vrot.lane.b32.xlu0 %v8681_v38, %s7837_s16  ;;  %v9038_v38 = vsel %vm979_vm4, %v986_v40, %v988_v20  ;;  %14722 = vst [vmem:[#allocation112_spill] sm:$0xff] %v9042_v29  ;;  %v14725_v20 = vld [vmem:[#allocation5_spill] sm:$0xff]  ;;  %926 = vst.msk [vmem:[#allocation3 + $0x58] sm:$0xff] %vm914_vm5, %v745_v10  ;;  %v1003_v18 = vrot.slane %v14728_v11, 2 }
  0xc9   :  { %848 = vrot.lane.b32.xlu1 %v9016_v59, %s7836_s18  ;;  %14721 = vst [vmem:[#allocation111_spill] sm:$0xff] %v9038_v38  ;;  %v996_v59 = vrot.slane %v8166_v7, 2  ;;  %v1000_v54 = vrot.slane %v14725_v20, 2 }
  0xcb   :  { %v9057_v40 = vsel %vm979_vm4, %v995_v58, %v996_v59  ;;  %v9068_v19 = vsel %vm979_vm4, %v996_v59, %v998_v21 }
  0xcc   :  { %1144 = vrot.lane.b32.xlu0 %v9027_v22, %s7837_s16  ;;  %14724 = vst [vmem:[#allocation114_spill] sm:$0xff] %v9057_v40  ;;  %v14726_v22 = vld [vmem:[#allocation6_spill] sm:$0xff]  ;;  %14727 = vst [vmem:[#allocation5_spill] sm:$0xff] %v9068_v19  ;;  %v749_v58 = vpop.permute.xlu1 %748 }
  0xcd   :  { %1142 = vrot.lane.b32.xlu1 %v8684_v41, %s7837_s16  ;;  %v743_v41 = vpop.permute.xlu0 %742  ;;  %v1001_v52 = vrot.slane %v14726_v22, 2  ;;  %v1006_v22 = vrot.slane %v14731_v14, 2  ;;  %928 = vst.msk [vmem:[#allocation3 + $0x68] sm:$0xff] %vm914_vm5, %v749_v58  ;;  %v14736_v14 = vld [vmem:[#allocation12_spill] sm:$0xff] }
  0xce   :  { %925 = vst.msk [vmem:[#allocation3 + $0x50] sm:$0xff] %vm914_vm5, %v743_v41 }
  0xcf   :  { %v9072_v41 = vsel %vm979_vm4, %v1000_v54, %v1001_v52  ;;  %v9083_v59 = vsel %vm979_vm4, %v1001_v52, %v1003_v18 }
  0xd0   :  { %1148 = vrot.lane.b32.xlu0 %v9042_v29, %s7837_s16  ;;  %14729 = vst [vmem:[#allocation18_spill] sm:$0xff] %v9072_v41  ;;  %v14730_v29 = vld [vmem:[#allocation7_spill] sm:$0xff]  ;;  %14732 = vst [vmem:[#allocation115_spill] sm:$0xff] %v9083_v59 }
  0xd1   :  { %1146 = vrot.lane.b32.xlu1 %v9038_v38, %s7837_s16  ;;  %v747_v38 = vpop.permute.xlu0 %746  ;;  %v1005_v10 = vrot.slane %v14730_v29, 2  ;;  %v1011_v29 = vrot.slane %v14736_v14, 2  ;;  %v14741_v14 = vld [vmem:[#allocation14_spill] sm:$0xff] }
  0xd2   :  { %927 = vst.msk [vmem:[#allocation3 + $0x60] sm:$0xff] %vm914_vm5, %v747_v38  ;;  %v14733_v38 = vld [vmem:[#allocation26_spill] sm:$0xff] }
  0xd3   :  { %v1008_v21 = vrot.slane %v14733_v38, 2  ;;  %v9087_v11 = vsel %vm979_vm4, %v1005_v10, %v1006_v22 }
  0xd4   :  { %1152 = vrot.lane.b32.xlu0 %v9057_v40, %s7837_s16  ;;  %14734 = vst [vmem:[#allocation26_spill] sm:$0xff] %v9087_v11  ;;  %v14735_v40 = vld [vmem:[#allocation10_spill] sm:$0xff] }
  0xd5   :  { %1150 = vrot.lane.b32.xlu1 %v9053_v6, %s7837_s16  ;;  %v751_v6 = vpop.permute.xlu0 %750  ;;  %v1010_v58 = vrot.slane %v14735_v40, 2  ;;  %v9098_v52 = vsel %vm979_vm4, %v1006_v22, %v1008_v21  ;;  %v1016_v40 = vrot.slane %v14741_v14, 2  ;;  %v14746_v14 = vld [vmem:[#allocation16_spill] sm:$0xff] }
  0xd6   :  { %929 = vst.msk [vmem:[#allocation3 + $0x70] sm:$0xff] %vm914_vm5, %v751_v6  ;;  %14737 = vst [vmem:[#allocation116_spill] sm:$0xff] %v9098_v52  ;;  %v14738_v6 = vld [vmem:[#allocation30_spill] sm:$0xff] }
  0xd7   :  { %v753_v54 = vpop.permute.xlu1 %752  ;;  %v1013_v18 = vrot.slane %v14738_v6, 2  ;;  %v9102_v38 = vsel %vm979_vm4, %v1010_v58, %v1011_v29 }
  0xd8   :  { %1156 = vrot.lane.b32.xlu0 %v9072_v41, %s7837_s16  ;;  %930 = vst.msk [vmem:[#allocation3 + $0x78] sm:$0xff] %vm914_vm5, %v753_v54  ;;  %14739 = vst [vmem:[#allocation30_spill] sm:$0xff] %v9102_v38  ;;  %v14740_v41 = vld [vmem:[#allocation13_spill] sm:$0xff] }
  0xd9   :  { %1154 = vrot.lane.b32.xlu1 %v9068_v19, %s7837_s16  ;;  %v755_v19 = vpop.permute.xlu0 %754  ;;  %v1015_v54 = vrot.slane %v14740_v41, 2  ;;  %v9113_v22 = vsel %vm979_vm4, %v1011_v29, %v1013_v18  ;;  %v1021_v41 = vrot.slane %v14746_v14, 2  ;;  %v14751_v14 = vld [vmem:[#allocation20_spill] sm:$0xff] }
  0xda   :  { %931 = vst.msk [vmem:[#allocation3 + $0x80] sm:$0xff] %vm914_vm5, %v755_v19  ;;  %14742 = vst [vmem:[#allocation117_spill] sm:$0xff] %v9113_v22  ;;  %v14743_v19 = vld [vmem:[#allocation35_spill] sm:$0xff] }
  0xdb   :  { %v757_v10 = vpop.permute.xlu1 %756  ;;  %v1018_v21 = vrot.slane %v14743_v19, 2  ;;  %v9117_v6 = vsel %vm979_vm4, %v1015_v54, %v1016_v40 }
  0xdc   :  { %1160 = vrot.lane.b32.xlu0 %v9087_v11, %s7837_s16  ;;  %932 = vst.msk [vmem:[#allocation3 + $0x88] sm:$0xff] %vm914_vm5, %v757_v10  ;;  %14744 = vst [vmem:[#allocation35_spill] sm:$0xff] %v9117_v6  ;;  %v14745_v11 = vld [vmem:[#allocation15_spill] sm:$0xff] }
  0xdd   :  { %1158 = vrot.lane.b32.xlu1 %v9083_v59, %s7837_s16  ;;  %v759_v59 = vpop.permute.xlu0 %758  ;;  %v1020_v10 = vrot.slane %v14745_v11, 2  ;;  %v9128_v29 = vsel %vm979_vm4, %v1016_v40, %v1018_v21  ;;  %v1026_v11 = vrot.slane %v14751_v14, 2  ;;  %v14756_v14 = vld [vmem:[#allocation23_spill] sm:$0xff] }
  0xde   :  { %933 = vst.msk [vmem:[#allocation3 + $0x90] sm:$0xff] %vm914_vm5, %v759_v59  ;;  %14747 = vst [vmem:[#allocation118_spill] sm:$0xff] %v9128_v29  ;;  %v14748_v59 = vld [vmem:[#allocation39_spill] sm:$0xff] }
  0xdf   :  { %v761_v58 = vpop.permute.xlu1 %760  ;;  %v1023_v18 = vrot.slane %v14748_v59, 2  ;;  %v9132_v19 = vsel %vm979_vm4, %v1020_v10, %v1021_v41 }
  0xe0   :  { %1164 = vrot.lane.b32.xlu0 %v9102_v38, %s7837_s16  ;;  %934 = vst.msk [vmem:[#allocation3 + $0x98] sm:$0xff] %vm914_vm5, %v761_v58  ;;  %14749 = vst [vmem:[#allocation39_spill] sm:$0xff] %v9132_v19  ;;  %v14750_v38 = vld [vmem:[#allocation19_spill] sm:$0xff] }
  0xe1   :  { %1162 = vrot.lane.b32.xlu1 %v9098_v52, %s7837_s16  ;;  %v763_v52 = vpop.permute.xlu0 %762  ;;  %v1025_v58 = vrot.slane %v14750_v38, 2  ;;  %v9143_v40 = vsel %vm979_vm4, %v1021_v41, %v1023_v18  ;;  %v1031_v38 = vrot.slane %v14756_v14, 2  ;;  %v14761_v14 = vld [vmem:[#allocation25_spill] sm:$0xff] }
  0xe2   :  { %935 = vst.msk [vmem:[#allocation3 + $0xa0] sm:$0xff] %vm914_vm5, %v763_v52  ;;  %14752 = vst [vmem:[#allocation119_spill] sm:$0xff] %v9143_v40  ;;  %v14753_v52 = vld [vmem:[#allocation47_spill] sm:$0xff] }
  0xe3   :  { %v765_v54 = vpop.permute.xlu1 %764  ;;  %v1028_v21 = vrot.slane %v14753_v52, 2  ;;  %v9147_v59 = vsel %vm979_vm4, %v1025_v58, %v1026_v11 }
  0xe4   :  { %1168 = vrot.lane.b32.xlu0 %v9117_v6, %s7837_s16  ;;  %936 = vst.msk [vmem:[#allocation3 + $0xa8] sm:$0xff] %vm914_vm5, %v765_v54  ;;  %14754 = vst [vmem:[#allocation47_spill] sm:$0xff] %v9147_v59  ;;  %v14755_v6 = vld [vmem:[#allocation22_spill] sm:$0xff] }
  0xe5   :  { %1166 = vrot.lane.b32.xlu1 %v9113_v22, %s7837_s16  ;;  %v767_v22 = vpop.permute.xlu0 %766  ;;  %v1030_v54 = vrot.slane %v14755_v6, 2  ;;  %v9158_v41 = vsel %vm979_vm4, %v1026_v11, %v1028_v21  ;;  %v1036_v6 = vrot.slane %v14761_v14, 2  ;;  %v14766_v14 = vld [vmem:[#allocation28_spill] sm:$0xff] }
  0xe6   :  { %937 = vst.msk [vmem:[#allocation3 + $0xb0] sm:$0xff] %vm914_vm5, %v767_v22  ;;  %14757 = vst [vmem:[#allocation120_spill] sm:$0xff] %v9158_v41  ;;  %v14758_v22 = vld [vmem:[#allocation48_spill] sm:$0xff] }
  0xe7   :  { %v1033_v18 = vrot.slane %v14758_v22, 2  ;;  %v9162_v52 = vsel %vm979_vm4, %v1030_v54, %v1031_v38 }
  0xe8   :  { %1172 = vrot.lane.b32.xlu0 %v9132_v19, %s7837_s16  ;;  %14759 = vst [vmem:[#allocation48_spill] sm:$0xff] %v9162_v52  ;;  %v14760_v19 = vld [vmem:[#allocation24_spill] sm:$0xff] }
  0xe9   :  { %1170 = vrot.lane.b32.xlu1 %v9128_v29, %s7837_s16  ;;  %v771_v29 = vpop.permute.xlu0 %770  ;;  %v9173_v11 = vsel %vm979_vm4, %v1031_v38, %v1033_v18 }
  0xea   :  { %939 = vst.msk [vmem:[#allocation3 + $0xc0] sm:$0xff] %vm914_vm5, %v771_v29  ;;  %14762 = vst [vmem:[#allocation121_spill] sm:$0xff] %v9173_v11  ;;  %v14763_v29 = vld [vmem:[#allocation58_spill] sm:$0xff] }
  0xeb   :  { %v769_v10 = vpop.permute.xlu1 %768  ;;  %v1038_v21 = vrot.slane %v14763_v29, 2  ;;  %v1045_v29 = vrot.slane %v8293_v46, 2 }
  0xec   :  { %938 = vst.msk [vmem:[#allocation3 + $0xb8] sm:$0xff] %vm914_vm5, %v769_v10  ;;  %1176 = vrot.lane.b32.xlu0 %v9147_v59, %s7837_s16  ;;  %v1035_v10 = vrot.slane %v14760_v19, 2  ;;  %v14765_v59 = vld [vmem:[#allocation27_spill] sm:$0xff]  ;;  %v1041_v19 = vrot.slane %v14766_v14, 2 }
  0xed   :  { %1174 = vrot.lane.b32.xlu1 %v9143_v40, %s7837_s16  ;;  %v9188_v38 = vsel %vm979_vm4, %v1036_v6, %v1038_v21 }
  0xee   :  { %v775_v40 = vpop.permute.xlu0 %774  ;;  %v9177_v22 = vsel %vm979_vm4, %v1035_v10, %v1036_v6  ;;  %14767 = vst [vmem:[#allocation27_spill] sm:$0xff] %v9188_v38  ;;  %v1048_v6 = vrot.slane %v8676_v35, 2  ;;  %v131_v35 = vld [vmem:[%s13978_s0 + $0xf0] sm:$0xff] }
  0xef   :  { %v773_v58 = vpop.permute.xlu1 %772  ;;  %941 = vst.msk [vmem:[#allocation3 + $0xd0] sm:$0xff] %vm914_vm5, %v775_v40  ;;  %14764 = vst [vmem:[#allocation58_spill] sm:$0xff] %v9177_v22  ;;  %v1043_v40 = vrot.slane %v8650_v24, 2 }
  0xf0   :  { %940 = vst.msk [vmem:[#allocation3 + $0xc8] sm:$0xff] %vm914_vm5, %v773_v58  ;;  %1180 = vrot.lane.b32.xlu0 %v9162_v52, %s7837_s16  ;;  %v1040_v58 = vrot.slane %v14765_v59, 2 }
  0xf1   :  { %1178 = vrot.lane.b32.xlu1 %v9158_v41, %s7837_s16  ;;  %v9203_v24 = vsel %vm979_vm4, %v1041_v19, %v1043_v40  ;;  %v195_v40 = vmax.f32 %v131_v35, 0.0 }
  0xf2   :  { %v779_v41 = vpop.permute.xlu0 %778  ;;  %v9192_v10 = vsel %vm979_vm4, %v1040_v58, %v1041_v19  ;;  %14769 = vst [vmem:[#allocation122_spill] sm:$0xff] %v9203_v24  ;;  %v1050_v58 = vrot.slane %v8447_v44, 2 }
  0xf3   :  { %v777_v54 = vpop.permute.xlu1 %776  ;;  %943 = vst.msk [vmem:[#allocation3 + $0xe0] sm:$0xff] %vm914_vm5, %v779_v41  ;;  %14768 = vst [vmem:[#allocation28_spill] sm:$0xff] %v9192_v10 }
  0xf4   :  { %942 = vst.msk [vmem:[#allocation3 + $0xd8] sm:$0xff] %vm914_vm5, %v777_v54  ;;  %1184 = vrot.lane.b32.xlu0 %v9177_v22, %s7837_s16  ;;  %v1046_v54 = vrot.slane %v8430_v61, 2 }
  0xf5   :  { %1182 = vrot.lane.b32.xlu1 %v9173_v11, %s7837_s16  ;;  %259 = vst.msk [vmem:[#allocation2 + $0x181] sm:$0xff] %vm20_vm0, %v195_v40 }
  0xf6   :  { %v783_v11 = vpop.permute.xlu0 %782  ;;  %v9207_v21 = vsel %vm979_vm4, %v1045_v29, %v1046_v54  ;;  %v9221_v19 = vsel %vm979_vm4, %v1046_v54, %v1048_v6  ;;  %v132_v29 = vld [vmem:[%s13978_s0 + $0xf8] sm:$0xff]  ;;  %v14774_v6 = vld [vmem:[#allocation73_spill] sm:$0xff] }
  0xf7   :  { %v781_v18 = vpop.permute.xlu1 %780  ;;  %945 = vst.msk [vmem:[#allocation3 + $0xf0] sm:$0xff] %vm914_vm5, %v783_v11  ;;  %14770 = vst [vmem:[#allocation123_spill] sm:$0xff] %v9207_v21  ;;  %v1053_v11 = vrot.slane %v8699_v4, 2  ;;  %v196_v22 = vmax.f32 %v132_v29, 0.0 }
  0xf8   :  { %944 = vst.msk [vmem:[#allocation3 + $0xe8] sm:$0xff] %vm914_vm5, %v781_v18  ;;  %1188 = vrot.lane.b32.xlu0 %v9192_v10, %s7837_s16  ;;  %v1051_v18 = vrot.slane %v8449_v47, 2  ;;  %14771 = vst [vmem:[#allocation124_spill] sm:$0xff] %v9221_v19  ;;  %v1056_v10 = vrot.slane %v8471_v17, 2 }
  0xf9   :  { %1186 = vrot.lane.b32.xlu1 %v9188_v38, %s7837_s16  ;;  %260 = vst.msk [vmem:[#allocation2 + $0x189] sm:$0xff] %vm20_vm0, %v196_v22 }
  0xfa   :  { %v787_v38 = vpop.permute.xlu0 %786  ;;  %v9241_v4 = vsel %vm979_vm4, %v1051_v18, %v1053_v11  ;;  %v14777_v11 = vld [vmem:[#allocation42_spill] sm:$0xff] }
  0xfb   :  { %v785_v41 = vpop.permute.xlu1 %784  ;;  %947 = vst.msk [vmem:[#allocation3 + $0x100] sm:$0xff] %vm914_vm5, %v787_v38  ;;  %v9228_v38 = vsel %vm979_vm4, %v1050_v58, %v1051_v18  ;;  %14773 = vst [vmem:[#allocation126_spill] sm:$0xff] %v9241_v4  ;;  %v1058_v58 = vrot.slane %v14774_v6, 2  ;;  %v14778_v6 = vld [vmem:[#allocation79_spill] sm:$0xff] }
  0xfc   :  { %946 = vst.msk [vmem:[#allocation3 + $0xf8] sm:$0xff] %vm914_vm5, %v785_v41  ;;  %1192 = vrot.lane.b32.xlu0 %v9207_v21, %s7837_s16  ;;  %14772 = vst [vmem:[#allocation125_spill] sm:$0xff] %v9228_v38 }
  0xfd   :  { %1190 = vrot.lane.b32.xlu1 %v9203_v24, %s7837_s16  ;;  %v1055_v24 = vrot.slane %v8469_v13, 2  ;;  %v9254_v22 = vsel %vm979_vm4, %v1056_v10, %v1058_v58 }
  0xfe   :  { %v791_v54 = vpop.permute.xlu0 %790  ;;  %14776 = vst [vmem:[#allocation127_spill] sm:$0xff] %v9254_v22 }
  0xff   :  { %v789_v41 = vpop.permute.xlu1 %788  ;;  %949 = vst.msk [vmem:[#allocation3 + $0x110] sm:$0xff] %vm914_vm5, %v791_v54  ;;  %v9245_v29 = vsel %vm979_vm4, %v1055_v24, %v1056_v10  ;;  %v1066_v24 = vrot.slane %v8484_v60, 2 }
 0x100   :  { %948 = vst.msk [vmem:[#allocation3 + $0x108] sm:$0xff] %vm914_vm5, %v789_v41  ;;  %1196 = vrot.lane.b32.xlu0 %v9228_v38, %s7837_s16  ;;  %14775 = vst [vmem:[#allocation73_spill] sm:$0xff] %v9245_v29  ;;  %v1065_v41 = vrot.slane %v14777_v11, 2 }
 0x101   :  { %1194 = vrot.lane.b32.xlu1 %v9221_v19, %s7837_s16 }
 0x102   :  { %v795_v40 = vpop.permute.xlu0 %794  ;;  %v9266_v58 = vsel %vm979_vm4, %v1065_v41, %v1066_v24  ;;  %v1073_v41 = vrot.slane %v8791_v26, 2 }
 0x103   :  { %v793_v35 = vpop.permute.xlu1 %792  ;;  %951 = vst.msk [vmem:[#allocation3 + $0x120] sm:$0xff] %vm914_vm5, %v795_v40  ;;  %14779 = vst [vmem:[#allocation42_spill] sm:$0xff] %v9266_v58  ;;  %v14780_v40 = vld [vmem:[#allocation43_spill] sm:$0xff] }
 0x104   :  { %950 = vst.msk [vmem:[#allocation3 + $0x118] sm:$0xff] %vm914_vm5, %v793_v35  ;;  %1200 = vrot.lane.b32.xlu0 %v9245_v29, %s7837_s16  ;;  %v1068_v35 = vrot.slane %v14778_v6, 2  ;;  %v1070_v29 = vrot.slane %v14780_v40, 2 }
 0x105   :  { %1198 = vrot.lane.b32.xlu1 %v9241_v4, %s7837_s16  ;;  %v14781_v4 = vld [vmem:[#allocation45_spill] sm:$0xff] }
 0x106   :  { %v799_v54 = vpop.permute.xlu0 %798  ;;  %v1071_v38 = vrot.slane %v14781_v4, 2 }
 0x107   :  { %v797_v18 = vpop.permute.xlu1 %796  ;;  %953 = vst.msk [vmem:[#allocation3 + $0x130] sm:$0xff] %vm914_vm5, %v799_v54 }
 0x108   :  { %952 = vst.msk [vmem:[#allocation3 + $0x128] sm:$0xff] %vm914_vm5, %v797_v18  ;;  %1204 = vrot.lane.b32.xlu0 %v8818_v15, %s7837_s16  ;;  %v9277_v15 = vsel %vm979_vm4, %v1066_v24, %v1068_v35  ;;  %v9281_v6 = vsel %vm979_vm4, %v1070_v29, %v1071_v38  ;;  %v9292_v26 = vsel %vm979_vm4, %v1071_v38, %v1073_v41  ;;  %v1078_v29 = vrot.slane %v8805_v31, 2 }
 0x109   :  { %1202 = vrot.lane.b32.xlu1 %v9254_v22, %s7837_s16  ;;  %14782 = vst [vmem:[#allocation79_spill] sm:$0xff] %v9277_v15  ;;  %14783 = vst [vmem:[#allocation43_spill] sm:$0xff] %v9281_v6  ;;  %v1076_v22 = vrot.slane %v8515_v53, 2  ;;  %v1083_v38 = vrot.slane %v8828_v23, 2 }
 0x10a   :  { %v803_v18 = vpop.permute.xlu0 %802  ;;  %14784 = vst [vmem:[#allocation45_spill] sm:$0xff] %v9292_v26 }
 0x10b   :  { %v801_v10 = vpop.permute.xlu1 %800  ;;  %955 = vst.msk [vmem:[#allocation3 + $0x140] sm:$0xff] %vm914_vm5, %v803_v18  ;;  %v1080_v18 = vrot.slane %v8521_v51, 2  ;;  %v9307_v31 = vsel %vm979_vm4, %v1076_v22, %v1078_v29 }
 0x10c   :  { %954 = vst.msk [vmem:[#allocation3 + $0x138] sm:$0xff] %vm914_vm5, %v801_v10  ;;  %1208 = vrot.lane.b32.xlu0 %v9266_v58, %s7837_s16  ;;  %v1075_v10 = vrot.slane %v8513_v62, 2  ;;  %14786 = vst [vmem:[#allocation129_spill] sm:$0xff] %v9307_v31 }
 0x10d   :  { %1206 = vrot.lane.b32.xlu1 %v8821_v48, %s7837_s16 }
 0x10e   :  { %v807_v48 = vpop.permute.xlu0 %806  ;;  %v9296_v35 = vsel %vm979_vm4, %v1075_v10, %v1076_v22  ;;  %v1088_v22 = vrot.slane %v8843_v42, 2 }
 0x10f   :  { %v805_v54 = vpop.permute.xlu1 %804  ;;  %957 = vst.msk [vmem:[#allocation3 + $0x150] sm:$0xff] %vm914_vm5, %v807_v48  ;;  %14785 = vst [vmem:[#allocation128_spill] sm:$0xff] %v9296_v35  ;;  %v1085_v48 = vrot.slane %v8533_v43, 2 }
 0x110   :  { %956 = vst.msk [vmem:[#allocation3 + $0x148] sm:$0xff] %vm914_vm5, %v805_v54  ;;  %1212 = vrot.lane.b32.xlu0 %v9281_v6, %s7837_s16  ;;  %v1081_v54 = vrot.slane %v8523_v5, 2 }
 0x111   :  { %1210 = vrot.lane.b32.xlu1 %v9277_v15, %s7837_s16 }
 0x112   :  { %v811_v15 = vpop.permute.xlu0 %810  ;;  %v9311_v10 = vsel %vm979_vm4, %v1080_v18, %v1081_v54  ;;  %v9322_v23 = vsel %vm979_vm4, %v1081_v54, %v1083_v38  ;;  %v1090_v18 = vrot.slane %v8547_v16, 2 }
 0x113   :  { %v809_v24 = vpop.permute.xlu1 %808  ;;  %959 = vst.msk [vmem:[#allocation3 + $0x160] sm:$0xff] %vm914_vm5, %v811_v15  ;;  %14787 = vst [vmem:[#allocation130_spill] sm:$0xff] %v9311_v10 }
 0x114   :  { %958 = vst.msk [vmem:[#allocation3 + $0x158] sm:$0xff] %vm914_vm5, %v809_v24  ;;  %1216 = vrot.lane.b32.xlu0 %v9296_v35, %s7837_s16  ;;  %v1086_v24 = vrot.slane %v8535_v30, 2  ;;  %14788 = vst [vmem:[#allocation131_spill] sm:$0xff] %v9322_v23 }
 0x115   :  { %1214 = vrot.lane.b32.xlu1 %v9292_v26, %s7837_s16 }
 0x116   :  { %v815_v26 = vpop.permute.xlu0 %814  ;;  %v9326_v29 = vsel %vm979_vm4, %v1085_v48, %v1086_v24  ;;  %v9337_v42 = vsel %vm979_vm4, %v1086_v24, %v1088_v22  ;;  %v1095_v48 = vrot.slane %v8551_v8, 2 }
 0x117   :  { %v813_v41 = vpop.permute.xlu1 %812  ;;  %961 = vst.msk [vmem:[#allocation3 + $0x170] sm:$0xff] %vm914_vm5, %v815_v26  ;;  %14789 = vst [vmem:[#allocation132_spill] sm:$0xff] %v9326_v29  ;;  %v1093_v26 = vrot.slane %v8858_v45, 2 }
 0x118   :  { %960 = vst.msk [vmem:[#allocation3 + $0x168] sm:$0xff] %vm914_vm5, %v813_v41  ;;  %1220 = vrot.lane.b32.xlu0 %v9311_v10, %s7837_s16  ;;  %v14790_v41 = vld [vmem:[#allocation50_spill] sm:$0xff] }
 0x119   :  { %1218 = vrot.lane.b32.xlu1 %v9307_v31, %s7837_s16  ;;  %v1091_v35 = vrot.slane %v14790_v41, 2  ;;  %14791 = vst [vmem:[#allocation50_spill] sm:$0xff] %v9337_v42 }
 0x11a   :  { %v819_v31 = vpop.permute.xlu0 %818 }
 0x11b   :  { %v817_v15 = vpop.permute.xlu1 %816  ;;  %963 = vst.msk [vmem:[#allocation3 + $0x180] sm:$0xff] %vm914_vm5, %v819_v31  ;;  %v9341_v38 = vsel %vm979_vm4, %v1090_v18, %v1091_v35  ;;  %v9352_v45 = vsel %vm979_vm4, %v1091_v35, %v1093_v26  ;;  %v1098_v31 = vrot.slane %v8873_v12, 2  ;;  %v1100_v18 = vrot.slane %v8568_v37, 2 }
 0x11c   :  { %962 = vst.msk [vmem:[#allocation3 + $0x178] sm:$0xff] %vm914_vm5, %v817_v15  ;;  %1224 = vrot.lane.b32.xlu0 %v9326_v29, %s7837_s16  ;;  %14792 = vst [vmem:[#allocation133_spill] sm:$0xff] %v9341_v38  ;;  %v14793_v15 = vld [vmem:[#allocation52_spill] sm:$0xff]  ;;  %v1103_v35 = vrot.slane %v8888_v55, 2 }
 0x11d   :  { %1222 = vrot.lane.b32.xlu1 %v9322_v23, %s7837_s16  ;;  %v1096_v10 = vrot.slane %v14793_v15, 2  ;;  %14794 = vst [vmem:[#allocation52_spill] sm:$0xff] %v9352_v45 }
 0x11e   :  { %v823_v23 = vpop.permute.xlu0 %822 }
 0x11f   :  { %v821_v54 = vpop.permute.xlu1 %820  ;;  %965 = vst.msk [vmem:[#allocation3 + $0x190] sm:$0xff] %vm914_vm5, %v823_v23  ;;  %v9356_v22 = vsel %vm979_vm4, %v1095_v48, %v1096_v10  ;;  %v9367_v12 = vsel %vm979_vm4, %v1096_v10, %v1098_v31  ;;  %v1105_v48 = vrot.slane %v8579_v33, 2  ;;  %v1108_v10 = vrot.slane %v8903_v32, 2 }
 0x120   :  { %964 = vst.msk [vmem:[#allocation3 + $0x188] sm:$0xff] %vm914_vm5, %v821_v54  ;;  %1228 = vrot.lane.b32.xlu0 %v9341_v38, %s7837_s16  ;;  %14795 = vst [vmem:[#allocation134_spill] sm:$0xff] %v9356_v22  ;;  %v14796_v54 = vld [vmem:[#allocation53_spill] sm:$0xff] }
 0x121   :  { %1226 = vrot.lane.b32.xlu1 %v9337_v42, %s7837_s16  ;;  %v1101_v29 = vrot.slane %v14796_v54, 2  ;;  %14797 = vst [vmem:[#allocation53_spill] sm:$0xff] %v9367_v12 }
 0x122   :  { %v827_v42 = vpop.permute.xlu0 %826 }
 0x123   :  { %v825_v24 = vpop.permute.xlu1 %824  ;;  %967 = vst.msk [vmem:[#allocation3 + $0x1a0] sm:$0xff] %vm914_vm5, %v827_v42  ;;  %v9371_v26 = vsel %vm979_vm4, %v1100_v18, %v1101_v29  ;;  %v9382_v55 = vsel %vm979_vm4, %v1101_v29, %v1103_v35  ;;  %v1110_v18 = vrot.slane %v8592_v25, 2  ;;  %v1113_v29 = vrot.slane %v8918_v28, 2 }
 0x124   :  { %966 = vst.msk [vmem:[#allocation3 + $0x198] sm:$0xff] %vm914_vm5, %v825_v24  ;;  %1232 = vrot.lane.b32.xlu0 %v9356_v22, %s7837_s16  ;;  %14798 = vst [vmem:[#allocation135_spill] sm:$0xff] %v9371_v26  ;;  %v14799_v24 = vld [vmem:[#allocation54_spill] sm:$0xff] }
 0x125   :  { %1230 = vrot.lane.b32.xlu1 %v9352_v45, %s7837_s16  ;;  %v1106_v38 = vrot.slane %v14799_v24, 2  ;;  %14800 = vst [vmem:[#allocation54_spill] sm:$0xff] %v9382_v55 }
 0x126   :  { %v831_v45 = vpop.permute.xlu0 %830 }
 0x127   :  { %v829_v23 = vpop.permute.xlu1 %828  ;;  %969 = vst.msk [vmem:[#allocation3 + $0x1b0] sm:$0xff] %vm914_vm5, %v831_v45  ;;  %v9386_v31 = vsel %vm979_vm4, %v1105_v48, %v1106_v38  ;;  %v9397_v32 = vsel %vm979_vm4, %v1106_v38, %v1108_v10  ;;  %v1115_v48 = vrot.slane %v8701_v63, 2  ;;  %v1118_v38 = vrot.slane %v8933_v49, 2 }
 0x128   :  { %968 = vst.msk [vmem:[#allocation3 + $0x1a8] sm:$0xff] %vm914_vm5, %v829_v23  ;;  %1236 = vrot.lane.b32.xlu0 %v9371_v26, %s7837_s16  ;;  %14801 = vst [vmem:[#allocation136_spill] sm:$0xff] %v9386_v31  ;;  %v14802_v23 = vld [vmem:[#allocation56_spill] sm:$0xff] }
 0x129   :  { %1234 = vrot.lane.b32.xlu1 %v9367_v12, %s7837_s16  ;;  %v1111_v22 = vrot.slane %v14802_v23, 2  ;;  %14803 = vst [vmem:[#allocation56_spill] sm:$0xff] %v9397_v32 }
 0x12a   :  { %v835_v12 = vpop.permute.xlu0 %834 }
 0x12b   :  { %v833_v42 = vpop.permute.xlu1 %832  ;;  %971 = vst.msk [vmem:[#allocation3 + $0x1c0] sm:$0xff] %vm914_vm5, %v835_v12  ;;  %v9401_v35 = vsel %vm979_vm4, %v1110_v18, %v1111_v22  ;;  %v9412_v28 = vsel %vm979_vm4, %v1111_v22, %v1113_v29  ;;  %v1120_v18 = vrot.slane %v8709_v27, 2  ;;  %v1123_v22 = vrot.slane %v8948_v50, 2 }
 0x12c   :  { %970 = vst.msk [vmem:[#allocation3 + $0x1b8] sm:$0xff] %vm914_vm5, %v833_v42  ;;  %1240 = vrot.lane.b32.xlu0 %v9386_v31, %s7837_s16  ;;  %14804 = vst [vmem:[#allocation137_spill] sm:$0xff] %v9401_v35  ;;  %v14805_v42 = vld [vmem:[#allocation65_spill] sm:$0xff] }
 0x12d   :  { %1238 = vrot.lane.b32.xlu1 %v9382_v55, %s7837_s16  ;;  %v1116_v26 = vrot.slane %v14805_v42, 2  ;;  %14806 = vst [vmem:[#allocation65_spill] sm:$0xff] %v9412_v28 }
 0x12e   :  { %v839_v55 = vpop.permute.xlu0 %838 }
 0x12f   :  { %v837_v45 = vpop.permute.xlu1 %836  ;;  %973 = vst.msk [vmem:[#allocation3 + $0x1d0] sm:$0xff] %vm914_vm5, %v839_v55  ;;  %v9416_v10 = vsel %vm979_vm4, %v1115_v48, %v1116_v26  ;;  %v9427_v49 = vsel %vm979_vm4, %v1116_v26, %v1118_v38  ;;  %v14811_v48 = vld [vmem:[#allocation67_spill] sm:$0xff]  ;;  %v1128_v26 = vrot.slane %v8963_v34, 2  ;;  %v163_v34 = vld [vmem:[%s13978_s0 + $0x1f0] sm:$0xff] }
 0x130   :  { %972 = vst.msk [vmem:[#allocation3 + $0x1c8] sm:$0xff] %vm914_vm5, %v837_v45  ;;  %1244 = vrot.lane.b32.xlu0 %v9401_v35, %s7837_s16  ;;  %14807 = vst [vmem:[#allocation138_spill] sm:$0xff] %v9416_v10  ;;  %v14808_v45 = vld [vmem:[#allocation66_spill] sm:$0xff]  ;;  %v14812_v35 = vld [vmem:[#allocation68_spill] sm:$0xff] }
 0x131   :  { %1242 = vrot.lane.b32.xlu1 %v9397_v32, %s7837_s16  ;;  %v1121_v31 = vrot.slane %v14808_v45, 2  ;;  %14809 = vst [vmem:[#allocation139_spill] sm:$0xff] %v9427_v49  ;;  %v1126_v6 = vrot.slane %v14812_v35, 2 }
 0x132   :  { %v843_v32 = vpop.permute.xlu0 %842 }
 0x133   :  { %v841_v12 = vpop.permute.xlu1 %840  ;;  %975 = vst.msk [vmem:[#allocation3 + $0x1e0] sm:$0xff] %vm914_vm5, %v843_v32  ;;  %v9431_v29 = vsel %vm979_vm4, %v1120_v18, %v1121_v31  ;;  %v9442_v50 = vsel %vm979_vm4, %v1121_v31, %v1123_v22  ;;  %v14815_v18 = vld [vmem:[#allocation70_spill] sm:$0xff]  ;;  %v9460_v31 = vsel %vm979_vm4, %v1126_v6, %v1128_v26  ;;  %v1133_v22 = vrot.slane %v8978_v3, 2 }
 0x134   :  { %974 = vst.msk [vmem:[#allocation3 + $0x1d8] sm:$0xff] %vm914_vm5, %v841_v12  ;;  %1248 = vrot.lane.b32.xlu0 %v9416_v10, %s7837_s16  ;;  %14810 = vst [vmem:[#allocation140_spill] sm:$0xff] %v9431_v29  ;;  %v1125_v12 = vrot.slane %v14811_v48, 2  ;;  %v14816_v10 = vld [vmem:[#allocation71_spill] sm:$0xff]  ;;  %v1138_v26 = vrot.slane %v8994_v36, 2 }
 0x135   :  { %1246 = vrot.lane.b32.xlu1 %v9412_v28, %s7837_s16  ;;  %14813 = vst [vmem:[#allocation141_spill] sm:$0xff] %v9442_v50  ;;  %v1131_v58 = vrot.slane %v14816_v10, 2 }
 0x136   :  { %v847_v28 = vpop.permute.xlu0 %846  ;;  %v9446_v38 = vsel %vm979_vm4, %v1125_v12, %v1126_v6  ;;  %v227_v12 = vmax.f32 %v163_v34, 0.0 }
 0x137   :  { %v845_v55 = vpop.permute.xlu1 %844  ;;  %977 = vst.msk [vmem:[#allocation3 + $0x1f0] sm:$0xff] %vm914_vm5, %v847_v28  ;;  %14814 = vst [vmem:[#allocation142_spill] sm:$0xff] %v9446_v38  ;;  %v9480_v3 = vsel %vm979_vm4, %v1131_v58, %v1133_v22 }
 0x138   :  { %976 = vst.msk [vmem:[#allocation3 + $0x1e8] sm:$0xff] %vm914_vm5, %v845_v55  ;;  %1252 = vrot.lane.b32.xlu0 %v9431_v29, %s7837_s16  ;;  %v1130_v55 = vrot.slane %v14815_v18, 2  ;;  %v1135_v29 = vrot.slane %v8748_v9, 2 }
 0x139   :  { %1250 = vrot.lane.b32.xlu1 %v9427_v49, %s7837_s16  ;;  %v1136_v49 = vrot.slane %v8750_v39, 2  ;;  %291 = vst.msk [vmem:[#allocation2 + $0x331] sm:$0xff] %vm20_vm0, %v227_v12 }
 0x13a   :  { %v1141_v28 = vpop.permute.xlu0 %1140 }
 0x13b   :  { %v849_v32 = vpop.permute.xlu1 %848  ;;  %1333 = vst.msk [vmem:[#allocation3] sm:$0xff] %vm1332_vm6, %v1141_v28  ;;  %v9467_v28 = vsel %vm979_vm4, %v1130_v55, %v1131_v58 }
 0x13c   :  { %978 = vst.msk [vmem:[#allocation3 + $0x1f8] sm:$0xff] %vm914_vm5, %v849_v32  ;;  %1256 = vrot.lane.b32.xlu0 %v9446_v38, %s7837_s16  ;;  %v164_v32 = vld [vmem:[%s13978_s0 + $0x1f8] sm:$0xff]  ;;  %14817 = vst [vmem:[#allocation143_spill] sm:$0xff] %v9467_v28 }
 0x13d   :  { %1254 = vrot.lane.b32.xlu1 %v9442_v50, %s7837_s16  ;;  %v228_v19 = vmax.f32 %v164_v32, 0.0 }
 0x13e   :  { %v1145_v6 = vpop.permute.xlu0 %1144 }
 0x13f   :  { %v1143_v50 = vpop.permute.xlu1 %1142  ;;  %1335 = vst.msk [vmem:[#allocation3 + $0x10] sm:$0xff] %vm1332_vm6, %v1145_v6 }
 0x140   :  { %1334 = vst.msk [vmem:[#allocation3 + $0x8] sm:$0xff] %vm1332_vm6, %v1143_v50  ;;  %1260 = vrot.lane.b32.xlu0 %v9467_v28, %s7837_s16  ;;  %v9484_v50 = vsel %vm979_vm4, %v1135_v29, %v1136_v49 }
 0x141   :  { %1258 = vrot.lane.b32.xlu1 %v9460_v31, %s7837_s16  ;;  %292 = vst.msk [vmem:[#allocation2 + $0x339] sm:$0xff] %vm20_vm0, %v228_v19  ;;  %v9493_v19 = vsel %vm979_vm4, %v1136_v49, %v1138_v26  ;;  %v14818_v26 = vld [vmem:[#allocation6_spill] sm:$0xff] }
 0x142   :  { %v1149_v34 = vpop.permute.xlu0 %1148 }
 0x143   :  { %v1147_v55 = vpop.permute.xlu1 %1146  ;;  %1337 = vst.msk [vmem:[#allocation3 + $0x20] sm:$0xff] %vm1332_vm6, %v1149_v34 }
 0x144   :  { %1336 = vst.msk [vmem:[#allocation3 + $0x18] sm:$0xff] %vm1332_vm6, %v1147_v55  ;;  %1264 = vrot.lane.b32.xlu0 %v9484_v50, %s7837_s16  ;;  %v14819_v55 = vld [vmem:[#allocation7_spill] sm:$0xff] }
 0x145   :  { %1262 = vrot.lane.b32.xlu1 %v9480_v3, %s7837_s16 }
 0x146   :  { %v1153_v36 = vpop.permute.xlu0 %1152 }
 0x147   :  { %v1151_v58 = vpop.permute.xlu1 %1150  ;;  %1339 = vst.msk [vmem:[#allocation3 + $0x30] sm:$0xff] %vm1332_vm6, %v1153_v36  ;;  %v14820_v36 = vld [vmem:[#allocation9_spill] sm:$0xff] }
 0x148   :  { %1338 = vst.msk [vmem:[#allocation3 + $0x28] sm:$0xff] %vm1332_vm6, %v1151_v58  ;;  %1401 = vrot.lane.b32.xlu0 %v8138_v56, %s7838_s26 }
 0x149   :  { %1266 = vrot.lane.b32.xlu1 %v9493_v19, %s7837_s16 }
 0x14a   :  { %v1157_v22 = vpop.permute.xlu0 %1156 }
 0x14b   :  { %v1155_v29 = vpop.permute.xlu1 %1154  ;;  %1341 = vst.msk [vmem:[#allocation3 + $0x40] sm:$0xff] %vm1332_vm6, %v1157_v22 }
 0x14c   :  { %1340 = vst.msk [vmem:[#allocation3 + $0x38] sm:$0xff] %vm1332_vm6, %v1155_v29  ;;  %1405 = vrot.lane.b32.xlu0 %v8150_v0, %s7838_s26  ;;  %v14821_v29 = vld [vmem:[#allocation10_spill] sm:$0xff] }
 0x14d   :  { %1403 = vrot.lane.b32.xlu1 %v8140_v57, %s7838_s26 }
 0x14e   :  { %v1161_v12 = vpop.permute.xlu0 %1160 }
 0x14f   :  { %v1159_v49 = vpop.permute.xlu1 %1158  ;;  %1343 = vst.msk [vmem:[#allocation3 + $0x50] sm:$0xff] %vm1332_vm6, %v1161_v12  ;;  %v14822_v12 = vld [vmem:[#allocation12_spill] sm:$0xff] }
 0x150   :  { %1342 = vst.msk [vmem:[#allocation3 + $0x48] sm:$0xff] %vm1332_vm6, %v1159_v49  ;;  %1409 = vrot.lane.b32.xlu0 %v8154_v2, %s7838_s26 }
 0x151   :  { %1407 = vrot.lane.b32.xlu1 %v8152_v1, %s7838_s26 }
 0x152   :  { %v1165_v57 = vpop.permute.xlu0 %1164 }
 0x153   :  { %v1163_v56 = vpop.permute.xlu1 %1162  ;;  %1345 = vst.msk [vmem:[#allocation3 + $0x60] sm:$0xff] %vm1332_vm6, %v1165_v57 }
 0x154   :  { %1344 = vst.msk [vmem:[#allocation3 + $0x58] sm:$0xff] %vm1332_vm6, %v1163_v56  ;;  %1413 = vrot.lane.b32.xlu0 %v14725_v20, %s7838_s26  ;;  %v14823_v56 = vld [vmem:[#allocation13_spill] sm:$0xff] }
 0x155   :  { %1411 = vrot.lane.b32.xlu1 %v8166_v7, %s7838_s26 }
 0x156   :  { %v1169_v6 = vpop.permute.xlu0 %1168 }
 0x157   :  { %v1167_v32 = vpop.permute.xlu1 %1166  ;;  %1347 = vst.msk [vmem:[#allocation3 + $0x70] sm:$0xff] %vm1332_vm6, %v1169_v6  ;;  %v14824_v6 = vld [vmem:[#allocation14_spill] sm:$0xff] }
 0x158   :  { %1346 = vst.msk [vmem:[#allocation3 + $0x68] sm:$0xff] %vm1332_vm6, %v1167_v32  ;;  %1417 = vrot.lane.b32.xlu0 %v14819_v55, %s7838_s26 }
 0x159   :  { %1415 = vrot.lane.b32.xlu1 %v14818_v26, %s7838_s26 }
 0x15a   :  { %v1173_v58 = vpop.permute.xlu0 %1172 }
 0x15b   :  { %v1171_v34 = vpop.permute.xlu1 %1170  ;;  %1349 = vst.msk [vmem:[#allocation3 + $0x80] sm:$0xff] %vm1332_vm6, %v1173_v58 }
 0x15c   :  { %1348 = vst.msk [vmem:[#allocation3 + $0x78] sm:$0xff] %vm1332_vm6, %v1171_v34  ;;  %1421 = vrot.lane.b32.xlu0 %v14821_v29, %s7838_s26  ;;  %v14825_v34 = vld [vmem:[#allocation15_spill] sm:$0xff] }
 0x15d   :  { %1419 = vrot.lane.b32.xlu1 %v14820_v36, %s7838_s26 }
 0x15e   :  { %v1177_v49 = vpop.permute.xlu0 %1176 }
 0x15f   :  { %v1175_v22 = vpop.permute.xlu1 %1174  ;;  %1351 = vst.msk [vmem:[#allocation3 + $0x90] sm:$0xff] %vm1332_vm6, %v1177_v49  ;;  %v14826_v49 = vld [vmem:[#allocation16_spill] sm:$0xff] }
 0x160   :  { %1350 = vst.msk [vmem:[#allocation3 + $0x88] sm:$0xff] %vm1332_vm6, %v1175_v22  ;;  %1425 = vrot.lane.b32.xlu0 %v14823_v56, %s7838_s26 }
 0x161   :  { %1423 = vrot.lane.b32.xlu1 %v14822_v12, %s7838_s26 }
 0x162   :  { %v1181_v32 = vpop.permute.xlu0 %1180 }
 0x163   :  { %v1179_v57 = vpop.permute.xlu1 %1178  ;;  %1353 = vst.msk [vmem:[#allocation3 + $0xa0] sm:$0xff] %vm1332_vm6, %v1181_v32  ;;  %v14828_v32 = vld [vmem:[#allocation20_spill] sm:$0xff] }
 0x164   :  { %1352 = vst.msk [vmem:[#allocation3 + $0x98] sm:$0xff] %vm1332_vm6, %v1179_v57  ;;  %1429 = vrot.lane.b32.xlu0 %v14825_v34, %s7838_s26  ;;  %v14827_v57 = vld [vmem:[#allocation19_spill] sm:$0xff] }
 0x165   :  { %1427 = vrot.lane.b32.xlu1 %v14824_v6, %s7838_s26 }
 0x166   :  { %v1185_v22 = vpop.permute.xlu0 %1184 }
 0x167   :  { %v1183_v58 = vpop.permute.xlu1 %1182  ;;  %1355 = vst.msk [vmem:[#allocation3 + $0xb0] sm:$0xff] %vm1332_vm6, %v1185_v22  ;;  %v14830_v22 = vld [vmem:[#allocation23_spill] sm:$0xff] }
 0x168   :  { %1354 = vst.msk [vmem:[#allocation3 + $0xa8] sm:$0xff] %vm1332_vm6, %v1183_v58  ;;  %1433 = vrot.lane.b32.xlu0 %v14827_v57, %s7838_s26  ;;  %v14829_v58 = vld [vmem:[#allocation22_spill] sm:$0xff] }
 0x169   :  { %1431 = vrot.lane.b32.xlu1 %v14826_v49, %s7838_s26 }
 0x16a   :  { %v1189_v6 = vpop.permute.xlu0 %1188 }
 0x16b   :  { %v1187_v56 = vpop.permute.xlu1 %1186  ;;  %1357 = vst.msk [vmem:[#allocation3 + $0xc0] sm:$0xff] %vm1332_vm6, %v1189_v6  ;;  %v14832_v6 = vld [vmem:[#allocation25_spill] sm:$0xff] }
 0x16c   :  { %1356 = vst.msk [vmem:[#allocation3 + $0xb8] sm:$0xff] %vm1332_vm6, %v1187_v56  ;;  %1437 = vrot.lane.b32.xlu0 %v14829_v58, %s7838_s26  ;;  %v14831_v56 = vld [vmem:[#allocation24_spill] sm:$0xff] }
 0x16d   :  { %1435 = vrot.lane.b32.xlu1 %v14828_v32, %s7838_s26 }
 0x16e   :  { %v1193_v49 = vpop.permute.xlu0 %1192 }
 0x16f   :  { %v1191_v34 = vpop.permute.xlu1 %1190  ;;  %1359 = vst.msk [vmem:[#allocation3 + $0xd0] sm:$0xff] %vm1332_vm6, %v1193_v49 }
 0x170   :  { %1358 = vst.msk [vmem:[#allocation3 + $0xc8] sm:$0xff] %vm1332_vm6, %v1191_v34  ;;  %1441 = vrot.lane.b32.xlu0 %v14831_v56, %s7838_s26 }
 0x171   :  { %1439 = vrot.lane.b32.xlu1 %v14830_v22, %s7838_s26 }
 0x172   :  { %v1197_v32 = vpop.permute.xlu0 %1196 }
 0x173   :  { %v1195_v57 = vpop.permute.xlu1 %1194  ;;  %1361 = vst.msk [vmem:[#allocation3 + $0xe0] sm:$0xff] %vm1332_vm6, %v1197_v32 }
 0x174   :  { %1360 = vst.msk [vmem:[#allocation3 + $0xd8] sm:$0xff] %vm1332_vm6, %v1195_v57  ;;  %1445 = vrot.lane.b32.xlu0 %v14765_v59, %s7838_s26 }
 0x175   :  { %1443 = vrot.lane.b32.xlu1 %v14832_v6, %s7838_s26 }
 0x176   :  { %v1201_v22 = vpop.permute.xlu0 %1200 }
 0x177   :  { %v1199_v34 = vpop.permute.xlu1 %1198  ;;  %1363 = vst.msk [vmem:[#allocation3 + $0xf0] sm:$0xff] %vm1332_vm6, %v1201_v22 }
 0x178   :  { %1362 = vst.msk [vmem:[#allocation3 + $0xe8] sm:$0xff] %vm1332_vm6, %v1199_v34  ;;  %1449 = vrot.lane.b32.xlu0 %v8293_v46, %s7838_s26 }
 0x179   :  { %1447 = vrot.lane.b32.xlu1 %v14766_v14, %s7838_s26 }
 0x17a   :  { %v1205_v57 = vpop.permute.xlu0 %1204 }
 0x17b   :  { %v1203_v49 = vpop.permute.xlu1 %1202  ;;  %1365 = vst.msk [vmem:[#allocation3 + $0x100] sm:$0xff] %vm1332_vm6, %v1205_v57 }
 0x17c   :  { %1364 = vst.msk [vmem:[#allocation3 + $0xf8] sm:$0xff] %vm1332_vm6, %v1203_v49  ;;  %1453 = vrot.lane.b32.xlu0 %v8447_v44, %s7838_s26  ;;  %v9585_v49 = vld [vmem:[#allocation2 + $0x180] sm:$0xff] }
 0x17d   :  { %1451 = vrot.lane.b32.xlu1 %v8430_v61, %s7838_s26 }
 0x17e   :  { %v1209_v34 = vpop.permute.xlu0 %1208 }
 0x17f   :  { %v1207_v32 = vpop.permute.xlu1 %1206  ;;  %1367 = vst.msk [vmem:[#allocation3 + $0x110] sm:$0xff] %vm1332_vm6, %v1209_v34 }
 0x180   :  { %1366 = vst.msk [vmem:[#allocation3 + $0x108] sm:$0xff] %vm1332_vm6, %v1207_v32  ;;  %1457 = vrot.lane.b32.xlu0 %v8469_v13, %s7838_s26  ;;  %v9593_v32 = vld [vmem:[#allocation2 + $0x188] sm:$0xff] }
 0x181   :  { %1455 = vrot.lane.b32.xlu1 %v8449_v47, %s7838_s26 }
 0x182   :  { %v1213_v57 = vpop.permute.xlu0 %1212 }
 0x183   :  { %v1211_v22 = vpop.permute.xlu1 %1210  ;;  %1369 = vst.msk [vmem:[#allocation3 + $0x120] sm:$0xff] %vm1332_vm6, %v1213_v57 }
 0x184   :  { %1368 = vst.msk [vmem:[#allocation3 + $0x118] sm:$0xff] %vm1332_vm6, %v1211_v22  ;;  %1461 = vrot.lane.b32.xlu0 %v9585_v49, %s7838_s26 }
 0x185   :  { %1459 = vrot.lane.b32.xlu1 %v8471_v17, %s7838_s26 }
 0x186   :  { %v1217_v13 = vpop.permute.xlu0 %1216 }
 0x187   :  { %v1215_v34 = vpop.permute.xlu1 %1214  ;;  %1371 = vst.msk [vmem:[#allocation3 + $0x130] sm:$0xff] %vm1332_vm6, %v1217_v13 }
 0x188   :  { %1370 = vst.msk [vmem:[#allocation3 + $0x128] sm:$0xff] %vm1332_vm6, %v1215_v34  ;;  %1465 = vrot.lane.b32.xlu0 %v14777_v11, %s7838_s26 }
 0x189   :  { %1463 = vrot.lane.b32.xlu1 %v9593_v32, %s7838_s26 }
 0x18a   :  { %v1221_v57 = vpop.permute.xlu0 %1220 }
 0x18b   :  { %v1219_v22 = vpop.permute.xlu1 %1218  ;;  %1373 = vst.msk [vmem:[#allocation3 + $0x140] sm:$0xff] %vm1332_vm6, %v1221_v57 }
 0x18c   :  { %1372 = vst.msk [vmem:[#allocation3 + $0x138] sm:$0xff] %vm1332_vm6, %v1219_v22  ;;  %1469 = vrot.lane.b32.xlu0 %v14780_v40, %s7838_s26 }
 0x18d   :  { %1467 = vrot.lane.b32.xlu1 %v8484_v60, %s7838_s26 }
 0x18e   :  { %v1225_v17 = vpop.permute.xlu0 %1224 }
 0x18f   :  { %v1223_v34 = vpop.permute.xlu1 %1222  ;;  %1375 = vst.msk [vmem:[#allocation3 + $0x150] sm:$0xff] %vm1332_vm6, %v1225_v17 }
 0x190   :  { %1374 = vst.msk [vmem:[#allocation3 + $0x148] sm:$0xff] %vm1332_vm6, %v1223_v34  ;;  %1473 = vrot.lane.b32.xlu0 %v8513_v62, %s7838_s26 }
 0x191   :  { %1471 = vrot.lane.b32.xlu1 %v14781_v4, %s7838_s26 }
 0x192   :  { %v1229_v60 = vpop.permute.xlu0 %1228 }
 0x193   :  { %v1227_v13 = vpop.permute.xlu1 %1226  ;;  %1377 = vst.msk [vmem:[#allocation3 + $0x160] sm:$0xff] %vm1332_vm6, %v1229_v60 }
 0x194   :  { %1376 = vst.msk [vmem:[#allocation3 + $0x158] sm:$0xff] %vm1332_vm6, %v1227_v13  ;;  %1477 = vrot.lane.b32.xlu0 %v8521_v51, %s7838_s26 }
 0x195   :  { %1475 = vrot.lane.b32.xlu1 %v8515_v53, %s7838_s26 }
 0x196   :  { %v1233_v22 = vpop.permute.xlu0 %1232 }
 0x197   :  { %v1231_v11 = vpop.permute.xlu1 %1230  ;;  %1379 = vst.msk [vmem:[#allocation3 + $0x170] sm:$0xff] %vm1332_vm6, %v1233_v22 }
 0x198   :  { %1378 = vst.msk [vmem:[#allocation3 + $0x168] sm:$0xff] %vm1332_vm6, %v1231_v11  ;;  %1481 = vrot.lane.b32.xlu0 %v8533_v43, %s7838_s26 }
 0x199   :  { %1479 = vrot.lane.b32.xlu1 %v8523_v5, %s7838_s26 }
 0x19a   :  { %v1237_v57 = vpop.permute.xlu0 %1236 }
 0x19b   :  { %v1235_v17 = vpop.permute.xlu1 %1234  ;;  %1381 = vst.msk [vmem:[#allocation3 + $0x180] sm:$0xff] %vm1332_vm6, %v1237_v57 }
 0x19c   :  { %1380 = vst.msk [vmem:[#allocation3 + $0x178] sm:$0xff] %vm1332_vm6, %v1235_v17  ;;  %1485 = vrot.lane.b32.xlu0 %v8547_v16, %s7838_s26 }
 0x19d   :  { %1483 = vrot.lane.b32.xlu1 %v8535_v30, %s7838_s26 }
 0x19e   :  { %v1241_v13 = vpop.permute.xlu0 %1240 }
 0x19f   :  { %v1239_v34 = vpop.permute.xlu1 %1238  ;;  %1383 = vst.msk [vmem:[#allocation3 + $0x190] sm:$0xff] %vm1332_vm6, %v1241_v13 }
 0x1a0   :  { %1382 = vst.msk [vmem:[#allocation3 + $0x188] sm:$0xff] %vm1332_vm6, %v1239_v34  ;;  %1489 = vrot.lane.b32.xlu0 %v8551_v8, %s7838_s26 }
 0x1a1   :  { %1487 = vrot.lane.b32.xlu1 %v14790_v41, %s7838_s26 }
 0x1a2   :  { %v1245_v11 = vpop.permute.xlu0 %1244 }
 0x1a3   :  { %v1243_v60 = vpop.permute.xlu1 %1242  ;;  %1385 = vst.msk [vmem:[#allocation3 + $0x1a0] sm:$0xff] %vm1332_vm6, %v1245_v11 }
 0x1a4   :  { %1384 = vst.msk [vmem:[#allocation3 + $0x198] sm:$0xff] %vm1332_vm6, %v1243_v60  ;;  %1493 = vrot.lane.b32.xlu0 %v8568_v37, %s7838_s26 }
 0x1a5   :  { %1491 = vrot.lane.b32.xlu1 %v14793_v15, %s7838_s26 }
 0x1a6   :  { %v1249_v17 = vpop.permute.xlu0 %1248 }
 0x1a7   :  { %v1247_v22 = vpop.permute.xlu1 %1246  ;;  %1387 = vst.msk [vmem:[#allocation3 + $0x1b0] sm:$0xff] %vm1332_vm6, %v1249_v17 }
 0x1a8   :  { %1386 = vst.msk [vmem:[#allocation3 + $0x1a8] sm:$0xff] %vm1332_vm6, %v1247_v22  ;;  %1497 = vrot.lane.b32.xlu0 %v8579_v33, %s7838_s26 }
 0x1a9   :  { %1495 = vrot.lane.b32.xlu1 %v14796_v54, %s7838_s26 }
 0x1aa   :  { %v1253_v34 = vpop.permute.xlu0 %1252 }
 0x1ab   :  { %v1251_v57 = vpop.permute.xlu1 %1250  ;;  %1389 = vst.msk [vmem:[#allocation3 + $0x1c0] sm:$0xff] %vm1332_vm6, %v1253_v34 }
 0x1ac   :  { %1388 = vst.msk [vmem:[#allocation3 + $0x1b8] sm:$0xff] %vm1332_vm6, %v1251_v57  ;;  %1501 = vrot.lane.b32.xlu0 %v8592_v25, %s7838_s26 }
 0x1ad   :  { %1499 = vrot.lane.b32.xlu1 %v14799_v24, %s7838_s26 }
 0x1ae   :  { %v1257_v60 = vpop.permute.xlu0 %1256 }
 0x1af   :  { %v1255_v13 = vpop.permute.xlu1 %1254  ;;  %1391 = vst.msk [vmem:[#allocation3 + $0x1d0] sm:$0xff] %vm1332_vm6, %v1257_v60 }
 0x1b0   :  { %1390 = vst.msk [vmem:[#allocation3 + $0x1c8] sm:$0xff] %vm1332_vm6, %v1255_v13  ;;  %1505 = vrot.lane.b32.xlu0 %v8701_v63, %s7838_s26 }
 0x1b1   :  { %1503 = vrot.lane.b32.xlu1 %v14802_v23, %s7838_s26 }
 0x1b2   :  { %v1261_v22 = vpop.permute.xlu0 %1260 }
 0x1b3   :  { %v1259_v11 = vpop.permute.xlu1 %1258  ;;  %1393 = vst.msk [vmem:[#allocation3 + $0x1e0] sm:$0xff] %vm1332_vm6, %v1261_v22 }
 0x1b4   :  { %1392 = vst.msk [vmem:[#allocation3 + $0x1d8] sm:$0xff] %vm1332_vm6, %v1259_v11  ;;  %1509 = vrot.lane.b32.xlu0 %v8709_v27, %s7838_s26 }
 0x1b5   :  { %1507 = vrot.lane.b32.xlu1 %v14805_v42, %s7838_s26 }
 0x1b6   :  { %v1265_v57 = vpop.permute.xlu0 %1264 }
 0x1b7   :  { %v1263_v17 = vpop.permute.xlu1 %1262  ;;  %1395 = vst.msk [vmem:[#allocation3 + $0x1f0] sm:$0xff] %vm1332_vm6, %v1265_v57 }
 0x1b8   :  { %1394 = vst.msk [vmem:[#allocation3 + $0x1e8] sm:$0xff] %vm1332_vm6, %v1263_v17  ;;  %1513 = vrot.lane.b32.xlu0 %v14811_v48, %s7838_s26  ;;  %v9685_v17 = vld [vmem:[#allocation2 + $0x330] sm:$0xff] }
 0x1b9   :  { %1511 = vrot.lane.b32.xlu1 %v14808_v45, %s7838_s26 }
 0x1ba   :  { %v1402_v13 = vpop.permute.xlu0 %1401 }
 0x1bb   :  { %v1267_v34 = vpop.permute.xlu1 %1266  ;;  %1594 = vst.msk [vmem:[#allocation3] sm:$0xff] %vm1593_vm7, %v1402_v13 }
 0x1bc   :  { %1396 = vst.msk [vmem:[#allocation3 + $0x1f8] sm:$0xff] %vm1332_vm6, %v1267_v34  ;;  %1517 = vrot.lane.b32.xlu0 %v14815_v18, %s7838_s26  ;;  %v9693_v34 = vld [vmem:[#allocation2 + $0x338] sm:$0xff]  ;;  %v9781_v18 = vld [vmem:[#allocation2 + $0x190] sm:$0x3] }
 0x1bd   :  { %1515 = vrot.lane.b32.xlu1 %v14812_v35, %s7838_s26 }
 0x1be   :  { %v1406_v11 = vpop.permute.xlu0 %1405 }
 0x1bf   :  { %v1404_v60 = vpop.permute.xlu1 %1403  ;;  %1596 = vst.msk [vmem:[#allocation3 + $0x10] sm:$0xff] %vm1593_vm7, %v1406_v11  ;;  %v14833_v11 = vld [vmem:[#allocation4_spill] sm:$0xff] }
 0x1c0   :  { %1595 = vst.msk [vmem:[#allocation3 + $0x8] sm:$0xff] %vm1593_vm7, %v1404_v60  ;;  %1521 = vrot.lane.b32.xlu0 %v8748_v9, %s7838_s26 }
 0x1c1   :  { %1519 = vrot.lane.b32.xlu1 %v14816_v10, %s7838_s26  ;;  %v14836_v10 = vld [vmem:[#allocation17_spill] sm:$0xff] }
 0x1c2   :  { %v1410_v57 = vpop.permute.xlu0 %1409 }
 0x1c3   :  { %v1408_v22 = vpop.permute.xlu1 %1407  ;;  %1598 = vst.msk [vmem:[#allocation3 + $0x20] sm:$0xff] %vm1593_vm7, %v1410_v57 }
 0x1c4   :  { %1597 = vst.msk [vmem:[#allocation3 + $0x18] sm:$0xff] %vm1593_vm7, %v1408_v22  ;;  %1525 = vrot.lane.b32.xlu0 %v9685_v17, %s7838_s26 }
 0x1c5   :  { %1523 = vrot.lane.b32.xlu1 %v8750_v39, %s7838_s26  ;;  %v14834_v39 = vld [vmem:[#allocation8_spill] sm:$0xff] }
 0x1c6   :  { %v1414_v60 = vpop.permute.xlu0 %1413 }
 0x1c7   :  { %v1412_v13 = vpop.permute.xlu1 %1411  ;;  %1600 = vst.msk [vmem:[#allocation3 + $0x30] sm:$0xff] %vm1593_vm7, %v1414_v60 }
 0x1c8   :  { %1599 = vst.msk [vmem:[#allocation3 + $0x28] sm:$0xff] %vm1593_vm7, %v1412_v13  ;;  %1670 = vrot.lane.b32.xlu0 %v14833_v11, %s7839_s27  ;;  %v14835_v13 = vld [vmem:[#allocation11_spill] sm:$0xff]  ;;  %v14837_v11 = vld [vmem:[#allocation21_spill] sm:$0xff] }
 0x1c9   :  { %1527 = vrot.lane.b32.xlu1 %v9693_v34, %s7838_s26 }
 0x1ca   :  { %v1418_v57 = vpop.permute.xlu0 %1417 }
 0x1cb   :  { %v1416_v22 = vpop.permute.xlu1 %1415  ;;  %1602 = vst.msk [vmem:[#allocation3 + $0x40] sm:$0xff] %vm1593_vm7, %v1418_v57  ;;  %v14838_v57 = vld [vmem:[#allocation29_spill] sm:$0xff] }
 0x1cc   :  { %1601 = vst.msk [vmem:[#allocation3 + $0x38] sm:$0xff] %vm1593_vm7, %v1416_v22  ;;  %1674 = vrot.lane.b32.xlu0 %v14835_v13, %s7839_s27 }
 0x1cd   :  { %1672 = vrot.lane.b32.xlu1 %v14834_v39, %s7839_s27 }
 0x1ce   :  { %v1422_v60 = vpop.permute.xlu0 %1421 }
 0x1cf   :  { %v1420_v9 = vpop.permute.xlu1 %1419  ;;  %1604 = vst.msk [vmem:[#allocation3 + $0x50] sm:$0xff] %vm1593_vm7, %v1422_v60  ;;  %v14840_v60 = vld [vmem:[#allocation32_spill] sm:$0xff] }
 0x1d0   :  { %1603 = vst.msk [vmem:[#allocation3 + $0x48] sm:$0xff] %vm1593_vm7, %v1420_v9  ;;  %1678 = vrot.lane.b32.xlu0 %v14837_v11, %s7839_s27  ;;  %v14839_v9 = vld [vmem:[#allocation31_spill] sm:$0xff] }
 0x1d1   :  { %1676 = vrot.lane.b32.xlu1 %v14836_v10, %s7839_s27 }
 0x1d2   :  { %v1426_v39 = vpop.permute.xlu0 %1425 }
 0x1d3   :  { %v1424_v22 = vpop.permute.xlu1 %1423  ;;  %1606 = vst.msk [vmem:[#allocation3 + $0x60] sm:$0xff] %vm1593_vm7, %v1426_v39  ;;  %v14842_v39 = vld [vmem:[#allocation34_spill] sm:$0xff] }
 0x1d4   :  { %1605 = vst.msk [vmem:[#allocation3 + $0x58] sm:$0xff] %vm1593_vm7, %v1424_v22  ;;  %1682 = vrot.lane.b32.xlu0 %v14839_v9, %s7839_s27  ;;  %v14841_v22 = vld [vmem:[#allocation33_spill] sm:$0xff] }
 0x1d5   :  { %1680 = vrot.lane.b32.xlu1 %v14838_v57, %s7839_s27 }
 0x1d6   :  { %v1430_v10 = vpop.permute.xlu0 %1429 }
 0x1d7   :  { %v1428_v13 = vpop.permute.xlu1 %1427  ;;  %1608 = vst.msk [vmem:[#allocation3 + $0x70] sm:$0xff] %vm1593_vm7, %v1430_v10  ;;  %v14844_v10 = vld [vmem:[#allocation37_spill] sm:$0xff] }
 0x1d8   :  { %1607 = vst.msk [vmem:[#allocation3 + $0x68] sm:$0xff] %vm1593_vm7, %v1428_v13  ;;  %1686 = vrot.lane.b32.xlu0 %v14841_v22, %s7839_s27  ;;  %v14843_v13 = vld [vmem:[#allocation36_spill] sm:$0xff] }
 0x1d9   :  { %1684 = vrot.lane.b32.xlu1 %v14840_v60, %s7839_s27 }
 0x1da   :  { %v1434_v57 = vpop.permute.xlu0 %1433 }
 0x1db   :  { %v1432_v11 = vpop.permute.xlu1 %1431  ;;  %1610 = vst.msk [vmem:[#allocation3 + $0x80] sm:$0xff] %vm1593_vm7, %v1434_v57  ;;  %v14846_v57 = vld [vmem:[#allocation44_spill] sm:$0xff] }
 0x1dc   :  { %1609 = vst.msk [vmem:[#allocation3 + $0x78] sm:$0xff] %vm1593_vm7, %v1432_v11  ;;  %1690 = vrot.lane.b32.xlu0 %v14843_v13, %s7839_s27  ;;  %v14845_v11 = vld [vmem:[#allocation38_spill] sm:$0xff] }
 0x1dd   :  { %1688 = vrot.lane.b32.xlu1 %v14842_v39, %s7839_s27 }
 0x1de   :  { %v1438_v60 = vpop.permute.xlu0 %1437 }
 0x1df   :  { %v1436_v9 = vpop.permute.xlu1 %1435  ;;  %1612 = vst.msk [vmem:[#allocation3 + $0x90] sm:$0xff] %vm1593_vm7, %v1438_v60  ;;  %v14848_v60 = vld [vmem:[#allocation49_spill] sm:$0xff] }
 0x1e0   :  { %1611 = vst.msk [vmem:[#allocation3 + $0x88] sm:$0xff] %vm1593_vm7, %v1436_v9  ;;  %1694 = vrot.lane.b32.xlu0 %v14845_v11, %s7839_s27  ;;  %v14847_v9 = vld [vmem:[#allocation46_spill] sm:$0xff] }
 0x1e1   :  { %1692 = vrot.lane.b32.xlu1 %v14844_v10, %s7839_s27 }
 0x1e2   :  { %v1442_v39 = vpop.permute.xlu0 %1441 }
 0x1e3   :  { %v1440_v22 = vpop.permute.xlu1 %1439  ;;  %1614 = vst.msk [vmem:[#allocation3 + $0xa0] sm:$0xff] %vm1593_vm7, %v1442_v39  ;;  %v14850_v39 = vld [vmem:[#allocation55_spill] sm:$0xff] }
 0x1e4   :  { %1613 = vst.msk [vmem:[#allocation3 + $0x98] sm:$0xff] %vm1593_vm7, %v1440_v22  ;;  %1698 = vrot.lane.b32.xlu0 %v14847_v9, %s7839_s27  ;;  %v14849_v22 = vld [vmem:[#allocation51_spill] sm:$0xff] }
 0x1e5   :  { %1696 = vrot.lane.b32.xlu1 %v14846_v57, %s7839_s27 }
 0x1e6   :  { %v1446_v10 = vpop.permute.xlu0 %1445 }
 0x1e7   :  { %v1444_v13 = vpop.permute.xlu1 %1443  ;;  %1616 = vst.msk [vmem:[#allocation3 + $0xb0] sm:$0xff] %vm1593_vm7, %v1446_v10  ;;  %v14852_v10 = vld [vmem:[#allocation59_spill] sm:$0xff] }
 0x1e8   :  { %1615 = vst.msk [vmem:[#allocation3 + $0xa8] sm:$0xff] %vm1593_vm7, %v1444_v13  ;;  %1702 = vrot.lane.b32.xlu0 %v14849_v22, %s7839_s27  ;;  %v14851_v13 = vld [vmem:[#allocation57_spill] sm:$0xff] }
 0x1e9   :  { %1700 = vrot.lane.b32.xlu1 %v14848_v60, %s7839_s27 }
 0x1ea   :  { %v1450_v57 = vpop.permute.xlu0 %1449 }
 0x1eb   :  { %v1448_v11 = vpop.permute.xlu1 %1447  ;;  %1618 = vst.msk [vmem:[#allocation3 + $0xc0] sm:$0xff] %vm1593_vm7, %v1450_v57  ;;  %v14854_v57 = vld [vmem:[#allocation61_spill] sm:$0xff] }
 0x1ec   :  { %1617 = vst.msk [vmem:[#allocation3 + $0xb8] sm:$0xff] %vm1593_vm7, %v1448_v11  ;;  %1706 = vrot.lane.b32.xlu0 %v14851_v13, %s7839_s27  ;;  %v14853_v11 = vld [vmem:[#allocation60_spill] sm:$0xff] }
 0x1ed   :  { %1704 = vrot.lane.b32.xlu1 %v14850_v39, %s7839_s27 }
 0x1ee   :  { %v1454_v60 = vpop.permute.xlu0 %1453 }
 0x1ef   :  { %v1452_v9 = vpop.permute.xlu1 %1451  ;;  %1620 = vst.msk [vmem:[#allocation3 + $0xd0] sm:$0xff] %vm1593_vm7, %v1454_v60  ;;  %v14856_v60 = vld [vmem:[#allocation63_spill] sm:$0xff] }
 0x1f0   :  { %1619 = vst.msk [vmem:[#allocation3 + $0xc8] sm:$0xff] %vm1593_vm7, %v1452_v9  ;;  %1710 = vrot.lane.b32.xlu0 %v14853_v11, %s7839_s27  ;;  %v14855_v9 = vld [vmem:[#allocation62_spill] sm:$0xff] }
 0x1f1   :  { %1708 = vrot.lane.b32.xlu1 %v14852_v10, %s7839_s27 }
 0x1f2   :  { %v1458_v39 = vpop.permute.xlu0 %1457 }
 0x1f3   :  { %v1456_v22 = vpop.permute.xlu1 %1455  ;;  %1622 = vst.msk [vmem:[#allocation3 + $0xe0] sm:$0xff] %vm1593_vm7, %v1458_v39  ;;  %v14858_v39 = vld [vmem:[#allocation69_spill] sm:$0xff] }
 0x1f4   :  { %1621 = vst.msk [vmem:[#allocation3 + $0xd8] sm:$0xff] %vm1593_vm7, %v1456_v22  ;;  %1714 = vrot.lane.b32.xlu0 %v14855_v9, %s7839_s27  ;;  %v14857_v22 = vld [vmem:[#allocation64_spill] sm:$0xff] }
 0x1f5   :  { %1712 = vrot.lane.b32.xlu1 %v14854_v57, %s7839_s27 }
 0x1f6   :  { %v1462_v10 = vpop.permute.xlu0 %1461 }
 0x1f7   :  { %v1460_v13 = vpop.permute.xlu1 %1459  ;;  %1624 = vst.msk [vmem:[#allocation3 + $0xf0] sm:$0xff] %vm1593_vm7, %v1462_v10  ;;  %v1661_v10 = vrot.slane %v9593_v32, 1 }
 0x1f8   :  { %1623 = vst.msk [vmem:[#allocation3 + $0xe8] sm:$0xff] %vm1593_vm7, %v1460_v13  ;;  %1718 = vrot.lane.b32.xlu0 %v14857_v22, %s7839_s27  ;;  %v14859_v13 = vld [vmem:[#allocation72_spill] sm:$0xff] }
 0x1f9   :  { %1716 = vrot.lane.b32.xlu1 %v14856_v60, %s7839_s27  ;;  %v1660_v60 = vrot.slane %v9585_v49, 1 }
 0x1fa   :  { %v1466_v57 = vpop.permute.xlu0 %1465 }
 0x1fb   :  { %v1464_v11 = vpop.permute.xlu1 %1463  ;;  %1626 = vst.msk [vmem:[#allocation3 + $0x100] sm:$0xff] %vm1593_vm7, %v1466_v57  ;;  %v14861_v57 = vld [vmem:[#allocation77_spill] sm:$0xff]  ;;  %v9791_v35 = vsel %vm561_vm2, %v1660_v60, %v1661_v10  ;;  %v14865_v60 = vld [vmem:[#allocation80_spill] sm:$0xff] }
 0x1fc   :  { %1625 = vst.msk [vmem:[#allocation3 + $0xf8] sm:$0xff] %vm1593_vm7, %v1464_v11  ;;  %1722 = vrot.lane.b32.xlu0 %v14859_v13, %s7839_s27  ;;  %v14860_v11 = vld [vmem:[#allocation76_spill] sm:$0xff]  ;;  %v1663_v13 = vrot.slane %v9781_v18, 1  ;;  %14862 = vst [vmem:[#allocation6_spill] sm:$0xff] %v9791_v35 }
 0x1fd   :  { %1720 = vrot.lane.b32.xlu1 %v14858_v39, %s7839_s27 }
 0x1fe   :  { %v1470_v22 = vpop.permute.xlu0 %1469 }
 0x1ff   :  { %v1468_v9 = vpop.permute.xlu1 %1467  ;;  %1628 = vst.msk [vmem:[#allocation3 + $0x110] sm:$0xff] %vm1593_vm7, %v1470_v22  ;;  %v9800_v22 = vsel %vm561_vm2, %v1661_v10, %v1663_v13  ;;  %v14867_v13 = vld [vmem:[#allocation82_spill] sm:$0xff] }
 0x200   :  { %1627 = vst.msk [vmem:[#allocation3 + $0x108] sm:$0xff] %vm1593_vm7, %v1468_v9  ;;  %1726 = vrot.lane.b32.xlu0 %v14861_v57, %s7839_s27  ;;  %v14863_v9 = vld [vmem:[#allocation78_spill] sm:$0xff]  ;;  %14864 = vst [vmem:[#allocation7_spill] sm:$0xff] %v9800_v22 }
 0x201   :  { %1724 = vrot.lane.b32.xlu1 %v14860_v11, %s7839_s27 }
 0x202   :  { %v1474_v48 = vpop.permute.xlu0 %1473 }
 0x203   :  { %v1472_v39 = vpop.permute.xlu1 %1471  ;;  %1630 = vst.msk [vmem:[#allocation3 + $0x120] sm:$0xff] %vm1593_vm7, %v1474_v48 }
 0x204   :  { %1629 = vst.msk [vmem:[#allocation3 + $0x118] sm:$0xff] %vm1593_vm7, %v1472_v39  ;;  %1730 = vrot.lane.b32.xlu0 %v9791_v35, %s7839_s27  ;;  %v14866_v35 = vld [vmem:[#allocation81_spill] sm:$0xff] }
 0x205   :  { %1728 = vrot.lane.b32.xlu1 %v14863_v9, %s7839_s27 }
 0x206   :  { %v1478_v11 = vpop.permute.xlu0 %1477 }
 0x207   :  { %v1476_v57 = vpop.permute.xlu1 %1475  ;;  %1632 = vst.msk [vmem:[#allocation3 + $0x130] sm:$0xff] %vm1593_vm7, %v1478_v11  ;;  %v14868_v11 = vld [vmem:[#allocation83_spill] sm:$0xff] }
 0x208   :  { %1631 = vst.msk [vmem:[#allocation3 + $0x128] sm:$0xff] %vm1593_vm7, %v1476_v57  ;;  %1734 = vrot.lane.b32.xlu0 %v14865_v60, %s7839_s27  ;;  %v14869_v60 = vld [vmem:[#allocation84_spill] sm:$0xff] }
 0x209   :  { %1732 = vrot.lane.b32.xlu1 %v9800_v22, %s7839_s27  ;;  %v9888_v22 = vld [vmem:[#allocation2 + $0x340] sm:$0x3] }
 0x20a   :  { %v1482_v48 = vpop.permute.xlu0 %1481 }
 0x20b   :  { %v1480_v39 = vpop.permute.xlu1 %1479  ;;  %1634 = vst.msk [vmem:[#allocation3 + $0x140] sm:$0xff] %vm1593_vm7, %v1482_v48  ;;  %v14870_v48 = vld [vmem:[#allocation85_spill] sm:$0xff] }
 0x20c   :  { %1633 = vst.msk [vmem:[#allocation3 + $0x138] sm:$0xff] %vm1593_vm7, %v1480_v39  ;;  %1738 = vrot.lane.b32.xlu0 %v14867_v13, %s7839_s27 }
 0x20d   :  { %1736 = vrot.lane.b32.xlu1 %v14866_v35, %s7839_s27 }
 0x20e   :  { %v1486_v57 = vpop.permute.xlu0 %1485 }
 0x20f   :  { %v1484_v10 = vpop.permute.xlu1 %1483  ;;  %1636 = vst.msk [vmem:[#allocation3 + $0x150] sm:$0xff] %vm1593_vm7, %v1486_v57  ;;  %v14872_v57 = vld [vmem:[#allocation87_spill] sm:$0xff] }
 0x210   :  { %1635 = vst.msk [vmem:[#allocation3 + $0x148] sm:$0xff] %vm1593_vm7, %v1484_v10  ;;  %1742 = vrot.lane.b32.xlu0 %v14869_v60, %s7839_s27  ;;  %v14871_v10 = vld [vmem:[#allocation86_spill] sm:$0xff] }
 0x211   :  { %1740 = vrot.lane.b32.xlu1 %v14868_v11, %s7839_s27 }
 0x212   :  { %v1490_v35 = vpop.permute.xlu0 %1489 }
 0x213   :  { %v1488_v39 = vpop.permute.xlu1 %1487  ;;  %1638 = vst.msk [vmem:[#allocation3 + $0x160] sm:$0xff] %vm1593_vm7, %v1490_v35  ;;  %v14874_v35 = vld [vmem:[#allocation89_spill] sm:$0xff] }
 0x214   :  { %1637 = vst.msk [vmem:[#allocation3 + $0x158] sm:$0xff] %vm1593_vm7, %v1488_v39  ;;  %1746 = vrot.lane.b32.xlu0 %v14871_v10, %s7839_s27  ;;  %v14873_v39 = vld [vmem:[#allocation88_spill] sm:$0xff] }
 0x215   :  { %1744 = vrot.lane.b32.xlu1 %v14870_v48, %s7839_s27 }
 0x216   :  { %v1494_v11 = vpop.permute.xlu0 %1493 }
 0x217   :  { %v1492_v13 = vpop.permute.xlu1 %1491  ;;  %1640 = vst.msk [vmem:[#allocation3 + $0x170] sm:$0xff] %vm1593_vm7, %v1494_v11  ;;  %v14876_v11 = vld [vmem:[#allocation91_spill] sm:$0xff] }
 0x218   :  { %1639 = vst.msk [vmem:[#allocation3 + $0x168] sm:$0xff] %vm1593_vm7, %v1492_v13  ;;  %1750 = vrot.lane.b32.xlu0 %v14873_v39, %s7839_s27  ;;  %v14875_v13 = vld [vmem:[#allocation90_spill] sm:$0xff] }
 0x219   :  { %1748 = vrot.lane.b32.xlu1 %v14872_v57, %s7839_s27 }
 0x21a   :  { %v1498_v48 = vpop.permute.xlu0 %1497 }
 0x21b   :  { %v1496_v60 = vpop.permute.xlu1 %1495  ;;  %1642 = vst.msk [vmem:[#allocation3 + $0x180] sm:$0xff] %vm1593_vm7, %v1498_v48  ;;  %v14878_v48 = vld [vmem:[#allocation93_spill] sm:$0xff] }
 0x21c   :  { %1641 = vst.msk [vmem:[#allocation3 + $0x178] sm:$0xff] %vm1593_vm7, %v1496_v60  ;;  %1754 = vrot.lane.b32.xlu0 %v14875_v13, %s7839_s27  ;;  %v14877_v60 = vld [vmem:[#allocation92_spill] sm:$0xff] }
 0x21d   :  { %1752 = vrot.lane.b32.xlu1 %v14874_v35, %s7839_s27 }
 0x21e   :  { %v1502_v57 = vpop.permute.xlu0 %1501 }
 0x21f   :  { %v1500_v10 = vpop.permute.xlu1 %1499  ;;  %1644 = vst.msk [vmem:[#allocation3 + $0x190] sm:$0xff] %vm1593_vm7, %v1502_v57  ;;  %v14880_v57 = vld [vmem:[#allocation95_spill] sm:$0xff] }
 0x220   :  { %1643 = vst.msk [vmem:[#allocation3 + $0x188] sm:$0xff] %vm1593_vm7, %v1500_v10  ;;  %1758 = vrot.lane.b32.xlu0 %v14877_v60, %s7839_s27  ;;  %v14879_v10 = vld [vmem:[#allocation94_spill] sm:$0xff] }
 0x221   :  { %1756 = vrot.lane.b32.xlu1 %v14876_v11, %s7839_s27 }
 0x222   :  { %v1506_v35 = vpop.permute.xlu0 %1505 }
 0x223   :  { %v1504_v39 = vpop.permute.xlu1 %1503  ;;  %1646 = vst.msk [vmem:[#allocation3 + $0x1a0] sm:$0xff] %vm1593_vm7, %v1506_v35  ;;  %v14882_v35 = vld [vmem:[#allocation97_spill] sm:$0xff] }
 0x224   :  { %1645 = vst.msk [vmem:[#allocation3 + $0x198] sm:$0xff] %vm1593_vm7, %v1504_v39  ;;  %1762 = vrot.lane.b32.xlu0 %v14879_v10, %s7839_s27  ;;  %v14881_v39 = vld [vmem:[#allocation96_spill] sm:$0xff] }
 0x225   :  { %1760 = vrot.lane.b32.xlu1 %v14878_v48, %s7839_s27 }
 0x226   :  { %v1510_v11 = vpop.permute.xlu0 %1509 }
 0x227   :  { %v1508_v13 = vpop.permute.xlu1 %1507  ;;  %1648 = vst.msk [vmem:[#allocation3 + $0x1b0] sm:$0xff] %vm1593_vm7, %v1510_v11  ;;  %v14884_v11 = vld [vmem:[#allocation99_spill] sm:$0xff] }
 0x228   :  { %1647 = vst.msk [vmem:[#allocation3 + $0x1a8] sm:$0xff] %vm1593_vm7, %v1508_v13  ;;  %1766 = vrot.lane.b32.xlu0 %v14881_v39, %s7839_s27  ;;  %v14883_v13 = vld [vmem:[#allocation98_spill] sm:$0xff] }
 0x229   :  { %1764 = vrot.lane.b32.xlu1 %v14880_v57, %s7839_s27 }
 0x22a   :  { %v1514_v48 = vpop.permute.xlu0 %1513 }
 0x22b   :  { %v1512_v60 = vpop.permute.xlu1 %1511  ;;  %1650 = vst.msk [vmem:[#allocation3 + $0x1c0] sm:$0xff] %vm1593_vm7, %v1514_v48  ;;  %v14886_v48 = vld [vmem:[#allocation101_spill] sm:$0xff] }
 0x22c   :  { %1649 = vst.msk [vmem:[#allocation3 + $0x1b8] sm:$0xff] %vm1593_vm7, %v1512_v60  ;;  %1770 = vrot.lane.b32.xlu0 %v14883_v13, %s7839_s27  ;;  %v14885_v60 = vld [vmem:[#allocation100_spill] sm:$0xff] }
 0x22d   :  { %1768 = vrot.lane.b32.xlu1 %v14882_v35, %s7839_s27 }
 0x22e   :  { %v1518_v57 = vpop.permute.xlu0 %1517 }
 0x22f   :  { %v1516_v10 = vpop.permute.xlu1 %1515  ;;  %1652 = vst.msk [vmem:[#allocation3 + $0x1d0] sm:$0xff] %vm1593_vm7, %v1518_v57  ;;  %v14888_v57 = vld [vmem:[#allocation103_spill] sm:$0xff] }
 0x230   :  { %1651 = vst.msk [vmem:[#allocation3 + $0x1c8] sm:$0xff] %vm1593_vm7, %v1516_v10  ;;  %1774 = vrot.lane.b32.xlu0 %v14885_v60, %s7839_s27  ;;  %v14887_v10 = vld [vmem:[#allocation102_spill] sm:$0xff] }
 0x231   :  { %1772 = vrot.lane.b32.xlu1 %v14884_v11, %s7839_s27 }
 0x232   :  { %v1522_v35 = vpop.permute.xlu0 %1521 }
 0x233   :  { %v1520_v39 = vpop.permute.xlu1 %1519  ;;  %1654 = vst.msk [vmem:[#allocation3 + $0x1e0] sm:$0xff] %vm1593_vm7, %v1522_v35 }
 0x234   :  { %1653 = vst.msk [vmem:[#allocation3 + $0x1d8] sm:$0xff] %vm1593_vm7, %v1520_v39  ;;  %1778 = vrot.lane.b32.xlu0 %v14887_v10, %s7839_s27  ;;  %v14889_v39 = vld [vmem:[#allocation104_spill] sm:$0xff] }
 0x235   :  { %1776 = vrot.lane.b32.xlu1 %v14886_v48, %s7839_s27  ;;  %v14890_v48 = vld [vmem:[#allocation105_spill] sm:$0xff] }
 0x236   :  { %v1526_v11 = vpop.permute.xlu0 %1525 }
 0x237   :  { %v1524_v13 = vpop.permute.xlu1 %1523  ;;  %1656 = vst.msk [vmem:[#allocation3 + $0x1f0] sm:$0xff] %vm1593_vm7, %v1526_v11  ;;  %v1666_v11 = vrot.slane %v9693_v34, 1 }
 0x238   :  { %1655 = vst.msk [vmem:[#allocation3 + $0x1e8] sm:$0xff] %vm1593_vm7, %v1524_v13  ;;  %1782 = vrot.lane.b32.xlu0 %v14889_v39, %s7839_s27  ;;  %v14891_v13 = vld [vmem:[#allocation106_spill] sm:$0xff] }
 0x239   :  { %1780 = vrot.lane.b32.xlu1 %v14888_v57, %s7839_s27  ;;  %v1665_v57 = vrot.slane %v9685_v17, 1 }
 0x23a   :  { %v1671_v35 = vpop.permute.xlu0 %1670 }
 0x23b   :  { %v1528_v60 = vpop.permute.xlu1 %1527  ;;  %1863 = vst.msk [vmem:[#allocation3] sm:$0xff] %vm1862_vm8, %v1671_v35  ;;  %v14893_v35 = vld [vmem:[#allocation108_spill] sm:$0xff]  ;;  %v9898_v9 = vsel %vm561_vm2, %v1665_v57, %v1666_v11 }
 0x23c   :  { %1657 = vst.msk [vmem:[#allocation3 + $0x1f8] sm:$0xff] %vm1593_vm7, %v1528_v60  ;;  %1786 = vrot.lane.b32.xlu0 %v14891_v13, %s7839_s27  ;;  %v14892_v60 = vld [vmem:[#allocation107_spill] sm:$0xff]  ;;  %v1668_v13 = vrot.slane %v9888_v22, 1 }
 0x23d   :  { %1784 = vrot.lane.b32.xlu1 %v14890_v48, %s7839_s27 }
 0x23e   :  { %v1675_v39 = vpop.permute.xlu0 %1674 }
 0x23f   :  { %v1673_v10 = vpop.permute.xlu1 %1672  ;;  %1865 = vst.msk [vmem:[#allocation3 + $0x10] sm:$0xff] %vm1862_vm8, %v1675_v39  ;;  %v9907_v39 = vsel %vm561_vm2, %v1666_v11, %v1668_v13  ;;  %v14897_v13 = vld [vmem:[#allocation111_spill] sm:$0xff]  ;;  %v14898_v11 = vld [vmem:[#allocation112_spill] sm:$0xff] }
 0x240   :  { %1864 = vst.msk [vmem:[#allocation3 + $0x8] sm:$0xff] %vm1862_vm8, %v1673_v10  ;;  %1790 = vrot.lane.b32.xlu0 %v14893_v35, %s7839_s27  ;;  %v14894_v10 = vld [vmem:[#allocation109_spill] sm:$0xff]  ;;  %14895 = vst [vmem:[#allocation9_spill] sm:$0xff] %v9907_v39 }
 0x241   :  { %1788 = vrot.lane.b32.xlu1 %v14892_v60, %s7839_s27 }
 0x242   :  { %v1679_v45 = vpop.permute.xlu0 %1678 }
 0x243   :  { %v1677_v48 = vpop.permute.xlu1 %1676  ;;  %1867 = vst.msk [vmem:[#allocation3 + $0x20] sm:$0xff] %vm1862_vm8, %v1679_v45 }
 0x244   :  { %1866 = vst.msk [vmem:[#allocation3 + $0x18] sm:$0xff] %vm1862_vm8, %v1677_v48  ;;  %1794 = vrot.lane.b32.xlu0 %v9898_v9, %s7839_s27  ;;  %v14896_v48 = vld [vmem:[#allocation110_spill] sm:$0xff] }
 0x245   :  { %1792 = vrot.lane.b32.xlu1 %v14894_v10, %s7839_s27 }
 0x246   :  { %v1683_v60 = vpop.permute.xlu0 %1682 }
 0x247   :  { %v1681_v35 = vpop.permute.xlu1 %1680  ;;  %1869 = vst.msk [vmem:[#allocation3 + $0x30] sm:$0xff] %vm1862_vm8, %v1683_v60 }
 0x248   :  { %1868 = vst.msk [vmem:[#allocation3 + $0x28] sm:$0xff] %vm1862_vm8, %v1681_v35  ;;  %1937 = vrot.lane.b32.xlu0 %v14896_v48, %s7840_s28  ;;  %v14900_v48 = vld [vmem:[#allocation114_spill] sm:$0xff] }
 0x249   :  { %1796 = vrot.lane.b32.xlu1 %v9907_v39, %s7839_s27  ;;  %v14899_v39 = vld [vmem:[#allocation113_spill] sm:$0xff] }
 0x24a   :  { %v1687_v57 = vpop.permute.xlu0 %1686 }
 0x24b   :  { %v1685_v45 = vpop.permute.xlu1 %1684  ;;  %1871 = vst.msk [vmem:[#allocation3 + $0x40] sm:$0xff] %vm1862_vm8, %v1687_v57  ;;  %v14901_v57 = vld [vmem:[#allocation5_spill] sm:$0xff] }
 0x24c   :  { %1870 = vst.msk [vmem:[#allocation3 + $0x38] sm:$0xff] %vm1862_vm8, %v1685_v45  ;;  %1941 = vrot.lane.b32.xlu0 %v14898_v11, %s7840_s28 }
 0x24d   :  { %1939 = vrot.lane.b32.xlu1 %v14897_v13, %s7840_s28 }
 0x24e   :  { %v1691_v60 = vpop.permute.xlu0 %1690 }
 0x24f   :  { %v1689_v35 = vpop.permute.xlu1 %1688  ;;  %1873 = vst.msk [vmem:[#allocation3 + $0x50] sm:$0xff] %vm1862_vm8, %v1691_v60  ;;  %v14903_v60 = vld [vmem:[#allocation115_spill] sm:$0xff] }
 0x250   :  { %1872 = vst.msk [vmem:[#allocation3 + $0x48] sm:$0xff] %vm1862_vm8, %v1689_v35  ;;  %1945 = vrot.lane.b32.xlu0 %v14900_v48, %s7840_s28  ;;  %v14902_v35 = vld [vmem:[#allocation18_spill] sm:$0xff] }
 0x251   :  { %1943 = vrot.lane.b32.xlu1 %v14899_v39, %s7840_s28 }
 0x252   :  { %v1695_v13 = vpop.permute.xlu0 %1694 }
 0x253   :  { %v1693_v45 = vpop.permute.xlu1 %1692  ;;  %1875 = vst.msk [vmem:[#allocation3 + $0x60] sm:$0xff] %vm1862_vm8, %v1695_v13  ;;  %v14905_v13 = vld [vmem:[#allocation116_spill] sm:$0xff] }
 0x254   :  { %1874 = vst.msk [vmem:[#allocation3 + $0x58] sm:$0xff] %vm1862_vm8, %v1693_v45  ;;  %1949 = vrot.lane.b32.xlu0 %v14902_v35, %s7840_s28  ;;  %v14904_v45 = vld [vmem:[#allocation26_spill] sm:$0xff] }
 0x255   :  { %1947 = vrot.lane.b32.xlu1 %v14901_v57, %s7840_s28 }
 0x256   :  { %v1699_v39 = vpop.permute.xlu0 %1698 }
 0x257   :  { %v1697_v11 = vpop.permute.xlu1 %1696  ;;  %1877 = vst.msk [vmem:[#allocation3 + $0x70] sm:$0xff] %vm1862_vm8, %v1699_v39  ;;  %v14907_v39 = vld [vmem:[#allocation117_spill] sm:$0xff] }
 0x258   :  { %1876 = vst.msk [vmem:[#allocation3 + $0x68] sm:$0xff] %vm1862_vm8, %v1697_v11  ;;  %1953 = vrot.lane.b32.xlu0 %v14904_v45, %s7840_s28  ;;  %v14906_v11 = vld [vmem:[#allocation30_spill] sm:$0xff] }
 0x259   :  { %1951 = vrot.lane.b32.xlu1 %v14903_v60, %s7840_s28 }
 0x25a   :  { %v1703_v57 = vpop.permute.xlu0 %1702 }
 0x25b   :  { %v1701_v48 = vpop.permute.xlu1 %1700  ;;  %1879 = vst.msk [vmem:[#allocation3 + $0x80] sm:$0xff] %vm1862_vm8, %v1703_v57  ;;  %v14909_v57 = vld [vmem:[#allocation118_spill] sm:$0xff] }
 0x25c   :  { %1878 = vst.msk [vmem:[#allocation3 + $0x78] sm:$0xff] %vm1862_vm8, %v1701_v48  ;;  %1957 = vrot.lane.b32.xlu0 %v14906_v11, %s7840_s28  ;;  %v14908_v48 = vld [vmem:[#allocation35_spill] sm:$0xff] }
 0x25d   :  { %1955 = vrot.lane.b32.xlu1 %v14905_v13, %s7840_s28 }
 0x25e   :  { %v1707_v60 = vpop.permute.xlu0 %1706 }
 0x25f   :  { %v1705_v35 = vpop.permute.xlu1 %1704  ;;  %1881 = vst.msk [vmem:[#allocation3 + $0x90] sm:$0xff] %vm1862_vm8, %v1707_v60  ;;  %v14911_v60 = vld [vmem:[#allocation119_spill] sm:$0xff] }
 0x260   :  { %1880 = vst.msk [vmem:[#allocation3 + $0x88] sm:$0xff] %vm1862_vm8, %v1705_v35  ;;  %1961 = vrot.lane.b32.xlu0 %v14908_v48, %s7840_s28  ;;  %v14910_v35 = vld [vmem:[#allocation39_spill] sm:$0xff] }
 0x261   :  { %1959 = vrot.lane.b32.xlu1 %v14907_v39, %s7840_s28 }
 0x262   :  { %v1711_v13 = vpop.permute.xlu0 %1710 }
 0x263   :  { %v1709_v45 = vpop.permute.xlu1 %1708  ;;  %1883 = vst.msk [vmem:[#allocation3 + $0xa0] sm:$0xff] %vm1862_vm8, %v1711_v13  ;;  %v14913_v13 = vld [vmem:[#allocation120_spill] sm:$0xff] }
 0x264   :  { %1882 = vst.msk [vmem:[#allocation3 + $0x98] sm:$0xff] %vm1862_vm8, %v1709_v45  ;;  %1965 = vrot.lane.b32.xlu0 %v14910_v35, %s7840_s28  ;;  %v14912_v45 = vld [vmem:[#allocation47_spill] sm:$0xff] }
 0x265   :  { %1963 = vrot.lane.b32.xlu1 %v14909_v57, %s7840_s28 }
 0x266   :  { %v1715_v39 = vpop.permute.xlu0 %1714 }
 0x267   :  { %v1713_v11 = vpop.permute.xlu1 %1712  ;;  %1885 = vst.msk [vmem:[#allocation3 + $0xb0] sm:$0xff] %vm1862_vm8, %v1715_v39  ;;  %v14914_v39 = vld [vmem:[#allocation121_spill] sm:$0xff] }
 0x268   :  { %1884 = vst.msk [vmem:[#allocation3 + $0xa8] sm:$0xff] %vm1862_vm8, %v1713_v11  ;;  %1969 = vrot.lane.b32.xlu0 %v14912_v45, %s7840_s28 }
 0x269   :  { %1967 = vrot.lane.b32.xlu1 %v14911_v60, %s7840_s28 }
 0x26a   :  { %v1719_v57 = vpop.permute.xlu0 %1718 }
 0x26b   :  { %v1717_v48 = vpop.permute.xlu1 %1716  ;;  %1887 = vst.msk [vmem:[#allocation3 + $0xc0] sm:$0xff] %vm1862_vm8, %v1719_v57  ;;  %v14916_v57 = vld [vmem:[#allocation27_spill] sm:$0xff] }
 0x26c   :  { %1886 = vst.msk [vmem:[#allocation3 + $0xb8] sm:$0xff] %vm1862_vm8, %v1717_v48  ;;  %1973 = vrot.lane.b32.xlu0 %v9162_v52, %s7840_s28  ;;  %v14915_v48 = vld [vmem:[#allocation58_spill] sm:$0xff] }
 0x26d   :  { %1971 = vrot.lane.b32.xlu1 %v14913_v13, %s7840_s28 }
 0x26e   :  { %v1723_v60 = vpop.permute.xlu0 %1722 }
 0x26f   :  { %v1721_v11 = vpop.permute.xlu1 %1720  ;;  %1889 = vst.msk [vmem:[#allocation3 + $0xd0] sm:$0xff] %vm1862_vm8, %v1723_v60  ;;  %v14918_v60 = vld [vmem:[#allocation122_spill] sm:$0xff] }
 0x270   :  { %1888 = vst.msk [vmem:[#allocation3 + $0xc8] sm:$0xff] %vm1862_vm8, %v1721_v11  ;;  %1977 = vrot.lane.b32.xlu0 %v14915_v48, %s7840_s28  ;;  %v14917_v11 = vld [vmem:[#allocation28_spill] sm:$0xff]  ;;  %v14921_v48 = vld [vmem:[#allocation126_spill] sm:$0xff] }
 0x271   :  { %1975 = vrot.lane.b32.xlu1 %v14914_v39, %s7840_s28 }
 0x272   :  { %v1727_v13 = vpop.permute.xlu0 %1726 }
 0x273   :  { %v1725_v45 = vpop.permute.xlu1 %1724  ;;  %1891 = vst.msk [vmem:[#allocation3 + $0xe0] sm:$0xff] %vm1862_vm8, %v1727_v13  ;;  %v14919_v13 = vld [vmem:[#allocation124_spill] sm:$0xff] }
 0x274   :  { %1890 = vst.msk [vmem:[#allocation3 + $0xd8] sm:$0xff] %vm1862_vm8, %v1725_v45  ;;  %1981 = vrot.lane.b32.xlu0 %v14917_v11, %s7840_s28 }
 0x275   :  { %1979 = vrot.lane.b32.xlu1 %v14916_v57, %s7840_s28 }
 0x276   :  { %v1731_v39 = vpop.permute.xlu0 %1730 }
 0x277   :  { %v1729_v52 = vpop.permute.xlu1 %1728  ;;  %1893 = vst.msk [vmem:[#allocation3 + $0xf0] sm:$0xff] %vm1862_vm8, %v1731_v39  ;;  %v1928_v39 = vrot.slane %v9593_v32, 2  ;;  %v14924_v32 = vld [vmem:[#allocation127_spill] sm:$0xff] }
 0x278   :  { %1892 = vst.msk [vmem:[#allocation3 + $0xe8] sm:$0xff] %vm1862_vm8, %v1729_v52  ;;  %1985 = vrot.lane.b32.xlu0 %v9207_v21, %s7840_s28  ;;  %v14920_v52 = vld [vmem:[#allocation125_spill] sm:$0xff] }
 0x279   :  { %1983 = vrot.lane.b32.xlu1 %v14918_v60, %s7840_s28  ;;  %v1927_v60 = vrot.slane %v9585_v49, 2 }
 0x27a   :  { %v1735_v57 = vpop.permute.xlu0 %1734 }
 0x27b   :  { %v1733_v45 = vpop.permute.xlu1 %1732  ;;  %1895 = vst.msk [vmem:[#allocation3 + $0x100] sm:$0xff] %vm1862_vm8, %v1735_v57  ;;  %v1930_v57 = vrot.slane %v9781_v18, 2 }
 0x27c   :  { %1894 = vst.msk [vmem:[#allocation3 + $0xf8] sm:$0xff] %vm1862_vm8, %v1733_v45  ;;  %1989 = vrot.lane.b32.xlu0 %v14920_v52, %s7840_s28  ;;  %v14922_v45 = vld [vmem:[#allocation73_spill] sm:$0xff]  ;;  %v10003_v52 = vsel %vm979_vm4, %v1927_v60, %v1928_v39  ;;  %v14925_v60 = vld [vmem:[#allocation42_spill] sm:$0xff] }
 0x27d   :  { %1987 = vrot.lane.b32.xlu1 %v14919_v13, %s7840_s28  ;;  %14923 = vst [vmem:[#allocation10_spill] sm:$0xff] %v10003_v52 }
 0x27e   :  { %v1739_v21 = vpop.permute.xlu0 %1738 }
 0x27f   :  { %v1737_v11 = vpop.permute.xlu1 %1736  ;;  %1897 = vst.msk [vmem:[#allocation3 + $0x110] sm:$0xff] %vm1862_vm8, %v1739_v21  ;;  %v10012_v21 = vsel %vm979_vm4, %v1928_v39, %v1930_v57  ;;  %v14927_v39 = vld [vmem:[#allocation43_spill] sm:$0xff] }
 0x280   :  { %1896 = vst.msk [vmem:[#allocation3 + $0x108] sm:$0xff] %vm1862_vm8, %v1737_v11  ;;  %1993 = vrot.lane.b32.xlu0 %v14922_v45, %s7840_s28 }
 0x281   :  { %1991 = vrot.lane.b32.xlu1 %v14921_v48, %s7840_s28 }
 0x282   :  { %v1743_v49 = vpop.permute.xlu0 %1742 }
 0x283   :  { %v1741_v13 = vpop.permute.xlu1 %1740  ;;  %1899 = vst.msk [vmem:[#allocation3 + $0x120] sm:$0xff] %vm1862_vm8, %v1743_v49 }
 0x284   :  { %1898 = vst.msk [vmem:[#allocation3 + $0x118] sm:$0xff] %vm1862_vm8, %v1741_v13  ;;  %1997 = vrot.lane.b32.xlu0 %v10003_v52, %s7840_s28  ;;  %v14926_v52 = vld [vmem:[#allocation79_spill] sm:$0xff] }
 0x285   :  { %1995 = vrot.lane.b32.xlu1 %v14924_v32, %s7840_s28 }
 0x286   :  { %v1747_v18 = vpop.permute.xlu0 %1746 }
 0x287   :  { %v1745_v11 = vpop.permute.xlu1 %1744  ;;  %1901 = vst.msk [vmem:[#allocation3 + $0x130] sm:$0xff] %vm1862_vm8, %v1747_v18  ;;  %v14928_v18 = vld [vmem:[#allocation45_spill] sm:$0xff] }
 0x288   :  { %1900 = vst.msk [vmem:[#allocation3 + $0x128] sm:$0xff] %vm1862_vm8, %v1745_v11  ;;  %2001 = vrot.lane.b32.xlu0 %v14925_v60, %s7840_s28  ;;  %v14929_v60 = vld [vmem:[#allocation128_spill] sm:$0xff] }
 0x289   :  { %1999 = vrot.lane.b32.xlu1 %v10012_v21, %s7840_s28 }
 0x28a   :  { %v1751_v49 = vpop.permute.xlu0 %1750 }
 0x28b   :  { %v1749_v13 = vpop.permute.xlu1 %1748  ;;  %1903 = vst.msk [vmem:[#allocation3 + $0x140] sm:$0xff] %vm1862_vm8, %v1751_v49  ;;  %v14930_v49 = vld [vmem:[#allocation129_spill] sm:$0xff] }
 0x28c   :  { %1902 = vst.msk [vmem:[#allocation3 + $0x138] sm:$0xff] %vm1862_vm8, %v1749_v13  ;;  %2005 = vrot.lane.b32.xlu0 %v14927_v39, %s7840_s28 }
 0x28d   :  { %2003 = vrot.lane.b32.xlu1 %v14926_v52, %s7840_s28 }
 0x28e   :  { %v1755_v11 = vpop.permute.xlu0 %1754 }
 0x28f   :  { %v1753_v57 = vpop.permute.xlu1 %1752  ;;  %1905 = vst.msk [vmem:[#allocation3 + $0x150] sm:$0xff] %vm1862_vm8, %v1755_v11  ;;  %v14932_v11 = vld [vmem:[#allocation131_spill] sm:$0xff] }
 0x290   :  { %1904 = vst.msk [vmem:[#allocation3 + $0x148] sm:$0xff] %vm1862_vm8, %v1753_v57  ;;  %2009 = vrot.lane.b32.xlu0 %v14929_v60, %s7840_s28  ;;  %v14931_v57 = vld [vmem:[#allocation130_spill] sm:$0xff] }
 0x291   :  { %2007 = vrot.lane.b32.xlu1 %v14928_v18, %s7840_s28 }
 0x292   :  { %v1759_v52 = vpop.permute.xlu0 %1758 }
 0x293   :  { %v1757_v13 = vpop.permute.xlu1 %1756  ;;  %1907 = vst.msk [vmem:[#allocation3 + $0x160] sm:$0xff] %vm1862_vm8, %v1759_v52  ;;  %v14934_v52 = vld [vmem:[#allocation50_spill] sm:$0xff] }
 0x294   :  { %1906 = vst.msk [vmem:[#allocation3 + $0x158] sm:$0xff] %vm1862_vm8, %v1757_v13  ;;  %2013 = vrot.lane.b32.xlu0 %v14931_v57, %s7840_s28  ;;  %v14933_v13 = vld [vmem:[#allocation132_spill] sm:$0xff] }
 0x295   :  { %2011 = vrot.lane.b32.xlu1 %v14930_v49, %s7840_s28 }
 0x296   :  { %v1763_v18 = vpop.permute.xlu0 %1762 }
 0x297   :  { %v1761_v39 = vpop.permute.xlu1 %1760  ;;  %1909 = vst.msk [vmem:[#allocation3 + $0x170] sm:$0xff] %vm1862_vm8, %v1763_v18  ;;  %v14936_v18 = vld [vmem:[#allocation52_spill] sm:$0xff] }
 0x298   :  { %1908 = vst.msk [vmem:[#allocation3 + $0x168] sm:$0xff] %vm1862_vm8, %v1761_v39  ;;  %2017 = vrot.lane.b32.xlu0 %v14933_v13, %s7840_s28  ;;  %v14935_v39 = vld [vmem:[#allocation133_spill] sm:$0xff] }
 0x299   :  { %2015 = vrot.lane.b32.xlu1 %v14932_v11, %s7840_s28 }
 0x29a   :  { %v1767_v49 = vpop.permute.xlu0 %1766 }
 0x29b   :  { %v1765_v60 = vpop.permute.xlu1 %1764  ;;  %1911 = vst.msk [vmem:[#allocation3 + $0x180] sm:$0xff] %vm1862_vm8, %v1767_v49  ;;  %v14938_v49 = vld [vmem:[#allocation53_spill] sm:$0xff] }
 0x29c   :  { %1910 = vst.msk [vmem:[#allocation3 + $0x178] sm:$0xff] %vm1862_vm8, %v1765_v60  ;;  %2021 = vrot.lane.b32.xlu0 %v14935_v39, %s7840_s28  ;;  %v14937_v60 = vld [vmem:[#allocation134_spill] sm:$0xff] }
 0x29d   :  { %2019 = vrot.lane.b32.xlu1 %v14934_v52, %s7840_s28 }
 0x29e   :  { %v1771_v11 = vpop.permute.xlu0 %1770 }
 0x29f   :  { %v1769_v57 = vpop.permute.xlu1 %1768  ;;  %1913 = vst.msk [vmem:[#allocation3 + $0x190] sm:$0xff] %vm1862_vm8, %v1771_v11  ;;  %v14940_v11 = vld [vmem:[#allocation54_spill] sm:$0xff] }
 0x2a0   :  { %1912 = vst.msk [vmem:[#allocation3 + $0x188] sm:$0xff] %vm1862_vm8, %v1769_v57  ;;  %2025 = vrot.lane.b32.xlu0 %v14937_v60, %s7840_s28  ;;  %v14939_v57 = vld [vmem:[#allocation135_spill] sm:$0xff] }
 0x2a1   :  { %2023 = vrot.lane.b32.xlu1 %v14936_v18, %s7840_s28 }
 0x2a2   :  { %v1775_v52 = vpop.permute.xlu0 %1774 }
 0x2a3   :  { %v1773_v13 = vpop.permute.xlu1 %1772  ;;  %1915 = vst.msk [vmem:[#allocation3 + $0x1a0] sm:$0xff] %vm1862_vm8, %v1775_v52  ;;  %v14942_v52 = vld [vmem:[#allocation56_spill] sm:$0xff] }
 0x2a4   :  { %1914 = vst.msk [vmem:[#allocation3 + $0x198] sm:$0xff] %vm1862_vm8, %v1773_v13  ;;  %2029 = vrot.lane.b32.xlu0 %v14939_v57, %s7840_s28  ;;  %v14941_v13 = vld [vmem:[#allocation136_spill] sm:$0xff] }
 0x2a5   :  { %2027 = vrot.lane.b32.xlu1 %v14938_v49, %s7840_s28 }
 0x2a6   :  { %v1779_v18 = vpop.permute.xlu0 %1778 }
 0x2a7   :  { %v1777_v39 = vpop.permute.xlu1 %1776  ;;  %1917 = vst.msk [vmem:[#allocation3 + $0x1b0] sm:$0xff] %vm1862_vm8, %v1779_v18  ;;  %v14944_v18 = vld [vmem:[#allocation65_spill] sm:$0xff] }
 0x2a8   :  { %1916 = vst.msk [vmem:[#allocation3 + $0x1a8] sm:$0xff] %vm1862_vm8, %v1777_v39  ;;  %2033 = vrot.lane.b32.xlu0 %v14941_v13, %s7840_s28  ;;  %v14943_v39 = vld [vmem:[#allocation137_spill] sm:$0xff] }
 0x2a9   :  { %2031 = vrot.lane.b32.xlu1 %v14940_v11, %s7840_s28 }
 0x2aa   :  { %v1783_v49 = vpop.permute.xlu0 %1782 }
 0x2ab   :  { %v1781_v60 = vpop.permute.xlu1 %1780  ;;  %1919 = vst.msk [vmem:[#allocation3 + $0x1c0] sm:$0xff] %vm1862_vm8, %v1783_v49  ;;  %v14946_v49 = vld [vmem:[#allocation139_spill] sm:$0xff] }
 0x2ac   :  { %1918 = vst.msk [vmem:[#allocation3 + $0x1b8] sm:$0xff] %vm1862_vm8, %v1781_v60  ;;  %2037 = vrot.lane.b32.xlu0 %v14943_v39, %s7840_s28  ;;  %v14945_v60 = vld [vmem:[#allocation138_spill] sm:$0xff] }
 0x2ad   :  { %2035 = vrot.lane.b32.xlu1 %v14942_v52, %s7840_s28 }
 0x2ae   :  { %v1787_v11 = vpop.permute.xlu0 %1786 }
 0x2af   :  { %v1785_v57 = vpop.permute.xlu1 %1784  ;;  %1921 = vst.msk [vmem:[#allocation3 + $0x1d0] sm:$0xff] %vm1862_vm8, %v1787_v11  ;;  %v14948_v11 = vld [vmem:[#allocation141_spill] sm:$0xff] }
 0x2b0   :  { %1920 = vst.msk [vmem:[#allocation3 + $0x1c8] sm:$0xff] %vm1862_vm8, %v1785_v57  ;;  %2041 = vrot.lane.b32.xlu0 %v14945_v60, %s7840_s28  ;;  %v14947_v57 = vld [vmem:[#allocation140_spill] sm:$0xff] }
 0x2b1   :  { %2039 = vrot.lane.b32.xlu1 %v14944_v18, %s7840_s28 }
 0x2b2   :  { %v1791_v52 = vpop.permute.xlu0 %1790 }
 0x2b3   :  { %v1789_v13 = vpop.permute.xlu1 %1788  ;;  %1923 = vst.msk [vmem:[#allocation3 + $0x1e0] sm:$0xff] %vm1862_vm8, %v1791_v52 }
 0x2b4   :  { %1922 = vst.msk [vmem:[#allocation3 + $0x1d8] sm:$0xff] %vm1862_vm8, %v1789_v13  ;;  %2045 = vrot.lane.b32.xlu0 %v14947_v57, %s7840_s28 }
 0x2b5   :  { %2043 = vrot.lane.b32.xlu1 %v14946_v49, %s7840_s28 }
 0x2b6   :  { %v1795_v18 = vpop.permute.xlu0 %1794 }
 0x2b7   :  { %v1793_v39 = vpop.permute.xlu1 %1792  ;;  %1925 = vst.msk [vmem:[#allocation3 + $0x1f0] sm:$0xff] %vm1862_vm8, %v1795_v18  ;;  %v1933_v18 = vrot.slane %v9693_v34, 2 }
 0x2b8   :  { %1924 = vst.msk [vmem:[#allocation3 + $0x1e8] sm:$0xff] %vm1862_vm8, %v1793_v39  ;;  %2049 = vrot.lane.b32.xlu0 %v9446_v38, %s7840_s28 }
 0x2b9   :  { %2047 = vrot.lane.b32.xlu1 %v14948_v11, %s7840_s28  ;;  %v1932_v11 = vrot.slane %v9685_v17, 2 }
 0x2ba   :  { %v1938_v52 = vpop.permute.xlu0 %1937 }
 0x2bb   :  { %v1797_v13 = vpop.permute.xlu1 %1796  ;;  %2130 = vst.msk [vmem:[#allocation3] sm:$0xff] %vm2129_vm9, %v1938_v52 }
 0x2bc   :  { %1926 = vst.msk [vmem:[#allocation3 + $0x1f8] sm:$0xff] %vm1862_vm8, %v1797_v13  ;;  %2053 = vrot.lane.b32.xlu0 %v9467_v28, %s7840_s28  ;;  %v1935_v13 = vrot.slane %v9888_v22, 2  ;;  %v10108_v28 = vsel %vm979_vm4, %v1932_v11, %v1933_v18 }
 0x2bd   :  { %2051 = vrot.lane.b32.xlu1 %v9460_v31, %s7840_s28 }
 0x2be   :  { %v1942_v38 = vpop.permute.xlu0 %1941 }
 0x2bf   :  { %v1940_v39 = vpop.permute.xlu1 %1939  ;;  %2132 = vst.msk [vmem:[#allocation3 + $0x10] sm:$0xff] %vm2129_vm9, %v1942_v38  ;;  %v10117_v38 = vsel %vm979_vm4, %v1933_v18, %v1935_v13 }
 0x2c0   :  { %2131 = vst.msk [vmem:[#allocation3 + $0x8] sm:$0xff] %vm2129_vm9, %v1940_v39  ;;  %2057 = vrot.lane.b32.xlu0 %v9484_v50, %s7840_s28 }
 0x2c1   :  { %2055 = vrot.lane.b32.xlu1 %v9480_v3, %s7840_s28 }
 0x2c2   :  { %v1946_v17 = vpop.permute.xlu0 %1945 }
 0x2c3   :  { %v1944_v52 = vpop.permute.xlu1 %1943  ;;  %2134 = vst.msk [vmem:[#allocation3 + $0x20] sm:$0xff] %vm2129_vm9, %v1946_v17  ;;  %v14950_v17 = vld [vmem:[#allocation14_spill] sm:$0xff] }
 0x2c4   :  { %2133 = vst.msk [vmem:[#allocation3 + $0x18] sm:$0xff] %vm2129_vm9, %v1944_v52  ;;  %2061 = vrot.lane.b32.xlu0 %v10108_v28, %s7840_s28 }
 0x2c5   :  { %2059 = vrot.lane.b32.xlu1 %v9493_v19, %s7840_s28 }
 0x2c6   :  { %v1950_v22 = vpop.permute.xlu0 %1949 }
 0x2c7   :  { %v1948_v34 = vpop.permute.xlu1 %1947  ;;  %2136 = vst.msk [vmem:[#allocation3 + $0x30] sm:$0xff] %vm2129_vm9, %v1950_v22  ;;  %v14952_v22 = vld [vmem:[#allocation16_spill] sm:$0xff] }
 0x2c8   :  { %2135 = vst.msk [vmem:[#allocation3 + $0x28] sm:$0xff] %vm2129_vm9, %v1948_v34  ;;  %2198 = vrot.lane.b32.xlu0 %v8150_v0, %s7841_s29 }
 0x2c9   :  { %2063 = vrot.lane.b32.xlu1 %v10117_v38, %s7840_s28 }
 0x2ca   :  { %v1954_v39 = vpop.permute.xlu0 %1953 }
 0x2cb   :  { %v1952_v11 = vpop.permute.xlu1 %1951  ;;  %2138 = vst.msk [vmem:[#allocation3 + $0x40] sm:$0xff] %vm2129_vm9, %v1954_v39 }
 0x2cc   :  { %2137 = vst.msk [vmem:[#allocation3 + $0x38] sm:$0xff] %vm2129_vm9, %v1952_v11  ;;  %2202 = vrot.lane.b32.xlu0 %v8154_v2, %s7841_s29  ;;  %v14953_v11 = vld [vmem:[#allocation19_spill] sm:$0xff] }
 0x2cd   :  { %2200 = vrot.lane.b32.xlu1 %v8152_v1, %s7841_s29 }
 0x2ce   :  { %v1958_v13 = vpop.permute.xlu0 %1957 }
 0x2cf   :  { %v1956_v18 = vpop.permute.xlu1 %1955  ;;  %2140 = vst.msk [vmem:[#allocation3 + $0x50] sm:$0xff] %vm2129_vm9, %v1958_v13  ;;  %v14954_v13 = vld [vmem:[#allocation20_spill] sm:$0xff] }
 0x2d0   :  { %2139 = vst.msk [vmem:[#allocation3 + $0x48] sm:$0xff] %vm2129_vm9, %v1956_v18  ;;  %2206 = vrot.lane.b32.xlu0 %v14725_v20, %s7841_s29 }
 0x2d1   :  { %2204 = vrot.lane.b32.xlu1 %v8166_v7, %s7841_s29 }
 0x2d2   :  { %v1962_v1 = vpop.permute.xlu0 %1961 }
 0x2d3   :  { %v1960_v0 = vpop.permute.xlu1 %1959  ;;  %2142 = vst.msk [vmem:[#allocation3 + $0x60] sm:$0xff] %vm2129_vm9, %v1962_v1 }
 0x2d4   :  { %2141 = vst.msk [vmem:[#allocation3 + $0x58] sm:$0xff] %vm2129_vm9, %v1960_v0  ;;  %2210 = vrot.lane.b32.xlu0 %v14819_v55, %s7841_s29  ;;  %v14949_v55 = vld [vmem:[#allocation13_spill] sm:$0xff] }
 0x2d5   :  { %2208 = vrot.lane.b32.xlu1 %v14818_v26, %s7841_s29 }
 0x2d6   :  { %v1966_v7 = vpop.permute.xlu0 %1965 }
 0x2d7   :  { %v1964_v2 = vpop.permute.xlu1 %1963  ;;  %2144 = vst.msk [vmem:[#allocation3 + $0x70] sm:$0xff] %vm2129_vm9, %v1966_v7 }
 0x2d8   :  { %2143 = vst.msk [vmem:[#allocation3 + $0x68] sm:$0xff] %vm2129_vm9, %v1964_v2  ;;  %2214 = vrot.lane.b32.xlu0 %v14821_v29, %s7841_s29  ;;  %v14951_v29 = vld [vmem:[#allocation15_spill] sm:$0xff] }
 0x2d9   :  { %2212 = vrot.lane.b32.xlu1 %v14820_v36, %s7841_s29  ;;  %v14955_v2 = vld [vmem:[#allocation23_spill] sm:$0xff] }
 0x2da   :  { %v1970_v26 = vpop.permute.xlu0 %1969 }
 0x2db   :  { %v1968_v20 = vpop.permute.xlu1 %1967  ;;  %2146 = vst.msk [vmem:[#allocation3 + $0x80] sm:$0xff] %vm2129_vm9, %v1970_v26 }
 0x2dc   :  { %2145 = vst.msk [vmem:[#allocation3 + $0x78] sm:$0xff] %vm2129_vm9, %v1968_v20  ;;  %2218 = vrot.lane.b32.xlu0 %v14949_v55, %s7841_s29 }
 0x2dd   :  { %2216 = vrot.lane.b32.xlu1 %v14822_v12, %s7841_s29 }
 0x2de   :  { %v1974_v36 = vpop.permute.xlu0 %1973 }
 0x2df   :  { %v1972_v52 = vpop.permute.xlu1 %1971  ;;  %2148 = vst.msk [vmem:[#allocation3 + $0x90] sm:$0xff] %vm2129_vm9, %v1974_v36 }
 0x2e0   :  { %2147 = vst.msk [vmem:[#allocation3 + $0x88] sm:$0xff] %vm2129_vm9, %v1972_v52  ;;  %2222 = vrot.lane.b32.xlu0 %v14951_v29, %s7841_s29  ;;  %v14957_v52 = vld [vmem:[#allocation41_spill] sm:$0xff] }
 0x2e1   :  { %2220 = vrot.lane.b32.xlu1 %v14950_v17, %s7841_s29  ;;  %v10208_v17 = vld [vmem:[#allocation2 + $0x198] sm:$0xff]  ;;  %v7810_v29 = vld [vmem:[#allocation2 + $0x188] sm:$0xff] }
 0x2e2   :  { %v1978_v12 = vpop.permute.xlu0 %1977 }
 0x2e3   :  { %v1976_v34 = vpop.permute.xlu1 %1975  ;;  %2150 = vst.msk [vmem:[#allocation3 + $0xa0] sm:$0xff] %vm2129_vm9, %v1978_v12 }
 0x2e4   :  { %2149 = vst.msk [vmem:[#allocation3 + $0x98] sm:$0xff] %vm2129_vm9, %v1976_v34  ;;  %2226 = vrot.lane.b32.xlu0 %v14953_v11, %s7841_s29  ;;  %v10215_v34 = vld [vmem:[#allocation2 + $0x1a0] sm:$0xff] }
 0x2e5   :  { %2224 = vrot.lane.b32.xlu1 %v14952_v22, %s7841_s29 }
 0x2e6   :  { %v1982_v18 = vpop.permute.xlu0 %1981 }
 0x2e7   :  { %v1980_v39 = vpop.permute.xlu1 %1979  ;;  %2152 = vst.msk [vmem:[#allocation3 + $0xb0] sm:$0xff] %vm2129_vm9, %v1982_v18 }
 0x2e8   :  { %2151 = vst.msk [vmem:[#allocation3 + $0xa8] sm:$0xff] %vm2129_vm9, %v1980_v39  ;;  %2230 = vrot.lane.b32.xlu0 %v14829_v58, %s7841_s29 }
 0x2e9   :  { %2228 = vrot.lane.b32.xlu1 %v14954_v13, %s7841_s29 }
 0x2ea   :  { %v1986_v1 = vpop.permute.xlu0 %1985 }
 0x2eb   :  { %v1984_v0 = vpop.permute.xlu1 %1983  ;;  %2154 = vst.msk [vmem:[#allocation3 + $0xc0] sm:$0xff] %vm2129_vm9, %v1986_v1 }
 0x2ec   :  { %2153 = vst.msk [vmem:[#allocation3 + $0xb8] sm:$0xff] %vm2129_vm9, %v1984_v0  ;;  %2234 = vrot.lane.b32.xlu0 %v14831_v56, %s7841_s29  ;;  %v14958_v0 = vld [vmem:[#allocation66_spill] sm:$0xff] }
 0x2ed   :  { %2232 = vrot.lane.b32.xlu1 %v14955_v2, %s7841_s29  ;;  %v14960_v2 = vld [vmem:[#allocation68_spill] sm:$0xff] }
 0x2ee   :  { %v1990_v20 = vpop.permute.xlu0 %1989 }
 0x2ef   :  { %v1988_v7 = vpop.permute.xlu1 %1987  ;;  %2156 = vst.msk [vmem:[#allocation3 + $0xd0] sm:$0xff] %vm2129_vm9, %v1990_v20 }
 0x2f0   :  { %2155 = vst.msk [vmem:[#allocation3 + $0xc8] sm:$0xff] %vm2129_vm9, %v1988_v7  ;;  %2238 = vrot.lane.b32.xlu0 %v14765_v59, %s7841_s29 }
 0x2f1   :  { %2236 = vrot.lane.b32.xlu1 %v14832_v6, %s7841_s29 }
 0x2f2   :  { %v1994_v26 = vpop.permute.xlu0 %1993 }
 0x2f3   :  { %v1992_v58 = vpop.permute.xlu1 %1991  ;;  %2158 = vst.msk [vmem:[#allocation3 + $0xe0] sm:$0xff] %vm2129_vm9, %v1994_v26  ;;  %v14963_v26 = vld [vmem:[#allocation74_spill] sm:$0xff] }
 0x2f4   :  { %2157 = vst.msk [vmem:[#allocation3 + $0xd8] sm:$0xff] %vm2129_vm9, %v1992_v58  ;;  %2242 = vrot.lane.b32.xlu0 %v8293_v46, %s7841_s29  ;;  %v14956_v46 = vld [vmem:[#allocation40_spill] sm:$0xff]  ;;  %v14962_v58 = vld [vmem:[#allocation71_spill] sm:$0xff] }
 0x2f5   :  { %2240 = vrot.lane.b32.xlu1 %v14766_v14, %s7841_s29 }
 0x2f6   :  { %v1998_v6 = vpop.permute.xlu0 %1997 }
 0x2f7   :  { %v1996_v56 = vpop.permute.xlu1 %1995  ;;  %2160 = vst.msk [vmem:[#allocation3 + $0xf0] sm:$0xff] %vm2129_vm9, %v1998_v6 }
 0x2f8   :  { %2159 = vst.msk [vmem:[#allocation3 + $0xe8] sm:$0xff] %vm2129_vm9, %v1996_v56  ;;  %2246 = vrot.lane.b32.xlu0 %v8447_v44, %s7841_s29  ;;  %v7809_v44 = vld [vmem:[#allocation2 + $0x180] sm:$0xff] }
 0x2f9   :  { %2244 = vrot.lane.b32.xlu1 %v8430_v61, %s7841_s29 }
 0x2fa   :  { %v2002_v14 = vpop.permute.xlu0 %2001 }
 0x2fb   :  { %v2000_v59 = vpop.permute.xlu1 %1999  ;;  %2162 = vst.msk [vmem:[#allocation3 + $0x100] sm:$0xff] %vm2129_vm9, %v2002_v14  ;;  %v7811_v14 = vld [vmem:[#allocation2 + $0x330] sm:$0xff] }
 0x2fc   :  { %2161 = vst.msk [vmem:[#allocation3 + $0xf8] sm:$0xff] %vm2129_vm9, %v2000_v59  ;;  %2250 = vrot.lane.b32.xlu0 %v14956_v46, %s7841_s29  ;;  %v14964_v59 = vld [vmem:[#allocation75_spill] sm:$0xff] }
 0x2fd   :  { %2248 = vrot.lane.b32.xlu1 %v8449_v47, %s7841_s29 }
 0x2fe   :  { %v2006_v61 = vpop.permute.xlu0 %2005 }
 0x2ff   :  { %v2004_v55 = vpop.permute.xlu1 %2003  ;;  %2164 = vst.msk [vmem:[#allocation3 + $0x110] sm:$0xff] %vm2129_vm9, %v2006_v61 }
 0x300   :  { %2163 = vst.msk [vmem:[#allocation3 + $0x108] sm:$0xff] %vm2129_vm9, %v2004_v55  ;;  %2254 = vrot.lane.b32.xlu0 %v7809_v44, %s7841_s29  ;;  %v10306_v55 = vld [vmem:[#allocation2 + $0x348] sm:$0xff]  ;;  %v10313_v44 = vld [vmem:[#allocation2 + $0x350] sm:$0xff] }
 0x301   :  { %2252 = vrot.lane.b32.xlu1 %v14957_v52, %s7841_s29  ;;  %v7812_v52 = vld [vmem:[#allocation2 + $0x338] sm:$0xff] }
 0x302   :  { %v2010_v47 = vpop.permute.xlu0 %2009 }
 0x303   :  { %v2008_v36 = vpop.permute.xlu1 %2007  ;;  %2166 = vst.msk [vmem:[#allocation3 + $0x120] sm:$0xff] %vm2129_vm9, %v2010_v47 }
 0x304   :  { %2165 = vst.msk [vmem:[#allocation3 + $0x118] sm:$0xff] %vm2129_vm9, %v2008_v36  ;;  %2258 = vrot.lane.b32.xlu0 %v10208_v17, %s7841_s29 }
 0x305   :  { %2256 = vrot.lane.b32.xlu1 %v7810_v29, %s7841_s29  ;;  %v14965_v29 = vld [vmem:[#allocation11_spill] sm:$0xff] }
 0x306   :  { %v2014_v22 = vpop.permute.xlu0 %2013 }
 0x307   :  { %v2012_v12 = vpop.permute.xlu1 %2011  ;;  %2168 = vst.msk [vmem:[#allocation3 + $0x130] sm:$0xff] %vm2129_vm9, %v2014_v22 }
 0x308   :  { %2167 = vst.msk [vmem:[#allocation3 + $0x128] sm:$0xff] %vm2129_vm9, %v2012_v12  ;;  %2262 = vrot.lane.b32.xlu0 %v14780_v40, %s7841_s29 }
 0x309   :  { %2260 = vrot.lane.b32.xlu1 %v10215_v34, %s7841_s29 }
 0x30a   :  { %v2018_v39 = vpop.permute.xlu0 %2017 }
 0x30b   :  { %v2016_v11 = vpop.permute.xlu1 %2015  ;;  %2170 = vst.msk [vmem:[#allocation3 + $0x140] sm:$0xff] %vm2129_vm9, %v2018_v39  ;;  %v14967_v39 = vld [vmem:[#allocation21_spill] sm:$0xff] }
 0x30c   :  { %2169 = vst.msk [vmem:[#allocation3 + $0x138] sm:$0xff] %vm2129_vm9, %v2016_v11  ;;  %2266 = vrot.lane.b32.xlu0 %v8513_v62, %s7841_s29  ;;  %v14966_v11 = vld [vmem:[#allocation17_spill] sm:$0xff] }
 0x30d   :  { %2264 = vrot.lane.b32.xlu1 %v14781_v4, %s7841_s29 }
 0x30e   :  { %v2022_v13 = vpop.permute.xlu0 %2021 }
 0x30f   :  { %v2020_v18 = vpop.permute.xlu1 %2019  ;;  %2172 = vst.msk [vmem:[#allocation3 + $0x150] sm:$0xff] %vm2129_vm9, %v2022_v13 }
 0x310   :  { %2171 = vst.msk [vmem:[#allocation3 + $0x148] sm:$0xff] %vm2129_vm9, %v2020_v18  ;;  %2270 = vrot.lane.b32.xlu0 %v8521_v51, %s7841_s29 }
 0x311   :  { %2268 = vrot.lane.b32.xlu1 %v8515_v53, %s7841_s29 }
 0x312   :  { %v2026_v4 = vpop.permute.xlu0 %2025 }
 0x313   :  { %v2024_v40 = vpop.permute.xlu1 %2023  ;;  %2174 = vst.msk [vmem:[#allocation3 + $0x160] sm:$0xff] %vm2129_vm9, %v2026_v4  ;;  %v14969_v4 = vld [vmem:[#allocation31_spill] sm:$0xff] }
 0x314   :  { %2173 = vst.msk [vmem:[#allocation3 + $0x158] sm:$0xff] %vm2129_vm9, %v2024_v40  ;;  %2274 = vrot.lane.b32.xlu0 %v8533_v43, %s7841_s29  ;;  %v14968_v40 = vld [vmem:[#allocation29_spill] sm:$0xff] }
 0x315   :  { %2272 = vrot.lane.b32.xlu1 %v8523_v5, %s7841_s29 }
 0x316   :  { %v2030_v53 = vpop.permute.xlu0 %2029 }
 0x317   :  { %v2028_v62 = vpop.permute.xlu1 %2027  ;;  %2176 = vst.msk [vmem:[#allocation3 + $0x170] sm:$0xff] %vm2129_vm9, %v2030_v53 }
 0x318   :  { %2175 = vst.msk [vmem:[#allocation3 + $0x168] sm:$0xff] %vm2129_vm9, %v2028_v62  ;;  %2278 = vrot.lane.b32.xlu0 %v8547_v16, %s7841_s29 }
 0x319   :  { %2276 = vrot.lane.b32.xlu1 %v8535_v30, %s7841_s29 }
 0x31a   :  { %v2034_v5 = vpop.permute.xlu0 %2033 }
 0x31b   :  { %v2032_v51 = vpop.permute.xlu1 %2031  ;;  %2178 = vst.msk [vmem:[#allocation3 + $0x180] sm:$0xff] %vm2129_vm9, %v2034_v5  ;;  %v14971_v5 = vld [vmem:[#allocation33_spill] sm:$0xff] }
 0x31c   :  { %2177 = vst.msk [vmem:[#allocation3 + $0x178] sm:$0xff] %vm2129_vm9, %v2032_v51  ;;  %2282 = vrot.lane.b32.xlu0 %v8551_v8, %s7841_s29  ;;  %v14970_v51 = vld [vmem:[#allocation32_spill] sm:$0xff] }
 0x31d   :  { %2280 = vrot.lane.b32.xlu1 %v14790_v41, %s7841_s29 }
 0x31e   :  { %v2038_v30 = vpop.permute.xlu0 %2037 }
 0x31f   :  { %v2036_v43 = vpop.permute.xlu1 %2035  ;;  %2180 = vst.msk [vmem:[#allocation3 + $0x190] sm:$0xff] %vm2129_vm9, %v2038_v30 }
 0x320   :  { %2179 = vst.msk [vmem:[#allocation3 + $0x188] sm:$0xff] %vm2129_vm9, %v2036_v43  ;;  %2286 = vrot.lane.b32.xlu0 %v8568_v37, %s7841_s29 }
 0x321   :  { %2284 = vrot.lane.b32.xlu1 %v14793_v15, %s7841_s29 }
 0x322   :  { %v2042_v41 = vpop.permute.xlu0 %2041 }
 0x323   :  { %v2040_v16 = vpop.permute.xlu1 %2039  ;;  %2182 = vst.msk [vmem:[#allocation3 + $0x1a0] sm:$0xff] %vm2129_vm9, %v2042_v41  ;;  %v14973_v41 = vld [vmem:[#allocation36_spill] sm:$0xff] }
 0x324   :  { %2181 = vst.msk [vmem:[#allocation3 + $0x198] sm:$0xff] %vm2129_vm9, %v2040_v16  ;;  %2290 = vrot.lane.b32.xlu0 %v8579_v33, %s7841_s29  ;;  %v14972_v16 = vld [vmem:[#allocation34_spill] sm:$0xff] }
 0x325   :  { %2288 = vrot.lane.b32.xlu1 %v14796_v54, %s7841_s29 }
 0x326   :  { %v2046_v15 = vpop.permute.xlu0 %2045 }
 0x327   :  { %v2044_v8 = vpop.permute.xlu1 %2043  ;;  %2184 = vst.msk [vmem:[#allocation3 + $0x1b0] sm:$0xff] %vm2129_vm9, %v2046_v15 }
 0x328   :  { %2183 = vst.msk [vmem:[#allocation3 + $0x1a8] sm:$0xff] %vm2129_vm9, %v2044_v8  ;;  %2294 = vrot.lane.b32.xlu0 %v8592_v25, %s7841_s29 }
 0x329   :  { %2292 = vrot.lane.b32.xlu1 %v14799_v24, %s7841_s29 }
 0x32a   :  { %v2050_v54 = vpop.permute.xlu0 %2049 }
 0x32b   :  { %v2048_v37 = vpop.permute.xlu1 %2047  ;;  %2186 = vst.msk [vmem:[#allocation3 + $0x1c0] sm:$0xff] %vm2129_vm9, %v2050_v54  ;;  %v14975_v54 = vld [vmem:[#allocation38_spill] sm:$0xff] }
 0x32c   :  { %2185 = vst.msk [vmem:[#allocation3 + $0x1b8] sm:$0xff] %vm2129_vm9, %v2048_v37  ;;  %2298 = vrot.lane.b32.xlu0 %v8701_v63, %s7841_s29  ;;  %v14959_v63 = vld [vmem:[#allocation67_spill] sm:$0xff]  ;;  %v14974_v37 = vld [vmem:[#allocation37_spill] sm:$0xff] }
 0x32d   :  { %2296 = vrot.lane.b32.xlu1 %v14802_v23, %s7841_s29 }
 0x32e   :  { %v2054_v24 = vpop.permute.xlu0 %2053 }
 0x32f   :  { %v2052_v33 = vpop.permute.xlu1 %2051  ;;  %2188 = vst.msk [vmem:[#allocation3 + $0x1d0] sm:$0xff] %vm2129_vm9, %v2054_v24 }
 0x330   :  { %2187 = vst.msk [vmem:[#allocation3 + $0x1c8] sm:$0xff] %vm2129_vm9, %v2052_v33  ;;  %2302 = vrot.lane.b32.xlu0 %v8709_v27, %s7841_s29  ;;  %v14961_v27 = vld [vmem:[#allocation70_spill] sm:$0xff] }
 0x331   :  { %2300 = vrot.lane.b32.xlu1 %v14805_v42, %s7841_s29 }
 0x332   :  { %v2058_v23 = vpop.permute.xlu0 %2057 }
 0x333   :  { %v2056_v25 = vpop.permute.xlu1 %2055  ;;  %2190 = vst.msk [vmem:[#allocation3 + $0x1e0] sm:$0xff] %vm2129_vm9, %v2058_v23  ;;  %v14977_v23 = vld [vmem:[#allocation46_spill] sm:$0xff] }
 0x334   :  { %2189 = vst.msk [vmem:[#allocation3 + $0x1d8] sm:$0xff] %vm2129_vm9, %v2056_v25  ;;  %2306 = vrot.lane.b32.xlu0 %v14959_v63, %s7841_s29  ;;  %v14976_v25 = vld [vmem:[#allocation44_spill] sm:$0xff] }
 0x335   :  { %2304 = vrot.lane.b32.xlu1 %v14958_v0, %s7841_s29 }
 0x336   :  { %v2062_v42 = vpop.permute.xlu0 %2061 }
 0x337   :  { %v2060_v1 = vpop.permute.xlu1 %2059  ;;  %2192 = vst.msk [vmem:[#allocation3 + $0x1f0] sm:$0xff] %vm2129_vm9, %v2062_v42  ;;  %v14979_v42 = vld [vmem:[#allocation51_spill] sm:$0xff] }
 0x338   :  { %2191 = vst.msk [vmem:[#allocation3 + $0x1e8] sm:$0xff] %vm2129_vm9, %v2060_v1  ;;  %2310 = vrot.lane.b32.xlu0 %v14961_v27, %s7841_s29  ;;  %v14978_v1 = vld [vmem:[#allocation49_spill] sm:$0xff] }
 0x339   :  { %2308 = vrot.lane.b32.xlu1 %v14960_v2, %s7841_s29 }
 0x33a   :  { %v2199_v20 = vpop.permute.xlu0 %2198 }
 0x33b   :  { %v2064_v7 = vpop.permute.xlu1 %2063  ;;  %2391 = vst.msk [vmem:[#allocation3] sm:$0xff] %vm2390_vm10, %v2199_v20  ;;  %v14981_v20 = vld [vmem:[#allocation57_spill] sm:$0xff] }
 0x33c   :  { %2193 = vst.msk [vmem:[#allocation3 + $0x1f8] sm:$0xff] %vm2129_vm9, %v2064_v7  ;;  %2314 = vrot.lane.b32.xlu0 %v14963_v26, %s7841_s29  ;;  %v14980_v7 = vld [vmem:[#allocation55_spill] sm:$0xff] }
 0x33d   :  { %2312 = vrot.lane.b32.xlu1 %v14962_v58, %s7841_s29 }
 0x33e   :  { %v2203_v6 = vpop.permute.xlu0 %2202 }
 0x33f   :  { %v2201_v56 = vpop.permute.xlu1 %2200  ;;  %2393 = vst.msk [vmem:[#allocation3 + $0x10] sm:$0xff] %vm2390_vm10, %v2203_v6  ;;  %v14983_v6 = vld [vmem:[#allocation60_spill] sm:$0xff] }
 0x340   :  { %2392 = vst.msk [vmem:[#allocation3 + $0x8] sm:$0xff] %vm2390_vm10, %v2201_v56  ;;  %2318 = vrot.lane.b32.xlu0 %v7811_v14, %s7841_s29  ;;  %v14982_v56 = vld [vmem:[#allocation59_spill] sm:$0xff] }
 0x341   :  { %2316 = vrot.lane.b32.xlu1 %v14964_v59, %s7841_s29 }
 0x342   :  { %v2207_v61 = vpop.permute.xlu0 %2206 }
 0x343   :  { %v2205_v46 = vpop.permute.xlu1 %2204  ;;  %2395 = vst.msk [vmem:[#allocation3 + $0x20] sm:$0xff] %vm2390_vm10, %v2207_v61  ;;  %v14985_v61 = vld [vmem:[#allocation62_spill] sm:$0xff] }
 0x344   :  { %2394 = vst.msk [vmem:[#allocation3 + $0x18] sm:$0xff] %vm2390_vm10, %v2205_v46  ;;  %2322 = vrot.lane.b32.xlu0 %v10306_v55, %s7841_s29  ;;  %v14984_v46 = vld [vmem:[#allocation61_spill] sm:$0xff] }
 0x345   :  { %2320 = vrot.lane.b32.xlu1 %v7812_v52, %s7841_s29 }
 0x346   :  { %v2211_v47 = vpop.permute.xlu0 %2210 }
 0x347   :  { %v2209_v36 = vpop.permute.xlu1 %2208  ;;  %2397 = vst.msk [vmem:[#allocation3 + $0x30] sm:$0xff] %vm2390_vm10, %v2211_v47  ;;  %v14986_v47 = vld [vmem:[#allocation63_spill] sm:$0xff] }
 0x348   :  { %2396 = vst.msk [vmem:[#allocation3 + $0x28] sm:$0xff] %vm2390_vm10, %v2209_v36  ;;  %2467 = vrot.lane.b32.xlu0 %v14965_v29, %s7842_s30  ;;  %v14987_v29 = vld [vmem:[#allocation64_spill] sm:$0xff] }
 0x349   :  { %2324 = vrot.lane.b32.xlu1 %v10313_v44, %s7841_s29 }
 0x34a   :  { %v2215_v22 = vpop.permute.xlu0 %2214 }
 0x34b   :  { %v2213_v12 = vpop.permute.xlu1 %2212  ;;  %2399 = vst.msk [vmem:[#allocation3 + $0x40] sm:$0xff] %vm2390_vm10, %v2215_v22 }
 0x34c   :  { %2398 = vst.msk [vmem:[#allocation3 + $0x38] sm:$0xff] %vm2390_vm10, %v2213_v12  ;;  %2471 = vrot.lane.b32.xlu0 %v14967_v39, %s7842_s30  ;;  %v14989_v39 = vld [vmem:[#allocation72_spill] sm:$0xff] }
 0x34d   :  { %2469 = vrot.lane.b32.xlu1 %v14966_v11, %s7842_s30  ;;  %v14988_v11 = vld [vmem:[#allocation69_spill] sm:$0xff] }
 0x34e   :  { %v2219_v13 = vpop.permute.xlu0 %2218 }
 0x34f   :  { %v2217_v18 = vpop.permute.xlu1 %2216  ;;  %2401 = vst.msk [vmem:[#allocation3 + $0x50] sm:$0xff] %vm2390_vm10, %v2219_v13 }
 0x350   :  { %2400 = vst.msk [vmem:[#allocation3 + $0x48] sm:$0xff] %vm2390_vm10, %v2217_v18  ;;  %2475 = vrot.lane.b32.xlu0 %v14969_v4, %s7842_s30  ;;  %v14991_v4 = vld [vmem:[#allocation77_spill] sm:$0xff] }
 0x351   :  { %2473 = vrot.lane.b32.xlu1 %v14968_v40, %s7842_s30  ;;  %v14990_v40 = vld [vmem:[#allocation76_spill] sm:$0xff] }
 0x352   :  { %v2223_v53 = vpop.permute.xlu0 %2222 }
 0x353   :  { %v2221_v62 = vpop.permute.xlu1 %2220  ;;  %2403 = vst.msk [vmem:[#allocation3 + $0x60] sm:$0xff] %vm2390_vm10, %v2223_v53  ;;  %v2458_v53 = vrot.slane %v10215_v34, 1 }
 0x354   :  { %2402 = vst.msk [vmem:[#allocation3 + $0x58] sm:$0xff] %vm2390_vm10, %v2221_v62  ;;  %2479 = vrot.lane.b32.xlu0 %v14971_v5, %s7842_s30  ;;  %v2457_v62 = vrot.slane %v10208_v17, 1  ;;  %v10401_v5 = vld [vmem:[#allocation2 + $0x1a8] sm:$0x3] }
 0x355   :  { %2477 = vrot.lane.b32.xlu1 %v14970_v51, %s7842_s30 }
 0x356   :  { %v2227_v30 = vpop.permute.xlu0 %2226 }
 0x357   :  { %v2225_v43 = vpop.permute.xlu1 %2224  ;;  %2405 = vst.msk [vmem:[#allocation3 + $0x70] sm:$0xff] %vm2390_vm10, %v2227_v30  ;;  %v14992_v30 = vld [vmem:[#allocation78_spill] sm:$0xff] }
 0x358   :  { %2404 = vst.msk [vmem:[#allocation3 + $0x68] sm:$0xff] %vm2390_vm10, %v2225_v43  ;;  %2483 = vrot.lane.b32.xlu0 %v14973_v41, %s7842_s30  ;;  %v2460_v41 = vrot.slane %v10401_v5, 1 }
 0x359   :  { %2481 = vrot.lane.b32.xlu1 %v14972_v16, %s7842_s30  ;;  %v14993_v16 = vld [vmem:[#allocation6_spill] sm:$0xff] }
 0x35a   :  { %v2231_v15 = vpop.permute.xlu0 %2230 }
 0x35b   :  { %v2229_v8 = vpop.permute.xlu1 %2228  ;;  %2407 = vst.msk [vmem:[#allocation3 + $0x80] sm:$0xff] %vm2390_vm10, %v2231_v15  ;;  %v2459_v15 = vsel %vm561_vm2, %v2457_v62, %v2458_v53 }
 0x35c   :  { %2406 = vst.msk [vmem:[#allocation3 + $0x78] sm:$0xff] %vm2390_vm10, %v2229_v8  ;;  %2487 = vrot.lane.b32.xlu0 %v14975_v54, %s7842_s30  ;;  %v14994_v54 = vld [vmem:[#allocation7_spill] sm:$0xff] }
 0x35d   :  { %2485 = vrot.lane.b32.xlu1 %v14974_v37, %s7842_s30 }
 0x35e   :  { %v2235_v24 = vpop.permute.xlu0 %2234 }
 0x35f   :  { %v2233_v33 = vpop.permute.xlu1 %2232  ;;  %2409 = vst.msk [vmem:[#allocation3 + $0x90] sm:$0xff] %vm2390_vm10, %v2235_v24 }
 0x360   :  { %2408 = vst.msk [vmem:[#allocation3 + $0x88] sm:$0xff] %vm2390_vm10, %v2233_v33  ;;  %2491 = vrot.lane.b32.xlu0 %v14977_v23, %s7842_s30  ;;  %v2461_v33 = vsel %vm561_vm2, %v2458_v53, %v2460_v41  ;;  %v14995_v23 = vld [vmem:[#allocation82_spill] sm:$0xff]  ;;  %v15012_v41 = vld [vmem:[#allocation99_spill] sm:$0xff] }
 0x361   :  { %2489 = vrot.lane.b32.xlu1 %v14976_v25, %s7842_s30 }
 0x362   :  { %v2239_v63 = vpop.permute.xlu0 %2238 }
 0x363   :  { %v2237_v0 = vpop.permute.xlu1 %2236  ;;  %2411 = vst.msk [vmem:[#allocation3 + $0xa0] sm:$0xff] %vm2390_vm10, %v2239_v63 }
 0x364   :  { %2410 = vst.msk [vmem:[#allocation3 + $0x98] sm:$0xff] %vm2390_vm10, %v2237_v0  ;;  %2495 = vrot.lane.b32.xlu0 %v14979_v42, %s7842_s30  ;;  %v14997_v42 = vld [vmem:[#allocation84_spill] sm:$0xff] }
 0x365   :  { %2493 = vrot.lane.b32.xlu1 %v14978_v1, %s7842_s30  ;;  %v14996_v1 = vld [vmem:[#allocation83_spill] sm:$0xff] }
 0x366   :  { %v2243_v27 = vpop.permute.xlu0 %2242 }
 0x367   :  { %v2241_v2 = vpop.permute.xlu1 %2240  ;;  %2413 = vst.msk [vmem:[#allocation3 + $0xb0] sm:$0xff] %vm2390_vm10, %v2243_v27 }
 0x368   :  { %2412 = vst.msk [vmem:[#allocation3 + $0xa8] sm:$0xff] %vm2390_vm10, %v2241_v2  ;;  %2499 = vrot.lane.b32.xlu0 %v14981_v20, %s7842_s30  ;;  %v14999_v20 = vld [vmem:[#allocation86_spill] sm:$0xff] }
 0x369   :  { %2497 = vrot.lane.b32.xlu1 %v14980_v7, %s7842_s30  ;;  %v14998_v7 = vld [vmem:[#allocation85_spill] sm:$0xff] }
 0x36a   :  { %v2247_v26 = vpop.permute.xlu0 %2246 }
 0x36b   :  { %v2245_v58 = vpop.permute.xlu1 %2244  ;;  %2415 = vst.msk [vmem:[#allocation3 + $0xc0] sm:$0xff] %vm2390_vm10, %v2247_v26 }
 0x36c   :  { %2414 = vst.msk [vmem:[#allocation3 + $0xb8] sm:$0xff] %vm2390_vm10, %v2245_v58  ;;  %2503 = vrot.lane.b32.xlu0 %v14983_v6, %s7842_s30  ;;  %v15001_v6 = vld [vmem:[#allocation88_spill] sm:$0xff] }
 0x36d   :  { %2501 = vrot.lane.b32.xlu1 %v14982_v56, %s7842_s30  ;;  %v15000_v56 = vld [vmem:[#allocation87_spill] sm:$0xff] }
 0x36e   :  { %v2251_v14 = vpop.permute.xlu0 %2250 }
 0x36f   :  { %v2249_v59 = vpop.permute.xlu1 %2248  ;;  %2417 = vst.msk [vmem:[#allocation3 + $0xd0] sm:$0xff] %vm2390_vm10, %v2251_v14 }
 0x370   :  { %2416 = vst.msk [vmem:[#allocation3 + $0xc8] sm:$0xff] %vm2390_vm10, %v2249_v59  ;;  %2507 = vrot.lane.b32.xlu0 %v14985_v61, %s7842_s30  ;;  %v15003_v61 = vld [vmem:[#allocation90_spill] sm:$0xff] }
 0x371   :  { %2505 = vrot.lane.b32.xlu1 %v14984_v46, %s7842_s30  ;;  %v15002_v46 = vld [vmem:[#allocation89_spill] sm:$0xff] }
 0x372   :  { %v2255_v36 = vpop.permute.xlu0 %2254 }
 0x373   :  { %v2253_v52 = vpop.permute.xlu1 %2252  ;;  %2419 = vst.msk [vmem:[#allocation3 + $0xe0] sm:$0xff] %vm2390_vm10, %v2255_v36 }
 0x374   :  { %2418 = vst.msk [vmem:[#allocation3 + $0xd8] sm:$0xff] %vm2390_vm10, %v2253_v52  ;;  %2511 = vrot.lane.b32.xlu0 %v14987_v29, %s7842_s30  ;;  %v15005_v29 = vld [vmem:[#allocation92_spill] sm:$0xff] }
 0x375   :  { %2509 = vrot.lane.b32.xlu1 %v14986_v47, %s7842_s30  ;;  %v15004_v47 = vld [vmem:[#allocation91_spill] sm:$0xff] }
 0x376   :  { %v2259_v22 = vpop.permute.xlu0 %2258 }
 0x377   :  { %v2257_v12 = vpop.permute.xlu1 %2256  ;;  %2421 = vst.msk [vmem:[#allocation3 + $0xf0] sm:$0xff] %vm2390_vm10, %v2259_v22 }
 0x378   :  { %2420 = vst.msk [vmem:[#allocation3 + $0xe8] sm:$0xff] %vm2390_vm10, %v2257_v12  ;;  %2515 = vrot.lane.b32.xlu0 %v14989_v39, %s7842_s30  ;;  %v15007_v39 = vld [vmem:[#allocation94_spill] sm:$0xff] }
 0x379   :  { %2513 = vrot.lane.b32.xlu1 %v14988_v11, %s7842_s30  ;;  %v15006_v11 = vld [vmem:[#allocation93_spill] sm:$0xff] }
 0x37a   :  { %v2263_v13 = vpop.permute.xlu0 %2262 }
 0x37b   :  { %v2261_v18 = vpop.permute.xlu1 %2260  ;;  %2423 = vst.msk [vmem:[#allocation3 + $0x100] sm:$0xff] %vm2390_vm10, %v2263_v13 }
 0x37c   :  { %2422 = vst.msk [vmem:[#allocation3 + $0xf8] sm:$0xff] %vm2390_vm10, %v2261_v18  ;;  %2519 = vrot.lane.b32.xlu0 %v14991_v4, %s7842_s30  ;;  %v15009_v4 = vld [vmem:[#allocation96_spill] sm:$0xff] }
 0x37d   :  { %2517 = vrot.lane.b32.xlu1 %v14990_v40, %s7842_s30  ;;  %v15008_v40 = vld [vmem:[#allocation95_spill] sm:$0xff] }
 0x37e   :  { %v2267_v43 = vpop.permute.xlu0 %2266 }
 0x37f   :  { %v2265_v51 = vpop.permute.xlu1 %2264  ;;  %2425 = vst.msk [vmem:[#allocation3 + $0x110] sm:$0xff] %vm2390_vm10, %v2267_v43  ;;  %v15011_v43 = vld [vmem:[#allocation98_spill] sm:$0xff] }
 0x380   :  { %2424 = vst.msk [vmem:[#allocation3 + $0x108] sm:$0xff] %vm2390_vm10, %v2265_v51  ;;  %2523 = vrot.lane.b32.xlu0 %v14993_v16, %s7842_s30  ;;  %v15010_v51 = vld [vmem:[#allocation97_spill] sm:$0xff] }
 0x381   :  { %2521 = vrot.lane.b32.xlu1 %v14992_v30, %s7842_s30 }
 0x382   :  { %v2271_v37 = vpop.permute.xlu0 %2270 }
 0x383   :  { %v2269_v8 = vpop.permute.xlu1 %2268  ;;  %2427 = vst.msk [vmem:[#allocation3 + $0x120] sm:$0xff] %vm2390_vm10, %v2271_v37 }
 0x384   :  { %2426 = vst.msk [vmem:[#allocation3 + $0x118] sm:$0xff] %vm2390_vm10, %v2269_v8  ;;  %2527 = vrot.lane.b32.xlu0 %v2459_v15, %s7842_s30  ;;  %v15013_v8 = vld [vmem:[#allocation100_spill] sm:$0xff] }
 0x385   :  { %2525 = vrot.lane.b32.xlu1 %v14994_v54, %s7842_s30  ;;  %v15014_v54 = vld [vmem:[#allocation101_spill] sm:$0xff] }
 0x386   :  { %v2275_v25 = vpop.permute.xlu0 %2274 }
 0x387   :  { %v2273_v24 = vpop.permute.xlu1 %2272  ;;  %2429 = vst.msk [vmem:[#allocation3 + $0x130] sm:$0xff] %vm2390_vm10, %v2275_v25 }
 0x388   :  { %2428 = vst.msk [vmem:[#allocation3 + $0x128] sm:$0xff] %vm2390_vm10, %v2273_v24  ;;  %2531 = vrot.lane.b32.xlu0 %v14995_v23, %s7842_s30  ;;  %v15016_v23 = vld [vmem:[#allocation103_spill] sm:$0xff] }
 0x389   :  { %2529 = vrot.lane.b32.xlu1 %v2461_v33, %s7842_s30  ;;  %v15015_v33 = vld [vmem:[#allocation102_spill] sm:$0xff] }
 0x38a   :  { %v2279_v63 = vpop.permute.xlu0 %2278 }
 0x38b   :  { %v2277_v0 = vpop.permute.xlu1 %2276  ;;  %2431 = vst.msk [vmem:[#allocation3 + $0x140] sm:$0xff] %vm2390_vm10, %v2279_v63 }
 0x38c   :  { %2430 = vst.msk [vmem:[#allocation3 + $0x138] sm:$0xff] %vm2390_vm10, %v2277_v0  ;;  %2535 = vrot.lane.b32.xlu0 %v14997_v42, %s7842_s30  ;;  %v15017_v0 = vld [vmem:[#allocation104_spill] sm:$0xff]  ;;  %v15018_v42 = vld [vmem:[#allocation105_spill] sm:$0xff] }
 0x38d   :  { %2533 = vrot.lane.b32.xlu1 %v14996_v1, %s7842_s30 }
 0x38e   :  { %v2283_v27 = vpop.permute.xlu0 %2282 }
 0x38f   :  { %v2281_v2 = vpop.permute.xlu1 %2280  ;;  %2433 = vst.msk [vmem:[#allocation3 + $0x150] sm:$0xff] %vm2390_vm10, %v2283_v27 }
 0x390   :  { %2432 = vst.msk [vmem:[#allocation3 + $0x148] sm:$0xff] %vm2390_vm10, %v2281_v2  ;;  %2539 = vrot.lane.b32.xlu0 %v14999_v20, %s7842_s30  ;;  %v15019_v2 = vld [vmem:[#allocation106_spill] sm:$0xff]  ;;  %v15020_v20 = vld [vmem:[#allocation107_spill] sm:$0xff] }
 0x391   :  { %2537 = vrot.lane.b32.xlu1 %v14998_v7, %s7842_s30 }
 0x392   :  { %v2287_v26 = vpop.permute.xlu0 %2286 }
 0x393   :  { %v2285_v58 = vpop.permute.xlu1 %2284  ;;  %2435 = vst.msk [vmem:[#allocation3 + $0x160] sm:$0xff] %vm2390_vm10, %v2287_v26  ;;  %v15021_v26 = vld [vmem:[#allocation108_spill] sm:$0xff] }
 0x394   :  { %2434 = vst.msk [vmem:[#allocation3 + $0x158] sm:$0xff] %vm2390_vm10, %v2285_v58  ;;  %2543 = vrot.lane.b32.xlu0 %v15001_v6, %s7842_s30  ;;  %v3059_v58 = vld [vmem:[%s13979_s1 + $0x20] sm:$0xf]  ;;  %v2463_v6 = vrot.slane %v10313_v44, 1 }
 0x395   :  { %2541 = vrot.lane.b32.xlu1 %v15000_v56, %s7842_s30  ;;  %7587 = vmatprep.subr.msk.mxu0 %vm3260_vm12, %v3059_v58  ;;  %v2462_v56 = vrot.slane %v10306_v55, 1  ;;  %v3057_v55 = vld [vmem:[%s13979_s1 + $0x10] sm:$0xff] }
 0x396   :  { %v2291_v14 = vpop.permute.xlu0 %2290  ;;  %7588 = vmatpush3.msk.msra.mxu0 %vm3260_vm12, %v3059_v58 }
 0x397   :  { %v2289_v59 = vpop.permute.xlu1 %2288  ;;  %2437 = vst.msk [vmem:[#allocation3 + $0x170] sm:$0xff] %vm2390_vm10, %v2291_v14  ;;  %v10506_v14 = vld [vmem:[#allocation2 + $0x358] sm:$0x3] }
 0x398   :  { %2436 = vst.msk [vmem:[#allocation3 + $0x168] sm:$0xff] %vm2390_vm10, %v2289_v59  ;;  %2547 = vrot.lane.b32.xlu0 %v15003_v61, %s7842_s30  ;;  %v2465_v44 = vrot.slane %v10506_v14, 1 }
 0x399   :  { %2545 = vrot.lane.b32.xlu1 %v15002_v46, %s7842_s30  ;;  %v3058_v46 = vld [vmem:[%s13979_s1 + $0x18] sm:$0xff] }
 0x39a   :  { %v2295_v36 = vpop.permute.xlu0 %2294  ;;  %7589 = vmatprep.subr.mxu0 %v3058_v46 }
 0x39b   :  { %v2293_v52 = vpop.permute.xlu1 %2292  ;;  %2439 = vst.msk [vmem:[#allocation3 + $0x180] sm:$0xff] %vm2390_vm10, %v2295_v36  ;;  %7590 = vmatpush3.msra.mxu0 %v3058_v46  ;;  %v2464_v36 = vsel %vm561_vm2, %v2462_v56, %v2463_v6  ;;  %v15037_v56 = vld [vmem:[#allocation120_spill] sm:$0xff]  ;;  %v15039_v46 = vld [vmem:[#allocation121_spill] sm:$0xff] }
 0x39c   :  { %2438 = vst.msk [vmem:[#allocation3 + $0x178] sm:$0xff] %vm2390_vm10, %v2293_v52  ;;  %2551 = vrot.lane.b32.xlu0 %v15005_v29, %s7842_s30  ;;  %7591 = vmatprep.subr.mxu0 %v3057_v55  ;;  %v15022_v29 = vld [vmem:[#allocation9_spill] sm:$0xff] }
 0x39d   :  { %2549 = vrot.lane.b32.xlu1 %v15004_v47, %s7842_s30  ;;  %7592 = vmatpush3.msra.mxu0 %v3057_v55 }
 0x39e   :  { %v2299_v22 = vpop.permute.xlu0 %2298 }
 0x39f   :  { %v2297_v12 = vpop.permute.xlu1 %2296  ;;  %2441 = vst.msk [vmem:[#allocation3 + $0x190] sm:$0xff] %vm2390_vm10, %v2299_v22 }
 0x3a0   :  { %2440 = vst.msk [vmem:[#allocation3 + $0x188] sm:$0xff] %vm2390_vm10, %v2297_v12  ;;  %2555 = vrot.lane.b32.xlu0 %v15007_v39, %s7842_s30  ;;  %v2466_v12 = vsel %vm561_vm2, %v2463_v6, %v2465_v44  ;;  %v15023_v39 = vld [vmem:[#allocation112_spill] sm:$0xff] }
 0x3a1   :  { %2553 = vrot.lane.b32.xlu1 %v15006_v11, %s7842_s30 }
 0x3a2   :  { %v2303_v13 = vpop.permute.xlu0 %2302 }
 0x3a3   :  { %v2301_v18 = vpop.permute.xlu1 %2300  ;;  %2443 = vst.msk [vmem:[#allocation3 + $0x1a0] sm:$0xff] %vm2390_vm10, %v2303_v13 }
 0x3a4   :  { %2442 = vst.msk [vmem:[#allocation3 + $0x198] sm:$0xff] %vm2390_vm10, %v2301_v18  ;;  %2559 = vrot.lane.b32.xlu0 %v15009_v4, %s7842_s30  ;;  %v15025_v4 = vld [vmem:[#allocation114_spill] sm:$0xff] }
 0x3a5   :  { %2557 = vrot.lane.b32.xlu1 %v15008_v40, %s7842_s30  ;;  %v15024_v40 = vld [vmem:[#allocation113_spill] sm:$0xff] }
 0x3a6   :  { %v2307_v53 = vpop.permute.xlu0 %2306 }
 0x3a7   :  { %v2305_v62 = vpop.permute.xlu1 %2304  ;;  %2445 = vst.msk [vmem:[#allocation3 + $0x1b0] sm:$0xff] %vm2390_vm10, %v2307_v53 }
 0x3a8   :  { %2444 = vst.msk [vmem:[#allocation3 + $0x1a8] sm:$0xff] %vm2390_vm10, %v2305_v62  ;;  %2563 = vrot.lane.b32.xlu0 %v15011_v43, %s7842_s30  ;;  %v15027_v43 = vld [vmem:[#allocation18_spill] sm:$0xff] }
 0x3a9   :  { %2561 = vrot.lane.b32.xlu1 %v15010_v51, %s7842_s30  ;;  %v15026_v51 = vld [vmem:[#allocation5_spill] sm:$0xff] }
 0x3aa   :  { %v2311_v16 = vpop.permute.xlu0 %2310 }
 0x3ab   :  { %v2309_v30 = vpop.permute.xlu1 %2308  ;;  %2447 = vst.msk [vmem:[#allocation3 + $0x1c0] sm:$0xff] %vm2390_vm10, %v2311_v16 }
 0x3ac   :  { %2446 = vst.msk [vmem:[#allocation3 + $0x1b8] sm:$0xff] %vm2390_vm10, %v2309_v30  ;;  %2567 = vrot.lane.b32.xlu0 %v15013_v8, %s7842_s30  ;;  %v15029_v8 = vld [vmem:[#allocation26_spill] sm:$0xff] }
 0x3ad   :  { %2565 = vrot.lane.b32.xlu1 %v15012_v41, %s7842_s30  ;;  %v15028_v41 = vld [vmem:[#allocation115_spill] sm:$0xff] }
 0x3ae   :  { %v2315_v37 = vpop.permute.xlu0 %2314 }
 0x3af   :  { %v2313_v15 = vpop.permute.xlu1 %2312  ;;  %2449 = vst.msk [vmem:[#allocation3 + $0x1d0] sm:$0xff] %vm2390_vm10, %v2315_v37 }
 0x3b0   :  { %2448 = vst.msk [vmem:[#allocation3 + $0x1c8] sm:$0xff] %vm2390_vm10, %v2313_v15  ;;  %2571 = vrot.lane.b32.xlu0 %v15015_v33, %s7842_s30  ;;  %v15031_v33 = vld [vmem:[#allocation30_spill] sm:$0xff] }
 0x3b1   :  { %2569 = vrot.lane.b32.xlu1 %v15014_v54, %s7842_s30  ;;  %v15030_v54 = vld [vmem:[#allocation116_spill] sm:$0xff] }
 0x3b2   :  { %v2319_v25 = vpop.permute.xlu0 %2318 }
 0x3b3   :  { %v2317_v24 = vpop.permute.xlu1 %2316  ;;  %2451 = vst.msk [vmem:[#allocation3 + $0x1e0] sm:$0xff] %vm2390_vm10, %v2319_v25 }
 0x3b4   :  { %2450 = vst.msk [vmem:[#allocation3 + $0x1d8] sm:$0xff] %vm2390_vm10, %v2317_v24  ;;  %2575 = vrot.lane.b32.xlu0 %v15017_v0, %s7842_s30  ;;  %v15033_v0 = vld [vmem:[#allocation35_spill] sm:$0xff] }
 0x3b5   :  { %2573 = vrot.lane.b32.xlu1 %v15016_v23, %s7842_s30  ;;  %v15032_v23 = vld [vmem:[#allocation117_spill] sm:$0xff] }
 0x3b6   :  { %v2323_v1 = vpop.permute.xlu0 %2322 }
 0x3b7   :  { %v2321_v63 = vpop.permute.xlu1 %2320  ;;  %2453 = vst.msk [vmem:[#allocation3 + $0x1f0] sm:$0xff] %vm2390_vm10, %v2323_v1 }
 0x3b8   :  { %2452 = vst.msk [vmem:[#allocation3 + $0x1e8] sm:$0xff] %vm2390_vm10, %v2321_v63  ;;  %2579 = vrot.lane.b32.xlu0 %v15019_v2, %s7842_s30 }
 0x3b9   :  { %2577 = vrot.lane.b32.xlu1 %v15018_v42, %s7842_s30  ;;  %v15034_v42 = vld [vmem:[#allocation118_spill] sm:$0xff] }
 0x3ba   :  { %v2468_v7 = vpop.permute.xlu0 %2467 }
 0x3bb   :  { %v2325_v27 = vpop.permute.xlu1 %2324  ;;  %2660 = vst.msk [vmem:[#allocation3] sm:$0xff] %vm2659_vm11, %v2468_v7  ;;  %v15035_v7 = vld [vmem:[#allocation119_spill] sm:$0xff] }
 0x3bc   :  { %2454 = vst.msk [vmem:[#allocation3 + $0x1f8] sm:$0xff] %vm2390_vm10, %v2325_v27  ;;  %2583 = vrot.lane.b32.xlu0 %v15021_v26, %s7842_s30 }
 0x3bd   :  { %2581 = vrot.lane.b32.xlu1 %v15020_v20, %s7842_s30  ;;  %v15036_v20 = vld [vmem:[#allocation47_spill] sm:$0xff] }
 0x3be   :  { %v2472_v61 = vpop.permute.xlu0 %2471 }
 0x3bf   :  { %v2470_v59 = vpop.permute.xlu1 %2469  ;;  %2662 = vst.msk [vmem:[#allocation3 + $0x10] sm:$0xff] %vm2659_vm11, %v2472_v61  ;;  %v15040_v61 = vld [vmem:[#allocation58_spill] sm:$0xff] }
 0x3c0   :  { %2661 = vst.msk [vmem:[#allocation3 + $0x8] sm:$0xff] %vm2659_vm11, %v2470_v59  ;;  %2587 = vrot.lane.b32.xlu0 %v9898_v9, %s7842_s30  ;;  %v3055_v9 = vld [vmem:[%s13979_s1] sm:$0xff] }
 0x3c1   :  { %2585 = vrot.lane.b32.xlu1 %v14894_v10, %s7842_s30  ;;  %v3056_v10 = vld [vmem:[%s13979_s1 + $0x8] sm:$0xff] }
 0x3c2   :  { %v2476_v47 = vpop.permute.xlu0 %2475  ;;  %7593 = vmatprep.subr.mxu0 %v3056_v10 }
 0x3c3   :  { %v2474_v52 = vpop.permute.xlu1 %2473  ;;  %2664 = vst.msk [vmem:[#allocation3 + $0x20] sm:$0xff] %vm2659_vm11, %v2476_v47  ;;  %7594 = vmatpush3.msra.mxu0 %v3056_v10 }
 0x3c4   :  { %2663 = vst.msk [vmem:[#allocation3 + $0x18] sm:$0xff] %vm2659_vm11, %v2474_v52  ;;  %2591 = vrot.lane.b32.xlu0 %v2464_v36, %s7842_s30  ;;  %7595 = vmatprep.subr.mxu0 %v3055_v9  ;;  %v15041_v52 = vld [vmem:[#allocation27_spill] sm:$0xff]  ;;  %v15042_v36 = vld [vmem:[#allocation28_spill] sm:$0xff] }
 0x3c5   :  { %2589 = vrot.lane.b32.xlu1 %v15022_v29, %s7842_s30  ;;  %7596 = vmatpush3.msra.mxu0 %v3055_v9  ;;  %v15043_v29 = vld [vmem:[#allocation122_spill] sm:$0xff]  ;;  %v15044_v9 = vld [vmem:[#allocation123_spill] sm:$0xff] }
 0x3c6   :  { %v2480_v11 = vpop.permute.xlu0 %2479 }
 0x3c7   :  { %v2478_v22 = vpop.permute.xlu1 %2477  ;;  %2666 = vst.msk [vmem:[#allocation3 + $0x30] sm:$0xff] %vm2659_vm11, %v2480_v11  ;;  %v15045_v11 = vld [vmem:[#allocation124_spill] sm:$0xff] }
 0x3c8   :  { %2665 = vst.msk [vmem:[#allocation3 + $0x28] sm:$0xff] %vm2659_vm11, %v2478_v22  ;;  %2734 = vrot.lane.b32.xlu0 %v15023_v39, %s7843_s17  ;;  %v15046_v39 = vld [vmem:[#allocation125_spill] sm:$0xff] }
 0x3c9   :  { %2593 = vrot.lane.b32.xlu1 %v2466_v12, %s7842_s30 }
 0x3ca   :  { %v2484_v13 = vpop.permute.xlu0 %2483 }
 0x3cb   :  { %v2482_v18 = vpop.permute.xlu1 %2481  ;;  %2668 = vst.msk [vmem:[#allocation3 + $0x40] sm:$0xff] %vm2659_vm11, %v2484_v13 }
 0x3cc   :  { %2667 = vst.msk [vmem:[#allocation3 + $0x38] sm:$0xff] %vm2659_vm11, %v2482_v18  ;;  %2738 = vrot.lane.b32.xlu0 %v15025_v4, %s7843_s17  ;;  %v2725_v4 = vrot.slane %v10215_v34, 2 }
 0x3cd   :  { %2736 = vrot.lane.b32.xlu1 %v15024_v40, %s7843_s17  ;;  %v2724_v40 = vrot.slane %v10208_v17, 2 }
 0x3ce   :  { %v2488_v53 = vpop.permute.xlu0 %2487 }
 0x3cf   :  { %v2486_v62 = vpop.permute.xlu1 %2485  ;;  %2670 = vst.msk [vmem:[#allocation3 + $0x50] sm:$0xff] %vm2659_vm11, %v2488_v53 }
 0x3d0   :  { %2669 = vst.msk [vmem:[#allocation3 + $0x48] sm:$0xff] %vm2659_vm11, %v2486_v62  ;;  %2742 = vrot.lane.b32.xlu0 %v15027_v43, %s7843_s17 }
 0x3d1   :  { %2740 = vrot.lane.b32.xlu1 %v15026_v51, %s7843_s17  ;;  %v2727_v51 = vrot.slane %v10401_v5, 2  ;;  %v15048_v5 = vld [vmem:[#allocation43_spill] sm:$0xff] }
 0x3d2   :  { %v2492_v16 = vpop.permute.xlu0 %2491 }
 0x3d3   :  { %v2490_v30 = vpop.permute.xlu1 %2489  ;;  %2672 = vst.msk [vmem:[#allocation3 + $0x60] sm:$0xff] %vm2659_vm11, %v2492_v16 }
 0x3d4   :  { %2671 = vst.msk [vmem:[#allocation3 + $0x58] sm:$0xff] %vm2659_vm11, %v2490_v30  ;;  %2746 = vrot.lane.b32.xlu0 %v15029_v8, %s7843_s17  ;;  %v15050_v8 = vld [vmem:[#allocation128_spill] sm:$0xff] }
 0x3d5   :  { %2744 = vrot.lane.b32.xlu1 %v15028_v41, %s7843_s17  ;;  %v15049_v41 = vld [vmem:[#allocation45_spill] sm:$0xff] }
 0x3d6   :  { %v2496_v37 = vpop.permute.xlu0 %2495 }
 0x3d7   :  { %v2494_v15 = vpop.permute.xlu1 %2493  ;;  %2674 = vst.msk [vmem:[#allocation3 + $0x70] sm:$0xff] %vm2659_vm11, %v2496_v37 }
 0x3d8   :  { %2673 = vst.msk [vmem:[#allocation3 + $0x68] sm:$0xff] %vm2659_vm11, %v2494_v15  ;;  %2750 = vrot.lane.b32.xlu0 %v15031_v33, %s7843_s17  ;;  %v15052_v33 = vld [vmem:[#allocation130_spill] sm:$0xff] }
 0x3d9   :  { %2748 = vrot.lane.b32.xlu1 %v15030_v54, %s7843_s17  ;;  %v15051_v54 = vld [vmem:[#allocation129_spill] sm:$0xff] }
 0x3da   :  { %v2500_v25 = vpop.permute.xlu0 %2499 }
 0x3db   :  { %v2498_v24 = vpop.permute.xlu1 %2497  ;;  %2676 = vst.msk [vmem:[#allocation3 + $0x80] sm:$0xff] %vm2659_vm11, %v2500_v25 }
 0x3dc   :  { %2675 = vst.msk [vmem:[#allocation3 + $0x78] sm:$0xff] %vm2659_vm11, %v2498_v24  ;;  %2754 = vrot.lane.b32.xlu0 %v15033_v0, %s7843_s17  ;;  %v15054_v0 = vld [vmem:[#allocation132_spill] sm:$0xff] }
 0x3dd   :  { %2752 = vrot.lane.b32.xlu1 %v15032_v23, %s7843_s17  ;;  %v15053_v23 = vld [vmem:[#allocation131_spill] sm:$0xff] }
 0x3de   :  { %v2504_v1 = vpop.permute.xlu0 %2503 }
 0x3df   :  { %v2502_v63 = vpop.permute.xlu1 %2501  ;;  %2678 = vst.msk [vmem:[#allocation3 + $0x90] sm:$0xff] %vm2659_vm11, %v2504_v1 }
 0x3e0   :  { %2677 = vst.msk [vmem:[#allocation3 + $0x88] sm:$0xff] %vm2659_vm11, %v2502_v63  ;;  %2758 = vrot.lane.b32.xlu0 %v14910_v35, %s7843_s17  ;;  %v15038_v35 = vld [vmem:[#allocation48_spill] sm:$0xff] }
 0x3e1   :  { %2756 = vrot.lane.b32.xlu1 %v15034_v42, %s7843_s17  ;;  %v15055_v42 = vld [vmem:[#allocation50_spill] sm:$0xff] }
 0x3e2   :  { %v2508_v27 = vpop.permute.xlu0 %2507 }
 0x3e3   :  { %v2506_v2 = vpop.permute.xlu1 %2505  ;;  %2680 = vst.msk [vmem:[#allocation3 + $0xa0] sm:$0xff] %vm2659_vm11, %v2508_v27 }
 0x3e4   :  { %2679 = vst.msk [vmem:[#allocation3 + $0x98] sm:$0xff] %vm2659_vm11, %v2506_v2  ;;  %2762 = vrot.lane.b32.xlu0 %v15036_v20, %s7843_s17  ;;  %v15056_v2 = vld [vmem:[#allocation133_spill] sm:$0xff]  ;;  %v15057_v20 = vld [vmem:[#allocation52_spill] sm:$0xff] }
 0x3e5   :  { %2760 = vrot.lane.b32.xlu1 %v15035_v7, %s7843_s17 }
 0x3e6   :  { %v2512_v26 = vpop.permute.xlu0 %2511 }
 0x3e7   :  { %v2510_v58 = vpop.permute.xlu1 %2509  ;;  %2682 = vst.msk [vmem:[#allocation3 + $0xb0] sm:$0xff] %vm2659_vm11, %v2512_v26 }
 0x3e8   :  { %2681 = vst.msk [vmem:[#allocation3 + $0xa8] sm:$0xff] %vm2659_vm11, %v2510_v58  ;;  %2766 = vrot.lane.b32.xlu0 %v15038_v35, %s7843_s17  ;;  %v15058_v58 = vld [vmem:[#allocation134_spill] sm:$0xff]  ;;  %v15059_v35 = vld [vmem:[#allocation53_spill] sm:$0xff] }
 0x3e9   :  { %2764 = vrot.lane.b32.xlu1 %v15037_v56, %s7843_s17 }
 0x3ea   :  { %v2516_v59 = vpop.permute.xlu0 %2515 }
 0x3eb   :  { %v2514_v6 = vpop.permute.xlu1 %2513  ;;  %2684 = vst.msk [vmem:[#allocation3 + $0xc0] sm:$0xff] %vm2659_vm11, %v2516_v59 }
 0x3ec   :  { %2683 = vst.msk [vmem:[#allocation3 + $0xb8] sm:$0xff] %vm2659_vm11, %v2514_v6  ;;  %2770 = vrot.lane.b32.xlu0 %v15040_v61, %s7843_s17  ;;  %v15060_v6 = vld [vmem:[#allocation135_spill] sm:$0xff]  ;;  %v15061_v61 = vld [vmem:[#allocation54_spill] sm:$0xff] }
 0x3ed   :  { %2768 = vrot.lane.b32.xlu1 %v15039_v46, %s7843_s17 }
 0x3ee   :  { %v2520_v44 = vpop.permute.xlu0 %2519 }
 0x3ef   :  { %v2518_v55 = vpop.permute.xlu1 %2517  ;;  %2686 = vst.msk [vmem:[#allocation3 + $0xd0] sm:$0xff] %vm2659_vm11, %v2520_v44 }
 0x3f0   :  { %2685 = vst.msk [vmem:[#allocation3 + $0xc8] sm:$0xff] %vm2659_vm11, %v2518_v55  ;;  %2774 = vrot.lane.b32.xlu0 %v15042_v36, %s7843_s17  ;;  %v15062_v55 = vld [vmem:[#allocation136_spill] sm:$0xff] }
 0x3f1   :  { %2772 = vrot.lane.b32.xlu1 %v15041_v52, %s7843_s17  ;;  %v15063_v36 = vld [vmem:[#allocation56_spill] sm:$0xff] }
 0x3f2   :  { %v2524_v47 = vpop.permute.xlu0 %2523 }
 0x3f3   :  { %v2522_v10 = vpop.permute.xlu1 %2521  ;;  %2688 = vst.msk [vmem:[#allocation3 + $0xe0] sm:$0xff] %vm2659_vm11, %v2524_v47 }
 0x3f4   :  { %2687 = vst.msk [vmem:[#allocation3 + $0xd8] sm:$0xff] %vm2659_vm11, %v2522_v10  ;;  %2778 = vrot.lane.b32.xlu0 %v15044_v9, %s7843_s17  ;;  %v15064_v10 = vld [vmem:[#allocation137_spill] sm:$0xff] }
 0x3f5   :  { %2776 = vrot.lane.b32.xlu1 %v15043_v29, %s7843_s17  ;;  %v15065_v9 = vld [vmem:[#allocation65_spill] sm:$0xff] }
 0x3f6   :  { %v2528_v22 = vpop.permute.xlu0 %2527 }
 0x3f7   :  { %v2526_v12 = vpop.permute.xlu1 %2525  ;;  %2690 = vst.msk [vmem:[#allocation3 + $0xf0] sm:$0xff] %vm2659_vm11, %v2528_v22 }
 0x3f8   :  { %2689 = vst.msk [vmem:[#allocation3 + $0xe8] sm:$0xff] %vm2659_vm11, %v2526_v12  ;;  %2782 = vrot.lane.b32.xlu0 %v15046_v39, %s7843_s17 }
 0x3f9   :  { %2780 = vrot.lane.b32.xlu1 %v15045_v11, %s7843_s17 }
 0x3fa   :  { %v2532_v13 = vpop.permute.xlu0 %2531 }
 0x3fb   :  { %v2530_v18 = vpop.permute.xlu1 %2529  ;;  %2692 = vst.msk [vmem:[#allocation3 + $0x100] sm:$0xff] %vm2659_vm11, %v2532_v13 }
 0x3fc   :  { %2691 = vst.msk [vmem:[#allocation3 + $0xf8] sm:$0xff] %vm2659_vm11, %v2530_v18  ;;  %2786 = vrot.lane.b32.xlu0 %v14922_v45, %s7843_s17  ;;  %v2726_v45 = vsel %vm979_vm4, %v2724_v40, %v2725_v4  ;;  %v15066_v18 = vld [vmem:[#allocation141_spill] sm:$0xff] }
 0x3fd   :  { %2784 = vrot.lane.b32.xlu1 %v14921_v48, %s7843_s17  ;;  %v15047_v48 = vld [vmem:[#allocation10_spill] sm:$0xff] }
 0x3fe   :  { %v2536_v53 = vpop.permute.xlu0 %2535 }
 0x3ff   :  { %v2534_v62 = vpop.permute.xlu1 %2533  ;;  %2694 = vst.msk [vmem:[#allocation3 + $0x110] sm:$0xff] %vm2659_vm11, %v2536_v53 }
 0x400   :  { %2693 = vst.msk [vmem:[#allocation3 + $0x108] sm:$0xff] %vm2659_vm11, %v2534_v62  ;;  %2790 = vrot.lane.b32.xlu0 %v15047_v48, %s7843_s17 }
 0x401   :  { %2788 = vrot.lane.b32.xlu1 %v14924_v32, %s7843_s17  ;;  %v2728_v32 = vsel %vm979_vm4, %v2725_v4, %v2727_v51 }
 0x402   :  { %v2540_v17 = vpop.permute.xlu0 %2539 }
 0x403   :  { %v2538_v43 = vpop.permute.xlu1 %2537  ;;  %2696 = vst.msk [vmem:[#allocation3 + $0x120] sm:$0xff] %vm2659_vm11, %v2540_v17 }
 0x404   :  { %2695 = vst.msk [vmem:[#allocation3 + $0x118] sm:$0xff] %vm2659_vm11, %v2538_v43  ;;  %2794 = vrot.lane.b32.xlu0 %v2726_v45, %s7843_s17 }
 0x405   :  { %2792 = vrot.lane.b32.xlu1 %v10012_v21, %s7843_s17 }
 0x406   :  { %v2544_v30 = vpop.permute.xlu0 %2543 }
 0x407   :  { %v2542_v34 = vpop.permute.xlu1 %2541  ;;  %2698 = vst.msk [vmem:[#allocation3 + $0x130] sm:$0xff] %vm2659_vm11, %v2544_v30 }
 0x408   :  { %2697 = vst.msk [vmem:[#allocation3 + $0x128] sm:$0xff] %vm2659_vm11, %v2542_v34  ;;  %2798 = vrot.lane.b32.xlu0 %v15048_v5, %s7843_s17 }
 0x409   :  { %2796 = vrot.lane.b32.xlu1 %v2728_v32, %s7843_s17 }
 0x40a   :  { %v2548_v21 = vpop.permute.xlu0 %2547 }
 0x40b   :  { %v2546_v16 = vpop.permute.xlu1 %2545  ;;  %2700 = vst.msk [vmem:[#allocation3 + $0x140] sm:$0xff] %vm2659_vm11, %v2548_v21 }
 0x40c   :  { %2699 = vst.msk [vmem:[#allocation3 + $0x138] sm:$0xff] %vm2659_vm11, %v2546_v16  ;;  %2802 = vrot.lane.b32.xlu0 %v15050_v8, %s7843_s17 }
 0x40d   :  { %2800 = vrot.lane.b32.xlu1 %v15049_v41, %s7843_s17 }
 0x40e   :  { %v2552_v37 = vpop.permute.xlu0 %2551 }
 0x40f   :  { %v2550_v15 = vpop.permute.xlu1 %2549  ;;  %2702 = vst.msk [vmem:[#allocation3 + $0x150] sm:$0xff] %vm2659_vm11, %v2552_v37 }
 0x410   :  { %2701 = vst.msk [vmem:[#allocation3 + $0x148] sm:$0xff] %vm2659_vm11, %v2550_v15  ;;  %2806 = vrot.lane.b32.xlu0 %v15052_v33, %s7843_s17 }
 0x411   :  { %2804 = vrot.lane.b32.xlu1 %v15051_v54, %s7843_s17 }
 0x412   :  { %v2556_v25 = vpop.permute.xlu0 %2555 }
 0x413   :  { %v2554_v24 = vpop.permute.xlu1 %2553  ;;  %2704 = vst.msk [vmem:[#allocation3 + $0x160] sm:$0xff] %vm2659_vm11, %v2556_v25 }
 0x414   :  { %2703 = vst.msk [vmem:[#allocation3 + $0x158] sm:$0xff] %vm2659_vm11, %v2554_v24  ;;  %2810 = vrot.lane.b32.xlu0 %v15054_v0, %s7843_s17 }
 0x415   :  { %2808 = vrot.lane.b32.xlu1 %v15053_v23, %s7843_s17 }
 0x416   :  { %v2560_v1 = vpop.permute.xlu0 %2559 }
 0x417   :  { %v2558_v63 = vpop.permute.xlu1 %2557  ;;  %2706 = vst.msk [vmem:[#allocation3 + $0x170] sm:$0xff] %vm2659_vm11, %v2560_v1 }
 0x418   :  { %2705 = vst.msk [vmem:[#allocation3 + $0x168] sm:$0xff] %vm2659_vm11, %v2558_v63  ;;  %2814 = vrot.lane.b32.xlu0 %v15056_v2, %s7843_s17 }
 0x419   :  { %2812 = vrot.lane.b32.xlu1 %v15055_v42, %s7843_s17 }
 0x41a   :  { %v2564_v7 = vpop.permute.xlu0 %2563 }
 0x41b   :  { %v2562_v27 = vpop.permute.xlu1 %2561  ;;  %2708 = vst.msk [vmem:[#allocation3 + $0x180] sm:$0xff] %vm2659_vm11, %v2564_v7 }
 0x41c   :  { %2707 = vst.msk [vmem:[#allocation3 + $0x178] sm:$0xff] %vm2659_vm11, %v2562_v27  ;;  %2818 = vrot.lane.b32.xlu0 %v15058_v58, %s7843_s17 }
 0x41d   :  { %2816 = vrot.lane.b32.xlu1 %v15057_v20, %s7843_s17 }
 0x41e   :  { %v2568_v56 = vpop.permute.xlu0 %2567 }
 0x41f   :  { %v2566_v26 = vpop.permute.xlu1 %2565  ;;  %2710 = vst.msk [vmem:[#allocation3 + $0x190] sm:$0xff] %vm2659_vm11, %v2568_v56 }
 0x420   :  { %2709 = vst.msk [vmem:[#allocation3 + $0x188] sm:$0xff] %vm2659_vm11, %v2566_v26  ;;  %2822 = vrot.lane.b32.xlu0 %v15060_v6, %s7843_s17 }
 0x421   :  { %2820 = vrot.lane.b32.xlu1 %v15059_v35, %s7843_s17 }
 0x422   :  { %v2572_v46 = vpop.permute.xlu0 %2571 }
 0x423   :  { %v2570_v59 = vpop.permute.xlu1 %2569  ;;  %2712 = vst.msk [vmem:[#allocation3 + $0x1a0] sm:$0xff] %vm2659_vm11, %v2572_v46 }
 0x424   :  { %2711 = vst.msk [vmem:[#allocation3 + $0x198] sm:$0xff] %vm2659_vm11, %v2570_v59  ;;  %2826 = vrot.lane.b32.xlu0 %v15062_v55, %s7843_s17 }
 0x425   :  { %2824 = vrot.lane.b32.xlu1 %v15061_v61, %s7843_s17 }
 0x426   :  { %v2576_v52 = vpop.permute.xlu0 %2575 }
 0x427   :  { %v2574_v44 = vpop.permute.xlu1 %2573  ;;  %2714 = vst.msk [vmem:[#allocation3 + $0x1b0] sm:$0xff] %vm2659_vm11, %v2576_v52 }
 0x428   :  { %2713 = vst.msk [vmem:[#allocation3 + $0x1a8] sm:$0xff] %vm2659_vm11, %v2574_v44  ;;  %2830 = vrot.lane.b32.xlu0 %v15064_v10, %s7843_s17 }
 0x429   :  { %2828 = vrot.lane.b32.xlu1 %v15063_v36, %s7843_s17 }
 0x42a   :  { %v2580_v29 = vpop.permute.xlu0 %2579 }
 0x42b   :  { %v2578_v47 = vpop.permute.xlu1 %2577  ;;  %2716 = vst.msk [vmem:[#allocation3 + $0x1c0] sm:$0xff] %vm2659_vm11, %v2580_v29 }
 0x42c   :  { %2715 = vst.msk [vmem:[#allocation3 + $0x1b8] sm:$0xff] %vm2659_vm11, %v2578_v47  ;;  %2834 = vrot.lane.b32.xlu0 %v14945_v60, %s7843_s17  ;;  %v15067_v60 = vld [vmem:[#allocation142_spill] sm:$0xff] }
 0x42d   :  { %2832 = vrot.lane.b32.xlu1 %v15065_v9, %s7843_s17 }
 0x42e   :  { %v2584_v22 = vpop.permute.xlu0 %2583 }
 0x42f   :  { %v2582_v12 = vpop.permute.xlu1 %2581  ;;  %2718 = vst.msk [vmem:[#allocation3 + $0x1d0] sm:$0xff] %vm2659_vm11, %v2584_v22 }
 0x430   :  { %2717 = vst.msk [vmem:[#allocation3 + $0x1c8] sm:$0xff] %vm2659_vm11, %v2582_v12  ;;  %2838 = vrot.lane.b32.xlu0 %v14947_v57, %s7843_s17  ;;  %v15068_v57 = vld [vmem:[#allocation143_spill] sm:$0xff] }
 0x431   :  { %2836 = vrot.lane.b32.xlu1 %v14946_v49, %s7843_s17 }
 0x432   :  { %v2588_v39 = vpop.permute.xlu0 %2587 }
 0x433   :  { %v2586_v11 = vpop.permute.xlu1 %2585  ;;  %2720 = vst.msk [vmem:[#allocation3 + $0x1e0] sm:$0xff] %vm2659_vm11, %v2588_v39 }
 0x434   :  { %2719 = vst.msk [vmem:[#allocation3 + $0x1d8] sm:$0xff] %vm2659_vm11, %v2586_v11  ;;  %2842 = vrot.lane.b32.xlu0 %v15067_v60, %s7843_s17 }
 0x435   :  { %2840 = vrot.lane.b32.xlu1 %v15066_v18, %s7843_s17 }
 0x436   :  { %v2592_v49 = vpop.permute.xlu0 %2591 }
 0x437   :  { %v2590_v13 = vpop.permute.xlu1 %2589  ;;  %2722 = vst.msk [vmem:[#allocation3 + $0x1f0] sm:$0xff] %vm2659_vm11, %v2592_v49 }
 0x438   :  { %2721 = vst.msk [vmem:[#allocation3 + $0x1e8] sm:$0xff] %vm2659_vm11, %v2590_v13  ;;  %2846 = vrot.lane.b32.xlu0 %v15068_v57, %s7843_s17 }
 0x439   :  { %2844 = vrot.lane.b32.xlu1 %v9460_v31, %s7843_s17 }
 0x43a   :  { %v2735_v4 = vpop.permute.xlu0 %2734 }
 0x43b   :  { %v2594_v40 = vpop.permute.xlu1 %2593  ;;  %2927 = vst.msk [vmem:[#allocation3] sm:$0xff] %vm2926_vm13, %v2735_v4 }
 0x43c   :  { %2723 = vst.msk [vmem:[#allocation3 + $0x1f8] sm:$0xff] %vm2659_vm11, %v2594_v40  ;;  %2850 = vrot.lane.b32.xlu0 %v9484_v50, %s7843_s17 }
 0x43d   :  { %2848 = vrot.lane.b32.xlu1 %v9480_v3, %s7843_s17 }
 0x43e   :  { %v2739_v31 = vpop.permute.xlu0 %2738 }
 0x43f   :  { %v2737_v62 = vpop.permute.xlu1 %2736  ;;  %2929 = vst.msk [vmem:[#allocation3 + $0x10] sm:$0xff] %vm2926_vm13, %v2739_v31 }
 0x440   :  { %2928 = vst.msk [vmem:[#allocation3 + $0x8] sm:$0xff] %vm2926_vm13, %v2737_v62  ;;  %2854 = vrot.lane.b32.xlu0 %v10108_v28, %s7843_s17 }
 0x441   :  { %2852 = vrot.lane.b32.xlu1 %v9493_v19, %s7843_s17 }
 0x442   :  { %v2743_v3 = vpop.permute.xlu0 %2742  ;;  %v2991_v48 = vld [vmem:[#allocation3] sm:$0xff] }
 0x443   :  { %v2741_v53 = vpop.permute.xlu1 %2740  ;;  %2931 = vst.msk [vmem:[#allocation3 + $0x20] sm:$0xff] %vm2926_vm13, %v2743_v3  ;;  %7597 = vmatprep.mubr.msk.f32.mxu0 %vm3067_vm14, %v2991_v48 }
 0x444   :  { %2930 = vst.msk [vmem:[#allocation3 + $0x18] sm:$0xff] %vm2926_vm13, %v2741_v53 }
 0x445   :  { %2856 = vrot.lane.b32.xlu1 %v10117_v38, %s7843_s17 }
 0x446   :  { %v2747_v28 = vpop.permute.xlu0 %2746  ;;  %v2993_v51 = vld [vmem:[#allocation3 + $0x10] sm:$0xff] }
 0x447   :  { %v2745_v50 = vpop.permute.xlu1 %2744  ;;  %v2992_v19 = vld [vmem:[#allocation3 + $0x8] sm:$0xff]  ;;  %2933 = vst.msk [vmem:[#allocation3 + $0x30] sm:$0xff] %vm2926_vm13, %v2747_v28 }
 0x448   :  { %2932 = vst.msk [vmem:[#allocation3 + $0x28] sm:$0xff] %vm2926_vm13, %v2745_v50  ;;  %7598 = vmatmul.mubr.msk.f32.vlgmr.msra.gmra.mxu0 %vm3067_vm14, %v2992_v19 }
 0x449   :  { %7600 = vmatprep.mubr.msk.f32.mxu0 %vm3067_vm14, %v2993_v51 }
 0x44a   :  { %v2751_v38 = vpop.permute.xlu0 %2750  ;;  %v2995_v17 = vld [vmem:[#allocation3 + $0x20] sm:$0xff] }
 0x44b   :  { %v2749_v43 = vpop.permute.xlu1 %2748  ;;  %v2994_v45 = vld [vmem:[#allocation3 + $0x18] sm:$0xff]  ;;  %2935 = vst.msk [vmem:[#allocation3 + $0x40] sm:$0xff] %vm2926_vm13, %v2751_v38 }
 0x44c   :  { %2934 = vst.msk [vmem:[#allocation3 + $0x38] sm:$0xff] %vm2926_vm13, %v2749_v43  ;;  %7601 = vmatmul.mubr.msk.f32.gmra.mxu0 %vm3067_vm14, %v2994_v45  ;;  %v7813_v45 = vld [vmem:[#allocation2 + $0x348] sm:$0xff] }
 0x44d   :  { %7603 = vmatprep.mubr.msk.f32.mxu0 %vm3067_vm14, %v2995_v17  ;;  %v2729_v38 = vrot.slane %v7813_v45, 2  ;;  %v7814_v17 = vld [vmem:[#allocation2 + $0x350] sm:$0xff] }
 0x44e   :  { %v2755_v30 = vpop.permute.xlu0 %2754  ;;  %v2997_v5 = vld [vmem:[#allocation3 + $0x30] sm:$0xff] }
 0x44f   :  { %v2753_v32 = vpop.permute.xlu1 %2752  ;;  %v2996_v34 = vld [vmem:[#allocation3 + $0x28] sm:$0xff]  ;;  %2937 = vst.msk [vmem:[#allocation3 + $0x50] sm:$0xff] %vm2926_vm13, %v2755_v30 }
 0x450   :  { %2936 = vst.msk [vmem:[#allocation3 + $0x48] sm:$0xff] %vm2926_vm13, %v2753_v32  ;;  %7604 = vmatmul.mubr.msk.f32.gmra.mxu0 %vm3067_vm14, %v2996_v34  ;;  %v2730_v32 = vrot.slane %v7814_v17, 2  ;;  %v10867_v17 = vld [vmem:[#allocation2 + $0x1b0] sm:$0xff] }
 0x451   :  { %7606 = vmatprep.mubr.msk.f32.mxu0 %vm3067_vm14, %v2997_v5 }
 0x452   :  { %v2759_v41 = vpop.permute.xlu0 %2758  ;;  %v2999_v8 = vld [vmem:[#allocation3 + $0x40] sm:$0xff] }
 0x453   :  { %v2757_v16 = vpop.permute.xlu1 %2756  ;;  %v2998_v21 = vld [vmem:[#allocation3 + $0x38] sm:$0xff]  ;;  %2939 = vst.msk [vmem:[#allocation3 + $0x60] sm:$0xff] %vm2926_vm13, %v2759_v41 }
 0x454   :  { %2938 = vst.msk [vmem:[#allocation3 + $0x58] sm:$0xff] %vm2926_vm13, %v2757_v16  ;;  %7607 = vmatmul.mubr.msk.f32.gmra.mxu0 %vm3067_vm14, %v2998_v21  ;;  %v2732_v21 = vrot.slane %v10506_v14, 2  ;;  %v10809_v14 = vld [vmem:[#allocation2] sm:$0xff] }
 0x455   :  { %7609 = vmatprep.mubr.msk.f32.mxu0 %vm3067_vm14, %v2999_v8  ;;  %3885 = vst.msk [vmem:[#allocation3] sm:$0xff] %vm20_vm0, %v10809_v14 }
 0x456   :  { %v2763_v54 = vpop.permute.xlu0 %2762  ;;  %v3001_v33 = vld [vmem:[#allocation3 + $0x50] sm:$0xff] }
 0x457   :  { %v2761_v15 = vpop.permute.xlu1 %2760  ;;  %v3000_v37 = vld [vmem:[#allocation3 + $0x48] sm:$0xff]  ;;  %2941 = vst.msk [vmem:[#allocation3 + $0x70] sm:$0xff] %vm2926_vm13, %v2763_v54 }
 0x458   :  { %2940 = vst.msk [vmem:[#allocation3 + $0x68] sm:$0xff] %vm2926_vm13, %v2761_v15  ;;  %7610 = vmatmul.mubr.msk.f32.gmra.mxu0 %vm3067_vm14, %v3000_v37  ;;  %v2731_v15 = vsel %vm979_vm4, %v2729_v38, %v2730_v32  ;;  %v10865_v38 = vld [vmem:[#allocation2 + $0x1b8] sm:$0xff] }
 0x459   :  { %7612 = vmatprep.mubr.msk.f32.mxu0 %vm3067_vm14, %v3001_v33  ;;  %2858 = vrot.lane.b32.xlu0 %v2731_v15, %s7843_s17  ;;  %v2733_v33 = vsel %vm979_vm4, %v2730_v32, %v2732_v21 }
 0x45a   :  { %v2767_v23 = vpop.permute.xlu0 %2766  ;;  %v3003_v0 = vld [vmem:[#allocation3 + $0x60] sm:$0xff]  ;;  %2860 = vrot.lane.b32.xlu1 %v2733_v33, %s7843_s17 }
 0x45b   :  { %v2765_v24 = vpop.permute.xlu1 %2764  ;;  %v3002_v25 = vld [vmem:[#allocation3 + $0x58] sm:$0xff]  ;;  %2943 = vst.msk [vmem:[#allocation3 + $0x80] sm:$0xff] %vm2926_vm13, %v2767_v23 }
 0x45c   :  { %2942 = vst.msk [vmem:[#allocation3 + $0x78] sm:$0xff] %vm2926_vm13, %v2765_v24  ;;  %7613 = vmatmul.mubr.msk.f32.gmra.mxu0 %vm3067_vm14, %v3002_v25  ;;  %v10811_v24 = vld [vmem:[#allocation2 + $0x8] sm:$0xff]  ;;  %v3779_v25 = vld [vmem:[#allocation2 + $0x10] sm:$0x3] }
 0x45d   :  { %7615 = vmatprep.mubr.msk.f32.mxu0 %vm3067_vm14, %v3003_v0  ;;  %3886 = vst.msk [vmem:[#allocation3 + $0x8] sm:$0xff] %vm20_vm0, %v10811_v24 }
 0x45e   :  { %v2771_v42 = vpop.permute.xlu0 %2770  ;;  %v3005_v2 = vld [vmem:[#allocation3 + $0x70] sm:$0xff] }
 0x45f   :  { %v2769_v63 = vpop.permute.xlu1 %2768  ;;  %v3004_v1 = vld [vmem:[#allocation3 + $0x68] sm:$0xff]  ;;  %2945 = vst.msk [vmem:[#allocation3 + $0x90] sm:$0xff] %vm2926_vm13, %v2771_v42  ;;  %v4048_v42 = vrot.slane %v3779_v25, 1 }
 0x460   :  { %2944 = vst.msk [vmem:[#allocation3 + $0x88] sm:$0xff] %vm2926_vm13, %v2769_v63  ;;  %7616 = vmatmul.mubr.msk.f32.gmra.mxu0 %vm3067_vm14, %v3004_v1  ;;  %v4045_v63 = vrot.slane %v10809_v14, 1  ;;  %v4046_v1 = vrot.slane %v10811_v24, 1 }
 0x461   :  { %7618 = vmatprep.mubr.msk.f32.mxu0 %vm3067_vm14, %v3005_v2 }
 0x462   :  { %v2775_v20 = vpop.permute.xlu0 %2774  ;;  %v3007_v58 = vld [vmem:[#allocation3 + $0x80] sm:$0xff] }
 0x463   :  { %v2773_v27 = vpop.permute.xlu1 %2772  ;;  %v3006_v7 = vld [vmem:[#allocation3 + $0x78] sm:$0xff]  ;;  %2947 = vst.msk [vmem:[#allocation3 + $0xa0] sm:$0xff] %vm2926_vm13, %v2775_v20  ;;  %v4049_v20 = vsel %vm561_vm2, %v4046_v1, %v4048_v42 }
 0x464   :  { %2946 = vst.msk [vmem:[#allocation3 + $0x98] sm:$0xff] %vm2926_vm13, %v2773_v27  ;;  %7619 = vmatmul.mubr.msk.f32.gmra.mxu0 %vm3067_vm14, %v3006_v7  ;;  %v4047_v7 = vsel %vm561_vm2, %v4045_v63, %v4046_v1  ;;  %4207 = vrot.lane.b32.xlu1 %v4049_v20, %s7836_s18 }
 0x465   :  { %7621 = vmatprep.mubr.msk.f32.mxu0 %vm3067_vm14, %v3007_v58  ;;  %4205 = vrot.lane.b32.xlu0 %v4047_v7, %s7836_s18 }
 0x466   :  { %v2779_v35 = vpop.permute.xlu0 %2778  ;;  %v3009_v6 = vld [vmem:[#allocation3 + $0x90] sm:$0xff] }
 0x467   :  { %v2777_v26 = vpop.permute.xlu1 %2776  ;;  %v3008_v56 = vld [vmem:[#allocation3 + $0x88] sm:$0xff]  ;;  %2949 = vst.msk [vmem:[#allocation3 + $0xb0] sm:$0xff] %vm2926_vm13, %v2779_v35 }
 0x468   :  { %2948 = vst.msk [vmem:[#allocation3 + $0xa8] sm:$0xff] %vm2926_vm13, %v2777_v26  ;;  %7622 = vmatmul.mubr.msk.f32.gmra.mxu0 %vm3067_vm14, %v3008_v56 }
 0x469   :  { %7624 = vmatprep.mubr.msk.f32.mxu0 %vm3067_vm14, %v3009_v6 }
 0x46a   :  { %v2783_v61 = vpop.permute.xlu0 %2782  ;;  %v3011_v55 = vld [vmem:[#allocation3 + $0xa0] sm:$0xff] }
 0x46b   :  { %v2781_v59 = vpop.permute.xlu1 %2780  ;;  %v3010_v46 = vld [vmem:[#allocation3 + $0x98] sm:$0xff]  ;;  %2951 = vst.msk [vmem:[#allocation3 + $0xc0] sm:$0xff] %vm2926_vm13, %v2783_v61 }
 0x46c   :  { %2950 = vst.msk [vmem:[#allocation3 + $0xb8] sm:$0xff] %vm2926_vm13, %v2781_v59  ;;  %7625 = vmatmul.mubr.msk.f32.gmra.mxu0 %vm3067_vm14, %v3010_v46 }
 0x46d   :  { %7627 = vmatprep.mubr.msk.f32.mxu0 %vm3067_vm14, %v3011_v55 }
 0x46e   :  { %v2787_v36 = vpop.permute.xlu0 %2786  ;;  %v3013_v10 = vld [vmem:[#allocation3 + $0xb0] sm:$0xff] }
 0x46f   :  { %v2785_v44 = vpop.permute.xlu1 %2784  ;;  %v3012_v52 = vld [vmem:[#allocation3 + $0xa8] sm:$0xff]  ;;  %2953 = vst.msk [vmem:[#allocation3 + $0xd0] sm:$0xff] %vm2926_vm13, %v2787_v36 }
 0x470   :  { %2952 = vst.msk [vmem:[#allocation3 + $0xc8] sm:$0xff] %vm2926_vm13, %v2785_v44  ;;  %7628 = vmatmul.mubr.msk.f32.gmra.mxu0 %vm3067_vm14, %v3012_v52 }
 0x471   :  { %7630 = vmatprep.mubr.msk.f32.mxu0 %vm3067_vm14, %v3013_v10 }
 0x472   :  { %v2791_v9 = vpop.permute.xlu0 %2790  ;;  %v3015_v12 = vld [vmem:[#allocation3 + $0xc0] sm:$0xff] }
 0x473   :  { %v2789_v47 = vpop.permute.xlu1 %2788  ;;  %v3014_v29 = vld [vmem:[#allocation3 + $0xb8] sm:$0xff]  ;;  %2955 = vst.msk [vmem:[#allocation3 + $0xe0] sm:$0xff] %vm2926_vm13, %v2791_v9 }
 0x474   :  { %2954 = vst.msk [vmem:[#allocation3 + $0xd8] sm:$0xff] %vm2926_vm13, %v2789_v47  ;;  %7631 = vmatmul.mubr.msk.f32.gmra.mxu0 %vm3067_vm14, %v3014_v29 }
 0x475   :  { %7633 = vmatprep.mubr.msk.f32.mxu0 %vm3067_vm14, %v3015_v12 }
 0x476   :  { %v2795_v39 = vpop.permute.xlu0 %2794  ;;  %v3017_v18 = vld [vmem:[#allocation3 + $0xd0] sm:$0xff] }
 0x477   :  { %v2793_v22 = vpop.permute.xlu1 %2792  ;;  %v3016_v11 = vld [vmem:[#allocation3 + $0xc8] sm:$0xff]  ;;  %2957 = vst.msk [vmem:[#allocation3 + $0xf0] sm:$0xff] %vm2926_vm13, %v2795_v39 }
 0x478   :  { %2956 = vst.msk [vmem:[#allocation3 + $0xe8] sm:$0xff] %vm2926_vm13, %v2793_v22  ;;  %7634 = vmatmul.mubr.msk.f32.gmra.mxu0 %vm3067_vm14, %v3016_v11 }
 0x479   :  { %7636 = vmatprep.mubr.msk.f32.mxu0 %vm3067_vm14, %v3017_v18 }
 0x47a   :  { %v2799_v49 = vpop.permute.xlu0 %2798  ;;  %v3019_v57 = vld [vmem:[#allocation3 + $0xe0] sm:$0xff] }
 0x47b   :  { %v2797_v60 = vpop.permute.xlu1 %2796  ;;  %v3018_v13 = vld [vmem:[#allocation3 + $0xd8] sm:$0xff]  ;;  %2959 = vst.msk [vmem:[#allocation3 + $0x100] sm:$0xff] %vm2926_vm13, %v2799_v49 }
 0x47c   :  { %2958 = vst.msk [vmem:[#allocation3 + $0xf8] sm:$0xff] %vm2926_vm13, %v2797_v60  ;;  %7637 = vmatmul.mubr.msk.f32.gmra.mxu0 %vm3067_vm14, %v3018_v13 }
 0x47d   :  { %7639 = vmatprep.mubr.msk.f32.mxu0 %vm3067_vm14, %v3019_v57 }
 0x47e   :  { %v2803_v62 = vpop.permute.xlu0 %2802  ;;  %v3021_v31 = vld [vmem:[#allocation3 + $0xf0] sm:$0xff] }
 0x47f   :  { %v2801_v40 = vpop.permute.xlu1 %2800  ;;  %v3020_v4 = vld [vmem:[#allocation3 + $0xe8] sm:$0xff]  ;;  %2961 = vst.msk [vmem:[#allocation3 + $0x110] sm:$0xff] %vm2926_vm13, %v2803_v62 }
 0x480   :  { %2960 = vst.msk [vmem:[#allocation3 + $0x108] sm:$0xff] %vm2926_vm13, %v2801_v40  ;;  %7640 = vmatmul.mubr.msk.f32.gmra.mxu0 %vm3067_vm14, %v3020_v4 }
 0x481   :  { %7642 = vmatprep.mubr.msk.f32.mxu0 %vm3067_vm14, %v3021_v31 }
 0x482   :  { %v2807_v48 = vpop.permute.xlu0 %2806  ;;  %v3023_v50 = vld [vmem:[#allocation3 + $0x100] sm:$0xff] }
 0x483   :  { %v2805_v53 = vpop.permute.xlu1 %2804  ;;  %v3022_v3 = vld [vmem:[#allocation3 + $0xf8] sm:$0xff]  ;;  %2963 = vst.msk [vmem:[#allocation3 + $0x120] sm:$0xff] %vm2926_vm13, %v2807_v48 }
 0x484   :  { %2962 = vst.msk [vmem:[#allocation3 + $0x118] sm:$0xff] %vm2926_vm13, %v2805_v53  ;;  %7643 = vmatmul.mubr.msk.f32.gmra.mxu0 %vm3067_vm14, %v3022_v3 }
 0x485   :  { %7645 = vmatprep.mubr.msk.f32.mxu0 %vm3067_vm14, %v3023_v50  ;;  %3917 = vst.msk [vmem:[#allocation3 + $0x100] sm:$0xff] %vm20_vm0, %v10867_v17 }
 0x486   :  { %v2811_v51 = vpop.permute.xlu0 %2810  ;;  %v3025_v43 = vld [vmem:[#allocation3 + $0x110] sm:$0xff] }
 0x487   :  { %v2809_v19 = vpop.permute.xlu1 %2808  ;;  %v3024_v28 = vld [vmem:[#allocation3 + $0x108] sm:$0xff]  ;;  %2965 = vst.msk [vmem:[#allocation3 + $0x130] sm:$0xff] %vm2926_vm13, %v2811_v51 }
 0x488   :  { %2964 = vst.msk [vmem:[#allocation3 + $0x128] sm:$0xff] %vm2926_vm13, %v2809_v19  ;;  %7646 = vmatmul.mubr.msk.f32.gmra.mxu0 %vm3067_vm14, %v3024_v28 }
 0x489   :  { %7648 = vmatprep.mubr.msk.f32.mxu0 %vm3067_vm14, %v3025_v43  ;;  %3918 = vst.msk [vmem:[#allocation3 + $0x108] sm:$0xff] %vm20_vm0, %v10865_v38 }
 0x48a   :  { %v2815_v5 = vpop.permute.xlu0 %2814  ;;  %v3027_v16 = vld [vmem:[#allocation3 + $0x120] sm:$0xff] }
 0x48b   :  { %v2813_v34 = vpop.permute.xlu1 %2812  ;;  %v3026_v30 = vld [vmem:[#allocation3 + $0x118] sm:$0xff]  ;;  %2967 = vst.msk [vmem:[#allocation3 + $0x140] sm:$0xff] %vm2926_vm13, %v2815_v5 }
 0x48c   :  { %2966 = vst.msk [vmem:[#allocation3 + $0x138] sm:$0xff] %vm2926_vm13, %v2813_v34  ;;  %7649 = vmatmul.mubr.msk.f32.gmra.mxu0 %vm3067_vm14, %v3026_v30  ;;  %v10878_v30 = vld [vmem:[%s13980_s2] ss:$0 sm:$0xff] }
 0x48d   :  { %7651 = vmatprep.mubr.msk.f32.mxu0 %vm3067_vm14, %v3027_v16 }
 0x48e   :  { %v2819_v37 = vpop.permute.xlu0 %2818  ;;  %v3029_v54 = vld [vmem:[#allocation3 + $0x130] sm:$0xff] }
 0x48f   :  { %v2817_v41 = vpop.permute.xlu1 %2816  ;;  %v3028_v8 = vld [vmem:[#allocation3 + $0x128] sm:$0xff]  ;;  %2969 = vst.msk [vmem:[#allocation3 + $0x150] sm:$0xff] %vm2926_vm13, %v2819_v37 }
 0x490   :  { %2968 = vst.msk [vmem:[#allocation3 + $0x148] sm:$0xff] %vm2926_vm13, %v2817_v41  ;;  %7652 = vmatmul.mubr.msk.f32.gmra.mxu0 %vm3067_vm14, %v3028_v8 }
 0x491   :  { %7654 = vmatprep.mubr.msk.f32.mxu0 %vm3067_vm14, %v3029_v54 }
 0x492   :  { %v2823_v2 = vpop.permute.xlu0 %2822  ;;  %v3031_v27 = vld [vmem:[#allocation3 + $0x140] sm:$0xff] }
 0x493   :  { %v2821_v23 = vpop.permute.xlu1 %2820  ;;  %v3030_v0 = vld [vmem:[#allocation3 + $0x138] sm:$0xff]  ;;  %2971 = vst.msk [vmem:[#allocation3 + $0x160] sm:$0xff] %vm2926_vm13, %v2823_v2 }
 0x494   :  { %2970 = vst.msk [vmem:[#allocation3 + $0x158] sm:$0xff] %vm2926_vm13, %v2821_v23  ;;  %7655 = vmatmul.mubr.msk.f32.gmra.mxu0 %vm3067_vm14, %v3030_v0 }
 0x495   :  { %7657 = vmatprep.mubr.msk.f32.mxu0 %vm3067_vm14, %v3031_v27 }
 0x496   :  { %v2827_v56 = vpop.permute.xlu0 %2826  ;;  %v3033_v35 = vld [vmem:[#allocation3 + $0x150] sm:$0xff] }
 0x497   :  { %v2825_v58 = vpop.permute.xlu1 %2824  ;;  %v3032_v26 = vld [vmem:[#allocation3 + $0x148] sm:$0xff]  ;;  %2973 = vst.msk [vmem:[#allocation3 + $0x170] sm:$0xff] %vm2926_vm13, %v2827_v56 }
 0x498   :  { %2972 = vst.msk [vmem:[#allocation3 + $0x168] sm:$0xff] %vm2926_vm13, %v2825_v58  ;;  %7658 = vmatmul.mubr.msk.f32.gmra.mxu0 %vm3067_vm14, %v3032_v26 }
 0x499   :  { %7660 = vmatprep.mubr.msk.f32.mxu0 %vm3067_vm14, %v3033_v35 }
 0x49a   :  { %v2831_v46 = vpop.permute.xlu0 %2830  ;;  %v3035_v61 = vld [vmem:[#allocation3 + $0x160] sm:$0xff] }
 0x49b   :  { %v2829_v6 = vpop.permute.xlu1 %2828  ;;  %v3034_v59 = vld [vmem:[#allocation3 + $0x158] sm:$0xff]  ;;  %2975 = vst.msk [vmem:[#allocation3 + $0x180] sm:$0xff] %vm2926_vm13, %v2831_v46 }
 0x49c   :  { %2974 = vst.msk [vmem:[#allocation3 + $0x178] sm:$0xff] %vm2926_vm13, %v2829_v6  ;;  %7661 = vmatmul.mubr.msk.f32.gmra.mxu0 %vm3067_vm14, %v3034_v59 }
 0x49d   :  { %7663 = vmatprep.mubr.msk.f32.mxu0 %vm3067_vm14, %v3035_v61 }
 0x49e   :  { %v2835_v52 = vpop.permute.xlu0 %2834  ;;  %v3037_v36 = vld [vmem:[#allocation3 + $0x170] sm:$0xff] }
 0x49f   :  { %v2833_v55 = vpop.permute.xlu1 %2832  ;;  %v3036_v44 = vld [vmem:[#allocation3 + $0x168] sm:$0xff]  ;;  %2977 = vst.msk [vmem:[#allocation3 + $0x190] sm:$0xff] %vm2926_vm13, %v2835_v52 }
 0x4a0   :  { %2976 = vst.msk [vmem:[#allocation3 + $0x188] sm:$0xff] %vm2926_vm13, %v2833_v55  ;;  %7664 = vmatmul.mubr.msk.f32.gmra.mxu0 %vm3067_vm14, %v3036_v44 }
 0x4a1   :  { %7666 = vmatprep.mubr.msk.f32.mxu0 %vm3067_vm14, %v3037_v36 }
 0x4a2   :  { %v2839_v29 = vpop.permute.xlu0 %2838  ;;  %v3039_v9 = vld [vmem:[#allocation3 + $0x180] sm:$0xff] }
 0x4a3   :  { %v2837_v10 = vpop.permute.xlu1 %2836  ;;  %v3038_v47 = vld [vmem:[#allocation3 + $0x178] sm:$0xff]  ;;  %2979 = vst.msk [vmem:[#allocation3 + $0x1a0] sm:$0xff] %vm2926_vm13, %v2839_v29 }
 0x4a4   :  { %2978 = vst.msk [vmem:[#allocation3 + $0x198] sm:$0xff] %vm2926_vm13, %v2837_v10  ;;  %7667 = vmatmul.mubr.msk.f32.gmra.mxu0 %vm3067_vm14, %v3038_v47 }
 0x4a5   :  { %7669 = vmatprep.mubr.msk.f32.mxu0 %vm3067_vm14, %v3039_v9 }
 0x4a6   :  { %v2843_v11 = vpop.permute.xlu0 %2842  ;;  %v3041_v39 = vld [vmem:[#allocation3 + $0x190] sm:$0xff] }
 0x4a7   :  { %v2841_v12 = vpop.permute.xlu1 %2840  ;;  %v3040_v22 = vld [vmem:[#allocation3 + $0x188] sm:$0xff]  ;;  %2981 = vst.msk [vmem:[#allocation3 + $0x1b0] sm:$0xff] %vm2926_vm13, %v2843_v11 }
 0x4a8   :  { %2980 = vst.msk [vmem:[#allocation3 + $0x1a8] sm:$0xff] %vm2926_vm13, %v2841_v12  ;;  %7670 = vmatmul.mubr.msk.f32.gmra.mxu0 %vm3067_vm14, %v3040_v22 }
 0x4a9   :  { %7672 = vmatprep.mubr.msk.f32.mxu0 %vm3067_vm14, %v3041_v39 }
 0x4aa   :  { %v2847_v13 = vpop.permute.xlu0 %2846  ;;  %v3043_v49 = vld [vmem:[#allocation3 + $0x1a0] sm:$0xff] }
 0x4ab   :  { %v2845_v18 = vpop.permute.xlu1 %2844  ;;  %v3042_v60 = vld [vmem:[#allocation3 + $0x198] sm:$0xff]  ;;  %2983 = vst.msk [vmem:[#allocation3 + $0x1c0] sm:$0xff] %vm2926_vm13, %v2847_v13 }
 0x4ac   :  { %2982 = vst.msk [vmem:[#allocation3 + $0x1b8] sm:$0xff] %vm2926_vm13, %v2845_v18  ;;  %7673 = vmatmul.mubr.msk.f32.gmra.mxu0 %vm3067_vm14, %v3042_v60 }
 0x4ad   :  { %7675 = vmatprep.mubr.msk.f32.mxu0 %vm3067_vm14, %v3043_v49 }
 0x4ae   :  { %v2851_v4 = vpop.permute.xlu0 %2850  ;;  %v3045_v62 = vld [vmem:[#allocation3 + $0x1b0] sm:$0xff] }
 0x4af   :  { %v2849_v57 = vpop.permute.xlu1 %2848  ;;  %v3044_v40 = vld [vmem:[#allocation3 + $0x1a8] sm:$0xff]  ;;  %2985 = vst.msk [vmem:[#allocation3 + $0x1d0] sm:$0xff] %vm2926_vm13, %v2851_v4 }
 0x4b0   :  { %2984 = vst.msk [vmem:[#allocation3 + $0x1c8] sm:$0xff] %vm2926_vm13, %v2849_v57  ;;  %7676 = vmatmul.mubr.msk.f32.gmra.mxu0 %vm3067_vm14, %v3044_v40 }
 0x4b1   :  { %7678 = vmatprep.mubr.msk.f32.mxu0 %vm3067_vm14, %v3045_v62 }
 0x4b2   :  { %v2855_v3 = vpop.permute.xlu0 %2854  ;;  %v3047_v48 = vld [vmem:[#allocation3 + $0x1c0] sm:$0xff] }
 0x4b3   :  { %v2853_v31 = vpop.permute.xlu1 %2852  ;;  %v3046_v53 = vld [vmem:[#allocation3 + $0x1b8] sm:$0xff]  ;;  %2987 = vst.msk [vmem:[#allocation3 + $0x1e0] sm:$0xff] %vm2926_vm13, %v2855_v3 }
 0x4b4   :  { %2986 = vst.msk [vmem:[#allocation3 + $0x1d8] sm:$0xff] %vm2926_vm13, %v2853_v31  ;;  %7679 = vmatmul.mubr.msk.f32.gmra.mxu0 %vm3067_vm14, %v3046_v53 }
 0x4b5   :  { %7681 = vmatprep.mubr.msk.f32.mxu0 %vm3067_vm14, %v3047_v48 }
 0x4b6   :  { %v3049_v28 = vld [vmem:[#allocation3 + $0x1d0] sm:$0xff] }
 0x4b7   :  { %v2857_v50 = vpop.permute.xlu1 %2856  ;;  %v3048_v19 = vld [vmem:[#allocation3 + $0x1c8] sm:$0xff] }
 0x4b8   :  { %2988 = vst.msk [vmem:[#allocation3 + $0x1e8] sm:$0xff] %vm2926_vm13, %v2857_v50  ;;  %7682 = vmatmul.mubr.msk.f32.gmra.mxu0 %vm3067_vm14, %v3048_v19 }
 0x4b9   :  { %7684 = vmatprep.mubr.msk.f32.mxu0 %vm3067_vm14, %v3049_v28 }
 0x4ba   :  { %v3051_v43 = vld [vmem:[#allocation3 + $0x1e0] sm:$0xff] }
 0x4bb   :  { %v3050_v51 = vld [vmem:[#allocation3 + $0x1d8] sm:$0xff] }
 0x4bc   :  { %7685 = vmatmul.mubr.msk.f32.gmra.mxu0 %vm3067_vm14, %v3050_v51 }
 0x4bd   :  { %7687 = vmatprep.mubr.msk.f32.mxu0 %vm3067_vm14, %v3051_v43 }
 0x4bf   :  { %v3052_v45 = vld [vmem:[#allocation3 + $0x1e8] sm:$0xff] }
 0x4c0   :  { %7688 = vmatmul.mubr.msk.f32.gmra.mxu0 %vm3067_vm14, %v3052_v45 }
 0x4cb   :  { %v2859_v32 = vpop.permute.xlu0 %2858 }
 0x4cc   :  { %2989 = vst.msk [vmem:[#allocation3 + $0x1f0] sm:$0xff] %vm2926_vm13, %v2859_v32  ;;  %v2861_v34 = vpop.permute.xlu1 %2860 }
 0x4cd   :  { %2990 = vst.msk [vmem:[#allocation3 + $0x1f8] sm:$0xff] %vm2926_vm13, %v2861_v34 }
 0x4d3   :  { %v3053_v54 = vld [vmem:[#allocation3 + $0x1f0] sm:$0xff] }
 0x4d4   :  { %7690 = vmatprep.mubr.msk.f32.mxu0 %vm3067_vm14, %v3053_v54  ;;  %v3054_v25 = vld [vmem:[#allocation3 + $0x1f8] sm:$0xff] }
 0x4d5   :  { %7691 = vmatmul.mubr.msk.f32.gmra.mxu0 %vm3067_vm14, %v3054_v25 }
 0x4d6   :  { %v4208_v41 = vpop.permute.xlu1 %4207 }
 0x4d7   :  { %v4206_v16 = vpop.permute.xlu0 %4205  ;;  %4398 = vst.msk [vmem:[#allocation3 + $0x8] sm:$0xff] %vm914_vm5, %v4208_v41 }
 0x4d8   :  { %4397 = vst.msk [vmem:[#allocation3] sm:$0xff] %vm914_vm5, %v4206_v16 }
 0x508   :  { %v7599_v5 = vpop.f32.mrf.mxu0 }
 0x509   :  { %v3336_v21 = vadd.f32 %v7599_v5, %v10878_v30 }
 0x50a   :  { %v3330_v8 = vpop.f32.mrf.mxu0 }
 0x50b   :  { %v3650_v15 = vmax.f32 %v3336_v21, 0.0  ;;  %v3331_v37 = vadd.f32 %v10878_v30, %v3330_v8 }
 0x50c   :  { %v7602_v33 = vpop.f32.mrf.mxu0 }
 0x50d   :  { %3714 = vst.msk [vmem:[#allocation2 + $0x21] sm:$0xff] %vm20_vm0, %v3650_v15  ;;  %v3649_v23 = vmax.f32 %v3331_v37, 0.0  ;;  %v3346_v0 = vadd.f32 %v7602_v33, %v10878_v30 }
 0x50e   :  { %v3340_v63 = vpop.f32.mrf.mxu0 }
 0x50f   :  { %3713 = vst.msk [vmem:[#allocation2 + $0x19] sm:$0xff] %vm20_vm0, %v3649_v23  ;;  %v3652_v1 = vmax.f32 %v3346_v0, 0.0  ;;  %v3341_v42 = vadd.f32 %v10878_v30, %v3340_v63 }
 0x510   :  { %v7605_v2 = vpop.f32.mrf.mxu0 }
 0x511   :  { %3716 = vst.msk [vmem:[#allocation2 + $0x39] sm:$0xff] %vm20_vm0, %v3652_v1  ;;  %v3651_v27 = vmax.f32 %v3341_v42, 0.0  ;;  %v3356_v7 = vadd.f32 %v7605_v2, %v10878_v30 }
 0x512   :  { %v3350_v20 = vpop.f32.mrf.mxu0 }
 0x513   :  { %3715 = vst.msk [vmem:[#allocation2 + $0x31] sm:$0xff] %vm20_vm0, %v3651_v27  ;;  %v3654_v58 = vmax.f32 %v3356_v7, 0.0  ;;  %v3351_v26 = vadd.f32 %v10878_v30, %v3350_v20 }
 0x514   :  { %v7608_v56 = vpop.f32.mrf.mxu0  ;;  %v3782_v35 = vld [vmem:[#allocation2 + $0x28] sm:$0x3] }
 0x515   :  { %3718 = vst.msk [vmem:[#allocation2 + $0x51] sm:$0xff] %vm20_vm0, %v3654_v58  ;;  %v3653_v6 = vmax.f32 %v3351_v26, 0.0  ;;  %v3366_v59 = vadd.f32 %v7608_v56, %v10878_v30  ;;  %v4053_v55 = vrot.slane %v3782_v35, 1 }
 0x516   :  { %v3360_v46 = vpop.f32.mrf.mxu0  ;;  %v10896_v61 = vld [vmem:[#allocation2 + $0x20] sm:$0xff]  ;;  %v10898_v44 = vld [vmem:[#allocation2 + $0x18] sm:$0xff] }
 0x517   :  { %3717 = vst.msk [vmem:[#allocation2 + $0x49] sm:$0xff] %vm20_vm0, %v3653_v6  ;;  %v3656_v52 = vmax.f32 %v3366_v59, 0.0  ;;  %v3361_v36 = vadd.f32 %v10878_v30, %v3360_v46  ;;  %v4051_v10 = vrot.slane %v10896_v61, 1  ;;  %3888 = vst.msk [vmem:[#allocation3 + $0x18] sm:$0xff] %vm20_vm0, %v10896_v61  ;;  %v4050_v47 = vrot.slane %v10898_v44, 1 }
 0x518   :  { %3887 = vst.msk [vmem:[#allocation3 + $0x10] sm:$0xff] %vm20_vm0, %v10898_v44  ;;  %v7611_v29 = vpop.f32.mrf.mxu0  ;;  %v3785_v9 = vld [vmem:[#allocation2 + $0x40] sm:$0x3] }
 0x519   :  { %3720 = vst.msk [vmem:[#allocation2 + $0x69] sm:$0xff] %vm20_vm0, %v3656_v52  ;;  %v3655_v12 = vmax.f32 %v3361_v36, 0.0  ;;  %v3376_v22 = vadd.f32 %v7611_v29, %v10878_v30  ;;  %v10911_v11 = vsel %vm561_vm2, %v4051_v10, %v4053_v55  ;;  %v10914_v39 = vsel %vm561_vm2, %v4050_v47, %v4051_v10 }
 0x51a   :  { %15069 = vst [vmem:[#allocation12_spill] sm:$0xff] %v10911_v11  ;;  %15070 = vst [vmem:[#allocation22_spill] sm:$0xff] %v10914_v39  ;;  %4211 = vrot.lane.b32.xlu1 %v10911_v11, %s7836_s18  ;;  %4209 = vrot.lane.b32.xlu0 %v10914_v39, %s7836_s18  ;;  %v3370_v18 = vpop.f32.mrf.mxu0  ;;  %v10920_v60 = vld [vmem:[#allocation2 + $0x38] sm:$0xff]  ;;  %v4058_v13 = vrot.slane %v3785_v9, 1  ;;  %v10922_v49 = vld [vmem:[#allocation2 + $0x30] sm:$0xff] }
 0x51b   :  { %3719 = vst.msk [vmem:[#allocation2 + $0x61] sm:$0xff] %vm20_vm0, %v3655_v12  ;;  %v3658_v57 = vmax.f32 %v3376_v22, 0.0  ;;  %v3371_v40 = vadd.f32 %v10878_v30, %v3370_v18  ;;  %v4056_v4 = vrot.slane %v10920_v60, 1  ;;  %3890 = vst.msk [vmem:[#allocation3 + $0x28] sm:$0xff] %vm20_vm0, %v10920_v60  ;;  %v4055_v62 = vrot.slane %v10922_v49, 1 }
 0x51c   :  { %3889 = vst.msk [vmem:[#allocation3 + $0x20] sm:$0xff] %vm20_vm0, %v10922_v49  ;;  %v7614_v31 = vpop.f32.mrf.mxu0  ;;  %v3788_v53 = vld [vmem:[#allocation2 + $0x58] sm:$0x3] }
 0x51d   :  { %3722 = vst.msk [vmem:[#allocation2 + $0x81] sm:$0xff] %vm20_vm0, %v3658_v57  ;;  %v3657_v3 = vmax.f32 %v3371_v40, 0.0  ;;  %v3386_v48 = vadd.f32 %v7614_v31, %v10878_v30  ;;  %v10935_v50 = vsel %vm561_vm2, %v4056_v4, %v4058_v13  ;;  %v10938_v19 = vsel %vm561_vm2, %v4055_v62, %v4056_v4 }
 0x51e   :  { %15071 = vst [vmem:[#allocation24_spill] sm:$0xff] %v10935_v50  ;;  %15072 = vst [vmem:[#allocation25_spill] sm:$0xff] %v10938_v19  ;;  %v3380_v28 = vpop.f32.mrf.mxu0  ;;  %4215 = vrot.lane.b32.xlu1 %v10935_v50, %s7836_s18  ;;  %4213 = vrot.lane.b32.xlu0 %v10938_v19, %s7836_s18  ;;  %v10944_v51 = vld [vmem:[#allocation2 + $0x50] sm:$0xff]  ;;  %v4063_v43 = vrot.slane %v3788_v53, 1  ;;  %v10946_v45 = vld [vmem:[#allocation2 + $0x48] sm:$0xff] }
 0x51f   :  { %3721 = vst.msk [vmem:[#allocation2 + $0x79] sm:$0xff] %vm20_vm0, %v3657_v3  ;;  %v3660_v32 = vmax.f32 %v3386_v48, 0.0  ;;  %v3381_v34 = vadd.f32 %v10878_v30, %v3380_v28  ;;  %v4061_v5 = vrot.slane %v10944_v51, 1  ;;  %3892 = vst.msk [vmem:[#allocation3 + $0x38] sm:$0xff] %vm20_vm0, %v10944_v51  ;;  %v4060_v16 = vrot.slane %v10946_v45, 1 }
 0x520   :  { %3891 = vst.msk [vmem:[#allocation3 + $0x30] sm:$0xff] %vm20_vm0, %v10946_v45  ;;  %v7617_v21 = vpop.f32.mrf.mxu0  ;;  %v3791_v41 = vld [vmem:[#allocation2 + $0x70] sm:$0x3] }
 0x521   :  { %3724 = vst.msk [vmem:[#allocation2 + $0x99] sm:$0xff] %vm20_vm0, %v3660_v32  ;;  %v3659_v8 = vmax.f32 %v3381_v34, 0.0  ;;  %v3396_v15 = vadd.f32 %v7617_v21, %v10878_v30  ;;  %v10959_v37 = vsel %vm561_vm2, %v4061_v5, %v4063_v43  ;;  %v10962_v54 = vsel %vm561_vm2, %v4060_v16, %v4061_v5 }
 0x522   :  { %15073 = vst [vmem:[#allocation4_spill] sm:$0xff] %v10959_v37  ;;  %15074 = vst [vmem:[#allocation8_spill] sm:$0xff] %v10962_v54  ;;  %v3390_v33 = vpop.f32.mrf.mxu0  ;;  %4219 = vrot.lane.b32.xlu1 %v10959_v37, %s7836_s18  ;;  %4217 = vrot.lane.b32.xlu0 %v10962_v54, %s7836_s18  ;;  %v10968_v25 = vld [vmem:[#allocation2 + $0x68] sm:$0xff]  ;;  %v4068_v23 = vrot.slane %v3791_v41, 1  ;;  %v10970_v0 = vld [vmem:[#allocation2 + $0x60] sm:$0xff] }
 0x523   :  { %3723 = vst.msk [vmem:[#allocation2 + $0x91] sm:$0xff] %vm20_vm0, %v3659_v8  ;;  %v3662_v63 = vmax.f32 %v3396_v15, 0.0  ;;  %v3391_v1 = vadd.f32 %v10878_v30, %v3390_v33  ;;  %v4066_v42 = vrot.slane %v10968_v25, 1  ;;  %3894 = vst.msk [vmem:[#allocation3 + $0x48] sm:$0xff] %vm20_vm0, %v10968_v25  ;;  %v4065_v2 = vrot.slane %v10970_v0, 1 }
 0x524   :  { %3893 = vst.msk [vmem:[#allocation3 + $0x40] sm:$0xff] %vm20_vm0, %v10970_v0  ;;  %v7620_v27 = vpop.f32.mrf.mxu0  ;;  %v3794_v7 = vld [vmem:[#allocation2 + $0x88] sm:$0x3] }
 0x525   :  { %3726 = vst.msk [vmem:[#allocation2 + $0xb1] sm:$0xff] %vm20_vm0, %v3662_v63  ;;  %v3661_v20 = vmax.f32 %v3391_v1, 0.0  ;;  %v3406_v58 = vadd.f32 %v7620_v27, %v10878_v30  ;;  %v10983_v26 = vsel %vm561_vm2, %v4066_v42, %v4068_v23  ;;  %v10986_v56 = vsel %vm561_vm2, %v4065_v2, %v4066_v42 }
 0x526   :  { %15075 = vst [vmem:[#allocation80_spill] sm:$0xff] %v10983_v26  ;;  %15076 = vst [vmem:[#allocation81_spill] sm:$0xff] %v10986_v56  ;;  %v3400_v35 = vpop.f32.mrf.mxu0  ;;  %4223 = vrot.lane.b32.xlu1 %v10983_v26, %s7836_s18  ;;  %4221 = vrot.lane.b32.xlu0 %v10986_v56, %s7836_s18  ;;  %v10992_v6 = vld [vmem:[#allocation2 + $0x80] sm:$0xff]  ;;  %v4073_v59 = vrot.slane %v3794_v7, 1  ;;  %v10994_v46 = vld [vmem:[#allocation2 + $0x78] sm:$0xff] }
 0x527   :  { %3725 = vst.msk [vmem:[#allocation2 + $0xa9] sm:$0xff] %vm20_vm0, %v3661_v20  ;;  %v3664_v55 = vmax.f32 %v3406_v58, 0.0  ;;  %v3401_v52 = vadd.f32 %v10878_v30, %v3400_v35  ;;  %v4071_v36 = vrot.slane %v10992_v6, 1  ;;  %3896 = vst.msk [vmem:[#allocation3 + $0x58] sm:$0xff] %vm20_vm0, %v10992_v6  ;;  %v4070_v10 = vrot.slane %v10994_v46, 1 }
 0x528   :  { %3895 = vst.msk [vmem:[#allocation3 + $0x50] sm:$0xff] %vm20_vm0, %v10994_v46  ;;  %v7623_v47 = vpop.f32.mrf.mxu0  ;;  %v3797_v29 = vld [vmem:[#allocation2 + $0xa0] sm:$0x3] }
 0x529   :  { %3728 = vst.msk [vmem:[#allocation2 + $0xc9] sm:$0xff] %vm20_vm0, %v3664_v55  ;;  %v3663_v9 = vmax.f32 %v3401_v52, 0.0  ;;  %v3416_v12 = vadd.f32 %v7623_v47, %v10878_v30  ;;  %v11007_v22 = vsel %vm561_vm2, %v4071_v36, %v4073_v59  ;;  %v11010_v18 = vsel %vm561_vm2, %v4070_v10, %v4071_v36 }
 0x52a   :  { %15077 = vst [vmem:[#allocation109_spill] sm:$0xff] %v11007_v22  ;;  %15078 = vst [vmem:[#allocation110_spill] sm:$0xff] %v11010_v18  ;;  %v3410_v13 = vpop.f32.mrf.mxu0  ;;  %4227 = vrot.lane.b32.xlu1 %v11007_v22, %s7836_s18  ;;  %4225 = vrot.lane.b32.xlu0 %v11010_v18, %s7836_s18  ;;  %v11016_v57 = vld [vmem:[#allocation2 + $0x98] sm:$0xff]  ;;  %v4078_v40 = vrot.slane %v3797_v29, 1  ;;  %v11018_v4 = vld [vmem:[#allocation2 + $0x90] sm:$0xff] }
 0x52b   :  { %3727 = vst.msk [vmem:[#allocation2 + $0xc1] sm:$0xff] %vm20_vm0, %v3663_v9  ;;  %v3666_v62 = vmax.f32 %v3416_v12, 0.0  ;;  %v3411_v31 = vadd.f32 %v10878_v30, %v3410_v13  ;;  %v4076_v53 = vrot.slane %v11016_v57, 1  ;;  %3898 = vst.msk [vmem:[#allocation3 + $0x68] sm:$0xff] %vm20_vm0, %v11016_v57  ;;  %v4075_v3 = vrot.slane %v11018_v4, 1 }
 0x52c   :  { %3897 = vst.msk [vmem:[#allocation3 + $0x60] sm:$0xff] %vm20_vm0, %v11018_v4  ;;  %v7626_v48 = vpop.f32.mrf.mxu0  ;;  %v3800_v28 = vld [vmem:[#allocation2 + $0xb8] sm:$0x3] }
 0x52d   :  { %3730 = vst.msk [vmem:[#allocation2 + $0xe1] sm:$0xff] %vm20_vm0, %v3666_v62  ;;  %v3665_v43 = vmax.f32 %v3411_v31, 0.0  ;;  %v3426_v32 = vadd.f32 %v7626_v48, %v10878_v30  ;;  %v11031_v34 = vsel %vm561_vm2, %v4076_v53, %v4078_v40  ;;  %v11034_v5 = vsel %vm561_vm2, %v4075_v3, %v4076_v53 }
 0x52e   :  { %15079 = vst [vmem:[#allocation111_spill] sm:$0xff] %v11031_v34  ;;  %15080 = vst [vmem:[#allocation39_spill] sm:$0xff] %v11034_v5  ;;  %v3420_v16 = vpop.f32.mrf.mxu0  ;;  %4231 = vrot.lane.b32.xlu1 %v11031_v34, %s7836_s18  ;;  %4229 = vrot.lane.b32.xlu0 %v11034_v5, %s7836_s18  ;;  %v11040_v21 = vld [vmem:[#allocation2 + $0xb0] sm:$0xff]  ;;  %v4083_v41 = vrot.slane %v3800_v28, 1  ;;  %v11042_v8 = vld [vmem:[#allocation2 + $0xa8] sm:$0xff] }
 0x52f   :  { %3729 = vst.msk [vmem:[#allocation2 + $0xd9] sm:$0xff] %vm20_vm0, %v3665_v43  ;;  %v3668_v15 = vmax.f32 %v3426_v32, 0.0  ;;  %v3421_v33 = vadd.f32 %v10878_v30, %v3420_v16  ;;  %v4081_v23 = vrot.slane %v11040_v21, 1  ;;  %3900 = vst.msk [vmem:[#allocation3 + $0x78] sm:$0xff] %vm20_vm0, %v11040_v21  ;;  %v4080_v63 = vrot.slane %v11042_v8, 1 }
 0x530   :  { %3899 = vst.msk [vmem:[#allocation3 + $0x70] sm:$0xff] %vm20_vm0, %v11042_v8  ;;  %v7629_v1 = vpop.f32.mrf.mxu0  ;;  %v3803_v42 = vld [vmem:[#allocation2 + $0xd0] sm:$0x3] }
 0x531   :  { %3732 = vst.msk [vmem:[#allocation2 + $0xf9] sm:$0xff] %vm20_vm0, %v3668_v15  ;;  %v3667_v2 = vmax.f32 %v3421_v33, 0.0  ;;  %v3436_v27 = vadd.f32 %v7629_v1, %v10878_v30  ;;  %v11055_v7 = vsel %vm561_vm2, %v4081_v23, %v4083_v41  ;;  %v11058_v20 = vsel %vm561_vm2, %v4080_v63, %v4081_v23 }
 0x532   :  { %15081 = vst [vmem:[#allocation126_spill] sm:$0xff] %v11055_v7  ;;  %15082 = vst [vmem:[#allocation73_spill] sm:$0xff] %v11058_v20  ;;  %v3430_v58 = vpop.f32.mrf.mxu0  ;;  %4235 = vrot.lane.b32.xlu1 %v11055_v7, %s7836_s18  ;;  %4233 = vrot.lane.b32.xlu0 %v11058_v20, %s7836_s18  ;;  %v11064_v35 = vld [vmem:[#allocation2 + $0xc8] sm:$0xff]  ;;  %v4088_v59 = vrot.slane %v3803_v42, 1  ;;  %v11066_v55 = vld [vmem:[#allocation2 + $0xc0] sm:$0xff] }
 0x533   :  { %3731 = vst.msk [vmem:[#allocation2 + $0xf1] sm:$0xff] %vm20_vm0, %v3667_v2  ;;  %v3670_v52 = vmax.f32 %v3436_v27, 0.0  ;;  %v3431_v36 = vadd.f32 %v10878_v30, %v3430_v58  ;;  %v4086_v10 = vrot.slane %v11064_v35, 1  ;;  %3902 = vst.msk [vmem:[#allocation3 + $0x88] sm:$0xff] %vm20_vm0, %v11064_v35  ;;  %v4085_v47 = vrot.slane %v11066_v55, 1 }
 0x534   :  { %3901 = vst.msk [vmem:[#allocation3 + $0x80] sm:$0xff] %vm20_vm0, %v11066_v55  ;;  %v7632_v29 = vpop.f32.mrf.mxu0  ;;  %v3806_v9 = vld [vmem:[#allocation2 + $0xe8] sm:$0x3] }
 0x535   :  { %3734 = vst.msk [vmem:[#allocation2 + $0x111] sm:$0xff] %vm20_vm0, %v3670_v52  ;;  %v3669_v12 = vmax.f32 %v3431_v36, 0.0  ;;  %v3446_v13 = vadd.f32 %v7632_v29, %v10878_v30  ;;  %v11079_v40 = vsel %vm561_vm2, %v4086_v10, %v4088_v59  ;;  %v11082_v62 = vsel %vm561_vm2, %v4085_v47, %v4086_v10 }
 0x536   :  { %15083 = vst [vmem:[#allocation127_spill] sm:$0xff] %v11079_v40  ;;  %15084 = vst [vmem:[#allocation42_spill] sm:$0xff] %v11082_v62  ;;  %v3440_v31 = vpop.f32.mrf.mxu0  ;;  %4239 = vrot.lane.b32.xlu1 %v11079_v40, %s7836_s18  ;;  %4237 = vrot.lane.b32.xlu0 %v11082_v62, %s7836_s18  ;;  %v11088_v53 = vld [vmem:[#allocation2 + $0xe0] sm:$0xff]  ;;  %v4093_v3 = vrot.slane %v3806_v9, 1  ;;  %v11090_v48 = vld [vmem:[#allocation2 + $0xd8] sm:$0xff] }
 0x537   :  { %3733 = vst.msk [vmem:[#allocation2 + $0x109] sm:$0xff] %vm20_vm0, %v3669_v12  ;;  %v3672_v28 = vmax.f32 %v3446_v13, 0.0  ;;  %v3441_v43 = vadd.f32 %v10878_v30, %v3440_v31  ;;  %v4091_v32 = vrot.slane %v11088_v53, 1  ;;  %3904 = vst.msk [vmem:[#allocation3 + $0x98] sm:$0xff] %vm20_vm0, %v11088_v53  ;;  %v4090_v16 = vrot.slane %v11090_v48, 1 }
 0x538   :  { %3903 = vst.msk [vmem:[#allocation3 + $0x90] sm:$0xff] %vm20_vm0, %v11090_v48  ;;  %v7635_v41 = vpop.f32.mrf.mxu0  ;;  %v3809_v15 = vld [vmem:[#allocation2 + $0x100] sm:$0x3] }
 0x539   :  { %3736 = vst.msk [vmem:[#allocation2 + $0x129] sm:$0xff] %vm20_vm0, %v3672_v28  ;;  %v3671_v33 = vmax.f32 %v3441_v43, 0.0  ;;  %v3456_v23 = vadd.f32 %v7635_v41, %v10878_v30  ;;  %v11103_v63 = vsel %vm561_vm2, %v4091_v32, %v4093_v3  ;;  %v11106_v1 = vsel %vm561_vm2, %v4090_v16, %v4091_v32 }
 0x53a   :  { %15085 = vst [vmem:[#allocation79_spill] sm:$0xff] %v11103_v63  ;;  %15086 = vst [vmem:[#allocation138_spill] sm:$0xff] %v11106_v1  ;;  %v3450_v42 = vpop.f32.mrf.mxu0  ;;  %4243 = vrot.lane.b32.xlu1 %v11103_v63, %s7836_s18  ;;  %4241 = vrot.lane.b32.xlu0 %v11106_v1, %s7836_s18  ;;  %v11112_v2 = vld [vmem:[#allocation2 + $0xf8] sm:$0xff]  ;;  %v4098_v27 = vrot.slane %v3809_v15, 1  ;;  %v11114_v58 = vld [vmem:[#allocation2 + $0xf0] sm:$0xff] }
 0x53b   :  { %3735 = vst.msk [vmem:[#allocation2 + $0x121] sm:$0xff] %vm20_vm0, %v3671_v33  ;;  %v3674_v59 = vmax.f32 %v3456_v23, 0.0  ;;  %v3451_v52 = vadd.f32 %v10878_v30, %v3450_v42  ;;  %v4096_v36 = vrot.slane %v11112_v2, 1  ;;  %3906 = vst.msk [vmem:[#allocation3 + $0xa8] sm:$0xff] %vm20_vm0, %v11112_v2  ;;  %v4095_v10 = vrot.slane %v11114_v58, 1 }
 0x53c   :  { %3905 = vst.msk [vmem:[#allocation3 + $0xa0] sm:$0xff] %vm20_vm0, %v11114_v58  ;;  %v7638_v47 = vpop.f32.mrf.mxu0  ;;  %v3812_v29 = vld [vmem:[#allocation2 + $0x118] sm:$0x3] }
 0x53d   :  { %3738 = vst.msk [vmem:[#allocation2 + $0x141] sm:$0xff] %vm20_vm0, %v3674_v59  ;;  %v3673_v9 = vmax.f32 %v3451_v52, 0.0  ;;  %v3466_v12 = vadd.f32 %v7638_v47, %v10878_v30  ;;  %v11127_v13 = vsel %vm561_vm2, %v4096_v36, %v4098_v27  ;;  %v11130_v31 = vsel %vm561_vm2, %v4095_v10, %v4096_v36 }
 0x53e   :  { %15087 = vst [vmem:[#allocation139_spill] sm:$0xff] %v11127_v13  ;;  %15088 = vst [vmem:[#allocation140_spill] sm:$0xff] %v11130_v31  ;;  %v3460_v3 = vpop.f32.mrf.mxu0  ;;  %4247 = vrot.lane.b32.xlu1 %v11127_v13, %s7836_s18  ;;  %4245 = vrot.lane.b32.xlu0 %v11130_v31, %s7836_s18  ;;  %v11136_v28 = vld [vmem:[#allocation2 + $0x110] sm:$0xff]  ;;  %v4103_v43 = vrot.slane %v3812_v29, 1  ;;  %v11138_v32 = vld [vmem:[#allocation2 + $0x108] sm:$0xff] }
 0x53f   :  { %15089 = vst [vmem:[#allocation13_spill] sm:$0xff] %v11136_v28  ;;  %15090 = vst [vmem:[#allocation14_spill] sm:$0xff] %v11138_v32  ;;  %v3676_v16 = vmax.f32 %v3466_v12, 0.0  ;;  %v3461_v41 = vadd.f32 %v10878_v30, %v3460_v3  ;;  %v4101_v15 = vrot.slane %v11136_v28, 1  ;;  %v4100_v33 = vrot.slane %v11138_v32, 1 }
 0x540   :  { %3737 = vst.msk [vmem:[#allocation2 + $0x139] sm:$0xff] %vm20_vm0, %v3673_v9  ;;  %3908 = vst.msk [vmem:[#allocation3 + $0xb8] sm:$0xff] %vm20_vm0, %v11136_v28  ;;  %v7641_v23 = vpop.f32.mrf.mxu0  ;;  %v3815_v42 = vld [vmem:[#allocation2 + $0x130] sm:$0x3] }
 0x541   :  { %3907 = vst.msk [vmem:[#allocation3 + $0xb0] sm:$0xff] %vm20_vm0, %v11138_v32  ;;  %3740 = vst.msk [vmem:[#allocation2 + $0x159] sm:$0xff] %vm20_vm0, %v3676_v16  ;;  %v3675_v27 = vmax.f32 %v3461_v41, 0.0  ;;  %v3476_v59 = vadd.f32 %v7641_v23, %v10878_v30  ;;  %v11151_v52 = vsel %vm561_vm2, %v4101_v15, %v4103_v43  ;;  %v11154_v36 = vsel %vm561_vm2, %v4100_v33, %v4101_v15 }
 0x542   :  { %15091 = vst [vmem:[#allocation15_spill] sm:$0xff] %v11151_v52  ;;  %15092 = vst [vmem:[#allocation16_spill] sm:$0xff] %v11154_v36  ;;  %v3470_v10 = vpop.f32.mrf.mxu0  ;;  %4251 = vrot.lane.b32.xlu1 %v11151_v52, %s7836_s18  ;;  %4249 = vrot.lane.b32.xlu0 %v11154_v36, %s7836_s18  ;;  %v11160_v47 = vld [vmem:[#allocation2 + $0x128] sm:$0xff]  ;;  %v4108_v29 = vrot.slane %v3815_v42, 1  ;;  %v11162_v9 = vld [vmem:[#allocation2 + $0x120] sm:$0xff] }
 0x543   :  { %15093 = vst [vmem:[#allocation19_spill] sm:$0xff] %v11160_v47  ;;  %15094 = vst [vmem:[#allocation20_spill] sm:$0xff] %v11162_v9  ;;  %v3678_v12 = vmax.f32 %v3476_v59, 0.0  ;;  %v3471_v3 = vadd.f32 %v10878_v30, %v3470_v10  ;;  %v4106_v43 = vrot.slane %v11160_v47, 1  ;;  %v4105_v16 = vrot.slane %v11162_v9, 1 }
 0x544   :  { %3739 = vst.msk [vmem:[#allocation2 + $0x151] sm:$0xff] %vm20_vm0, %v3675_v27  ;;  %3910 = vst.msk [vmem:[#allocation3 + $0xc8] sm:$0xff] %vm20_vm0, %v11160_v47  ;;  %v7644_v41 = vpop.f32.mrf.mxu0  ;;  %v11172_v15 = vld [vmem:[#allocation2 + $0x148] sm:$0x3] }
 0x545   :  { %3909 = vst.msk [vmem:[#allocation3 + $0xc0] sm:$0xff] %vm20_vm0, %v11162_v9  ;;  %3742 = vst.msk [vmem:[#allocation2 + $0x171] sm:$0xff] %vm20_vm0, %v3678_v12  ;;  %v3677_v33 = vmax.f32 %v3471_v3, 0.0  ;;  %v3486_v23 = vadd.f32 %v7644_v41, %v10878_v30  ;;  %v11177_v42 = vsel %vm561_vm2, %v4106_v43, %v4108_v29  ;;  %v11180_v27 = vsel %vm561_vm2, %v4105_v16, %v4106_v43 }
 0x546   :  { %15095 = vst [vmem:[#allocation23_spill] sm:$0xff] %v11177_v42  ;;  %15096 = vst [vmem:[#allocation40_spill] sm:$0xff] %v11180_v27  ;;  %v3480_v59 = vpop.f32.mrf.mxu0  ;;  %4255 = vrot.lane.b32.xlu1 %v11177_v42, %s7836_s18  ;;  %4253 = vrot.lane.b32.xlu0 %v11180_v27, %s7836_s18  ;;  %v4113_v12 = vrot.slane %v11172_v15, 1 }
 0x547   :  { %v11186_v10 = vld [vmem:[#allocation2 + $0x140] sm:$0xff]  ;;  %v11189_v3 = vld [vmem:[#allocation2 + $0x138] sm:$0xff]  ;;  %3741 = vst.msk [vmem:[#allocation2 + $0x169] sm:$0xff] %vm20_vm0, %v3677_v33  ;;  %v3680_v29 = vmax.f32 %v3486_v23, 0.0  ;;  %v3481_v41 = vadd.f32 %v10878_v30, %v3480_v59 }
 0x548   :  { %15097 = vst [vmem:[#allocation41_spill] sm:$0xff] %v11186_v10  ;;  %15098 = vst [vmem:[#allocation66_spill] sm:$0xff] %v11189_v3  ;;  %v4111_v43 = vrot.slane %v11186_v10, 1  ;;  %v4110_v16 = vrot.slane %v11189_v3, 1  ;;  %v7647_v27 = vpop.f32.mrf.mxu0  ;;  %v11199_v42 = vld [vmem:[#allocation2 + $0x160] sm:$0x3] }
 0x549   :  { %3912 = vst.msk [vmem:[#allocation3 + $0xd8] sm:$0xff] %vm20_vm0, %v11186_v10  ;;  %3911 = vst.msk [vmem:[#allocation3 + $0xd0] sm:$0xff] %vm20_vm0, %v11189_v3  ;;  %v3679_v36 = vmax.f32 %v3481_v41, 0.0  ;;  %v3496_v33 = vadd.f32 %v7647_v27, %v10878_v30 }
 0x54a   :  { %3744 = vst.msk [vmem:[#allocation2 + $0x189] sm:$0xff] %vm20_vm0, %v3680_v29  ;;  %v11204_v23 = vsel %vm561_vm2, %v4111_v43, %v4113_v12  ;;  %v11207_v59 = vsel %vm561_vm2, %v4110_v16, %v4111_v43  ;;  %v3490_v52 = vpop.f32.mrf.mxu0  ;;  %v4118_v29 = vrot.slane %v11199_v42, 1 }
 0x54b   :  { %15099 = vst [vmem:[#allocation67_spill] sm:$0xff] %v11204_v23  ;;  %15100 = vst [vmem:[#allocation68_spill] sm:$0xff] %v11207_v59  ;;  %4259 = vrot.lane.b32.xlu1 %v11204_v23, %s7836_s18  ;;  %4257 = vrot.lane.b32.xlu0 %v11207_v59, %s7836_s18  ;;  %v11213_v31 = vld [vmem:[#allocation2 + $0x158] sm:$0xff]  ;;  %v11216_v41 = vld [vmem:[#allocation2 + $0x150] sm:$0xff]  ;;  %v3682_v27 = vmax.f32 %v3496_v33, 0.0  ;;  %v3491_v12 = vadd.f32 %v10878_v30, %v3490_v52 }
 0x54c   :  { %15101 = vst [vmem:[#allocation70_spill] sm:$0xff] %v11213_v31  ;;  %15102 = vst [vmem:[#allocation71_spill] sm:$0xff] %v11216_v41  ;;  %v4116_v43 = vrot.slane %v11213_v31, 1  ;;  %v4115_v16 = vrot.slane %v11216_v41, 1  ;;  %v11226_v59 = vld [vmem:[#allocation2 + $0x1c0] sm:$0x3]  ;;  %v7650_v23 = vpop.f32.mrf.mxu0 }
 0x54d   :  { %3743 = vst.msk [vmem:[#allocation2 + $0x181] sm:$0xff] %vm20_vm0, %v3679_v36  ;;  %3914 = vst.msk [vmem:[#allocation3 + $0xe8] sm:$0xff] %vm20_vm0, %v11213_v31  ;;  %v11228_v13 = vld [vmem:[#allocation2 + $0x178] sm:$0x3]  ;;  %v3681_v36 = vmax.f32 %v3491_v12, 0.0  ;;  %v3506_v52 = vadd.f32 %v7650_v23, %v10878_v30  ;;  %v4126_v23 = vrot.slane %v10865_v38, 1 }
 0x54e   :  { %3913 = vst.msk [vmem:[#allocation3 + $0xe0] sm:$0xff] %vm20_vm0, %v11216_v41  ;;  %3746 = vst.msk [vmem:[#allocation2 + $0x1d1] sm:$0xff] %vm20_vm0, %v3682_v27  ;;  %v11233_v33 = vsel %vm561_vm2, %v4116_v43, %v4118_v29  ;;  %v11236_v1 = vsel %vm561_vm2, %v4115_v16, %v4116_v43  ;;  %v3500_v63 = vpop.f32.mrf.mxu0  ;;  %v11242_v62 = vld [vmem:[#allocation2 + $0x170] sm:$0xff]  ;;  %v4123_v27 = vrot.slane %v11228_v13, 1  ;;  %v11245_v12 = vld [vmem:[#allocation2 + $0x168] sm:$0xff]  ;;  %v4128_v29 = vrot.slane %v11226_v59, 1 }
 0x54f   :  { %15103 = vst [vmem:[#allocation74_spill] sm:$0xff] %v11233_v33  ;;  %15104 = vst [vmem:[#allocation75_spill] sm:$0xff] %v11236_v1  ;;  %4263 = vrot.lane.b32.xlu1 %v11233_v33, %s7836_s18  ;;  %4261 = vrot.lane.b32.xlu0 %v11236_v1, %s7836_s18  ;;  %v4125_v43 = vrot.slane %v10867_v17, 1  ;;  %v3684_v16 = vmax.f32 %v3506_v52, 0.0  ;;  %v3501_v33 = vadd.f32 %v10878_v30, %v3500_v63  ;;  %v4121_v40 = vrot.slane %v11242_v62, 1 }
 0x550   :  { %15105 = vst [vmem:[#allocation11_spill] sm:$0xff] %v11242_v62  ;;  %15106 = vst [vmem:[#allocation17_spill] sm:$0xff] %v11245_v12  ;;  %v4120_v1 = vrot.slane %v11245_v12, 1  ;;  %v7653_v20 = vpop.f32.mrf.mxu0 }
 0x551   :  { %3745 = vst.msk [vmem:[#allocation2 + $0x1c9] sm:$0xff] %vm20_vm0, %v3681_v36  ;;  %3916 = vst.msk [vmem:[#allocation3 + $0xf8] sm:$0xff] %vm20_vm0, %v11242_v62  ;;  %v3683_v7 = vmax.f32 %v3501_v33, 0.0  ;;  %v3516_v5 = vadd.f32 %v7653_v20, %v10878_v30  ;;  %v11261_v36 = vsel %vm561_vm2, %v4121_v40, %v4123_v27  ;;  %v4129_v20 = vsel %vm561_vm2, %v4126_v23, %v4128_v29 }
 0x552   :  { %3915 = vst.msk [vmem:[#allocation3 + $0xf0] sm:$0xff] %vm20_vm0, %v11245_v12  ;;  %3748 = vst.msk [vmem:[#allocation2 + $0x1e9] sm:$0xff] %vm20_vm0, %v3684_v16  ;;  %v11264_v63 = vsel %vm561_vm2, %v4120_v1, %v4121_v40  ;;  %v3510_v52 = vpop.f32.mrf.mxu0  ;;  %v4127_v27 = vsel %vm561_vm2, %v4125_v43, %v4126_v23 }
 0x553   :  { %15107 = vst [vmem:[#allocation21_spill] sm:$0xff] %v11261_v36  ;;  %15108 = vst [vmem:[#allocation29_spill] sm:$0xff] %v11264_v63  ;;  %4267 = vrot.lane.b32.xlu1 %v11261_v36, %s7836_s18  ;;  %4265 = vrot.lane.b32.xlu0 %v11264_v63, %s7836_s18  ;;  %v3686_v34 = vmax.f32 %v3516_v5, 0.0  ;;  %v3511_v33 = vadd.f32 %v10878_v30, %v3510_v52 }
 0x554   :  { %3747 = vst.msk [vmem:[#allocation2 + $0x1e1] sm:$0xff] %vm20_vm0, %v3683_v7  ;;  %v7656_v16 = vpop.f32.mrf.mxu0 }
 0x555   :  { %v11274_v18 = vld [vmem:[#allocation2 + $0x1d8] sm:$0x3]  ;;  %3750 = vst.msk [vmem:[#allocation2 + $0x201] sm:$0xff] %vm20_vm0, %v3686_v34  ;;  %v3685_v40 = vmax.f32 %v3511_v33, 0.0  ;;  %v3526_v1 = vadd.f32 %v7656_v16, %v10878_v30 }
 0x556   :  { %v3520_v36 = vpop.f32.mrf.mxu0  ;;  %v4133_v7 = vrot.slane %v11274_v18, 1 }
 0x557   :  { %4271 = vrot.lane.b32.xlu1 %v4129_v20, %s7836_s18  ;;  %4269 = vrot.lane.b32.xlu0 %v4127_v27, %s7836_s18  ;;  %3749 = vst.msk [vmem:[#allocation2 + $0x1f9] sm:$0xff] %vm20_vm0, %v3685_v40  ;;  %v3688_v23 = vmax.f32 %v3526_v1, 0.0  ;;  %v3521_v43 = vadd.f32 %v10878_v30, %v3520_v36 }
 0x558   :  { %v11280_v5 = vld [vmem:[#allocation2 + $0x1d0] sm:$0xff]  ;;  %v11283_v29 = vld [vmem:[#allocation2 + $0x1c8] sm:$0xff]  ;;  %v7659_v33 = vpop.f32.mrf.mxu0 }
 0x559   :  { %v4131_v34 = vrot.slane %v11280_v5, 1  ;;  %3920 = vst.msk [vmem:[#allocation3 + $0x118] sm:$0xff] %vm20_vm0, %v11280_v5  ;;  %v4130_v52 = vrot.slane %v11283_v29, 1  ;;  %3919 = vst.msk [vmem:[#allocation3 + $0x110] sm:$0xff] %vm20_vm0, %v11283_v29  ;;  %v11293_v20 = vld [vmem:[#allocation2 + $0x1f0] sm:$0x3]  ;;  %v3536_v16 = vadd.f32 %v7659_v33, %v10878_v30 }
 0x55a   :  { %3752 = vst.msk [vmem:[#allocation2 + $0x219] sm:$0xff] %vm20_vm0, %v3688_v23  ;;  %v3687_v27 = vmax.f32 %v3521_v43, 0.0  ;;  %v3530_v1 = vpop.f32.mrf.mxu0  ;;  %v4138_v23 = vrot.slane %v11293_v20, 1 }
 0x55b   :  { %v11298_v36 = vsel %vm561_vm2, %v4131_v34, %v4133_v7  ;;  %v11301_v40 = vsel %vm561_vm2, %v4130_v52, %v4131_v34  ;;  %v11307_v63 = vld [vmem:[#allocation2 + $0x1e8] sm:$0xff]  ;;  %v11310_v43 = vld [vmem:[#allocation2 + $0x1e0] sm:$0xff]  ;;  %v3690_v7 = vmax.f32 %v3536_v16, 0.0  ;;  %v3531_v33 = vadd.f32 %v10878_v30, %v3530_v1 }
 0x55c   :  { %15109 = vst [vmem:[#allocation31_spill] sm:$0xff] %v11298_v36  ;;  %15110 = vst [vmem:[#allocation32_spill] sm:$0xff] %v11301_v40  ;;  %4275 = vrot.lane.b32.xlu1 %v11298_v36, %s7836_s18  ;;  %4273 = vrot.lane.b32.xlu0 %v11301_v40, %s7836_s18  ;;  %v4136_v34 = vrot.slane %v11307_v63, 1  ;;  %v4135_v52 = vrot.slane %v11310_v43, 1  ;;  %v7662_v40 = vpop.f32.mrf.mxu0  ;;  %v11320_v36 = vld [vmem:[#allocation2 + $0x208] sm:$0x3] }
 0x55d   :  { %15111 = vst [vmem:[#allocation33_spill] sm:$0xff] %v11307_v63  ;;  %15112 = vst [vmem:[#allocation34_spill] sm:$0xff] %v11310_v43  ;;  %v3689_v22 = vmax.f32 %v3531_v33, 0.0 }
 0x55e   :  { %3751 = vst.msk [vmem:[#allocation2 + $0x211] sm:$0xff] %vm20_vm0, %v3687_v27  ;;  %3922 = vst.msk [vmem:[#allocation3 + $0x128] sm:$0xff] %vm20_vm0, %v11307_v63  ;;  %v3546_v27 = vadd.f32 %v7662_v40, %v10878_v30  ;;  %v11325_v16 = vsel %vm561_vm2, %v4136_v34, %v4138_v23  ;;  %v11328_v1 = vsel %vm561_vm2, %v4135_v52, %v4136_v34  ;;  %v3540_v56 = vpop.f32.mrf.mxu0  ;;  %v11334_v26 = vld [vmem:[#allocation2 + $0x200] sm:$0xff]  ;;  %v11337_v33 = vld [vmem:[#allocation2 + $0x1f8] sm:$0xff] }
 0x55f   :  { %3921 = vst.msk [vmem:[#allocation3 + $0x120] sm:$0xff] %vm20_vm0, %v11310_v43  ;;  %3754 = vst.msk [vmem:[#allocation2 + $0x231] sm:$0xff] %vm20_vm0, %v3690_v7  ;;  %v4143_v7 = vrot.slane %v11320_v36, 1  ;;  %v3541_v23 = vadd.f32 %v10878_v30, %v3540_v56  ;;  %v4141_v34 = vrot.slane %v11334_v26, 1  ;;  %v4140_v52 = vrot.slane %v11337_v33, 1 }
 0x560   :  { %15113 = vst [vmem:[#allocation36_spill] sm:$0xff] %v11325_v16  ;;  %15114 = vst [vmem:[#allocation37_spill] sm:$0xff] %v11328_v1  ;;  %4279 = vrot.lane.b32.xlu1 %v11325_v16, %s7836_s18  ;;  %4277 = vrot.lane.b32.xlu0 %v11328_v1, %s7836_s18  ;;  %v3692_v40 = vmax.f32 %v3546_v27, 0.0  ;;  %v7665_v1 = vpop.f32.mrf.mxu0 }
 0x561   :  { %15115 = vst [vmem:[#allocation38_spill] sm:$0xff] %v11334_v26  ;;  %15116 = vst [vmem:[#allocation44_spill] sm:$0xff] %v11337_v33  ;;  %v11347_v16 = vld [vmem:[#allocation2 + $0x220] sm:$0x3]  ;;  %v3691_v54 = vmax.f32 %v3541_v23, 0.0  ;;  %v11352_v56 = vsel %vm561_vm2, %v4141_v34, %v4143_v7  ;;  %v11355_v27 = vsel %vm561_vm2, %v4140_v52, %v4141_v34 }
 0x562   :  { %3753 = vst.msk [vmem:[#allocation2 + $0x229] sm:$0xff] %vm20_vm0, %v3689_v22  ;;  %3924 = vst.msk [vmem:[#allocation3 + $0x138] sm:$0xff] %vm20_vm0, %v11334_v26  ;;  %v3556_v22 = vadd.f32 %v7665_v1, %v10878_v30  ;;  %v3550_v37 = vpop.f32.mrf.mxu0 }
 0x563   :  { %3923 = vst.msk [vmem:[#allocation3 + $0x130] sm:$0xff] %vm20_vm0, %v11337_v33  ;;  %3756 = vst.msk [vmem:[#allocation2 + $0x249] sm:$0xff] %vm20_vm0, %v3692_v40  ;;  %v4148_v40 = vrot.slane %v11347_v16, 1  ;;  %v3551_v7 = vadd.f32 %v10878_v30, %v3550_v37 }
 0x564   :  { %15117 = vst [vmem:[#allocation46_spill] sm:$0xff] %v11352_v56  ;;  %15118 = vst [vmem:[#allocation49_spill] sm:$0xff] %v11355_v27  ;;  %4283 = vrot.lane.b32.xlu1 %v11352_v56, %s7836_s18  ;;  %4281 = vrot.lane.b32.xlu0 %v11355_v27, %s7836_s18  ;;  %v3694_v1 = vmax.f32 %v3556_v22, 0.0  ;;  %v7668_v27 = vpop.f32.mrf.mxu0 }
 0x565   :  { %v11361_v19 = vld [vmem:[#allocation2 + $0x218] sm:$0xff]  ;;  %v11364_v23 = vld [vmem:[#allocation2 + $0x210] sm:$0xff]  ;;  %3755 = vst.msk [vmem:[#allocation2 + $0x241] sm:$0xff] %vm20_vm0, %v3691_v54  ;;  %v3693_v50 = vmax.f32 %v3551_v7, 0.0  ;;  %v3566_v54 = vadd.f32 %v7668_v27, %v10878_v30 }
 0x566   :  { %15119 = vst [vmem:[#allocation51_spill] sm:$0xff] %v11361_v19  ;;  %15120 = vst [vmem:[#allocation55_spill] sm:$0xff] %v11364_v23  ;;  %v4146_v34 = vrot.slane %v11361_v19, 1  ;;  %v4145_v52 = vrot.slane %v11364_v23, 1  ;;  %v11374_v56 = vld [vmem:[#allocation2 + $0x238] sm:$0x3]  ;;  %v3560_v39 = vpop.f32.mrf.mxu0 }
 0x567   :  { %3926 = vst.msk [vmem:[#allocation3 + $0x148] sm:$0xff] %vm20_vm0, %v11361_v19  ;;  %3925 = vst.msk [vmem:[#allocation3 + $0x140] sm:$0xff] %vm20_vm0, %v11364_v23  ;;  %v3696_v27 = vmax.f32 %v3566_v54, 0.0 }
 0x568   :  { %15121 = vst [vmem:[#allocation57_spill] sm:$0xff] %v11374_v56  ;;  %3758 = vst.msk [vmem:[#allocation2 + $0x261] sm:$0xff] %vm20_vm0, %v3694_v1  ;;  %v11379_v37 = vsel %vm561_vm2, %v4146_v34, %v4148_v40  ;;  %v11382_v22 = vsel %vm561_vm2, %v4145_v52, %v4146_v34  ;;  %v4153_v1 = vrot.slane %v11374_v56, 1  ;;  %v3561_v40 = vadd.f32 %v10878_v30, %v3560_v39 }
 0x569   :  { %15122 = vst [vmem:[#allocation59_spill] sm:$0xff] %v11379_v37  ;;  %15123 = vst [vmem:[#allocation60_spill] sm:$0xff] %v11382_v22  ;;  %4287 = vrot.lane.b32.xlu1 %v11379_v37, %s7836_s18  ;;  %4285 = vrot.lane.b32.xlu0 %v11382_v22, %s7836_s18  ;;  %v11388_v11 = vld [vmem:[#allocation2 + $0x230] sm:$0xff]  ;;  %v11391_v7 = vld [vmem:[#allocation2 + $0x228] sm:$0xff]  ;;  %v7671_v22 = vpop.f32.mrf.mxu0 }
 0x56a   :  { %15124 = vst [vmem:[#allocation61_spill] sm:$0xff] %v11388_v11  ;;  %15125 = vst [vmem:[#allocation62_spill] sm:$0xff] %v11391_v7  ;;  %v4151_v34 = vrot.slane %v11388_v11, 1  ;;  %v4150_v52 = vrot.slane %v11391_v7, 1  ;;  %v11401_v37 = vld [vmem:[#allocation2 + $0x250] sm:$0x3] }
 0x56b   :  { %3757 = vst.msk [vmem:[#allocation2 + $0x259] sm:$0xff] %vm20_vm0, %v3693_v50  ;;  %3928 = vst.msk [vmem:[#allocation3 + $0x158] sm:$0xff] %vm20_vm0, %v11388_v11  ;;  %v3695_v56 = vmax.f32 %v3561_v40, 0.0  ;;  %v3576_v50 = vadd.f32 %v7671_v22, %v10878_v30  ;;  %v3570_v11 = vpop.f32.mrf.mxu0 }
 0x56c   :  { %3927 = vst.msk [vmem:[#allocation3 + $0x150] sm:$0xff] %vm20_vm0, %v11391_v7  ;;  %15126 = vst [vmem:[#allocation63_spill] sm:$0xff] %v11401_v37  ;;  %v11406_v39 = vsel %vm561_vm2, %v4151_v34, %v4153_v1  ;;  %v11409_v54 = vsel %vm561_vm2, %v4150_v52, %v4151_v34  ;;  %v11415_v7 = vld [vmem:[#allocation2 + $0x248] sm:$0xff]  ;;  %v11418_v40 = vld [vmem:[#allocation2 + $0x240] sm:$0xff]  ;;  %v3571_v1 = vadd.f32 %v10878_v30, %v3570_v11 }
 0x56d   :  { %3760 = vst.msk [vmem:[#allocation2 + $0x279] sm:$0xff] %vm20_vm0, %v3696_v27  ;;  %15127 = vst [vmem:[#allocation64_spill] sm:$0xff] %v11406_v39  ;;  %4291 = vrot.lane.b32.xlu1 %v11406_v39, %s7836_s18  ;;  %4289 = vrot.lane.b32.xlu0 %v11409_v54, %s7836_s18  ;;  %v4158_v27 = vrot.slane %v11401_v37, 1  ;;  %v3698_v22 = vmax.f32 %v3576_v50, 0.0  ;;  %v4156_v34 = vrot.slane %v11415_v7, 1  ;;  %v4155_v52 = vrot.slane %v11418_v40, 1 }
 0x56e   :  { %15128 = vst [vmem:[#allocation69_spill] sm:$0xff] %v11409_v54  ;;  %15129 = vst [vmem:[#allocation72_spill] sm:$0xff] %v11415_v7  ;;  %v7674_v54 = vpop.f32.mrf.mxu0  ;;  %v3697_v37 = vmax.f32 %v3571_v1, 0.0 }
 0x56f   :  { %15130 = vst [vmem:[#allocation76_spill] sm:$0xff] %v11418_v40  ;;  %3759 = vst.msk [vmem:[#allocation2 + $0x271] sm:$0xff] %vm20_vm0, %v3695_v56  ;;  %v11428_v39 = vld [vmem:[#allocation2 + $0x268] sm:$0x3]  ;;  %v3586_v56 = vadd.f32 %v7674_v54, %v10878_v30  ;;  %v11433_v11 = vsel %vm561_vm2, %v4156_v34, %v4158_v27  ;;  %v11436_v50 = vsel %vm561_vm2, %v4155_v52, %v4156_v34 }
 0x570   :  { %3930 = vst.msk [vmem:[#allocation3 + $0x168] sm:$0xff] %vm20_vm0, %v11415_v7  ;;  %3929 = vst.msk [vmem:[#allocation3 + $0x160] sm:$0xff] %vm20_vm0, %v11418_v40  ;;  %v3580_v7 = vpop.f32.mrf.mxu0 }
 0x571   :  { %15131 = vst [vmem:[#allocation77_spill] sm:$0xff] %v11428_v39  ;;  %3762 = vst.msk [vmem:[#allocation2 + $0x291] sm:$0xff] %vm20_vm0, %v3698_v22  ;;  %4295 = vrot.lane.b32.xlu1 %v11433_v11, %s7836_s18  ;;  %4293 = vrot.lane.b32.xlu0 %v11436_v50, %s7836_s18  ;;  %v4163_v22 = vrot.slane %v11428_v39, 1  ;;  %v3700_v54 = vmax.f32 %v3586_v56, 0.0  ;;  %v3581_v27 = vadd.f32 %v10878_v30, %v3580_v7 }
 0x572   :  { %15132 = vst [vmem:[#allocation78_spill] sm:$0xff] %v11433_v11  ;;  %15133 = vst [vmem:[#allocation6_spill] sm:$0xff] %v11436_v50  ;;  %v11442_v40 = vld [vmem:[#allocation2 + $0x260] sm:$0xff]  ;;  %v11445_v1 = vld [vmem:[#allocation2 + $0x258] sm:$0xff]  ;;  %v7677_v50 = vpop.f32.mrf.mxu0 }
 0x573   :  { %15134 = vst [vmem:[#allocation7_spill] sm:$0xff] %v11442_v40  ;;  %15135 = vst [vmem:[#allocation82_spill] sm:$0xff] %v11445_v1  ;;  %v4161_v34 = vrot.slane %v11442_v40, 1  ;;  %v4160_v52 = vrot.slane %v11445_v1, 1  ;;  %v3699_v39 = vmax.f32 %v3581_v27, 0.0 }
 0x574   :  { %3761 = vst.msk [vmem:[#allocation2 + $0x289] sm:$0xff] %vm20_vm0, %v3697_v37  ;;  %3932 = vst.msk [vmem:[#allocation3 + $0x178] sm:$0xff] %vm20_vm0, %v11442_v40  ;;  %v11455_v11 = vld [vmem:[#allocation2 + $0x280] sm:$0x3]  ;;  %v3596_v37 = vadd.f32 %v7677_v50, %v10878_v30  ;;  %v3590_v40 = vpop.f32.mrf.mxu0 }
 0x575   :  { %3931 = vst.msk [vmem:[#allocation3 + $0x170] sm:$0xff] %vm20_vm0, %v11445_v1  ;;  %15136 = vst [vmem:[#allocation83_spill] sm:$0xff] %v11455_v11  ;;  %v11460_v7 = vsel %vm561_vm2, %v4161_v34, %v4163_v22  ;;  %v11463_v56 = vsel %vm561_vm2, %v4160_v52, %v4161_v34  ;;  %v3591_v22 = vadd.f32 %v10878_v30, %v3590_v40 }
 0x576   :  { %3764 = vst.msk [vmem:[#allocation2 + $0x2a9] sm:$0xff] %vm20_vm0, %v3700_v54  ;;  %15137 = vst [vmem:[#allocation84_spill] sm:$0xff] %v11460_v7  ;;  %4299 = vrot.lane.b32.xlu1 %v11460_v7, %s7836_s18  ;;  %4297 = vrot.lane.b32.xlu0 %v11463_v56, %s7836_s18  ;;  %v11469_v1 = vld [vmem:[#allocation2 + $0x278] sm:$0xff]  ;;  %v4168_v54 = vrot.slane %v11455_v11, 1  ;;  %v11472_v27 = vld [vmem:[#allocation2 + $0x270] sm:$0xff]  ;;  %v3702_v50 = vmax.f32 %v3596_v37, 0.0 }
 0x577   :  { %15138 = vst [vmem:[#allocation85_spill] sm:$0xff] %v11463_v56  ;;  %15139 = vst [vmem:[#allocation86_spill] sm:$0xff] %v11469_v1  ;;  %v4166_v34 = vrot.slane %v11469_v1, 1  ;;  %v4165_v52 = vrot.slane %v11472_v27, 1  ;;  %v7680_v56 = vpop.f32.mrf.mxu0  ;;  %v3701_v11 = vmax.f32 %v3591_v22, 0.0 }
 0x578   :  { %15140 = vst [vmem:[#allocation87_spill] sm:$0xff] %v11472_v27  ;;  %3763 = vst.msk [vmem:[#allocation2 + $0x2a1] sm:$0xff] %vm20_vm0, %v3699_v39  ;;  %v11482_v7 = vld [vmem:[#allocation2 + $0x298] sm:$0x3]  ;;  %v3606_v39 = vadd.f32 %v7680_v56, %v10878_v30  ;;  %v11505_v56 = vld [vmem:[%s13980_s2] ss:$0 sm:$0xff] }
 0x579   :  { %3934 = vst.msk [vmem:[#allocation3 + $0x188] sm:$0xff] %vm20_vm0, %v11469_v1  ;;  %3933 = vst.msk [vmem:[#allocation3 + $0x180] sm:$0xff] %vm20_vm0, %v11472_v27  ;;  %v11487_v40 = vsel %vm561_vm2, %v4166_v34, %v4168_v54  ;;  %v11490_v37 = vsel %vm561_vm2, %v4165_v52, %v4166_v34  ;;  %v3600_v1 = vpop.f32.mrf.mxu0 }
 0x57a   :  { %15141 = vst [vmem:[#allocation88_spill] sm:$0xff] %v11482_v7  ;;  %3766 = vst.msk [vmem:[#allocation2 + $0x2c1] sm:$0xff] %vm20_vm0, %v3702_v50  ;;  %4303 = vrot.lane.b32.xlu1 %v11487_v40, %s7836_s18  ;;  %4301 = vrot.lane.b32.xlu0 %v11490_v37, %s7836_s18  ;;  %v4173_v50 = vrot.slane %v11482_v7, 1  ;;  %v3704_v30 = vmax.f32 %v3606_v39, 0.0  ;;  %v3601_v54 = vadd.f32 %v11505_v56, %v3600_v1 }
 0x57b   :  { %15142 = vst [vmem:[#allocation89_spill] sm:$0xff] %v11487_v40  ;;  %15143 = vst [vmem:[#allocation90_spill] sm:$0xff] %v11490_v37  ;;  %v11496_v27 = vld [vmem:[#allocation2 + $0x290] sm:$0xff]  ;;  %v11499_v22 = vld [vmem:[#allocation2 + $0x288] sm:$0xff]  ;;  %v7683_v37 = vpop.f32.mrf.mxu0 }
 0x57c   :  { %15144 = vst [vmem:[#allocation91_spill] sm:$0xff] %v11496_v27  ;;  %15145 = vst [vmem:[#allocation92_spill] sm:$0xff] %v11499_v22  ;;  %v4171_v34 = vrot.slane %v11496_v27, 1  ;;  %v4170_v52 = vrot.slane %v11499_v22, 1  ;;  %v3703_v39 = vmax.f32 %v3601_v54, 0.0  ;;  %v3616_v40 = vadd.f32 %v11505_v56, %v7683_v37 }
 0x57d   :  { %3765 = vst.msk [vmem:[#allocation2 + $0x2b9] sm:$0xff] %vm20_vm0, %v3701_v11  ;;  %3936 = vst.msk [vmem:[#allocation3 + $0x198] sm:$0xff] %vm20_vm0, %v11496_v27  ;;  %v11514_v11 = vld [vmem:[#allocation2 + $0x2b0] sm:$0x3]  ;;  %v3610_v27 = vpop.f32.mrf.mxu0 }
 0x57e   :  { %3935 = vst.msk [vmem:[#allocation3 + $0x190] sm:$0xff] %vm20_vm0, %v11499_v22  ;;  %15146 = vst [vmem:[#allocation93_spill] sm:$0xff] %v11514_v11  ;;  %v11519_v1 = vsel %vm561_vm2, %v4171_v34, %v4173_v50  ;;  %v11522_v7 = vsel %vm561_vm2, %v4170_v52, %v4171_v34  ;;  %v3706_v37 = vmax.f32 %v3616_v40, 0.0  ;;  %v3611_v50 = vadd.f32 %v11505_v56, %v3610_v27 }
 0x57f   :  { %3768 = vst.msk [vmem:[#allocation2 + $0x2d9] sm:$0xff] %vm20_vm0, %v3704_v30  ;;  %15147 = vst [vmem:[#allocation94_spill] sm:$0xff] %v11519_v1  ;;  %4307 = vrot.lane.b32.xlu1 %v11519_v1, %s7836_s18  ;;  %4305 = vrot.lane.b32.xlu0 %v11522_v7, %s7836_s18  ;;  %v11528_v22 = vld [vmem:[#allocation2 + $0x2a8] sm:$0xff]  ;;  %v4178_v30 = vrot.slane %v11514_v11, 1  ;;  %v11531_v54 = vld [vmem:[#allocation2 + $0x2a0] sm:$0xff] }
 0x580   :  { %15148 = vst [vmem:[#allocation95_spill] sm:$0xff] %v11522_v7  ;;  %15149 = vst [vmem:[#allocation96_spill] sm:$0xff] %v11528_v22  ;;  %v4176_v34 = vrot.slane %v11528_v22, 1  ;;  %v4175_v52 = vrot.slane %v11531_v54, 1  ;;  %v7686_v7 = vpop.f32.mrf.mxu0  ;;  %v3705_v11 = vmax.f32 %v3611_v50, 0.0 }
 0x581   :  { %15150 = vst [vmem:[#allocation97_spill] sm:$0xff] %v11531_v54  ;;  %3767 = vst.msk [vmem:[#allocation2 + $0x2d1] sm:$0xff] %vm20_vm0, %v3703_v39  ;;  %v11541_v1 = vld [vmem:[#allocation2 + $0x2c8] sm:$0x3]  ;;  %v3626_v40 = vadd.f32 %v11505_v56, %v7686_v7 }
 0x582   :  { %3938 = vst.msk [vmem:[#allocation3 + $0x1a8] sm:$0xff] %vm20_vm0, %v11528_v22  ;;  %3937 = vst.msk [vmem:[#allocation3 + $0x1a0] sm:$0xff] %vm20_vm0, %v11531_v54  ;;  %v11546_v27 = vsel %vm561_vm2, %v4176_v34, %v4178_v30  ;;  %v11549_v39 = vsel %vm561_vm2, %v4175_v52, %v4176_v34  ;;  %v3620_v22 = vpop.f32.mrf.mxu0 }
 0x583   :  { %15151 = vst [vmem:[#allocation98_spill] sm:$0xff] %v11541_v1  ;;  %3770 = vst.msk [vmem:[#allocation2 + $0x2f1] sm:$0xff] %vm20_vm0, %v3706_v37  ;;  %4311 = vrot.lane.b32.xlu1 %v11546_v27, %s7836_s18  ;;  %4309 = vrot.lane.b32.xlu0 %v11549_v39, %s7836_s18  ;;  %v4183_v37 = vrot.slane %v11541_v1, 1  ;;  %v3708_v7 = vmax.f32 %v3626_v40, 0.0  ;;  %v3621_v30 = vadd.f32 %v11505_v56, %v3620_v22 }
 0x584   :  { %15152 = vst [vmem:[#allocation99_spill] sm:$0xff] %v11546_v27  ;;  %15153 = vst [vmem:[#allocation100_spill] sm:$0xff] %v11549_v39  ;;  %v11555_v54 = vld [vmem:[#allocation2 + $0x2c0] sm:$0xff]  ;;  %v11558_v50 = vld [vmem:[#allocation2 + $0x2b8] sm:$0xff]  ;;  %v7689_v39 = vpop.f32.mrf.mxu0 }
 0x585   :  { %15154 = vst [vmem:[#allocation101_spill] sm:$0xff] %v11555_v54  ;;  %15155 = vst [vmem:[#allocation102_spill] sm:$0xff] %v11558_v50  ;;  %v4181_v34 = vrot.slane %v11555_v54, 1  ;;  %v4180_v52 = vrot.slane %v11558_v50, 1  ;;  %v3707_v1 = vmax.f32 %v3621_v30, 0.0 }
 0x586   :  { %3769 = vst.msk [vmem:[#allocation2 + $0x2e9] sm:$0xff] %vm20_vm0, %v3705_v11  ;;  %3940 = vst.msk [vmem:[#allocation3 + $0x1b8] sm:$0xff] %vm20_vm0, %v11555_v54  ;;  %v11568_v27 = vld [vmem:[#allocation2 + $0x2e0] sm:$0x3]  ;;  %v3636_v11 = vadd.f32 %v11505_v56, %v7689_v39  ;;  %v3630_v54 = vpop.f32.mrf.mxu0 }
 0x587   :  { %3939 = vst.msk [vmem:[#allocation3 + $0x1b0] sm:$0xff] %vm20_vm0, %v11558_v50  ;;  %15156 = vst [vmem:[#allocation103_spill] sm:$0xff] %v11568_v27  ;;  %v11573_v22 = vsel %vm561_vm2, %v4181_v34, %v4183_v37  ;;  %v11576_v40 = vsel %vm561_vm2, %v4180_v52, %v4181_v34  ;;  %v3631_v37 = vadd.f32 %v11505_v56, %v3630_v54 }
 0x588   :  { %3772 = vst.msk [vmem:[#allocation2 + $0x309] sm:$0xff] %vm20_vm0, %v3708_v7  ;;  %15157 = vst [vmem:[#allocation104_spill] sm:$0xff] %v11573_v22  ;;  %4315 = vrot.lane.b32.xlu1 %v11573_v22, %s7836_s18  ;;  %4313 = vrot.lane.b32.xlu0 %v11576_v40, %s7836_s18  ;;  %v11582_v50 = vld [vmem:[#allocation2 + $0x2d8] sm:$0xff]  ;;  %v4188_v7 = vrot.slane %v11568_v27, 1  ;;  %v11585_v30 = vld [vmem:[#allocation2 + $0x2d0] sm:$0xff]  ;;  %v3710_v39 = vmax.f32 %v3636_v11, 0.0 }
 0x589   :  { %15158 = vst [vmem:[#allocation105_spill] sm:$0xff] %v11576_v40  ;;  %15159 = vst [vmem:[#allocation106_spill] sm:$0xff] %v11582_v50  ;;  %v4186_v34 = vrot.slane %v11582_v50, 1  ;;  %v4185_v52 = vrot.slane %v11585_v30, 1  ;;  %v3709_v22 = vmax.f32 %v3631_v37, 0.0 }
 0x58a   :  { %15160 = vst [vmem:[#allocation107_spill] sm:$0xff] %v11585_v30  ;;  %3771 = vst.msk [vmem:[#allocation2 + $0x301] sm:$0xff] %vm20_vm0, %v3707_v1  ;;  %v11595_v40 = vld [vmem:[#allocation2 + $0x2f8] sm:$0x3] }
 0x58b   :  { %3942 = vst.msk [vmem:[#allocation3 + $0x1c8] sm:$0xff] %vm20_vm0, %v11582_v50  ;;  %3941 = vst.msk [vmem:[#allocation3 + $0x1c0] sm:$0xff] %vm20_vm0, %v11585_v30  ;;  %v11599_v1 = vsel %vm561_vm2, %v4186_v34, %v4188_v7  ;;  %v11602_v54 = vsel %vm561_vm2, %v4185_v52, %v4186_v34  ;;  %v4193_v7 = vrot.slane %v11595_v40, 1 }
 0x58c   :  { %15161 = vst [vmem:[#allocation108_spill] sm:$0xff] %v11595_v40  ;;  %3774 = vst.msk [vmem:[#allocation2 + $0x321] sm:$0xff] %vm20_vm0, %v3710_v39  ;;  %4319 = vrot.lane.b32.xlu1 %v11599_v1, %s7836_s18  ;;  %4317 = vrot.lane.b32.xlu0 %v11602_v54, %s7836_s18 }
 0x58d   :  { %15162 = vst [vmem:[#allocation9_spill] sm:$0xff] %v11599_v1  ;;  %15163 = vst [vmem:[#allocation112_spill] sm:$0xff] %v11602_v54  ;;  %v11608_v11 = vld [vmem:[#allocation2 + $0x2f0] sm:$0xff]  ;;  %v11610_v27 = vld [vmem:[#allocation2 + $0x2e8] sm:$0xff] }
 0x58e   :  { %15164 = vst [vmem:[#allocation113_spill] sm:$0xff] %v11608_v11  ;;  %15165 = vst [vmem:[#allocation114_spill] sm:$0xff] %v11610_v27  ;;  %v4191_v39 = vrot.slane %v11608_v11, 1  ;;  %v4190_v37 = vrot.slane %v11610_v27, 1 }
 0x58f   :  { %3773 = vst.msk [vmem:[#allocation2 + $0x319] sm:$0xff] %vm20_vm0, %v3709_v22  ;;  %3944 = vst.msk [vmem:[#allocation3 + $0x1d8] sm:$0xff] %vm20_vm0, %v11608_v11  ;;  %v11620_v34 = vld [vmem:[#allocation2 + $0x310] sm:$0x3] }
 0x590   :  { %3943 = vst.msk [vmem:[#allocation3 + $0x1d0] sm:$0xff] %vm20_vm0, %v11610_v27  ;;  %15166 = vst [vmem:[#allocation5_spill] sm:$0xff] %v11620_v34  ;;  %v11623_v52 = vsel %vm561_vm2, %v4191_v39, %v4193_v7  ;;  %v11626_v54 = vsel %vm561_vm2, %v4190_v37, %v4191_v39  ;;  %v4198_v27 = vrot.slane %v11620_v34, 1  ;;  %v4210_v7 = vpop.permute.xlu0 %4209  ;;  %v4212_v37 = vpop.permute.xlu1 %4211  ;;  %v7816_v11 = vld [vmem:[#allocation2 + $0x10] sm:$0x3] }
 0x591   :  { %15167 = vst [vmem:[#allocation18_spill] sm:$0xff] %v11623_v52  ;;  %15168 = vst [vmem:[#allocation115_spill] sm:$0xff] %v11626_v54  ;;  %4323 = vrot.lane.b32.xlu1 %v11623_v52, %s7836_s18  ;;  %4321 = vrot.lane.b32.xlu0 %v11626_v54, %s7836_s18  ;;  %v11632_v22 = vld [vmem:[#allocation2 + $0x308] sm:$0xff]  ;;  %v11634_v1 = vld [vmem:[#allocation2 + $0x300] sm:$0xff] }
 0x592   :  { %15169 = vst [vmem:[#allocation26_spill] sm:$0xff] %v11632_v22  ;;  %15170 = vst [vmem:[#allocation116_spill] sm:$0xff] %v11634_v1  ;;  %v4196_v40 = vrot.slane %v11632_v22, 1  ;;  %v4195_v39 = vrot.slane %v11634_v1, 1 }
 0x593   :  { %3946 = vst.msk [vmem:[#allocation3 + $0x1e8] sm:$0xff] %vm20_vm0, %v11632_v22  ;;  %3945 = vst.msk [vmem:[#allocation3 + $0x1e0] sm:$0xff] %vm20_vm0, %v11634_v1  ;;  %v11643_v52 = vld [vmem:[#allocation2 + $0x328] sm:$0x3] }
 0x594   :  { %15171 = vst [vmem:[#allocation30_spill] sm:$0xff] %v11643_v52  ;;  %4399 = vst.msk [vmem:[#allocation3 + $0x10] sm:$0xff] %vm914_vm5, %v4210_v7  ;;  %v11648_v54 = vsel %vm561_vm2, %v4196_v40, %v4198_v27  ;;  %v11651_v34 = vsel %vm561_vm2, %v4195_v39, %v4196_v40  ;;  %v4462_v7 = vrot.slane %v10811_v24, 2  ;;  %v4203_v30 = vrot.slane %v11643_v52, 1 }
 0x595   :  { %4400 = vst.msk [vmem:[#allocation3 + $0x18] sm:$0xff] %vm914_vm5, %v4212_v37  ;;  %15172 = vst [vmem:[#allocation117_spill] sm:$0xff] %v11648_v54  ;;  %4327 = vrot.lane.b32.xlu1 %v11648_v54, %s7836_s18  ;;  %4325 = vrot.lane.b32.xlu0 %v11651_v34, %s7836_s18  ;;  %v4464_v37 = vrot.slane %v7816_v11, 2  ;;  %v4461_v39 = vrot.slane %v10809_v14, 2  ;;  %v4214_v54 = vpop.permute.xlu0 %4213 }
 0x596   :  { %15173 = vst [vmem:[#allocation35_spill] sm:$0xff] %v11651_v34  ;;  %v11657_v1 = vld [vmem:[#allocation2 + $0x320] sm:$0xff]  ;;  %v11659_v22 = vld [vmem:[#allocation2 + $0x318] sm:$0xff]  ;;  %v4216_v34 = vpop.permute.xlu1 %4215  ;;  %4401 = vst.msk [vmem:[#allocation3 + $0x20] sm:$0xff] %vm914_vm5, %v4214_v54  ;;  %v4466_v54 = vrot.slane %v10898_v44, 2 }
 0x597   :  { %15174 = vst [vmem:[#allocation118_spill] sm:$0xff] %v11657_v1  ;;  %15175 = vst [vmem:[#allocation119_spill] sm:$0xff] %v11659_v22  ;;  %v4201_v27 = vrot.slane %v11657_v1, 1  ;;  %v4200_v40 = vrot.slane %v11659_v22, 1  ;;  %v4465_v14 = vsel %vm979_vm4, %v4462_v7, %v4464_v37  ;;  %v4463_v52 = vsel %vm979_vm4, %v4461_v39, %v4462_v7 }
 0x598   :  { %3948 = vst.msk [vmem:[#allocation3 + $0x1f8] sm:$0xff] %vm20_vm0, %v11657_v1  ;;  %3947 = vst.msk [vmem:[#allocation3 + $0x1f0] sm:$0xff] %vm20_vm0, %v11659_v22  ;;  %v4472_v39 = vrot.slane %v10920_v60, 2 }
 0x599   :  { %4402 = vst.msk [vmem:[#allocation3 + $0x28] sm:$0xff] %vm914_vm5, %v4216_v34  ;;  %v11673_v24 = vsel %vm561_vm2, %v4201_v27, %v4203_v30  ;;  %v11676_v11 = vsel %vm561_vm2, %v4200_v40, %v4201_v27  ;;  %v4218_v34 = vpop.permute.xlu0 %4217  ;;  %v4467_v30 = vrot.slane %v10896_v61, 2  ;;  %v7817_v27 = vld [vmem:[#allocation2 + $0x28] sm:$0x3] }
 0x59a   :  { %15176 = vst [vmem:[#allocation47_spill] sm:$0xff] %v11673_v24  ;;  %15177 = vst [vmem:[#allocation120_spill] sm:$0xff] %v11676_v11  ;;  %4331 = vrot.lane.b32.xlu1 %v11673_v24, %s7836_s18  ;;  %4329 = vrot.lane.b32.xlu0 %v11676_v11, %s7836_s18  ;;  %v4220_v22 = vpop.permute.xlu1 %4219  ;;  %v4469_v40 = vrot.slane %v7817_v27, 2 }
 0x59b   :  { %4404 = vst.msk [vmem:[#allocation3 + $0x38] sm:$0xff] %vm914_vm5, %v4220_v22  ;;  %4403 = vst.msk [vmem:[#allocation3 + $0x30] sm:$0xff] %vm914_vm5, %v4218_v34  ;;  %v11696_v7 = vsel %vm979_vm4, %v4466_v54, %v4467_v30 }
 0x59c   :  { %v11693_v22 = vsel %vm979_vm4, %v4467_v30, %v4469_v40  ;;  %15179 = vst [vmem:[#allocation121_spill] sm:$0xff] %v11696_v7  ;;  %v4477_v40 = vrot.slane %v10944_v51, 2 }
 0x59d   :  { %v4222_v37 = vpop.permute.xlu0 %4221  ;;  %15178 = vst [vmem:[#allocation48_spill] sm:$0xff] %v11693_v22 }
 0x59e   :  { %4623 = vrot.lane.b32.xlu1 %v4465_v14, %s7837_s16  ;;  %4621 = vrot.lane.b32.xlu0 %v4463_v52, %s7837_s16  ;;  %v4224_v11 = vpop.permute.xlu1 %4223  ;;  %4405 = vst.msk [vmem:[#allocation3 + $0x40] sm:$0xff] %vm914_vm5, %v4222_v37  ;;  %v4471_v14 = vrot.slane %v10922_v49, 2  ;;  %v7818_v52 = vld [vmem:[#allocation2 + $0x40] sm:$0x3]  ;;  %v4476_v37 = vrot.slane %v10946_v45, 2 }
 0x59f   :  { %4406 = vst.msk [vmem:[#allocation3 + $0x48] sm:$0xff] %vm914_vm5, %v4224_v11  ;;  %v4474_v11 = vrot.slane %v7818_v52, 2  ;;  %v7819_v52 = vld [vmem:[#allocation2 + $0x58] sm:$0x3] }
 0x5a0   :  { %v11710_v54 = vsel %vm979_vm4, %v4471_v14, %v4472_v39  ;;  %v11724_v14 = vsel %vm979_vm4, %v4476_v37, %v4477_v40 }
 0x5a1   :  { %v4226_v27 = vpop.permute.xlu0 %4225  ;;  %v11707_v30 = vsel %vm979_vm4, %v4472_v39, %v4474_v11  ;;  %15181 = vst [vmem:[#allocation27_spill] sm:$0xff] %v11710_v54  ;;  %15183 = vst [vmem:[#allocation122_spill] sm:$0xff] %v11724_v14  ;;  %v4482_v11 = vrot.slane %v10968_v25, 2 }
 0x5a2   :  { %4627 = vrot.lane.b32.xlu1 %v11693_v22, %s7837_s16  ;;  %4625 = vrot.lane.b32.xlu0 %v11696_v7, %s7837_s16  ;;  %v4228_v34 = vpop.permute.xlu1 %4227  ;;  %4407 = vst.msk [vmem:[#allocation3 + $0x50] sm:$0xff] %vm914_vm5, %v4226_v27  ;;  %15180 = vst [vmem:[#allocation58_spill] sm:$0xff] %v11707_v30 }
 0x5a3   :  { %4408 = vst.msk [vmem:[#allocation3 + $0x58] sm:$0xff] %vm914_vm5, %v4228_v34  ;;  %v4479_v34 = vrot.slane %v7819_v52, 2  ;;  %v7820_v52 = vld [vmem:[#allocation2 + $0x70] sm:$0x3] }
 0x5a5   :  { %v4230_v27 = vpop.permute.xlu0 %4229  ;;  %v11721_v39 = vsel %vm979_vm4, %v4477_v40, %v4479_v34  ;;  %v4487_v34 = vrot.slane %v10992_v6, 2 }
 0x5a6   :  { %4631 = vrot.lane.b32.xlu1 %v11707_v30, %s7837_s16  ;;  %4629 = vrot.lane.b32.xlu0 %v11710_v54, %s7837_s16  ;;  %v4232_v7 = vpop.permute.xlu1 %4231  ;;  %4409 = vst.msk [vmem:[#allocation3 + $0x60] sm:$0xff] %vm914_vm5, %v4230_v27  ;;  %15182 = vst [vmem:[#allocation28_spill] sm:$0xff] %v11721_v39  ;;  %v4481_v30 = vrot.slane %v10970_v0, 2 }
 0x5a7   :  { %4410 = vst.msk [vmem:[#allocation3 + $0x68] sm:$0xff] %vm914_vm5, %v4232_v7  ;;  %v4484_v7 = vrot.slane %v7820_v52, 2  ;;  %v7821_v52 = vld [vmem:[#allocation2 + $0x88] sm:$0x3] }
 0x5a8   :  { %v11738_v37 = vsel %vm979_vm4, %v4481_v30, %v4482_v11 }
 0x5a9   :  { %v4234_v27 = vpop.permute.xlu0 %4233  ;;  %v11735_v40 = vsel %vm979_vm4, %v4482_v11, %v4484_v7  ;;  %15185 = vst [vmem:[#allocation124_spill] sm:$0xff] %v11738_v37  ;;  %v4492_v7 = vrot.slane %v11016_v57, 2 }
 0x5aa   :  { %4635 = vrot.lane.b32.xlu1 %v11721_v39, %s7837_s16  ;;  %4633 = vrot.lane.b32.xlu0 %v11724_v14, %s7837_s16  ;;  %v4236_v54 = vpop.permute.xlu1 %4235  ;;  %4411 = vst.msk [vmem:[#allocation3 + $0x70] sm:$0xff] %vm914_vm5, %v4234_v27  ;;  %15184 = vst [vmem:[#allocation123_spill] sm:$0xff] %v11735_v40  ;;  %v4486_v39 = vrot.slane %v10994_v46, 2 }
 0x5ab   :  { %4412 = vst.msk [vmem:[#allocation3 + $0x78] sm:$0xff] %vm914_vm5, %v4236_v54  ;;  %v4489_v54 = vrot.slane %v7821_v52, 2  ;;  %v7822_v52 = vld [vmem:[#allocation2 + $0xa0] sm:$0x3] }
 0x5ac   :  { %v11752_v11 = vsel %vm979_vm4, %v4486_v39, %v4487_v34 }
 0x5ad   :  { %v4238_v27 = vpop.permute.xlu0 %4237  ;;  %v11749_v30 = vsel %vm979_vm4, %v4487_v34, %v4489_v54  ;;  %15187 = vst [vmem:[#allocation10_spill] sm:$0xff] %v11752_v11  ;;  %v4497_v54 = vrot.slane %v11040_v21, 2 }
 0x5ae   :  { %4639 = vrot.lane.b32.xlu1 %v11735_v40, %s7837_s16  ;;  %4637 = vrot.lane.b32.xlu0 %v11738_v37, %s7837_s16  ;;  %v4240_v14 = vpop.permute.xlu1 %4239  ;;  %4413 = vst.msk [vmem:[#allocation3 + $0x80] sm:$0xff] %vm914_vm5, %v4238_v27  ;;  %15186 = vst [vmem:[#allocation125_spill] sm:$0xff] %v11749_v30  ;;  %v4491_v40 = vrot.slane %v11018_v4, 2 }
 0x5af   :  { %4414 = vst.msk [vmem:[#allocation3 + $0x88] sm:$0xff] %vm914_vm5, %v4240_v14  ;;  %v4494_v14 = vrot.slane %v7822_v52, 2  ;;  %v7823_v52 = vld [vmem:[#allocation2 + $0xb8] sm:$0x3] }
 0x5b0   :  { %v11766_v34 = vsel %vm979_vm4, %v4491_v40, %v4492_v7 }
 0x5b1   :  { %v4242_v27 = vpop.permute.xlu0 %4241  ;;  %v11763_v39 = vsel %vm979_vm4, %v4492_v7, %v4494_v14  ;;  %15189 = vst [vmem:[#allocation45_spill] sm:$0xff] %v11766_v34  ;;  %v4502_v14 = vrot.slane %v11064_v35, 2 }
 0x5b2   :  { %4643 = vrot.lane.b32.xlu1 %v11749_v30, %s7837_s16  ;;  %4641 = vrot.lane.b32.xlu0 %v11752_v11, %s7837_s16  ;;  %v4244_v37 = vpop.permute.xlu1 %4243  ;;  %4415 = vst.msk [vmem:[#allocation3 + $0x90] sm:$0xff] %vm914_vm5, %v4242_v27  ;;  %15188 = vst [vmem:[#allocation43_spill] sm:$0xff] %v11763_v39  ;;  %v4496_v30 = vrot.slane %v11042_v8, 2 }
 0x5b3   :  { %4416 = vst.msk [vmem:[#allocation3 + $0x98] sm:$0xff] %vm914_vm5, %v4244_v37  ;;  %v4499_v37 = vrot.slane %v7823_v52, 2  ;;  %v7824_v52 = vld [vmem:[#allocation2 + $0xd0] sm:$0x3] }
 0x5b4   :  { %v11780_v7 = vsel %vm979_vm4, %v4496_v30, %v4497_v54 }
 0x5b5   :  { %v4246_v27 = vpop.permute.xlu0 %4245  ;;  %v11777_v40 = vsel %vm979_vm4, %v4497_v54, %v4499_v37  ;;  %15191 = vst [vmem:[#allocation129_spill] sm:$0xff] %v11780_v7  ;;  %v4507_v37 = vrot.slane %v11088_v53, 2 }
 0x5b6   :  { %4647 = vrot.lane.b32.xlu1 %v11763_v39, %s7837_s16  ;;  %4645 = vrot.lane.b32.xlu0 %v11766_v34, %s7837_s16  ;;  %v4248_v11 = vpop.permute.xlu1 %4247  ;;  %4417 = vst.msk [vmem:[#allocation3 + $0xa0] sm:$0xff] %vm914_vm5, %v4246_v27  ;;  %15190 = vst [vmem:[#allocation128_spill] sm:$0xff] %v11777_v40  ;;  %v4501_v39 = vrot.slane %v11066_v55, 2 }
 0x5b7   :  { %4418 = vst.msk [vmem:[#allocation3 + $0xa8] sm:$0xff] %vm914_vm5, %v4248_v11  ;;  %v4504_v11 = vrot.slane %v7824_v52, 2  ;;  %v7825_v52 = vld [vmem:[#allocation2 + $0xe8] sm:$0x3] }
 0x5b8   :  { %v11794_v54 = vsel %vm979_vm4, %v4501_v39, %v4502_v14 }
 0x5b9   :  { %v4250_v27 = vpop.permute.xlu0 %4249  ;;  %v11791_v30 = vsel %vm979_vm4, %v4502_v14, %v4504_v11  ;;  %15193 = vst [vmem:[#allocation131_spill] sm:$0xff] %v11794_v54  ;;  %v4512_v11 = vrot.slane %v11112_v2, 2 }
 0x5ba   :  { %4651 = vrot.lane.b32.xlu1 %v11777_v40, %s7837_s16  ;;  %4649 = vrot.lane.b32.xlu0 %v11780_v7, %s7837_s16  ;;  %v4252_v34 = vpop.permute.xlu1 %4251  ;;  %4419 = vst.msk [vmem:[#allocation3 + $0xb0] sm:$0xff] %vm914_vm5, %v4250_v27  ;;  %15192 = vst [vmem:[#allocation130_spill] sm:$0xff] %v11791_v30  ;;  %v4506_v40 = vrot.slane %v11090_v48, 2 }
 0x5bb   :  { %4420 = vst.msk [vmem:[#allocation3 + $0xb8] sm:$0xff] %vm914_vm5, %v4252_v34  ;;  %v4509_v34 = vrot.slane %v7825_v52, 2  ;;  %v7826_v52 = vld [vmem:[#allocation2 + $0x100] sm:$0x3] }
 0x5bc   :  { %v11808_v14 = vsel %vm979_vm4, %v4506_v40, %v4507_v37 }
 0x5bd   :  { %v4254_v27 = vpop.permute.xlu0 %4253  ;;  %v11805_v39 = vsel %vm979_vm4, %v4507_v37, %v4509_v34  ;;  %15195 = vst [vmem:[#allocation50_spill] sm:$0xff] %v11808_v14  ;;  %v4517_v34 = vrot.slane %v11136_v28, 2 }
 0x5be   :  { %4655 = vrot.lane.b32.xlu1 %v11791_v30, %s7837_s16  ;;  %4653 = vrot.lane.b32.xlu0 %v11794_v54, %s7837_s16  ;;  %v4256_v7 = vpop.permute.xlu1 %4255  ;;  %4421 = vst.msk [vmem:[#allocation3 + $0xc0] sm:$0xff] %vm914_vm5, %v4254_v27  ;;  %15194 = vst [vmem:[#allocation132_spill] sm:$0xff] %v11805_v39  ;;  %v4511_v30 = vrot.slane %v11114_v58, 2 }
 0x5bf   :  { %4422 = vst.msk [vmem:[#allocation3 + $0xc8] sm:$0xff] %vm914_vm5, %v4256_v7  ;;  %v4514_v7 = vrot.slane %v7826_v52, 2  ;;  %v7827_v52 = vld [vmem:[#allocation2 + $0x118] sm:$0x3] }
 0x5c0   :  { %v11822_v37 = vsel %vm979_vm4, %v4511_v30, %v4512_v11 }
 0x5c1   :  { %v4258_v27 = vpop.permute.xlu0 %4257  ;;  %v11819_v40 = vsel %vm979_vm4, %v4512_v11, %v4514_v7  ;;  %15197 = vst [vmem:[#allocation52_spill] sm:$0xff] %v11822_v37  ;;  %v4522_v7 = vrot.slane %v11160_v47, 2 }
 0x5c2   :  { %4659 = vrot.lane.b32.xlu1 %v11805_v39, %s7837_s16  ;;  %4657 = vrot.lane.b32.xlu0 %v11808_v14, %s7837_s16  ;;  %v4260_v54 = vpop.permute.xlu1 %4259  ;;  %4423 = vst.msk [vmem:[#allocation3 + $0xd0] sm:$0xff] %vm914_vm5, %v4258_v27  ;;  %15196 = vst [vmem:[#allocation133_spill] sm:$0xff] %v11819_v40  ;;  %v4516_v39 = vrot.slane %v11138_v32, 2 }
 0x5c3   :  { %4424 = vst.msk [vmem:[#allocation3 + $0xd8] sm:$0xff] %vm914_vm5, %v4260_v54  ;;  %v4519_v54 = vrot.slane %v7827_v52, 2  ;;  %v7828_v52 = vld [vmem:[#allocation2 + $0x130] sm:$0x3] }
 0x5c4   :  { %v11836_v11 = vsel %vm979_vm4, %v4516_v39, %v4517_v34 }
 0x5c5   :  { %v4262_v27 = vpop.permute.xlu0 %4261  ;;  %v11833_v30 = vsel %vm979_vm4, %v4517_v34, %v4519_v54  ;;  %15199 = vst [vmem:[#allocation53_spill] sm:$0xff] %v11836_v11  ;;  %v4527_v54 = vrot.slane %v11186_v10, 2 }
 0x5c6   :  { %4663 = vrot.lane.b32.xlu1 %v11819_v40, %s7837_s16  ;;  %4661 = vrot.lane.b32.xlu0 %v11822_v37, %s7837_s16  ;;  %v4264_v14 = vpop.permute.xlu1 %4263  ;;  %4425 = vst.msk [vmem:[#allocation3 + $0xe0] sm:$0xff] %vm914_vm5, %v4262_v27  ;;  %15198 = vst [vmem:[#allocation134_spill] sm:$0xff] %v11833_v30  ;;  %v4521_v40 = vrot.slane %v11162_v9, 2 }
 0x5c7   :  { %4426 = vst.msk [vmem:[#allocation3 + $0xe8] sm:$0xff] %vm914_vm5, %v4264_v14  ;;  %v4524_v14 = vrot.slane %v7828_v52, 2 }
 0x5c8   :  { %v11850_v34 = vsel %vm979_vm4, %v4521_v40, %v4522_v7 }
 0x5c9   :  { %v4266_v27 = vpop.permute.xlu0 %4265  ;;  %v11847_v39 = vsel %vm979_vm4, %v4522_v7, %v4524_v14  ;;  %15201 = vst [vmem:[#allocation54_spill] sm:$0xff] %v11850_v34  ;;  %v4532_v14 = vrot.slane %v11213_v31, 2 }
 0x5ca   :  { %4667 = vrot.lane.b32.xlu1 %v11833_v30, %s7837_s16  ;;  %4665 = vrot.lane.b32.xlu0 %v11836_v11, %s7837_s16  ;;  %v4268_v37 = vpop.permute.xlu1 %4267  ;;  %4427 = vst.msk [vmem:[#allocation3 + $0xf0] sm:$0xff] %vm914_vm5, %v4266_v27  ;;  %15200 = vst [vmem:[#allocation135_spill] sm:$0xff] %v11847_v39  ;;  %v4526_v30 = vrot.slane %v11189_v3, 2 }
 0x5cb   :  { %4428 = vst.msk [vmem:[#allocation3 + $0xf8] sm:$0xff] %vm914_vm5, %v4268_v37  ;;  %v4529_v37 = vrot.slane %v11172_v15, 2  ;;  %v4534_v15 = vrot.slane %v11199_v42, 2 }
 0x5cc   :  { %v11865_v7 = vsel %vm979_vm4, %v4526_v30, %v4527_v54 }
 0x5cd   :  { %v4270_v27 = vpop.permute.xlu0 %4269  ;;  %v11862_v40 = vsel %vm979_vm4, %v4527_v54, %v4529_v37  ;;  %15203 = vst [vmem:[#allocation56_spill] sm:$0xff] %v11865_v7  ;;  %v11877_v30 = vsel %vm979_vm4, %v4532_v14, %v4534_v15  ;;  %v4537_v37 = vrot.slane %v11242_v62, 2  ;;  %v4542_v15 = vrot.slane %v10865_v38, 2 }
 0x5ce   :  { %4671 = vrot.lane.b32.xlu1 %v11847_v39, %s7837_s16  ;;  %4669 = vrot.lane.b32.xlu0 %v11850_v34, %s7837_s16  ;;  %v4272_v52 = vpop.permute.xlu1 %4271  ;;  %4429 = vst.msk [vmem:[#allocation3 + $0x100] sm:$0xff] %vm914_vm5, %v4270_v27  ;;  %15202 = vst [vmem:[#allocation136_spill] sm:$0xff] %v11862_v40  ;;  %v4531_v39 = vrot.slane %v11216_v41, 2  ;;  %v7692_v34 = vpop.f32.mrf.mxu0 }
 0x5cf   :  { %4430 = vst.msk [vmem:[#allocation3 + $0x108] sm:$0xff] %vm914_vm5, %v4272_v52  ;;  %15204 = vst [vmem:[#allocation137_spill] sm:$0xff] %v11877_v30  ;;  %v3646_v42 = vadd.f32 %v11505_v56, %v7692_v34 }
 0x5d0   :  { %v11880_v54 = vsel %vm979_vm4, %v4531_v39, %v4532_v14  ;;  %v4544_v39 = vrot.slane %v11226_v59, 2  ;;  %v4541_v14 = vrot.slane %v10867_v17, 2 }
 0x5d1   :  { %v4274_v27 = vpop.permute.xlu0 %4273  ;;  %15205 = vst [vmem:[#allocation65_spill] sm:$0xff] %v11880_v54  ;;  %v3712_v22 = vmax.f32 %v3646_v42, 0.0 }
 0x5d2   :  { %4675 = vrot.lane.b32.xlu1 %v11862_v40, %s7837_s16  ;;  %4673 = vrot.lane.b32.xlu0 %v11865_v7, %s7837_s16  ;;  %v4276_v52 = vpop.permute.xlu1 %4275  ;;  %4431 = vst.msk [vmem:[#allocation3 + $0x110] sm:$0xff] %vm914_vm5, %v4274_v27  ;;  %v4536_v40 = vrot.slane %v11245_v12, 2  ;;  %v3640_v27 = vpop.f32.mrf.mxu0  ;;  %v4545_v17 = vsel %vm979_vm4, %v4542_v15, %v4544_v39  ;;  %v4543_v59 = vsel %vm979_vm4, %v4541_v14, %v4542_v15  ;;  %v4552_v15 = vrot.slane %v11307_v63, 2 }
 0x5d3   :  { %4432 = vst.msk [vmem:[#allocation3 + $0x118] sm:$0xff] %vm914_vm5, %v4276_v52  ;;  %v4539_v52 = vrot.slane %v11228_v13, 2  ;;  %v3641_v24 = vadd.f32 %v11505_v56, %v3640_v27  ;;  %v4551_v39 = vrot.slane %v11310_v43, 2 }
 0x5d4   :  { %v11900_v13 = vsel %vm979_vm4, %v4536_v40, %v4537_v37  ;;  %3776 = vst.msk [vmem:[#allocation2 + $0x339] sm:$0xff] %vm20_vm0, %v3712_v22  ;;  %v4547_v40 = vrot.slane %v11280_v5, 2 }
 0x5d5   :  { %v4278_v11 = vpop.permute.xlu0 %4277  ;;  %v11897_v34 = vsel %vm979_vm4, %v4537_v37, %v4539_v52  ;;  %15207 = vst [vmem:[#allocation142_spill] sm:$0xff] %v11900_v13  ;;  %v3711_v38 = vmax.f32 %v3641_v24, 0.0  ;;  %v4549_v24 = vrot.slane %v11274_v18, 2  ;;  %v4554_v18 = vrot.slane %v11293_v20, 2 }
 0x5d6   :  { %4679 = vrot.lane.b32.xlu1 %v11877_v30, %s7837_s16  ;;  %4677 = vrot.lane.b32.xlu0 %v11880_v54, %s7837_s16  ;;  %v4280_v7 = vpop.permute.xlu1 %4279  ;;  %4433 = vst.msk [vmem:[#allocation3 + $0x120] sm:$0xff] %vm914_vm5, %v4278_v11  ;;  %15206 = vst [vmem:[#allocation141_spill] sm:$0xff] %v11897_v34  ;;  %v4559_v20 = vrot.slane %v11320_v36, 2  ;;  %v4564_v36 = vrot.slane %v11347_v16, 2  ;;  %v15218_v16 = vld [vmem:[#allocation57_spill] sm:$0xff] }
 0x5d7   :  { %4434 = vst.msk [vmem:[#allocation3 + $0x128] sm:$0xff] %vm914_vm5, %v4280_v7  ;;  %v4546_v7 = vrot.slane %v11283_v29, 2  ;;  %v11920_v42 = vsel %vm979_vm4, %v4547_v40, %v4549_v24 }
 0x5d8   :  { %3775 = vst.msk [vmem:[#allocation2 + $0x331] sm:$0xff] %vm20_vm0, %v3711_v38  ;;  %15208 = vst [vmem:[#allocation143_spill] sm:$0xff] %v11920_v42  ;;  %v11935_v38 = vsel %vm979_vm4, %v4552_v15, %v4554_v18 }
 0x5d9   :  { %v4282_v11 = vpop.permute.xlu0 %4281  ;;  %v11923_v52 = vsel %vm979_vm4, %v4546_v7, %v4547_v40  ;;  %15210 = vst [vmem:[#allocation145_spill] sm:$0xff] %v11935_v38 }
 0x5da   :  { %4683 = vrot.lane.b32.xlu1 %v11897_v34, %s7837_s16  ;;  %4681 = vrot.lane.b32.xlu0 %v11900_v13, %s7837_s16  ;;  %v4284_v56 = vpop.permute.xlu1 %4283  ;;  %4435 = vst.msk [vmem:[#allocation3 + $0x130] sm:$0xff] %vm914_vm5, %v4282_v11  ;;  %15209 = vst [vmem:[#allocation144_spill] sm:$0xff] %v11923_v52 }
 0x5db   :  { %4436 = vst.msk [vmem:[#allocation3 + $0x138] sm:$0xff] %vm914_vm5, %v4284_v56  ;;  %v4556_v56 = vrot.slane %v11337_v33, 2 }
 0x5dd   :  { %v4286_v37 = vpop.permute.xlu0 %4285 }
 0x5de   :  { %4687 = vrot.lane.b32.xlu1 %v4545_v17, %s7837_s16  ;;  %4685 = vrot.lane.b32.xlu0 %v4543_v59, %s7837_s16  ;;  %v4288_v22 = vpop.permute.xlu1 %4287  ;;  %4437 = vst.msk [vmem:[#allocation3 + $0x140] sm:$0xff] %vm914_vm5, %v4286_v37  ;;  %v11938_v17 = vsel %vm979_vm4, %v4551_v39, %v4552_v15  ;;  %v4557_v59 = vrot.slane %v11334_v26, 2  ;;  %v4561_v37 = vrot.slane %v11364_v23, 2 }
 0x5df   :  { %4438 = vst.msk [vmem:[#allocation3 + $0x148] sm:$0xff] %vm914_vm5, %v4288_v22  ;;  %15211 = vst [vmem:[#allocation146_spill] sm:$0xff] %v11938_v17  ;;  %v4562_v22 = vrot.slane %v11361_v19, 2 }
 0x5e0   :  { %v11950_v7 = vsel %vm979_vm4, %v4557_v59, %v4559_v20  ;;  %v11953_v24 = vsel %vm979_vm4, %v4556_v56, %v4557_v59  ;;  %v15217_v56 = vld [vmem:[#allocation62_spill] sm:$0xff] }
 0x5e1   :  { %v4290_v27 = vpop.permute.xlu0 %4289  ;;  %15212 = vst [vmem:[#allocation147_spill] sm:$0xff] %v11950_v7  ;;  %15213 = vst [vmem:[#allocation148_spill] sm:$0xff] %v11953_v24  ;;  %v11965_v18 = vsel %vm979_vm4, %v4562_v22, %v4564_v36  ;;  %v4566_v20 = vrot.slane %v15217_v56, 2  ;;  %v15221_v36 = vld [vmem:[#allocation72_spill] sm:$0xff] }
 0x5e2   :  { %4691 = vrot.lane.b32.xlu1 %v11920_v42, %s7837_s16  ;;  %4689 = vrot.lane.b32.xlu0 %v11923_v52, %s7837_s16  ;;  %v4292_v14 = vpop.permute.xlu1 %4291  ;;  %4439 = vst.msk [vmem:[#allocation3 + $0x150] sm:$0xff] %vm914_vm5, %v4290_v27  ;;  %15214 = vst [vmem:[#allocation149_spill] sm:$0xff] %v11965_v18  ;;  %v15216_v27 = vld [vmem:[#allocation61_spill] sm:$0xff] }
 0x5e3   :  { %4440 = vst.msk [vmem:[#allocation3 + $0x158] sm:$0xff] %vm914_vm5, %v4292_v14  ;;  %v11968_v14 = vsel %vm979_vm4, %v4561_v37, %v4562_v22  ;;  %v4567_v59 = vrot.slane %v15216_v27, 2 }
 0x5e4   :  { %15215 = vst [vmem:[#allocation150_spill] sm:$0xff] %v11968_v14 }
 0x5e5   :  { %v4294_v40 = vpop.permute.xlu0 %4293  ;;  %v11983_v37 = vsel %vm979_vm4, %v4566_v20, %v4567_v59 }
 0x5e6   :  { %4695 = vrot.lane.b32.xlu1 %v11935_v38, %s7837_s16  ;;  %4693 = vrot.lane.b32.xlu0 %v11938_v17, %s7837_s16  ;;  %v4296_v11 = vpop.permute.xlu1 %4295  ;;  %4441 = vst.msk [vmem:[#allocation3 + $0x160] sm:$0xff] %vm914_vm5, %v4294_v40  ;;  %15220 = vst [vmem:[#allocation151_spill] sm:$0xff] %v11983_v37 }
 0x5e7   :  { %4442 = vst.msk [vmem:[#allocation3 + $0x168] sm:$0xff] %vm914_vm5, %v4296_v11  ;;  %v4569_v11 = vrot.slane %v15218_v16, 2  ;;  %v15223_v16 = vld [vmem:[#allocation63_spill] sm:$0xff] }
 0x5e9   :  { %v4298_v39 = vpop.permute.xlu0 %4297  ;;  %v11980_v22 = vsel %vm979_vm4, %v4567_v59, %v4569_v11  ;;  %v15226_v11 = vld [vmem:[#allocation7_spill] sm:$0xff] }
 0x5ea   :  { %4699 = vrot.lane.b32.xlu1 %v11950_v7, %s7837_s16  ;;  %4697 = vrot.lane.b32.xlu0 %v11953_v24, %s7837_s16  ;;  %v4300_v15 = vpop.permute.xlu1 %4299  ;;  %4443 = vst.msk [vmem:[#allocation3 + $0x170] sm:$0xff] %vm914_vm5, %v4298_v39  ;;  %15219 = vst [vmem:[#allocation57_spill] sm:$0xff] %v11980_v22  ;;  %v4572_v39 = vrot.slane %v15221_v36, 2  ;;  %v4577_v7 = vrot.slane %v15226_v11, 2 }
 0x5eb   :  { %4444 = vst.msk [vmem:[#allocation3 + $0x178] sm:$0xff] %vm914_vm5, %v4300_v15 }
 0x5ed   :  { %v4302_v15 = vpop.permute.xlu0 %4301 }
 0x5ee   :  { %4703 = vrot.lane.b32.xlu1 %v11965_v18, %s7837_s16  ;;  %4701 = vrot.lane.b32.xlu0 %v11968_v14, %s7837_s16  ;;  %v4304_v40 = vpop.permute.xlu1 %4303  ;;  %4445 = vst.msk [vmem:[#allocation3 + $0x180] sm:$0xff] %vm914_vm5, %v4302_v15  ;;  %v15222_v18 = vld [vmem:[#allocation76_spill] sm:$0xff] }
 0x5ef   :  { %4446 = vst.msk [vmem:[#allocation3 + $0x188] sm:$0xff] %vm914_vm5, %v4304_v40  ;;  %v4571_v24 = vrot.slane %v15222_v18, 2  ;;  %v4574_v40 = vrot.slane %v15223_v16, 2  ;;  %v15228_v16 = vld [vmem:[#allocation77_spill] sm:$0xff] }
 0x5f1   :  { %v4306_v15 = vpop.permute.xlu0 %4305  ;;  %v11995_v59 = vsel %vm979_vm4, %v4572_v39, %v4574_v40  ;;  %v11998_v20 = vsel %vm979_vm4, %v4571_v24, %v4572_v39  ;;  %v15231_v40 = vld [vmem:[#allocation86_spill] sm:$0xff] }
 0x5f2   :  { %4707 = vrot.lane.b32.xlu1 %v11980_v22, %s7837_s16  ;;  %4705 = vrot.lane.b32.xlu0 %v11983_v37, %s7837_s16  ;;  %v4308_v14 = vpop.permute.xlu1 %4307  ;;  %4447 = vst.msk [vmem:[#allocation3 + $0x190] sm:$0xff] %vm914_vm5, %v4306_v15  ;;  %15224 = vst [vmem:[#allocation63_spill] sm:$0xff] %v11995_v59  ;;  %v15227_v22 = vld [vmem:[#allocation82_spill] sm:$0xff]  ;;  %v4582_v38 = vrot.slane %v15231_v40, 2 }
 0x5f3   :  { %4448 = vst.msk [vmem:[#allocation3 + $0x198] sm:$0xff] %vm914_vm5, %v4308_v14  ;;  %15225 = vst [vmem:[#allocation152_spill] sm:$0xff] %v11998_v20  ;;  %v4576_v17 = vrot.slane %v15227_v22, 2  ;;  %v4579_v14 = vrot.slane %v15228_v16, 2  ;;  %v15233_v16 = vld [vmem:[#allocation83_spill] sm:$0xff] }
 0x5f5   :  { %v4310_v15 = vpop.permute.xlu0 %4309  ;;  %v12010_v24 = vsel %vm979_vm4, %v4577_v7, %v4579_v14  ;;  %v12013_v39 = vsel %vm979_vm4, %v4576_v17, %v4577_v7  ;;  %v15236_v14 = vld [vmem:[#allocation91_spill] sm:$0xff] }
 0x5f6   :  { %4711 = vrot.lane.b32.xlu1 %v11995_v59, %s7837_s16  ;;  %4709 = vrot.lane.b32.xlu0 %v11998_v20, %s7837_s16  ;;  %v4312_v37 = vpop.permute.xlu1 %4311  ;;  %4449 = vst.msk [vmem:[#allocation3 + $0x1a0] sm:$0xff] %vm914_vm5, %v4310_v15  ;;  %15229 = vst [vmem:[#allocation77_spill] sm:$0xff] %v12010_v24  ;;  %v15232_v59 = vld [vmem:[#allocation87_spill] sm:$0xff]  ;;  %v4587_v42 = vrot.slane %v15236_v14, 2 }
 0x5f7   :  { %4450 = vst.msk [vmem:[#allocation3 + $0x1a8] sm:$0xff] %vm914_vm5, %v4312_v37  ;;  %15230 = vst [vmem:[#allocation153_spill] sm:$0xff] %v12013_v39  ;;  %v4581_v52 = vrot.slane %v15232_v59, 2  ;;  %v4584_v37 = vrot.slane %v15233_v16, 2  ;;  %v15238_v16 = vld [vmem:[#allocation88_spill] sm:$0xff] }
 0x5f9   :  { %v12025_v17 = vsel %vm979_vm4, %v4582_v38, %v4584_v37  ;;  %v12028_v7 = vsel %vm979_vm4, %v4581_v52, %v4582_v38  ;;  %v15241_v37 = vld [vmem:[#allocation96_spill] sm:$0xff] }
 0x5fa   :  { %4715 = vrot.lane.b32.xlu1 %v12010_v24, %s7837_s16  ;;  %4713 = vrot.lane.b32.xlu0 %v12013_v39, %s7837_s16  ;;  %v4316_v20 = vpop.permute.xlu1 %4315  ;;  %v4314_v15 = vpop.permute.xlu0 %4313  ;;  %15234 = vst [vmem:[#allocation83_spill] sm:$0xff] %v12025_v17  ;;  %15235 = vst [vmem:[#allocation154_spill] sm:$0xff] %v12028_v7  ;;  %v15237_v24 = vld [vmem:[#allocation92_spill] sm:$0xff]  ;;  %v4592_v34 = vrot.slane %v15241_v37, 2 }
 0x5fb   :  { %4452 = vst.msk [vmem:[#allocation3 + $0x1b8] sm:$0xff] %vm914_vm5, %v4316_v20  ;;  %4451 = vst.msk [vmem:[#allocation3 + $0x1b0] sm:$0xff] %vm914_vm5, %v4314_v15  ;;  %v4586_v13 = vrot.slane %v15237_v24, 2  ;;  %v4589_v20 = vrot.slane %v15238_v16, 2  ;;  %v15243_v16 = vld [vmem:[#allocation93_spill] sm:$0xff] }
 0x5fd   :  { %v12040_v52 = vsel %vm979_vm4, %v4587_v42, %v4589_v20  ;;  %v12043_v38 = vsel %vm979_vm4, %v4586_v13, %v4587_v42  ;;  %v15246_v20 = vld [vmem:[#allocation101_spill] sm:$0xff] }
 0x5fe   :  { %4719 = vrot.lane.b32.xlu1 %v12025_v17, %s7837_s16  ;;  %4717 = vrot.lane.b32.xlu0 %v12028_v7, %s7837_s16  ;;  %v4320_v39 = vpop.permute.xlu1 %4319  ;;  %v4318_v15 = vpop.permute.xlu0 %4317  ;;  %15239 = vst [vmem:[#allocation88_spill] sm:$0xff] %v12040_v52  ;;  %15240 = vst [vmem:[#allocation155_spill] sm:$0xff] %v12043_v38  ;;  %v15242_v17 = vld [vmem:[#allocation97_spill] sm:$0xff]  ;;  %v4597_v30 = vrot.slane %v15246_v20, 2 }
 0x5ff   :  { %4454 = vst.msk [vmem:[#allocation3 + $0x1c8] sm:$0xff] %vm914_vm5, %v4320_v39  ;;  %4453 = vst.msk [vmem:[#allocation3 + $0x1c0] sm:$0xff] %vm914_vm5, %v4318_v15  ;;  %v4591_v54 = vrot.slane %v15242_v17, 2  ;;  %v4594_v39 = vrot.slane %v15243_v16, 2  ;;  %v15248_v16 = vld [vmem:[#allocation98_spill] sm:$0xff] }
 0x601   :  { %v12055_v13 = vsel %vm979_vm4, %v4592_v34, %v4594_v39  ;;  %v12058_v42 = vsel %vm979_vm4, %v4591_v54, %v4592_v34  ;;  %v4602_v39 = vrot.slane %v11582_v50, 2 }
 0x602   :  { %4723 = vrot.lane.b32.xlu1 %v12040_v52, %s7837_s16  ;;  %4721 = vrot.lane.b32.xlu0 %v12043_v38, %s7837_s16  ;;  %15244 = vst [vmem:[#allocation93_spill] sm:$0xff] %v12055_v13  ;;  %15245 = vst [vmem:[#allocation156_spill] sm:$0xff] %v12058_v42  ;;  %v15247_v52 = vld [vmem:[#allocation102_spill] sm:$0xff] }
 0x603   :  { %v4324_v7 = vpop.permute.xlu1 %4323  ;;  %v4322_v15 = vpop.permute.xlu0 %4321  ;;  %v4596_v17 = vrot.slane %v15247_v52, 2 }
 0x604   :  { %4456 = vst.msk [vmem:[#allocation3 + $0x1d8] sm:$0xff] %vm914_vm5, %v4324_v7  ;;  %4455 = vst.msk [vmem:[#allocation3 + $0x1d0] sm:$0xff] %vm914_vm5, %v4322_v15  ;;  %v4599_v7 = vrot.slane %v15248_v16, 2  ;;  %v15252_v16 = vld [vmem:[#allocation103_spill] sm:$0xff] }
 0x605   :  { %v12073_v34 = vsel %vm979_vm4, %v4596_v17, %v4597_v30 }
 0x606   :  { %4727 = vrot.lane.b32.xlu1 %v12055_v13, %s7837_s16  ;;  %4725 = vrot.lane.b32.xlu0 %v12058_v42, %s7837_s16  ;;  %v12070_v54 = vsel %vm979_vm4, %v4597_v30, %v4599_v7  ;;  %15250 = vst [vmem:[#allocation157_spill] sm:$0xff] %v12073_v34  ;;  %v15251_v13 = vld [vmem:[#allocation107_spill] sm:$0xff]  ;;  %v15255_v7 = vld [vmem:[#allocation113_spill] sm:$0xff] }
 0x607   :  { %v4328_v38 = vpop.permute.xlu1 %4327  ;;  %v4326_v15 = vpop.permute.xlu0 %4325  ;;  %15249 = vst [vmem:[#allocation98_spill] sm:$0xff] %v12070_v54  ;;  %v4601_v52 = vrot.slane %v15251_v13, 2  ;;  %v4607_v13 = vrot.slane %v15255_v7, 2 }
 0x608   :  { %4458 = vst.msk [vmem:[#allocation3 + $0x1e8] sm:$0xff] %vm914_vm5, %v4328_v38  ;;  %4457 = vst.msk [vmem:[#allocation3 + $0x1e0] sm:$0xff] %vm914_vm5, %v4326_v15  ;;  %v4604_v38 = vrot.slane %v15252_v16, 2  ;;  %v15257_v16 = vld [vmem:[#allocation108_spill] sm:$0xff] }
 0x609   :  { %v12088_v17 = vsel %vm979_vm4, %v4601_v52, %v4602_v39 }
 0x60a   :  { %4731 = vrot.lane.b32.xlu1 %v12070_v54, %s7837_s16  ;;  %4729 = vrot.lane.b32.xlu0 %v12073_v34, %s7837_s16  ;;  %v12085_v30 = vsel %vm979_vm4, %v4602_v39, %v4604_v38  ;;  %15254 = vst [vmem:[#allocation158_spill] sm:$0xff] %v12088_v17  ;;  %v15256_v54 = vld [vmem:[#allocation114_spill] sm:$0xff] }
 0x60b   :  { %15253 = vst [vmem:[#allocation103_spill] sm:$0xff] %v12085_v30  ;;  %v4606_v50 = vrot.slane %v15256_v54, 2  ;;  %v15260_v38 = vld [vmem:[#allocation26_spill] sm:$0xff] }
 0x60c   :  { %v4332_v42 = vpop.permute.xlu1 %4331  ;;  %v4330_v15 = vpop.permute.xlu0 %4329  ;;  %v4612_v54 = vrot.slane %v15260_v38, 2 }
 0x60d   :  { %4460 = vst.msk [vmem:[#allocation3 + $0x1f8] sm:$0xff] %vm914_vm5, %v4332_v42  ;;  %4459 = vst.msk [vmem:[#allocation3 + $0x1f0] sm:$0xff] %vm914_vm5, %v4330_v15  ;;  %v4609_v42 = vrot.slane %v15257_v16, 2  ;;  %v12103_v39 = vsel %vm979_vm4, %v4606_v50, %v4607_v13  ;;  %v15262_v16 = vld [vmem:[#allocation5_spill] sm:$0xff] }
 0x60e   :  { %4735 = vrot.lane.b32.xlu1 %v12085_v30, %s7837_s16  ;;  %4733 = vrot.lane.b32.xlu0 %v12088_v17, %s7837_s16  ;;  %15259 = vst [vmem:[#allocation159_spill] sm:$0xff] %v12103_v39  ;;  %v15261_v30 = vld [vmem:[#allocation116_spill] sm:$0xff] }
 0x60f   :  { %v12100_v52 = vsel %vm979_vm4, %v4607_v13, %v4609_v42  ;;  %v4611_v7 = vrot.slane %v15261_v30, 2  ;;  %v4617_v42 = vrot.slane %v11657_v1, 2 }
 0x610   :  { %v4624_v34 = vpop.permute.xlu1 %4623  ;;  %v4622_v15 = vpop.permute.xlu0 %4621  ;;  %15258 = vst [vmem:[#allocation108_spill] sm:$0xff] %v12100_v52 }
 0x611   :  { %4814 = vst.msk [vmem:[#allocation3 + $0x8] sm:$0xff] %vm1332_vm6, %v4624_v34  ;;  %4813 = vst.msk [vmem:[#allocation3] sm:$0xff] %vm1332_vm6, %v4622_v15  ;;  %v4614_v34 = vrot.slane %v15262_v16, 2  ;;  %v12118_v13 = vsel %vm979_vm4, %v4611_v7, %v4612_v54  ;;  %v15265_v16 = vld [vmem:[#allocation30_spill] sm:$0xff] }
 0x612   :  { %4739 = vrot.lane.b32.xlu1 %v12100_v52, %s7837_s16  ;;  %4737 = vrot.lane.b32.xlu0 %v12103_v39, %s7837_s16  ;;  %15263 = vst [vmem:[#allocation5_spill] sm:$0xff] %v12118_v13  ;;  %v15264_v52 = vld [vmem:[#allocation119_spill] sm:$0xff] }
 0x613   :  { %v12115_v50 = vsel %vm979_vm4, %v4612_v54, %v4614_v34  ;;  %v4616_v30 = vrot.slane %v15264_v52, 2 }
 0x614   :  { %v4628_v17 = vpop.permute.xlu1 %4627  ;;  %v4626_v15 = vpop.permute.xlu0 %4625 }
 0x615   :  { %4816 = vst.msk [vmem:[#allocation3 + $0x18] sm:$0xff] %vm1332_vm6, %v4628_v17  ;;  %4815 = vst.msk [vmem:[#allocation3 + $0x10] sm:$0xff] %vm1332_vm6, %v4626_v15  ;;  %v4619_v17 = vrot.slane %v15265_v16, 2  ;;  %v12133_v7 = vsel %vm979_vm4, %v4616_v30, %v4617_v42 }
 0x616   :  { %4743 = vrot.lane.b32.xlu1 %v12115_v50, %s7837_s16  ;;  %4741 = vrot.lane.b32.xlu0 %v12118_v13, %s7837_s16  ;;  %15267 = vst [vmem:[#allocation160_spill] sm:$0xff] %v12133_v7 }
 0x617   :  { %v12130_v54 = vsel %vm979_vm4, %v4617_v42, %v4619_v17 }
 0x618   :  { %v4632_v39 = vpop.permute.xlu1 %4631  ;;  %v4630_v15 = vpop.permute.xlu0 %4629  ;;  %15266 = vst [vmem:[#allocation30_spill] sm:$0xff] %v12130_v54 }
 0x619   :  { %4818 = vst.msk [vmem:[#allocation3 + $0x28] sm:$0xff] %vm1332_vm6, %v4632_v39  ;;  %4817 = vst.msk [vmem:[#allocation3 + $0x20] sm:$0xff] %vm1332_vm6, %v4630_v15 }
 0x61a   :  { %4747 = vrot.lane.b32.xlu1 %v12130_v54, %s7837_s16  ;;  %4745 = vrot.lane.b32.xlu0 %v12133_v7, %s7837_s16  ;;  %v15273_v54 = vld [vmem:[#allocation114_spill] sm:$0xff]  ;;  %v15274_v7 = vld [vmem:[#allocation116_spill] sm:$0xff] }
 0x61c   :  { %v4636_v34 = vpop.permute.xlu1 %4635  ;;  %v4634_v16 = vpop.permute.xlu0 %4633 }
 0x61d   :  { %4820 = vst.msk [vmem:[#allocation3 + $0x38] sm:$0xff] %vm1332_vm6, %v4636_v34  ;;  %4819 = vst.msk [vmem:[#allocation3 + $0x30] sm:$0xff] %vm1332_vm6, %v4634_v16 }
 0x61e   :  { %4883 = vrot.lane.b32.xlu1 %v10896_v61, %s7838_s26  ;;  %4881 = vrot.lane.b32.xlu0 %v10898_v44, %s7838_s26 }
 0x620   :  { %v4640_v30 = vpop.permute.xlu1 %4639  ;;  %v4638_v39 = vpop.permute.xlu0 %4637 }
 0x621   :  { %4822 = vst.msk [vmem:[#allocation3 + $0x48] sm:$0xff] %vm1332_vm6, %v4640_v30  ;;  %4821 = vst.msk [vmem:[#allocation3 + $0x40] sm:$0xff] %vm1332_vm6, %v4638_v39 }
 0x622   :  { %4887 = vrot.lane.b32.xlu1 %v10920_v60, %s7838_s26  ;;  %4885 = vrot.lane.b32.xlu0 %v10922_v49, %s7838_s26 }
 0x624   :  { %v4644_v42 = vpop.permute.xlu1 %4643  ;;  %v4642_v17 = vpop.permute.xlu0 %4641 }
 0x625   :  { %4824 = vst.msk [vmem:[#allocation3 + $0x58] sm:$0xff] %vm1332_vm6, %v4644_v42  ;;  %4823 = vst.msk [vmem:[#allocation3 + $0x50] sm:$0xff] %vm1332_vm6, %v4642_v17 }
 0x626   :  { %4891 = vrot.lane.b32.xlu1 %v10944_v51, %s7838_s26  ;;  %4889 = vrot.lane.b32.xlu0 %v10946_v45, %s7838_s26 }
 0x628   :  { %v4648_v61 = vpop.permute.xlu1 %4647  ;;  %v4646_v44 = vpop.permute.xlu0 %4645 }
 0x629   :  { %4826 = vst.msk [vmem:[#allocation3 + $0x68] sm:$0xff] %vm1332_vm6, %v4648_v61  ;;  %4825 = vst.msk [vmem:[#allocation3 + $0x60] sm:$0xff] %vm1332_vm6, %v4646_v44 }
 0x62a   :  { %4895 = vrot.lane.b32.xlu1 %v10968_v25, %s7838_s26  ;;  %4893 = vrot.lane.b32.xlu0 %v10970_v0, %s7838_s26 }
 0x62c   :  { %v4652_v15 = vpop.permute.xlu1 %4651  ;;  %v4650_v34 = vpop.permute.xlu0 %4649 }
 0x62d   :  { %4828 = vst.msk [vmem:[#allocation3 + $0x78] sm:$0xff] %vm1332_vm6, %v4652_v15  ;;  %4827 = vst.msk [vmem:[#allocation3 + $0x70] sm:$0xff] %vm1332_vm6, %v4650_v34 }
 0x62e   :  { %4899 = vrot.lane.b32.xlu1 %v10992_v6, %s7838_s26  ;;  %4897 = vrot.lane.b32.xlu0 %v10994_v46, %s7838_s26 }
 0x630   :  { %v4656_v16 = vpop.permute.xlu1 %4655  ;;  %v4654_v30 = vpop.permute.xlu0 %4653 }
 0x631   :  { %4830 = vst.msk [vmem:[#allocation3 + $0x88] sm:$0xff] %vm1332_vm6, %v4656_v16  ;;  %4829 = vst.msk [vmem:[#allocation3 + $0x80] sm:$0xff] %vm1332_vm6, %v4654_v30 }
 0x632   :  { %4903 = vrot.lane.b32.xlu1 %v11016_v57, %s7838_s26  ;;  %4901 = vrot.lane.b32.xlu0 %v11018_v4, %s7838_s26 }
 0x634   :  { %v4660_v39 = vpop.permute.xlu1 %4659  ;;  %v4658_v42 = vpop.permute.xlu0 %4657 }
 0x635   :  { %4832 = vst.msk [vmem:[#allocation3 + $0x98] sm:$0xff] %vm1332_vm6, %v4660_v39  ;;  %4831 = vst.msk [vmem:[#allocation3 + $0x90] sm:$0xff] %vm1332_vm6, %v4658_v42 }
 0x636   :  { %4907 = vrot.lane.b32.xlu1 %v11040_v21, %s7838_s26  ;;  %4905 = vrot.lane.b32.xlu0 %v11042_v8, %s7838_s26 }
 0x638   :  { %v4664_v17 = vpop.permute.xlu1 %4663  ;;  %v4662_v61 = vpop.permute.xlu0 %4661 }
 0x639   :  { %4834 = vst.msk [vmem:[#allocation3 + $0xa8] sm:$0xff] %vm1332_vm6, %v4664_v17  ;;  %4833 = vst.msk [vmem:[#allocation3 + $0xa0] sm:$0xff] %vm1332_vm6, %v4662_v61 }
 0x63a   :  { %4911 = vrot.lane.b32.xlu1 %v11064_v35, %s7838_s26  ;;  %4909 = vrot.lane.b32.xlu0 %v11066_v55, %s7838_s26 }
 0x63c   :  { %v4668_v44 = vpop.permute.xlu1 %4667  ;;  %v4666_v15 = vpop.permute.xlu0 %4665 }
 0x63d   :  { %4836 = vst.msk [vmem:[#allocation3 + $0xb8] sm:$0xff] %vm1332_vm6, %v4668_v44  ;;  %4835 = vst.msk [vmem:[#allocation3 + $0xb0] sm:$0xff] %vm1332_vm6, %v4666_v15 }
 0x63e   :  { %4915 = vrot.lane.b32.xlu1 %v11088_v53, %s7838_s26  ;;  %4913 = vrot.lane.b32.xlu0 %v11090_v48, %s7838_s26 }
 0x640   :  { %v4672_v34 = vpop.permute.xlu1 %4671  ;;  %v4670_v16 = vpop.permute.xlu0 %4669 }
 0x641   :  { %4838 = vst.msk [vmem:[#allocation3 + $0xc8] sm:$0xff] %vm1332_vm6, %v4672_v34  ;;  %4837 = vst.msk [vmem:[#allocation3 + $0xc0] sm:$0xff] %vm1332_vm6, %v4670_v16 }
 0x642   :  { %4919 = vrot.lane.b32.xlu1 %v11112_v2, %s7838_s26  ;;  %4917 = vrot.lane.b32.xlu0 %v11114_v58, %s7838_s26 }
 0x644   :  { %v4676_v30 = vpop.permute.xlu1 %4675  ;;  %v4674_v39 = vpop.permute.xlu0 %4673 }
 0x645   :  { %4840 = vst.msk [vmem:[#allocation3 + $0xd8] sm:$0xff] %vm1332_vm6, %v4676_v30  ;;  %4839 = vst.msk [vmem:[#allocation3 + $0xd0] sm:$0xff] %vm1332_vm6, %v4674_v39 }
 0x646   :  { %4923 = vrot.lane.b32.xlu1 %v11136_v28, %s7838_s26  ;;  %4921 = vrot.lane.b32.xlu0 %v11138_v32, %s7838_s26  ;;  %v15358_v32 = vld [vmem:[#allocation52_spill] sm:$0xff]  ;;  %v15359_v28 = vld [vmem:[#allocation134_spill] sm:$0xff] }
 0x648   :  { %v4680_v42 = vpop.permute.xlu1 %4679  ;;  %v4678_v17 = vpop.permute.xlu0 %4677 }
 0x649   :  { %4842 = vst.msk [vmem:[#allocation3 + $0xe8] sm:$0xff] %vm1332_vm6, %v4680_v42  ;;  %4841 = vst.msk [vmem:[#allocation3 + $0xe0] sm:$0xff] %vm1332_vm6, %v4678_v17  ;;  %v12231_v17 = vld [vmem:[#allocation2 + $0x188] sm:$0xff] }
 0x64a   :  { %4927 = vrot.lane.b32.xlu1 %v11160_v47, %s7838_s26  ;;  %4925 = vrot.lane.b32.xlu0 %v11162_v9, %s7838_s26  ;;  %v15354_v9 = vld [vmem:[#allocation131_spill] sm:$0xff]  ;;  %v15355_v47 = vld [vmem:[#allocation132_spill] sm:$0xff] }
 0x64c   :  { %v4684_v61 = vpop.permute.xlu1 %4683  ;;  %v4682_v44 = vpop.permute.xlu0 %4681 }
 0x64d   :  { %4844 = vst.msk [vmem:[#allocation3 + $0xf8] sm:$0xff] %vm1332_vm6, %v4684_v61  ;;  %4843 = vst.msk [vmem:[#allocation3 + $0xf0] sm:$0xff] %vm1332_vm6, %v4682_v44  ;;  %v12233_v61 = vld [vmem:[#allocation2 + $0x180] sm:$0xff] }
 0x64e   :  { %4931 = vrot.lane.b32.xlu1 %v11186_v10, %s7838_s26  ;;  %4929 = vrot.lane.b32.xlu0 %v11189_v3, %s7838_s26  ;;  %v15350_v3 = vld [vmem:[#allocation45_spill] sm:$0xff]  ;;  %v15351_v10 = vld [vmem:[#allocation128_spill] sm:$0xff] }
 0x650   :  { %v4688_v15 = vpop.permute.xlu1 %4687  ;;  %v4686_v34 = vpop.permute.xlu0 %4685 }
 0x651   :  { %4846 = vst.msk [vmem:[#allocation3 + $0x108] sm:$0xff] %vm1332_vm6, %v4688_v15  ;;  %4845 = vst.msk [vmem:[#allocation3 + $0x100] sm:$0xff] %vm1332_vm6, %v4686_v34 }
 0x652   :  { %4935 = vrot.lane.b32.xlu1 %v11213_v31, %s7838_s26  ;;  %4933 = vrot.lane.b32.xlu0 %v11216_v41, %s7838_s26  ;;  %v5139_v41 = vrot.slane %v12233_v61, 1 }
 0x654   :  { %v4692_v16 = vpop.permute.xlu1 %4691  ;;  %v4690_v30 = vpop.permute.xlu0 %4689 }
 0x655   :  { %4848 = vst.msk [vmem:[#allocation3 + $0x118] sm:$0xff] %vm1332_vm6, %v4692_v16  ;;  %4847 = vst.msk [vmem:[#allocation3 + $0x110] sm:$0xff] %vm1332_vm6, %v4690_v30 }
 0x656   :  { %4939 = vrot.lane.b32.xlu1 %v11242_v62, %s7838_s26  ;;  %4937 = vrot.lane.b32.xlu0 %v11245_v12, %s7838_s26  ;;  %v12423_v12 = vld [vmem:[#allocation2 + $0x190] sm:$0x3]  ;;  %v5140_v62 = vrot.slane %v12231_v17, 1 }
 0x658   :  { %v4696_v39 = vpop.permute.xlu1 %4695  ;;  %v4694_v42 = vpop.permute.xlu0 %4693 }
 0x659   :  { %4850 = vst.msk [vmem:[#allocation3 + $0x128] sm:$0xff] %vm1332_vm6, %v4696_v39  ;;  %4849 = vst.msk [vmem:[#allocation3 + $0x120] sm:$0xff] %vm1332_vm6, %v4694_v42 }
 0x65a   :  { %4943 = vrot.lane.b32.xlu1 %v12231_v17, %s7838_s26  ;;  %4941 = vrot.lane.b32.xlu0 %v12233_v61, %s7838_s26 }
 0x65c   :  { %v4700_v44 = vpop.permute.xlu1 %4699  ;;  %v4698_v15 = vpop.permute.xlu0 %4697 }
 0x65d   :  { %4852 = vst.msk [vmem:[#allocation3 + $0x138] sm:$0xff] %vm1332_vm6, %v4700_v44  ;;  %4851 = vst.msk [vmem:[#allocation3 + $0x130] sm:$0xff] %vm1332_vm6, %v4698_v15 }
 0x65e   :  { %4947 = vrot.lane.b32.xlu1 %v11280_v5, %s7838_s26  ;;  %4945 = vrot.lane.b32.xlu0 %v11283_v29, %s7838_s26 }
 0x660   :  { %v4704_v34 = vpop.permute.xlu1 %4703  ;;  %v4702_v16 = vpop.permute.xlu0 %4701 }
 0x661   :  { %4854 = vst.msk [vmem:[#allocation3 + $0x148] sm:$0xff] %vm1332_vm6, %v4704_v34  ;;  %4853 = vst.msk [vmem:[#allocation3 + $0x140] sm:$0xff] %vm1332_vm6, %v4702_v16 }
 0x662   :  { %4951 = vrot.lane.b32.xlu1 %v11307_v63, %s7838_s26  ;;  %4949 = vrot.lane.b32.xlu0 %v11310_v43, %s7838_s26  ;;  %v15301_v43 = vld [vmem:[#allocation74_spill] sm:$0xff]  ;;  %v15302_v63 = vld [vmem:[#allocation75_spill] sm:$0xff] }
 0x664   :  { %v4708_v30 = vpop.permute.xlu1 %4707  ;;  %v4706_v39 = vpop.permute.xlu0 %4705 }
 0x665   :  { %4856 = vst.msk [vmem:[#allocation3 + $0x158] sm:$0xff] %vm1332_vm6, %v4708_v30  ;;  %4855 = vst.msk [vmem:[#allocation3 + $0x150] sm:$0xff] %vm1332_vm6, %v4706_v39 }
 0x666   :  { %4955 = vrot.lane.b32.xlu1 %v11334_v26, %s7838_s26  ;;  %4953 = vrot.lane.b32.xlu0 %v11337_v33, %s7838_s26  ;;  %v15299_v33 = vld [vmem:[#allocation67_spill] sm:$0xff]  ;;  %v15300_v26 = vld [vmem:[#allocation68_spill] sm:$0xff] }
 0x668   :  { %v4712_v5 = vpop.permute.xlu1 %4711  ;;  %v4710_v29 = vpop.permute.xlu0 %4709 }
 0x669   :  { %4858 = vst.msk [vmem:[#allocation3 + $0x168] sm:$0xff] %vm1332_vm6, %v4712_v5  ;;  %4857 = vst.msk [vmem:[#allocation3 + $0x160] sm:$0xff] %vm1332_vm6, %v4710_v29 }
 0x66a   :  { %4959 = vrot.lane.b32.xlu1 %v11361_v19, %s7838_s26  ;;  %4957 = vrot.lane.b32.xlu0 %v11364_v23, %s7838_s26  ;;  %v15297_v23 = vld [vmem:[#allocation23_spill] sm:$0xff]  ;;  %v15298_v19 = vld [vmem:[#allocation40_spill] sm:$0xff] }
 0x66c   :  { %v4716_v42 = vpop.permute.xlu1 %4715  ;;  %v4714_v44 = vpop.permute.xlu0 %4713 }
 0x66d   :  { %4860 = vst.msk [vmem:[#allocation3 + $0x178] sm:$0xff] %vm1332_vm6, %v4716_v42  ;;  %4859 = vst.msk [vmem:[#allocation3 + $0x170] sm:$0xff] %vm1332_vm6, %v4714_v44 }
 0x66e   :  { %4963 = vrot.lane.b32.xlu1 %v15216_v27, %s7838_s26  ;;  %4961 = vrot.lane.b32.xlu0 %v15217_v56, %s7838_s26  ;;  %v15295_v56 = vld [vmem:[#allocation15_spill] sm:$0xff]  ;;  %v15296_v27 = vld [vmem:[#allocation16_spill] sm:$0xff] }
 0x670   :  { %v4720_v15 = vpop.permute.xlu1 %4719  ;;  %v4718_v34 = vpop.permute.xlu0 %4717 }
 0x671   :  { %4862 = vst.msk [vmem:[#allocation3 + $0x188] sm:$0xff] %vm1332_vm6, %v4720_v15  ;;  %4861 = vst.msk [vmem:[#allocation3 + $0x180] sm:$0xff] %vm1332_vm6, %v4718_v34  ;;  %v15268_v34 = vld [vmem:[#allocation97_spill] sm:$0xff] }
 0x672   :  { %4967 = vrot.lane.b32.xlu1 %v15221_v36, %s7838_s26  ;;  %4965 = vrot.lane.b32.xlu0 %v15222_v18, %s7838_s26  ;;  %v15293_v18 = vld [vmem:[#allocation139_spill] sm:$0xff]  ;;  %v15294_v36 = vld [vmem:[#allocation140_spill] sm:$0xff] }
 0x674   :  { %v4724_v16 = vpop.permute.xlu1 %4723  ;;  %v4722_v30 = vpop.permute.xlu0 %4721 }
 0x675   :  { %4864 = vst.msk [vmem:[#allocation3 + $0x198] sm:$0xff] %vm1332_vm6, %v4724_v16  ;;  %4863 = vst.msk [vmem:[#allocation3 + $0x190] sm:$0xff] %vm1332_vm6, %v4722_v30 }
 0x676   :  { %4971 = vrot.lane.b32.xlu1 %v15226_v11, %s7838_s26  ;;  %4969 = vrot.lane.b32.xlu0 %v15227_v22, %s7838_s26  ;;  %v15291_v22 = vld [vmem:[#allocation79_spill] sm:$0xff]  ;;  %v15292_v11 = vld [vmem:[#allocation138_spill] sm:$0xff] }
 0x678   :  { %v4728_v39 = vpop.permute.xlu1 %4727  ;;  %v4726_v5 = vpop.permute.xlu0 %4725 }
 0x679   :  { %4866 = vst.msk [vmem:[#allocation3 + $0x1a8] sm:$0xff] %vm1332_vm6, %v4728_v39  ;;  %4865 = vst.msk [vmem:[#allocation3 + $0x1a0] sm:$0xff] %vm1332_vm6, %v4726_v5  ;;  %v15269_v39 = vld [vmem:[#allocation102_spill] sm:$0xff] }
 0x67a   :  { %4975 = vrot.lane.b32.xlu1 %v15231_v40, %s7838_s26  ;;  %4973 = vrot.lane.b32.xlu0 %v15232_v59, %s7838_s26  ;;  %v15289_v59 = vld [vmem:[#allocation127_spill] sm:$0xff]  ;;  %v15290_v40 = vld [vmem:[#allocation42_spill] sm:$0xff] }
 0x67c   :  { %v4732_v29 = vpop.permute.xlu1 %4731  ;;  %v4730_v42 = vpop.permute.xlu0 %4729 }
 0x67d   :  { %4868 = vst.msk [vmem:[#allocation3 + $0x1b8] sm:$0xff] %vm1332_vm6, %v4732_v29  ;;  %4867 = vst.msk [vmem:[#allocation3 + $0x1b0] sm:$0xff] %vm1332_vm6, %v4730_v42  ;;  %v15270_v42 = vld [vmem:[#allocation106_spill] sm:$0xff] }
 0x67e   :  { %4979 = vrot.lane.b32.xlu1 %v15236_v14, %s7838_s26  ;;  %4977 = vrot.lane.b32.xlu0 %v15237_v24, %s7838_s26  ;;  %v15287_v24 = vld [vmem:[#allocation126_spill] sm:$0xff]  ;;  %v15288_v14 = vld [vmem:[#allocation73_spill] sm:$0xff] }
 0x680   :  { %v4736_v44 = vpop.permute.xlu1 %4735  ;;  %v4734_v15 = vpop.permute.xlu0 %4733 }
 0x681   :  { %4870 = vst.msk [vmem:[#allocation3 + $0x1c8] sm:$0xff] %vm1332_vm6, %v4736_v44  ;;  %4869 = vst.msk [vmem:[#allocation3 + $0x1c0] sm:$0xff] %vm1332_vm6, %v4734_v15  ;;  %v15271_v44 = vld [vmem:[#allocation107_spill] sm:$0xff] }
 0x682   :  { %4983 = vrot.lane.b32.xlu1 %v15241_v37, %s7838_s26  ;;  %4981 = vrot.lane.b32.xlu0 %v15268_v34, %s7838_s26  ;;  %v15285_v34 = vld [vmem:[#allocation111_spill] sm:$0xff] }
 0x683   :  { %v15286_v37 = vld [vmem:[#allocation39_spill] sm:$0xff] }
 0x684   :  { %v4740_v16 = vpop.permute.xlu1 %4739  ;;  %v4738_v30 = vpop.permute.xlu0 %4737 }
 0x685   :  { %4872 = vst.msk [vmem:[#allocation3 + $0x1d8] sm:$0xff] %vm1332_vm6, %v4740_v16  ;;  %4871 = vst.msk [vmem:[#allocation3 + $0x1d0] sm:$0xff] %vm1332_vm6, %v4738_v30  ;;  %v15272_v30 = vld [vmem:[#allocation113_spill] sm:$0xff] }
 0x686   :  { %4987 = vrot.lane.b32.xlu1 %v15246_v20, %s7838_s26  ;;  %4985 = vrot.lane.b32.xlu0 %v15269_v39, %s7838_s26  ;;  %v15283_v39 = vld [vmem:[#allocation109_spill] sm:$0xff]  ;;  %v15284_v20 = vld [vmem:[#allocation110_spill] sm:$0xff] }
 0x688   :  { %v4744_v5 = vpop.permute.xlu1 %4743  ;;  %v4742_v29 = vpop.permute.xlu0 %4741 }
 0x689   :  { %4874 = vst.msk [vmem:[#allocation3 + $0x1e8] sm:$0xff] %vm1332_vm6, %v4744_v5  ;;  %4873 = vst.msk [vmem:[#allocation3 + $0x1e0] sm:$0xff] %vm1332_vm6, %v4742_v29 }
 0x68a   :  { %4991 = vrot.lane.b32.xlu1 %v15270_v42, %s7838_s26  ;;  %4989 = vrot.lane.b32.xlu0 %v15271_v44, %s7838_s26  ;;  %v15281_v44 = vld [vmem:[#allocation80_spill] sm:$0xff]  ;;  %v15282_v42 = vld [vmem:[#allocation81_spill] sm:$0xff] }
 0x68c   :  { %v4748_v15 = vpop.permute.xlu1 %4747  ;;  %v4746_v16 = vpop.permute.xlu0 %4745 }
 0x68d   :  { %4876 = vst.msk [vmem:[#allocation3 + $0x1f8] sm:$0xff] %vm1332_vm6, %v4748_v15  ;;  %4875 = vst.msk [vmem:[#allocation3 + $0x1f0] sm:$0xff] %vm1332_vm6, %v4746_v16 }
 0x68e   :  { %4995 = vrot.lane.b32.xlu1 %v15272_v30, %s7838_s26  ;;  %4993 = vrot.lane.b32.xlu0 %v15273_v54, %s7838_s26  ;;  %v15277_v54 = vld [vmem:[#allocation24_spill] sm:$0xff]  ;;  %v15278_v30 = vld [vmem:[#allocation25_spill] sm:$0xff] }
 0x690   :  { %v4884_v5 = vpop.permute.xlu1 %4883  ;;  %v4882_v29 = vpop.permute.xlu0 %4881 }
 0x691   :  { %5074 = vst.msk [vmem:[#allocation3 + $0x8] sm:$0xff] %vm1593_vm7, %v4884_v5  ;;  %5073 = vst.msk [vmem:[#allocation3] sm:$0xff] %vm1593_vm7, %v4882_v29 }
 0x692   :  { %4999 = vrot.lane.b32.xlu1 %v15260_v38, %s7838_s26  ;;  %4997 = vrot.lane.b32.xlu0 %v15274_v7, %s7838_s26  ;;  %v12331_v38 = vld [vmem:[#allocation2 + $0x338] sm:$0xff]  ;;  %v12333_v7 = vld [vmem:[#allocation2 + $0x330] sm:$0xff] }
 0x694   :  { %v4888_v15 = vpop.permute.xlu1 %4887  ;;  %v4886_v16 = vpop.permute.xlu0 %4885 }
 0x695   :  { %5076 = vst.msk [vmem:[#allocation3 + $0x18] sm:$0xff] %vm1593_vm7, %v4888_v15  ;;  %5075 = vst.msk [vmem:[#allocation3 + $0x10] sm:$0xff] %vm1593_vm7, %v4886_v16 }
 0x696   :  { %5003 = vrot.lane.b32.xlu1 %v11657_v1, %s7838_s26  ;;  %5001 = vrot.lane.b32.xlu0 %v15264_v52, %s7838_s26 }
 0x698   :  { %v4892_v5 = vpop.permute.xlu1 %4891  ;;  %v4890_v29 = vpop.permute.xlu0 %4889 }
 0x699   :  { %5078 = vst.msk [vmem:[#allocation3 + $0x28] sm:$0xff] %vm1593_vm7, %v4892_v5  ;;  %5077 = vst.msk [vmem:[#allocation3 + $0x20] sm:$0xff] %vm1593_vm7, %v4890_v29  ;;  %v15275_v5 = vld [vmem:[#allocation12_spill] sm:$0xff]  ;;  %v15276_v29 = vld [vmem:[#allocation22_spill] sm:$0xff] }
 0x69a   :  { %5007 = vrot.lane.b32.xlu1 %v12331_v38, %s7838_s26  ;;  %5005 = vrot.lane.b32.xlu0 %v12333_v7, %s7838_s26 }
 0x69c   :  { %v4896_v15 = vpop.permute.xlu1 %4895  ;;  %v4894_v16 = vpop.permute.xlu0 %4893 }
 0x69d   :  { %5080 = vst.msk [vmem:[#allocation3 + $0x38] sm:$0xff] %vm1593_vm7, %v4896_v15  ;;  %5079 = vst.msk [vmem:[#allocation3 + $0x30] sm:$0xff] %vm1593_vm7, %v4894_v16 }
 0x69e   :  { %5151 = vrot.lane.b32.xlu1 %v15275_v5, %s7839_s27  ;;  %5149 = vrot.lane.b32.xlu0 %v15276_v29, %s7839_s27  ;;  %v15279_v5 = vld [vmem:[#allocation4_spill] sm:$0xff] }
 0x69f   :  { %v15280_v29 = vld [vmem:[#allocation8_spill] sm:$0xff] }
 0x6a0   :  { %v4900_v52 = vpop.permute.xlu1 %4899  ;;  %v4898_v1 = vpop.permute.xlu0 %4897 }
 0x6a1   :  { %5082 = vst.msk [vmem:[#allocation3 + $0x48] sm:$0xff] %vm1593_vm7, %v4900_v52  ;;  %5081 = vst.msk [vmem:[#allocation3 + $0x40] sm:$0xff] %vm1593_vm7, %v4898_v1 }
 0x6a2   :  { %5155 = vrot.lane.b32.xlu1 %v15277_v54, %s7839_s27  ;;  %5153 = vrot.lane.b32.xlu0 %v15278_v30, %s7839_s27 }
 0x6a4   :  { %v4904_v15 = vpop.permute.xlu1 %4903  ;;  %v4902_v16 = vpop.permute.xlu0 %4901 }
 0x6a5   :  { %5084 = vst.msk [vmem:[#allocation3 + $0x58] sm:$0xff] %vm1593_vm7, %v4904_v15  ;;  %5083 = vst.msk [vmem:[#allocation3 + $0x50] sm:$0xff] %vm1593_vm7, %v4902_v16 }
 0x6a6   :  { %5159 = vrot.lane.b32.xlu1 %v15279_v5, %s7839_s27  ;;  %5157 = vrot.lane.b32.xlu0 %v15280_v29, %s7839_s27 }
 0x6a8   :  { %v4908_v52 = vpop.permute.xlu1 %4907  ;;  %v4906_v1 = vpop.permute.xlu0 %4905 }
 0x6a9   :  { %5086 = vst.msk [vmem:[#allocation3 + $0x68] sm:$0xff] %vm1593_vm7, %v4908_v52  ;;  %5085 = vst.msk [vmem:[#allocation3 + $0x60] sm:$0xff] %vm1593_vm7, %v4906_v1 }
 0x6aa   :  { %5163 = vrot.lane.b32.xlu1 %v15281_v44, %s7839_s27  ;;  %5161 = vrot.lane.b32.xlu0 %v15282_v42, %s7839_s27 }
 0x6ac   :  { %v4912_v15 = vpop.permute.xlu1 %4911  ;;  %v4910_v16 = vpop.permute.xlu0 %4909 }
 0x6ad   :  { %5088 = vst.msk [vmem:[#allocation3 + $0x78] sm:$0xff] %vm1593_vm7, %v4912_v15  ;;  %5087 = vst.msk [vmem:[#allocation3 + $0x70] sm:$0xff] %vm1593_vm7, %v4910_v16 }
 0x6ae   :  { %5167 = vrot.lane.b32.xlu1 %v15283_v39, %s7839_s27  ;;  %5165 = vrot.lane.b32.xlu0 %v15284_v20, %s7839_s27 }
 0x6b0   :  { %v4916_v52 = vpop.permute.xlu1 %4915  ;;  %v4914_v1 = vpop.permute.xlu0 %4913 }
 0x6b1   :  { %5090 = vst.msk [vmem:[#allocation3 + $0x88] sm:$0xff] %vm1593_vm7, %v4916_v52  ;;  %5089 = vst.msk [vmem:[#allocation3 + $0x80] sm:$0xff] %vm1593_vm7, %v4914_v1 }
 0x6b2   :  { %5171 = vrot.lane.b32.xlu1 %v15285_v34, %s7839_s27  ;;  %5169 = vrot.lane.b32.xlu0 %v15286_v37, %s7839_s27 }
 0x6b4   :  { %v4920_v15 = vpop.permute.xlu1 %4919  ;;  %v4918_v16 = vpop.permute.xlu0 %4917 }
 0x6b5   :  { %5092 = vst.msk [vmem:[#allocation3 + $0x98] sm:$0xff] %vm1593_vm7, %v4920_v15  ;;  %5091 = vst.msk [vmem:[#allocation3 + $0x90] sm:$0xff] %vm1593_vm7, %v4918_v16 }
 0x6b6   :  { %5175 = vrot.lane.b32.xlu1 %v15287_v24, %s7839_s27  ;;  %5173 = vrot.lane.b32.xlu0 %v15288_v14, %s7839_s27 }
 0x6b8   :  { %v4924_v52 = vpop.permute.xlu1 %4923  ;;  %v4922_v1 = vpop.permute.xlu0 %4921 }
 0x6b9   :  { %5094 = vst.msk [vmem:[#allocation3 + $0xa8] sm:$0xff] %vm1593_vm7, %v4924_v52  ;;  %5093 = vst.msk [vmem:[#allocation3 + $0xa0] sm:$0xff] %vm1593_vm7, %v4922_v1 }
 0x6ba   :  { %5179 = vrot.lane.b32.xlu1 %v15289_v59, %s7839_s27  ;;  %5177 = vrot.lane.b32.xlu0 %v15290_v40, %s7839_s27 }
 0x6bc   :  { %v4928_v15 = vpop.permute.xlu1 %4927  ;;  %v4926_v16 = vpop.permute.xlu0 %4925 }
 0x6bd   :  { %5096 = vst.msk [vmem:[#allocation3 + $0xb8] sm:$0xff] %vm1593_vm7, %v4928_v15  ;;  %5095 = vst.msk [vmem:[#allocation3 + $0xb0] sm:$0xff] %vm1593_vm7, %v4926_v16 }
 0x6be   :  { %5183 = vrot.lane.b32.xlu1 %v15291_v22, %s7839_s27  ;;  %5181 = vrot.lane.b32.xlu0 %v15292_v11, %s7839_s27 }
 0x6c0   :  { %v4932_v52 = vpop.permute.xlu1 %4931  ;;  %v4930_v1 = vpop.permute.xlu0 %4929 }
 0x6c1   :  { %5098 = vst.msk [vmem:[#allocation3 + $0xc8] sm:$0xff] %vm1593_vm7, %v4932_v52  ;;  %5097 = vst.msk [vmem:[#allocation3 + $0xc0] sm:$0xff] %vm1593_vm7, %v4930_v1 }
 0x6c2   :  { %5187 = vrot.lane.b32.xlu1 %v15293_v18, %s7839_s27  ;;  %5185 = vrot.lane.b32.xlu0 %v15294_v36, %s7839_s27  ;;  %v15360_v36 = vld [vmem:[#allocation53_spill] sm:$0xff]  ;;  %v5406_v18 = vrot.slane %v12231_v17, 2 }
 0x6c4   :  { %v4936_v15 = vpop.permute.xlu1 %4935  ;;  %v4934_v16 = vpop.permute.xlu0 %4933 }
 0x6c5   :  { %5100 = vst.msk [vmem:[#allocation3 + $0xd8] sm:$0xff] %vm1593_vm7, %v4936_v15  ;;  %5099 = vst.msk [vmem:[#allocation3 + $0xd0] sm:$0xff] %vm1593_vm7, %v4934_v16 }
 0x6c6   :  { %5191 = vrot.lane.b32.xlu1 %v15295_v56, %s7839_s27  ;;  %5189 = vrot.lane.b32.xlu0 %v15296_v27, %s7839_s27  ;;  %v15356_v27 = vld [vmem:[#allocation50_spill] sm:$0xff]  ;;  %v15357_v56 = vld [vmem:[#allocation133_spill] sm:$0xff] }
 0x6c8   :  { %v4940_v52 = vpop.permute.xlu1 %4939  ;;  %v4938_v1 = vpop.permute.xlu0 %4937 }
 0x6c9   :  { %5102 = vst.msk [vmem:[#allocation3 + $0xe8] sm:$0xff] %vm1593_vm7, %v4940_v52  ;;  %5101 = vst.msk [vmem:[#allocation3 + $0xe0] sm:$0xff] %vm1593_vm7, %v4938_v1 }
 0x6ca   :  { %5195 = vrot.lane.b32.xlu1 %v15297_v23, %s7839_s27  ;;  %5193 = vrot.lane.b32.xlu0 %v15298_v19, %s7839_s27  ;;  %v15352_v19 = vld [vmem:[#allocation129_spill] sm:$0xff]  ;;  %v15353_v23 = vld [vmem:[#allocation130_spill] sm:$0xff] }
 0x6cc   :  { %v4944_v15 = vpop.permute.xlu1 %4943  ;;  %v4942_v16 = vpop.permute.xlu0 %4941 }
 0x6cd   :  { %5104 = vst.msk [vmem:[#allocation3 + $0xf8] sm:$0xff] %vm1593_vm7, %v4944_v15  ;;  %5103 = vst.msk [vmem:[#allocation3 + $0xf0] sm:$0xff] %vm1593_vm7, %v4942_v16 }
 0x6ce   :  { %5199 = vrot.lane.b32.xlu1 %v15299_v33, %s7839_s27  ;;  %5197 = vrot.lane.b32.xlu0 %v15300_v26, %s7839_s27  ;;  %v15349_v33 = vld [vmem:[#allocation43_spill] sm:$0xff] }
 0x6d0   :  { %v4948_v52 = vpop.permute.xlu1 %4947  ;;  %v4946_v1 = vpop.permute.xlu0 %4945 }
 0x6d1   :  { %5106 = vst.msk [vmem:[#allocation3 + $0x108] sm:$0xff] %vm1593_vm7, %v4948_v52  ;;  %5105 = vst.msk [vmem:[#allocation3 + $0x100] sm:$0xff] %vm1593_vm7, %v4946_v1  ;;  %v15303_v52 = vld [vmem:[#allocation21_spill] sm:$0xff] }
 0x6d2   :  { %5203 = vrot.lane.b32.xlu1 %v15301_v43, %s7839_s27  ;;  %5201 = vrot.lane.b32.xlu0 %v15302_v63, %s7839_s27  ;;  %v15304_v1 = vld [vmem:[#allocation29_spill] sm:$0xff]  ;;  %v5142_v63 = vrot.slane %v12423_v12, 1 }
 0x6d4   :  { %v4952_v15 = vpop.permute.xlu1 %4951  ;;  %v4950_v16 = vpop.permute.xlu0 %4949  ;;  %v12437_v26 = vsel %vm561_vm2, %v5140_v62, %v5142_v63  ;;  %v15308_v63 = vld [vmem:[#allocation32_spill] sm:$0xff] }
 0x6d5   :  { %5108 = vst.msk [vmem:[#allocation3 + $0x118] sm:$0xff] %vm1593_vm7, %v4952_v15  ;;  %5107 = vst.msk [vmem:[#allocation3 + $0x110] sm:$0xff] %vm1593_vm7, %v4950_v16  ;;  %v12440_v15 = vsel %vm561_vm2, %v5139_v41, %v5140_v62 }
 0x6d6   :  { %5207 = vrot.lane.b32.xlu1 %v15303_v52, %s7839_s27  ;;  %5205 = vrot.lane.b32.xlu0 %v15304_v1, %s7839_s27  ;;  %15305 = vst [vmem:[#allocation12_spill] sm:$0xff] %v12437_v26  ;;  %15306 = vst [vmem:[#allocation22_spill] sm:$0xff] %v12440_v15  ;;  %v5144_v52 = vrot.slane %v12333_v7, 1 }
 0x6d8   :  { %v4956_v43 = vpop.permute.xlu1 %4955  ;;  %v4954_v31 = vpop.permute.xlu0 %4953 }
 0x6d9   :  { %5110 = vst.msk [vmem:[#allocation3 + $0x128] sm:$0xff] %vm1593_vm7, %v4956_v43  ;;  %5109 = vst.msk [vmem:[#allocation3 + $0x120] sm:$0xff] %vm1593_vm7, %v4954_v31  ;;  %v15307_v31 = vld [vmem:[#allocation31_spill] sm:$0xff]  ;;  %v15309_v43 = vld [vmem:[#allocation36_spill] sm:$0xff] }
 0x6da   :  { %5211 = vrot.lane.b32.xlu1 %v12437_v26, %s7839_s27  ;;  %5209 = vrot.lane.b32.xlu0 %v12440_v15, %s7839_s27  ;;  %v15310_v15 = vld [vmem:[#allocation37_spill] sm:$0xff] }
 0x6dc   :  { %v4960_v16 = vpop.permute.xlu1 %4959  ;;  %v4958_v1 = vpop.permute.xlu0 %4957 }
 0x6dd   :  { %5112 = vst.msk [vmem:[#allocation3 + $0x138] sm:$0xff] %vm1593_vm7, %v4960_v16  ;;  %5111 = vst.msk [vmem:[#allocation3 + $0x130] sm:$0xff] %vm1593_vm7, %v4958_v1 }
 0x6de   :  { %5215 = vrot.lane.b32.xlu1 %v15307_v31, %s7839_s27  ;;  %5213 = vrot.lane.b32.xlu0 %v15308_v63, %s7839_s27  ;;  %v15311_v31 = vld [vmem:[#allocation46_spill] sm:$0xff]  ;;  %v15312_v63 = vld [vmem:[#allocation49_spill] sm:$0xff] }
 0x6e0   :  { %v4964_v62 = vpop.permute.xlu1 %4963  ;;  %v4962_v41 = vpop.permute.xlu0 %4961 }
 0x6e1   :  { %5114 = vst.msk [vmem:[#allocation3 + $0x148] sm:$0xff] %vm1593_vm7, %v4964_v62  ;;  %5113 = vst.msk [vmem:[#allocation3 + $0x140] sm:$0xff] %vm1593_vm7, %v4962_v41 }
 0x6e2   :  { %5219 = vrot.lane.b32.xlu1 %v15309_v43, %s7839_s27  ;;  %5217 = vrot.lane.b32.xlu0 %v15310_v15, %s7839_s27  ;;  %v15313_v15 = vld [vmem:[#allocation59_spill] sm:$0xff]  ;;  %v15314_v43 = vld [vmem:[#allocation60_spill] sm:$0xff] }
 0x6e4   :  { %v4968_v16 = vpop.permute.xlu1 %4967  ;;  %v4966_v1 = vpop.permute.xlu0 %4965 }
 0x6e5   :  { %5116 = vst.msk [vmem:[#allocation3 + $0x158] sm:$0xff] %vm1593_vm7, %v4968_v16  ;;  %5115 = vst.msk [vmem:[#allocation3 + $0x150] sm:$0xff] %vm1593_vm7, %v4966_v1 }
 0x6e6   :  { %5223 = vrot.lane.b32.xlu1 %v15311_v31, %s7839_s27  ;;  %5221 = vrot.lane.b32.xlu0 %v15312_v63, %s7839_s27  ;;  %v15315_v63 = vld [vmem:[#allocation64_spill] sm:$0xff]  ;;  %v15316_v31 = vld [vmem:[#allocation69_spill] sm:$0xff] }
 0x6e8   :  { %v4972_v62 = vpop.permute.xlu1 %4971  ;;  %v4970_v41 = vpop.permute.xlu0 %4969 }
 0x6e9   :  { %5118 = vst.msk [vmem:[#allocation3 + $0x168] sm:$0xff] %vm1593_vm7, %v4972_v62  ;;  %5117 = vst.msk [vmem:[#allocation3 + $0x160] sm:$0xff] %vm1593_vm7, %v4970_v41 }
 0x6ea   :  { %5227 = vrot.lane.b32.xlu1 %v15313_v15, %s7839_s27  ;;  %5225 = vrot.lane.b32.xlu0 %v15314_v43, %s7839_s27  ;;  %v15317_v43 = vld [vmem:[#allocation78_spill] sm:$0xff] }
 0x6eb   :  { %v15318_v15 = vld [vmem:[#allocation6_spill] sm:$0xff] }
 0x6ec   :  { %v4976_v16 = vpop.permute.xlu1 %4975  ;;  %v4974_v1 = vpop.permute.xlu0 %4973 }
 0x6ed   :  { %5120 = vst.msk [vmem:[#allocation3 + $0x178] sm:$0xff] %vm1593_vm7, %v4976_v16  ;;  %5119 = vst.msk [vmem:[#allocation3 + $0x170] sm:$0xff] %vm1593_vm7, %v4974_v1 }
 0x6ee   :  { %5231 = vrot.lane.b32.xlu1 %v15315_v63, %s7839_s27  ;;  %5229 = vrot.lane.b32.xlu0 %v15316_v31, %s7839_s27  ;;  %v15319_v31 = vld [vmem:[#allocation84_spill] sm:$0xff]  ;;  %v15320_v63 = vld [vmem:[#allocation85_spill] sm:$0xff] }
 0x6f0   :  { %v4980_v62 = vpop.permute.xlu1 %4979  ;;  %v4978_v41 = vpop.permute.xlu0 %4977 }
 0x6f1   :  { %5122 = vst.msk [vmem:[#allocation3 + $0x188] sm:$0xff] %vm1593_vm7, %v4980_v62  ;;  %5121 = vst.msk [vmem:[#allocation3 + $0x180] sm:$0xff] %vm1593_vm7, %v4978_v41 }
 0x6f2   :  { %5235 = vrot.lane.b32.xlu1 %v15317_v43, %s7839_s27  ;;  %5233 = vrot.lane.b32.xlu0 %v15318_v15, %s7839_s27  ;;  %v15321_v15 = vld [vmem:[#allocation89_spill] sm:$0xff]  ;;  %v15322_v43 = vld [vmem:[#allocation90_spill] sm:$0xff] }
 0x6f4   :  { %v4984_v16 = vpop.permute.xlu1 %4983  ;;  %v4982_v1 = vpop.permute.xlu0 %4981 }
 0x6f5   :  { %5124 = vst.msk [vmem:[#allocation3 + $0x198] sm:$0xff] %vm1593_vm7, %v4984_v16  ;;  %5123 = vst.msk [vmem:[#allocation3 + $0x190] sm:$0xff] %vm1593_vm7, %v4982_v1 }
 0x6f6   :  { %5239 = vrot.lane.b32.xlu1 %v15319_v31, %s7839_s27  ;;  %5237 = vrot.lane.b32.xlu0 %v15320_v63, %s7839_s27  ;;  %v15323_v63 = vld [vmem:[#allocation94_spill] sm:$0xff]  ;;  %v15324_v31 = vld [vmem:[#allocation95_spill] sm:$0xff] }
 0x6f8   :  { %v4988_v62 = vpop.permute.xlu1 %4987  ;;  %v4986_v41 = vpop.permute.xlu0 %4985 }
 0x6f9   :  { %5126 = vst.msk [vmem:[#allocation3 + $0x1a8] sm:$0xff] %vm1593_vm7, %v4988_v62  ;;  %5125 = vst.msk [vmem:[#allocation3 + $0x1a0] sm:$0xff] %vm1593_vm7, %v4986_v41 }
 0x6fa   :  { %5243 = vrot.lane.b32.xlu1 %v15321_v15, %s7839_s27  ;;  %5241 = vrot.lane.b32.xlu0 %v15322_v43, %s7839_s27  ;;  %v15325_v43 = vld [vmem:[#allocation99_spill] sm:$0xff]  ;;  %v15326_v15 = vld [vmem:[#allocation100_spill] sm:$0xff] }
 0x6fc   :  { %v4992_v16 = vpop.permute.xlu1 %4991  ;;  %v4990_v1 = vpop.permute.xlu0 %4989 }
 0x6fd   :  { %5128 = vst.msk [vmem:[#allocation3 + $0x1b8] sm:$0xff] %vm1593_vm7, %v4992_v16  ;;  %5127 = vst.msk [vmem:[#allocation3 + $0x1b0] sm:$0xff] %vm1593_vm7, %v4990_v1 }
 0x6fe   :  { %5247 = vrot.lane.b32.xlu1 %v15323_v63, %s7839_s27  ;;  %5245 = vrot.lane.b32.xlu0 %v15324_v31, %s7839_s27  ;;  %v15327_v31 = vld [vmem:[#allocation104_spill] sm:$0xff]  ;;  %v15328_v63 = vld [vmem:[#allocation105_spill] sm:$0xff] }
 0x700   :  { %v4996_v62 = vpop.permute.xlu1 %4995  ;;  %v4994_v41 = vpop.permute.xlu0 %4993 }
 0x701   :  { %5130 = vst.msk [vmem:[#allocation3 + $0x1c8] sm:$0xff] %vm1593_vm7, %v4996_v62  ;;  %5129 = vst.msk [vmem:[#allocation3 + $0x1c0] sm:$0xff] %vm1593_vm7, %v4994_v41 }
 0x702   :  { %5251 = vrot.lane.b32.xlu1 %v15325_v43, %s7839_s27  ;;  %5249 = vrot.lane.b32.xlu0 %v15326_v15, %s7839_s27  ;;  %v15329_v15 = vld [vmem:[#allocation9_spill] sm:$0xff]  ;;  %v15330_v43 = vld [vmem:[#allocation112_spill] sm:$0xff] }
 0x704   :  { %v5000_v16 = vpop.permute.xlu1 %4999  ;;  %v4998_v1 = vpop.permute.xlu0 %4997 }
 0x705   :  { %5132 = vst.msk [vmem:[#allocation3 + $0x1d8] sm:$0xff] %vm1593_vm7, %v5000_v16  ;;  %5131 = vst.msk [vmem:[#allocation3 + $0x1d0] sm:$0xff] %vm1593_vm7, %v4998_v1 }
 0x706   :  { %5255 = vrot.lane.b32.xlu1 %v15327_v31, %s7839_s27  ;;  %5253 = vrot.lane.b32.xlu0 %v15328_v63, %s7839_s27  ;;  %v15331_v63 = vld [vmem:[#allocation18_spill] sm:$0xff]  ;;  %v15332_v31 = vld [vmem:[#allocation115_spill] sm:$0xff] }
 0x708   :  { %v5004_v62 = vpop.permute.xlu1 %5003  ;;  %v5002_v41 = vpop.permute.xlu0 %5001 }
 0x709   :  { %5134 = vst.msk [vmem:[#allocation3 + $0x1e8] sm:$0xff] %vm1593_vm7, %v5004_v62  ;;  %5133 = vst.msk [vmem:[#allocation3 + $0x1e0] sm:$0xff] %vm1593_vm7, %v5002_v41 }
 0x70a   :  { %5259 = vrot.lane.b32.xlu1 %v15329_v15, %s7839_s27  ;;  %5257 = vrot.lane.b32.xlu0 %v15330_v43, %s7839_s27  ;;  %v15333_v43 = vld [vmem:[#allocation117_spill] sm:$0xff]  ;;  %v15334_v15 = vld [vmem:[#allocation35_spill] sm:$0xff] }
 0x70c   :  { %v5008_v16 = vpop.permute.xlu1 %5007  ;;  %v5006_v1 = vpop.permute.xlu0 %5005 }
 0x70d   :  { %5136 = vst.msk [vmem:[#allocation3 + $0x1f8] sm:$0xff] %vm1593_vm7, %v5008_v16  ;;  %5135 = vst.msk [vmem:[#allocation3 + $0x1f0] sm:$0xff] %vm1593_vm7, %v5006_v1  ;;  %v3881_v16 = vld [vmem:[#allocation2 + $0x340] sm:$0x3] }
 0x70e   :  { %5263 = vrot.lane.b32.xlu1 %v15331_v63, %s7839_s27  ;;  %5261 = vrot.lane.b32.xlu0 %v15332_v31, %s7839_s27  ;;  %v5145_v63 = vrot.slane %v12331_v38, 1 }
 0x710   :  { %v5152_v62 = vpop.permute.xlu1 %5151  ;;  %v5150_v41 = vpop.permute.xlu0 %5149  ;;  %v12544_v7 = vsel %vm561_vm2, %v5144_v52, %v5145_v63 }
 0x711   :  { %5342 = vst.msk [vmem:[#allocation3 + $0x8] sm:$0xff] %vm1862_vm8, %v5152_v62  ;;  %5341 = vst.msk [vmem:[#allocation3] sm:$0xff] %vm1862_vm8, %v5150_v41  ;;  %v5147_v62 = vrot.slane %v3881_v16, 1  ;;  %v15335_v41 = vld [vmem:[#allocation47_spill] sm:$0xff] }
 0x712   :  { %5267 = vrot.lane.b32.xlu1 %v15333_v43, %s7839_s27  ;;  %5265 = vrot.lane.b32.xlu0 %v15334_v15, %s7839_s27  ;;  %v15336_v43 = vld [vmem:[#allocation120_spill] sm:$0xff]  ;;  %15338 = vst [vmem:[#allocation25_spill] sm:$0xff] %v12544_v7 }
 0x713   :  { %v12541_v38 = vsel %vm561_vm2, %v5145_v63, %v5147_v62  ;;  %v15342_v62 = vld [vmem:[#allocation27_spill] sm:$0xff] }
 0x714   :  { %v5156_v1 = vpop.permute.xlu1 %5155  ;;  %v5154_v26 = vpop.permute.xlu0 %5153  ;;  %15337 = vst [vmem:[#allocation24_spill] sm:$0xff] %v12541_v38 }
 0x715   :  { %5344 = vst.msk [vmem:[#allocation3 + $0x18] sm:$0xff] %vm1862_vm8, %v5156_v1  ;;  %5343 = vst.msk [vmem:[#allocation3 + $0x10] sm:$0xff] %vm1862_vm8, %v5154_v26  ;;  %v15341_v1 = vld [vmem:[#allocation58_spill] sm:$0xff] }
 0x716   :  { %5271 = vrot.lane.b32.xlu1 %v15335_v41, %s7839_s27  ;;  %5269 = vrot.lane.b32.xlu0 %v15336_v43, %s7839_s27  ;;  %v15347_v43 = vld [vmem:[#allocation125_spill] sm:$0xff]  ;;  %v15348_v41 = vld [vmem:[#allocation10_spill] sm:$0xff] }
 0x718   :  { %v5160_v31 = vpop.permute.xlu1 %5159  ;;  %v5158_v15 = vpop.permute.xlu0 %5157 }
 0x719   :  { %5346 = vst.msk [vmem:[#allocation3 + $0x28] sm:$0xff] %vm1862_vm8, %v5160_v31  ;;  %5345 = vst.msk [vmem:[#allocation3 + $0x20] sm:$0xff] %vm1862_vm8, %v5158_v15  ;;  %v15339_v15 = vld [vmem:[#allocation48_spill] sm:$0xff]  ;;  %v15340_v31 = vld [vmem:[#allocation121_spill] sm:$0xff] }
 0x71a   :  { %5275 = vrot.lane.b32.xlu1 %v12541_v38, %s7839_s27  ;;  %5273 = vrot.lane.b32.xlu0 %v12544_v7, %s7839_s27  ;;  %v15345_v7 = vld [vmem:[#allocation123_spill] sm:$0xff]  ;;  %v15346_v38 = vld [vmem:[#allocation124_spill] sm:$0xff] }
 0x71c   :  { %v5164_v26 = vpop.permute.xlu1 %5163  ;;  %v5162_v16 = vpop.permute.xlu0 %5161 }
 0x71d   :  { %5348 = vst.msk [vmem:[#allocation3 + $0x38] sm:$0xff] %vm1862_vm8, %v5164_v26  ;;  %5347 = vst.msk [vmem:[#allocation3 + $0x30] sm:$0xff] %vm1862_vm8, %v5162_v16 }
 0x71e   :  { %5417 = vrot.lane.b32.xlu1 %v15339_v15, %s7840_s28  ;;  %5415 = vrot.lane.b32.xlu0 %v15340_v31, %s7840_s28  ;;  %v15343_v15 = vld [vmem:[#allocation28_spill] sm:$0xff]  ;;  %v15344_v31 = vld [vmem:[#allocation122_spill] sm:$0xff] }
 0x720   :  { %v5168_v52 = vpop.permute.xlu1 %5167  ;;  %v5166_v63 = vpop.permute.xlu0 %5165 }
 0x721   :  { %5350 = vst.msk [vmem:[#allocation3 + $0x48] sm:$0xff] %vm1862_vm8, %v5168_v52  ;;  %5349 = vst.msk [vmem:[#allocation3 + $0x40] sm:$0xff] %vm1862_vm8, %v5166_v63 }
 0x722   :  { %5421 = vrot.lane.b32.xlu1 %v15341_v1, %s7840_s28  ;;  %5419 = vrot.lane.b32.xlu0 %v15342_v62, %s7840_s28 }
 0x724   :  { %v5172_v26 = vpop.permute.xlu1 %5171  ;;  %v5170_v16 = vpop.permute.xlu0 %5169 }
 0x725   :  { %5352 = vst.msk [vmem:[#allocation3 + $0x58] sm:$0xff] %vm1862_vm8, %v5172_v26  ;;  %5351 = vst.msk [vmem:[#allocation3 + $0x50] sm:$0xff] %vm1862_vm8, %v5170_v16 }
 0x726   :  { %5425 = vrot.lane.b32.xlu1 %v15343_v15, %s7840_s28  ;;  %5423 = vrot.lane.b32.xlu0 %v15344_v31, %s7840_s28 }
 0x728   :  { %v5176_v52 = vpop.permute.xlu1 %5175  ;;  %v5174_v63 = vpop.permute.xlu0 %5173 }
 0x729   :  { %5354 = vst.msk [vmem:[#allocation3 + $0x68] sm:$0xff] %vm1862_vm8, %v5176_v52  ;;  %5353 = vst.msk [vmem:[#allocation3 + $0x60] sm:$0xff] %vm1862_vm8, %v5174_v63 }
 0x72a   :  { %5429 = vrot.lane.b32.xlu1 %v15345_v7, %s7840_s28  ;;  %5427 = vrot.lane.b32.xlu0 %v15346_v38, %s7840_s28 }
 0x72c   :  { %v5180_v26 = vpop.permute.xlu1 %5179  ;;  %v5178_v16 = vpop.permute.xlu0 %5177 }
 0x72d   :  { %5356 = vst.msk [vmem:[#allocation3 + $0x78] sm:$0xff] %vm1862_vm8, %v5180_v26  ;;  %5355 = vst.msk [vmem:[#allocation3 + $0x70] sm:$0xff] %vm1862_vm8, %v5178_v16 }
 0x72e   :  { %5433 = vrot.lane.b32.xlu1 %v15347_v43, %s7840_s28  ;;  %5431 = vrot.lane.b32.xlu0 %v15348_v41, %s7840_s28 }
 0x730   :  { %v5184_v52 = vpop.permute.xlu1 %5183  ;;  %v5182_v63 = vpop.permute.xlu0 %5181 }
 0x731   :  { %5358 = vst.msk [vmem:[#allocation3 + $0x88] sm:$0xff] %vm1862_vm8, %v5184_v52  ;;  %5357 = vst.msk [vmem:[#allocation3 + $0x80] sm:$0xff] %vm1862_vm8, %v5182_v63 }
 0x732   :  { %5437 = vrot.lane.b32.xlu1 %v15349_v33, %s7840_s28  ;;  %5435 = vrot.lane.b32.xlu0 %v15350_v3, %s7840_s28 }
 0x734   :  { %v5188_v26 = vpop.permute.xlu1 %5187  ;;  %v5186_v16 = vpop.permute.xlu0 %5185 }
 0x735   :  { %5360 = vst.msk [vmem:[#allocation3 + $0x98] sm:$0xff] %vm1862_vm8, %v5188_v26  ;;  %5359 = vst.msk [vmem:[#allocation3 + $0x90] sm:$0xff] %vm1862_vm8, %v5186_v16 }
 0x736   :  { %5441 = vrot.lane.b32.xlu1 %v15351_v10, %s7840_s28  ;;  %5439 = vrot.lane.b32.xlu0 %v15352_v19, %s7840_s28 }
 0x738   :  { %v5192_v52 = vpop.permute.xlu1 %5191  ;;  %v5190_v63 = vpop.permute.xlu0 %5189 }
 0x739   :  { %5362 = vst.msk [vmem:[#allocation3 + $0xa8] sm:$0xff] %vm1862_vm8, %v5192_v52  ;;  %5361 = vst.msk [vmem:[#allocation3 + $0xa0] sm:$0xff] %vm1862_vm8, %v5190_v63 }
 0x73a   :  { %5445 = vrot.lane.b32.xlu1 %v15353_v23, %s7840_s28  ;;  %5443 = vrot.lane.b32.xlu0 %v15354_v9, %s7840_s28 }
 0x73c   :  { %v5196_v26 = vpop.permute.xlu1 %5195  ;;  %v5194_v16 = vpop.permute.xlu0 %5193 }
 0x73d   :  { %5364 = vst.msk [vmem:[#allocation3 + $0xb8] sm:$0xff] %vm1862_vm8, %v5196_v26  ;;  %5363 = vst.msk [vmem:[#allocation3 + $0xb0] sm:$0xff] %vm1862_vm8, %v5194_v16 }
 0x73e   :  { %5449 = vrot.lane.b32.xlu1 %v15355_v47, %s7840_s28  ;;  %5447 = vrot.lane.b32.xlu0 %v15356_v27, %s7840_s28 }
 0x740   :  { %v5200_v52 = vpop.permute.xlu1 %5199  ;;  %v5198_v63 = vpop.permute.xlu0 %5197 }
 0x741   :  { %5366 = vst.msk [vmem:[#allocation3 + $0xc8] sm:$0xff] %vm1862_vm8, %v5200_v52  ;;  %5365 = vst.msk [vmem:[#allocation3 + $0xc0] sm:$0xff] %vm1862_vm8, %v5198_v63 }
 0x742   :  { %5453 = vrot.lane.b32.xlu1 %v15357_v56, %s7840_s28  ;;  %5451 = vrot.lane.b32.xlu0 %v15358_v32, %s7840_s28  ;;  %v15361_v32 = vld [vmem:[#allocation135_spill] sm:$0xff]  ;;  %v15362_v56 = vld [vmem:[#allocation54_spill] sm:$0xff] }
 0x744   :  { %v5204_v26 = vpop.permute.xlu1 %5203  ;;  %v5202_v16 = vpop.permute.xlu0 %5201 }
 0x745   :  { %5368 = vst.msk [vmem:[#allocation3 + $0xd8] sm:$0xff] %vm1862_vm8, %v5204_v26  ;;  %5367 = vst.msk [vmem:[#allocation3 + $0xd0] sm:$0xff] %vm1862_vm8, %v5202_v16 }
 0x746   :  { %5457 = vrot.lane.b32.xlu1 %v15359_v28, %s7840_s28  ;;  %5455 = vrot.lane.b32.xlu0 %v15360_v36, %s7840_s28  ;;  %v15363_v36 = vld [vmem:[#allocation136_spill] sm:$0xff] }
 0x747   :  { %v15364_v28 = vld [vmem:[#allocation56_spill] sm:$0xff] }
 0x748   :  { %v5208_v52 = vpop.permute.xlu1 %5207  ;;  %v5206_v63 = vpop.permute.xlu0 %5205 }
 0x749   :  { %5370 = vst.msk [vmem:[#allocation3 + $0xe8] sm:$0xff] %vm1862_vm8, %v5208_v52  ;;  %5369 = vst.msk [vmem:[#allocation3 + $0xe0] sm:$0xff] %vm1862_vm8, %v5206_v63 }
 0x74a   :  { %5461 = vrot.lane.b32.xlu1 %v15361_v32, %s7840_s28  ;;  %5459 = vrot.lane.b32.xlu0 %v15362_v56, %s7840_s28  ;;  %v15365_v56 = vld [vmem:[#allocation137_spill] sm:$0xff] }
 0x74b   :  { %v15366_v32 = vld [vmem:[#allocation65_spill] sm:$0xff] }
 0x74c   :  { %v5212_v26 = vpop.permute.xlu1 %5211  ;;  %v5210_v16 = vpop.permute.xlu0 %5209 }
 0x74d   :  { %5372 = vst.msk [vmem:[#allocation3 + $0xf8] sm:$0xff] %vm1862_vm8, %v5212_v26  ;;  %5371 = vst.msk [vmem:[#allocation3 + $0xf0] sm:$0xff] %vm1862_vm8, %v5210_v16 }
 0x74e   :  { %5465 = vrot.lane.b32.xlu1 %v15363_v36, %s7840_s28  ;;  %5463 = vrot.lane.b32.xlu0 %v15364_v28, %s7840_s28  ;;  %v5405_v36 = vrot.slane %v12233_v61, 2 }
 0x750   :  { %v5216_v52 = vpop.permute.xlu1 %5215  ;;  %v5214_v63 = vpop.permute.xlu0 %5213  ;;  %v12649_v61 = vsel %vm979_vm4, %v5405_v36, %v5406_v18  ;;  %v15371_v36 = vld [vmem:[#allocation145_spill] sm:$0xff] }
 0x751   :  { %5374 = vst.msk [vmem:[#allocation3 + $0x108] sm:$0xff] %vm1862_vm8, %v5216_v52  ;;  %5373 = vst.msk [vmem:[#allocation3 + $0x100] sm:$0xff] %vm1862_vm8, %v5214_v63  ;;  %v15367_v52 = vld [vmem:[#allocation141_spill] sm:$0xff]  ;;  %v15368_v63 = vld [vmem:[#allocation142_spill] sm:$0xff] }
 0x752   :  { %5469 = vrot.lane.b32.xlu1 %v15365_v56, %s7840_s28  ;;  %5467 = vrot.lane.b32.xlu0 %v15366_v32, %s7840_s28  ;;  %v5408_v56 = vrot.slane %v12423_v12, 2 }
 0x754   :  { %v5220_v26 = vpop.permute.xlu1 %5219  ;;  %v5218_v16 = vpop.permute.xlu0 %5217  ;;  %v12646_v17 = vsel %vm979_vm4, %v5406_v18, %v5408_v56 }
 0x755   :  { %5376 = vst.msk [vmem:[#allocation3 + $0x118] sm:$0xff] %vm1862_vm8, %v5220_v26  ;;  %5375 = vst.msk [vmem:[#allocation3 + $0x110] sm:$0xff] %vm1862_vm8, %v5218_v16  ;;  %v15372_v16 = vld [vmem:[#allocation146_spill] sm:$0xff] }
 0x756   :  { %5473 = vrot.lane.b32.xlu1 %v15367_v52, %s7840_s28  ;;  %5471 = vrot.lane.b32.xlu0 %v15368_v63, %s7840_s28 }
 0x758   :  { %v5224_v28 = vpop.permute.xlu1 %5223  ;;  %v5222_v32 = vpop.permute.xlu0 %5221 }
 0x759   :  { %5378 = vst.msk [vmem:[#allocation3 + $0x128] sm:$0xff] %vm1862_vm8, %v5224_v28  ;;  %5377 = vst.msk [vmem:[#allocation3 + $0x120] sm:$0xff] %vm1862_vm8, %v5222_v32  ;;  %v15369_v28 = vld [vmem:[#allocation143_spill] sm:$0xff]  ;;  %v15370_v32 = vld [vmem:[#allocation144_spill] sm:$0xff] }
 0x75a   :  { %5477 = vrot.lane.b32.xlu1 %v12646_v17, %s7840_s28  ;;  %5475 = vrot.lane.b32.xlu0 %v12649_v61, %s7840_s28 }
 0x75c   :  { %v5228_v26 = vpop.permute.xlu1 %5227  ;;  %v5226_v12 = vpop.permute.xlu0 %5225 }
 0x75d   :  { %5380 = vst.msk [vmem:[#allocation3 + $0x138] sm:$0xff] %vm1862_vm8, %v5228_v26  ;;  %5379 = vst.msk [vmem:[#allocation3 + $0x130] sm:$0xff] %vm1862_vm8, %v5226_v12 }
 0x75e   :  { %5481 = vrot.lane.b32.xlu1 %v15369_v28, %s7840_s28  ;;  %5479 = vrot.lane.b32.xlu0 %v15370_v32, %s7840_s28  ;;  %v15373_v28 = vld [vmem:[#allocation147_spill] sm:$0xff]  ;;  %v15374_v32 = vld [vmem:[#allocation148_spill] sm:$0xff] }
 0x760   :  { %v5232_v18 = vpop.permute.xlu1 %5231  ;;  %v5230_v56 = vpop.permute.xlu0 %5229 }
 0x761   :  { %5382 = vst.msk [vmem:[#allocation3 + $0x148] sm:$0xff] %vm1862_vm8, %v5232_v18  ;;  %5381 = vst.msk [vmem:[#allocation3 + $0x140] sm:$0xff] %vm1862_vm8, %v5230_v56 }
 0x762   :  { %5485 = vrot.lane.b32.xlu1 %v15371_v36, %s7840_s28  ;;  %5483 = vrot.lane.b32.xlu0 %v15372_v16, %s7840_s28  ;;  %v15375_v16 = vld [vmem:[#allocation149_spill] sm:$0xff]  ;;  %v15376_v36 = vld [vmem:[#allocation150_spill] sm:$0xff] }
 0x764   :  { %v5236_v26 = vpop.permute.xlu1 %5235  ;;  %v5234_v12 = vpop.permute.xlu0 %5233 }
 0x765   :  { %5384 = vst.msk [vmem:[#allocation3 + $0x158] sm:$0xff] %vm1862_vm8, %v5236_v26  ;;  %5383 = vst.msk [vmem:[#allocation3 + $0x150] sm:$0xff] %vm1862_vm8, %v5234_v12 }
 0x766   :  { %5489 = vrot.lane.b32.xlu1 %v15373_v28, %s7840_s28  ;;  %5487 = vrot.lane.b32.xlu0 %v15374_v32, %s7840_s28  ;;  %v15377_v32 = vld [vmem:[#allocation57_spill] sm:$0xff]  ;;  %v15378_v28 = vld [vmem:[#allocation151_spill] sm:$0xff] }
 0x768   :  { %v5240_v18 = vpop.permute.xlu1 %5239  ;;  %v5238_v56 = vpop.permute.xlu0 %5237 }
 0x769   :  { %5386 = vst.msk [vmem:[#allocation3 + $0x168] sm:$0xff] %vm1862_vm8, %v5240_v18  ;;  %5385 = vst.msk [vmem:[#allocation3 + $0x160] sm:$0xff] %vm1862_vm8, %v5238_v56 }
 0x76a   :  { %5493 = vrot.lane.b32.xlu1 %v15375_v16, %s7840_s28  ;;  %5491 = vrot.lane.b32.xlu0 %v15376_v36, %s7840_s28  ;;  %v15379_v36 = vld [vmem:[#allocation63_spill] sm:$0xff]  ;;  %v15380_v16 = vld [vmem:[#allocation152_spill] sm:$0xff] }
 0x76c   :  { %v5244_v26 = vpop.permute.xlu1 %5243  ;;  %v5242_v12 = vpop.permute.xlu0 %5241 }
 0x76d   :  { %5388 = vst.msk [vmem:[#allocation3 + $0x178] sm:$0xff] %vm1862_vm8, %v5244_v26  ;;  %5387 = vst.msk [vmem:[#allocation3 + $0x170] sm:$0xff] %vm1862_vm8, %v5242_v12 }
 0x76e   :  { %5497 = vrot.lane.b32.xlu1 %v15377_v32, %s7840_s28  ;;  %5495 = vrot.lane.b32.xlu0 %v15378_v28, %s7840_s28  ;;  %v15381_v28 = vld [vmem:[#allocation77_spill] sm:$0xff] }
 0x76f   :  { %v15382_v32 = vld [vmem:[#allocation153_spill] sm:$0xff] }
 0x770   :  { %v5248_v18 = vpop.permute.xlu1 %5247  ;;  %v5246_v56 = vpop.permute.xlu0 %5245 }
 0x771   :  { %5390 = vst.msk [vmem:[#allocation3 + $0x188] sm:$0xff] %vm1862_vm8, %v5248_v18  ;;  %5389 = vst.msk [vmem:[#allocation3 + $0x180] sm:$0xff] %vm1862_vm8, %v5246_v56 }
 0x772   :  { %5501 = vrot.lane.b32.xlu1 %v15379_v36, %s7840_s28  ;;  %5499 = vrot.lane.b32.xlu0 %v15380_v16, %s7840_s28  ;;  %v15383_v16 = vld [vmem:[#allocation83_spill] sm:$0xff]  ;;  %v15384_v36 = vld [vmem:[#allocation154_spill] sm:$0xff] }
 0x774   :  { %v5252_v26 = vpop.permute.xlu1 %5251  ;;  %v5250_v12 = vpop.permute.xlu0 %5249 }
 0x775   :  { %5392 = vst.msk [vmem:[#allocation3 + $0x198] sm:$0xff] %vm1862_vm8, %v5252_v26  ;;  %5391 = vst.msk [vmem:[#allocation3 + $0x190] sm:$0xff] %vm1862_vm8, %v5250_v12 }
 0x776   :  { %5505 = vrot.lane.b32.xlu1 %v15381_v28, %s7840_s28  ;;  %5503 = vrot.lane.b32.xlu0 %v15382_v32, %s7840_s28  ;;  %v15385_v32 = vld [vmem:[#allocation88_spill] sm:$0xff]  ;;  %v15386_v28 = vld [vmem:[#allocation155_spill] sm:$0xff] }
 0x778   :  { %v5256_v18 = vpop.permute.xlu1 %5255  ;;  %v5254_v56 = vpop.permute.xlu0 %5253 }
 0x779   :  { %5394 = vst.msk [vmem:[#allocation3 + $0x1a8] sm:$0xff] %vm1862_vm8, %v5256_v18  ;;  %5393 = vst.msk [vmem:[#allocation3 + $0x1a0] sm:$0xff] %vm1862_vm8, %v5254_v56 }
 0x77a   :  { %5509 = vrot.lane.b32.xlu1 %v15383_v16, %s7840_s28  ;;  %5507 = vrot.lane.b32.xlu0 %v15384_v36, %s7840_s28  ;;  %v15387_v36 = vld [vmem:[#allocation93_spill] sm:$0xff]  ;;  %v15388_v16 = vld [vmem:[#allocation156_spill] sm:$0xff] }
 0x77c   :  { %v5260_v26 = vpop.permute.xlu1 %5259  ;;  %v5258_v12 = vpop.permute.xlu0 %5257 }
 0x77d   :  { %5396 = vst.msk [vmem:[#allocation3 + $0x1b8] sm:$0xff] %vm1862_vm8, %v5260_v26  ;;  %5395 = vst.msk [vmem:[#allocation3 + $0x1b0] sm:$0xff] %vm1862_vm8, %v5258_v12 }
 0x77e   :  { %5513 = vrot.lane.b32.xlu1 %v15385_v32, %s7840_s28  ;;  %5511 = vrot.lane.b32.xlu0 %v15386_v28, %s7840_s28  ;;  %v15389_v28 = vld [vmem:[#allocation98_spill] sm:$0xff]  ;;  %v15390_v32 = vld [vmem:[#allocation157_spill] sm:$0xff] }
 0x780   :  { %v5264_v18 = vpop.permute.xlu1 %5263  ;;  %v5262_v56 = vpop.permute.xlu0 %5261 }
 0x781   :  { %5398 = vst.msk [vmem:[#allocation3 + $0x1c8] sm:$0xff] %vm1862_vm8, %v5264_v18  ;;  %5397 = vst.msk [vmem:[#allocation3 + $0x1c0] sm:$0xff] %vm1862_vm8, %v5262_v56 }
 0x782   :  { %5517 = vrot.lane.b32.xlu1 %v15387_v36, %s7840_s28  ;;  %5515 = vrot.lane.b32.xlu0 %v15388_v16, %s7840_s28  ;;  %v15391_v16 = vld [vmem:[#allocation103_spill] sm:$0xff]  ;;  %v15392_v36 = vld [vmem:[#allocation158_spill] sm:$0xff] }
 0x784   :  { %v5268_v26 = vpop.permute.xlu1 %5267  ;;  %v5266_v12 = vpop.permute.xlu0 %5265 }
 0x785   :  { %5400 = vst.msk [vmem:[#allocation3 + $0x1d8] sm:$0xff] %vm1862_vm8, %v5268_v26  ;;  %5399 = vst.msk [vmem:[#allocation3 + $0x1d0] sm:$0xff] %vm1862_vm8, %v5266_v12 }
 0x786   :  { %5521 = vrot.lane.b32.xlu1 %v15389_v28, %s7840_s28  ;;  %5519 = vrot.lane.b32.xlu0 %v15390_v32, %s7840_s28  ;;  %v15393_v32 = vld [vmem:[#allocation108_spill] sm:$0xff]  ;;  %v15394_v28 = vld [vmem:[#allocation159_spill] sm:$0xff] }
 0x788   :  { %v5272_v18 = vpop.permute.xlu1 %5271  ;;  %v5270_v56 = vpop.permute.xlu0 %5269 }
 0x789   :  { %5402 = vst.msk [vmem:[#allocation3 + $0x1e8] sm:$0xff] %vm1862_vm8, %v5272_v18  ;;  %5401 = vst.msk [vmem:[#allocation3 + $0x1e0] sm:$0xff] %vm1862_vm8, %v5270_v56  ;;  %v6533_v18 = vld [vmem:[%s13981_s3 + $0x20] sm:$0xf] }
 0x78a   :  { %5525 = vrot.lane.b32.xlu1 %v15391_v16, %s7840_s28  ;;  %5523 = vrot.lane.b32.xlu0 %v15392_v36, %s7840_s28 }
 0x78b   :  { %7693 = vmatprep.subr.msk.mxu1 %vm3260_vm12, %v6533_v18 }
 0x78c   :  { %v5276_v26 = vpop.permute.xlu1 %5275  ;;  %v5274_v12 = vpop.permute.xlu0 %5273  ;;  %7694 = vmatpush3.msk.msra.mxu1 %vm3260_vm12, %v6533_v18 }
 0x78d   :  { %5404 = vst.msk [vmem:[#allocation3 + $0x1f8] sm:$0xff] %vm1862_vm8, %v5276_v26  ;;  %5403 = vst.msk [vmem:[#allocation3 + $0x1f0] sm:$0xff] %vm1862_vm8, %v5274_v12  ;;  %v6532_v26 = vld [vmem:[%s13981_s3 + $0x18] sm:$0xff]  ;;  %v6531_v12 = vld [vmem:[%s13981_s3 + $0x10] sm:$0xff] }
 0x78e   :  { %5529 = vrot.lane.b32.xlu1 %v15393_v32, %s7840_s28  ;;  %5527 = vrot.lane.b32.xlu0 %v15394_v28, %s7840_s28 }
 0x78f   :  { %7695 = vmatprep.subr.mxu1 %v6532_v26 }
 0x790   :  { %v5418_v56 = vpop.permute.xlu1 %5417  ;;  %v5416_v16 = vpop.permute.xlu0 %5415  ;;  %7696 = vmatpush3.msra.mxu1 %v6532_v26  ;;  %v6529_v26 = vld [vmem:[%s13981_s3] sm:$0xff] }
 0x791   :  { %5608 = vst.msk [vmem:[#allocation3 + $0x8] sm:$0xff] %vm2129_vm9, %v5418_v56  ;;  %5607 = vst.msk [vmem:[#allocation3] sm:$0xff] %vm2129_vm9, %v5416_v16  ;;  %7697 = vmatprep.subr.mxu1 %v6531_v12  ;;  %v6530_v16 = vld [vmem:[%s13981_s3 + $0x8] sm:$0xff] }
 0x792   :  { %5533 = vrot.lane.b32.xlu1 %v12115_v50, %s7840_s28  ;;  %5531 = vrot.lane.b32.xlu0 %v12118_v13, %s7840_s28 }
 0x793   :  { %7698 = vmatpush3.msra.mxu1 %v6531_v12 }
 0x794   :  { %v5422_v56 = vpop.permute.xlu1 %5421  ;;  %v5420_v28 = vpop.permute.xlu0 %5419  ;;  %7699 = vmatprep.subr.mxu1 %v6530_v16 }
 0x795   :  { %5610 = vst.msk [vmem:[#allocation3 + $0x18] sm:$0xff] %vm2129_vm9, %v5422_v56  ;;  %5609 = vst.msk [vmem:[#allocation3 + $0x10] sm:$0xff] %vm2129_vm9, %v5420_v28  ;;  %7700 = vmatpush3.msra.mxu1 %v6530_v16 }
 0x796   :  { %5677 = vrot.lane.b32.xlu1 %v10920_v60, %s7841_s29  ;;  %5675 = vrot.lane.b32.xlu0 %v10922_v49, %s7841_s29 }
 0x797   :  { %7701 = vmatprep.subr.mxu1 %v6529_v26 }
 0x798   :  { %v5426_v18 = vpop.permute.xlu1 %5425  ;;  %v5424_v13 = vpop.permute.xlu0 %5423  ;;  %7702 = vmatpush3.msra.mxu1 %v6529_v26  ;;  %v15399_v26 = vld [vmem:[#allocation13_spill] sm:$0xff] }
 0x799   :  { %5612 = vst.msk [vmem:[#allocation3 + $0x28] sm:$0xff] %vm2129_vm9, %v5426_v18  ;;  %5611 = vst.msk [vmem:[#allocation3 + $0x20] sm:$0xff] %vm2129_vm9, %v5424_v13 }
 0x79a   :  { %5945 = vrot.lane.b32.xlu1 %v15277_v54, %s7842_s30  ;;  %5943 = vrot.lane.b32.xlu0 %v15278_v30, %s7842_s30 }
 0x79c   :  { %v5430_v60 = vpop.permute.xlu1 %5429  ;;  %v5428_v49 = vpop.permute.xlu0 %5427 }
 0x79d   :  { %5614 = vst.msk [vmem:[#allocation3 + $0x38] sm:$0xff] %vm2129_vm9, %v5430_v60  ;;  %5613 = vst.msk [vmem:[#allocation3 + $0x30] sm:$0xff] %vm2129_vm9, %v5428_v49  ;;  %v15400_v60 = vld [vmem:[#allocation14_spill] sm:$0xff] }
 0x79e   :  { %6211 = vrot.lane.b32.xlu1 %v15341_v1, %s7843_s17  ;;  %6209 = vrot.lane.b32.xlu0 %v15342_v62, %s7843_s17 }
 0x7a0   :  { %v5434_v13 = vpop.permute.xlu1 %5433  ;;  %v5432_v28 = vpop.permute.xlu0 %5431 }
 0x7a1   :  { %5616 = vst.msk [vmem:[#allocation3 + $0x48] sm:$0xff] %vm2129_vm9, %v5434_v13  ;;  %5615 = vst.msk [vmem:[#allocation3 + $0x40] sm:$0xff] %vm2129_vm9, %v5432_v28  ;;  %v15401_v28 = vld [vmem:[#allocation15_spill] sm:$0xff] }
 0x7a2   :  { %5681 = vrot.lane.b32.xlu1 %v10944_v51, %s7841_s29  ;;  %5679 = vrot.lane.b32.xlu0 %v10946_v45, %s7841_s29 }
 0x7a4   :  { %v5438_v54 = vpop.permute.xlu1 %5437  ;;  %v5436_v30 = vpop.permute.xlu0 %5435 }
 0x7a5   :  { %5618 = vst.msk [vmem:[#allocation3 + $0x58] sm:$0xff] %vm2129_vm9, %v5438_v54  ;;  %5617 = vst.msk [vmem:[#allocation3 + $0x50] sm:$0xff] %vm2129_vm9, %v5436_v30  ;;  %v15402_v54 = vld [vmem:[#allocation16_spill] sm:$0xff] }
 0x7a6   :  { %5949 = vrot.lane.b32.xlu1 %v15279_v5, %s7842_s30  ;;  %5947 = vrot.lane.b32.xlu0 %v15280_v29, %s7842_s30 }
 0x7a8   :  { %v5442_v1 = vpop.permute.xlu1 %5441  ;;  %v5440_v62 = vpop.permute.xlu0 %5439 }
 0x7a9   :  { %5620 = vst.msk [vmem:[#allocation3 + $0x68] sm:$0xff] %vm2129_vm9, %v5442_v1  ;;  %5619 = vst.msk [vmem:[#allocation3 + $0x60] sm:$0xff] %vm2129_vm9, %v5440_v62  ;;  %v15403_v62 = vld [vmem:[#allocation134_spill] sm:$0xff] }
 0x7aa   :  { %6215 = vrot.lane.b32.xlu1 %v15343_v15, %s7843_s17  ;;  %6213 = vrot.lane.b32.xlu0 %v15344_v31, %s7843_s17 }
 0x7ac   :  { %v5446_v51 = vpop.permute.xlu1 %5445  ;;  %v5444_v45 = vpop.permute.xlu0 %5443 }
 0x7ad   :  { %5622 = vst.msk [vmem:[#allocation3 + $0x78] sm:$0xff] %vm2129_vm9, %v5446_v51  ;;  %5621 = vst.msk [vmem:[#allocation3 + $0x70] sm:$0xff] %vm2129_vm9, %v5444_v45  ;;  %v15404_v51 = vld [vmem:[#allocation53_spill] sm:$0xff] }
 0x7ae   :  { %5685 = vrot.lane.b32.xlu1 %v10968_v25, %s7841_s29  ;;  %5683 = vrot.lane.b32.xlu0 %v10970_v0, %s7841_s29 }
 0x7b0   :  { %v5450_v5 = vpop.permute.xlu1 %5449  ;;  %v5448_v29 = vpop.permute.xlu0 %5447 }
 0x7b1   :  { %5624 = vst.msk [vmem:[#allocation3 + $0x88] sm:$0xff] %vm2129_vm9, %v5450_v5  ;;  %5623 = vst.msk [vmem:[#allocation3 + $0x80] sm:$0xff] %vm2129_vm9, %v5448_v29  ;;  %v15405_v29 = vld [vmem:[#allocation19_spill] sm:$0xff] }
 0x7b2   :  { %5953 = vrot.lane.b32.xlu1 %v15281_v44, %s7842_s30  ;;  %5951 = vrot.lane.b32.xlu0 %v15282_v42, %s7842_s30 }
 0x7b4   :  { %v5454_v15 = vpop.permute.xlu1 %5453  ;;  %v5452_v31 = vpop.permute.xlu0 %5451 }
 0x7b5   :  { %5626 = vst.msk [vmem:[#allocation3 + $0x98] sm:$0xff] %vm2129_vm9, %v5454_v15  ;;  %5625 = vst.msk [vmem:[#allocation3 + $0x90] sm:$0xff] %vm2129_vm9, %v5452_v31  ;;  %v15406_v15 = vld [vmem:[#allocation20_spill] sm:$0xff] }
 0x7b6   :  { %6219 = vrot.lane.b32.xlu1 %v15345_v7, %s7843_s17  ;;  %6217 = vrot.lane.b32.xlu0 %v15346_v38, %s7843_s17 }
 0x7b8   :  { %v5458_v25 = vpop.permute.xlu1 %5457  ;;  %v5456_v0 = vpop.permute.xlu0 %5455 }
 0x7b9   :  { %5628 = vst.msk [vmem:[#allocation3 + $0xa8] sm:$0xff] %vm2129_vm9, %v5458_v25  ;;  %5627 = vst.msk [vmem:[#allocation3 + $0xa0] sm:$0xff] %vm2129_vm9, %v5456_v0  ;;  %v15407_v0 = vld [vmem:[#allocation23_spill] sm:$0xff] }
 0x7ba   :  { %5689 = vrot.lane.b32.xlu1 %v10992_v6, %s7841_s29  ;;  %5687 = vrot.lane.b32.xlu0 %v10994_v46, %s7841_s29 }
 0x7bc   :  { %v5462_v42 = vpop.permute.xlu1 %5461  ;;  %v5460_v44 = vpop.permute.xlu0 %5459 }
 0x7bd   :  { %5630 = vst.msk [vmem:[#allocation3 + $0xb8] sm:$0xff] %vm2129_vm9, %v5462_v42  ;;  %5629 = vst.msk [vmem:[#allocation3 + $0xb0] sm:$0xff] %vm2129_vm9, %v5460_v44  ;;  %v15408_v42 = vld [vmem:[#allocation40_spill] sm:$0xff] }
 0x7be   :  { %5957 = vrot.lane.b32.xlu1 %v15283_v39, %s7842_s30  ;;  %5955 = vrot.lane.b32.xlu0 %v15284_v20, %s7842_s30 }
 0x7c0   :  { %v5466_v38 = vpop.permute.xlu1 %5465  ;;  %v5464_v7 = vpop.permute.xlu0 %5463 }
 0x7c1   :  { %5632 = vst.msk [vmem:[#allocation3 + $0xc8] sm:$0xff] %vm2129_vm9, %v5466_v38  ;;  %5631 = vst.msk [vmem:[#allocation3 + $0xc0] sm:$0xff] %vm2129_vm9, %v5464_v7  ;;  %v15409_v7 = vld [vmem:[#allocation135_spill] sm:$0xff] }
 0x7c2   :  { %6223 = vrot.lane.b32.xlu1 %v15347_v43, %s7843_s17  ;;  %6221 = vrot.lane.b32.xlu0 %v15348_v41, %s7843_s17 }
 0x7c4   :  { %v5470_v6 = vpop.permute.xlu1 %5469  ;;  %v5468_v46 = vpop.permute.xlu0 %5467 }
 0x7c5   :  { %5634 = vst.msk [vmem:[#allocation3 + $0xd8] sm:$0xff] %vm2129_vm9, %v5470_v6  ;;  %5633 = vst.msk [vmem:[#allocation3 + $0xd0] sm:$0xff] %vm2129_vm9, %v5468_v46  ;;  %v15410_v6 = vld [vmem:[#allocation54_spill] sm:$0xff] }
 0x7c6   :  { %5693 = vrot.lane.b32.xlu1 %v11016_v57, %s7841_s29  ;;  %5691 = vrot.lane.b32.xlu0 %v11018_v4, %s7841_s29 }
 0x7c8   :  { %v5474_v20 = vpop.permute.xlu1 %5473  ;;  %v5472_v39 = vpop.permute.xlu0 %5471 }
 0x7c9   :  { %5636 = vst.msk [vmem:[#allocation3 + $0xe8] sm:$0xff] %vm2129_vm9, %v5474_v20  ;;  %5635 = vst.msk [vmem:[#allocation3 + $0xe0] sm:$0xff] %vm2129_vm9, %v5472_v39 }
 0x7ca   :  { %5961 = vrot.lane.b32.xlu1 %v15285_v34, %s7842_s30  ;;  %5959 = vrot.lane.b32.xlu0 %v15286_v37, %s7842_s30 }
 0x7cc   :  { %v5478_v43 = vpop.permute.xlu1 %5477  ;;  %v5476_v41 = vpop.permute.xlu0 %5475 }
 0x7cd   :  { %5638 = vst.msk [vmem:[#allocation3 + $0xf8] sm:$0xff] %vm2129_vm9, %v5478_v43  ;;  %5637 = vst.msk [vmem:[#allocation3 + $0xf0] sm:$0xff] %vm2129_vm9, %v5476_v41  ;;  %v15411_v41 = vld [vmem:[#allocation41_spill] sm:$0xff] }
 0x7ce   :  { %6227 = vrot.lane.b32.xlu1 %v15349_v33, %s7843_s17  ;;  %6225 = vrot.lane.b32.xlu0 %v15350_v3, %s7843_s17 }
 0x7d0   :  { %v5482_v57 = vpop.permute.xlu1 %5481  ;;  %v5480_v4 = vpop.permute.xlu0 %5479 }
 0x7d1   :  { %5640 = vst.msk [vmem:[#allocation3 + $0x108] sm:$0xff] %vm2129_vm9, %v5482_v57  ;;  %5639 = vst.msk [vmem:[#allocation3 + $0x100] sm:$0xff] %vm2129_vm9, %v5480_v4  ;;  %v15412_v57 = vld [vmem:[#allocation66_spill] sm:$0xff] }
 0x7d2   :  { %5697 = vrot.lane.b32.xlu1 %v11040_v21, %s7841_s29  ;;  %5695 = vrot.lane.b32.xlu0 %v11042_v8, %s7841_s29 }
 0x7d4   :  { %v5486_v37 = vpop.permute.xlu1 %5485  ;;  %v5484_v34 = vpop.permute.xlu0 %5483 }
 0x7d5   :  { %5642 = vst.msk [vmem:[#allocation3 + $0x118] sm:$0xff] %vm2129_vm9, %v5486_v37  ;;  %5641 = vst.msk [vmem:[#allocation3 + $0x110] sm:$0xff] %vm2129_vm9, %v5484_v34  ;;  %v15413_v34 = vld [vmem:[#allocation67_spill] sm:$0xff] }
 0x7d6   :  { %5965 = vrot.lane.b32.xlu1 %v15287_v24, %s7842_s30  ;;  %5963 = vrot.lane.b32.xlu0 %v15288_v14, %s7842_s30 }
 0x7d8   :  { %v5490_v3 = vpop.permute.xlu1 %5489  ;;  %v5488_v33 = vpop.permute.xlu0 %5487 }
 0x7d9   :  { %5644 = vst.msk [vmem:[#allocation3 + $0x128] sm:$0xff] %vm2129_vm9, %v5490_v3  ;;  %5643 = vst.msk [vmem:[#allocation3 + $0x120] sm:$0xff] %vm2129_vm9, %v5488_v33  ;;  %v15414_v3 = vld [vmem:[#allocation68_spill] sm:$0xff] }
 0x7da   :  { %6231 = vrot.lane.b32.xlu1 %v15351_v10, %s7843_s17  ;;  %6229 = vrot.lane.b32.xlu0 %v15352_v19, %s7843_s17 }
 0x7dc   :  { %v5494_v21 = vpop.permute.xlu1 %5493  ;;  %v5492_v8 = vpop.permute.xlu0 %5491 }
 0x7dd   :  { %5646 = vst.msk [vmem:[#allocation3 + $0x138] sm:$0xff] %vm2129_vm9, %v5494_v21  ;;  %5645 = vst.msk [vmem:[#allocation3 + $0x130] sm:$0xff] %vm2129_vm9, %v5492_v8  ;;  %v15415_v8 = vld [vmem:[#allocation136_spill] sm:$0xff] }
 0x7de   :  { %5701 = vrot.lane.b32.xlu1 %v11064_v35, %s7841_s29  ;;  %5699 = vrot.lane.b32.xlu0 %v11066_v55, %s7841_s29 }
 0x7e0   :  { %v5498_v24 = vpop.permute.xlu1 %5497  ;;  %v5496_v14 = vpop.permute.xlu0 %5495 }
 0x7e1   :  { %5648 = vst.msk [vmem:[#allocation3 + $0x148] sm:$0xff] %vm2129_vm9, %v5498_v24  ;;  %5647 = vst.msk [vmem:[#allocation3 + $0x140] sm:$0xff] %vm2129_vm9, %v5496_v14  ;;  %v15416_v24 = vld [vmem:[#allocation56_spill] sm:$0xff] }
 0x7e2   :  { %5969 = vrot.lane.b32.xlu1 %v15289_v59, %s7842_s30  ;;  %5967 = vrot.lane.b32.xlu0 %v15290_v40, %s7842_s30 }
 0x7e4   :  { %v5502_v19 = vpop.permute.xlu1 %5501  ;;  %v5500_v10 = vpop.permute.xlu0 %5499 }
 0x7e5   :  { %5650 = vst.msk [vmem:[#allocation3 + $0x158] sm:$0xff] %vm2129_vm9, %v5502_v19  ;;  %5649 = vst.msk [vmem:[#allocation3 + $0x150] sm:$0xff] %vm2129_vm9, %v5500_v10 }
 0x7e6   :  { %6235 = vrot.lane.b32.xlu1 %v15353_v23, %s7843_s17  ;;  %6233 = vrot.lane.b32.xlu0 %v15354_v9, %s7843_s17 }
 0x7e8   :  { %v5506_v35 = vpop.permute.xlu1 %5505  ;;  %v5504_v55 = vpop.permute.xlu0 %5503 }
 0x7e9   :  { %5652 = vst.msk [vmem:[#allocation3 + $0x168] sm:$0xff] %vm2129_vm9, %v5506_v35  ;;  %5651 = vst.msk [vmem:[#allocation3 + $0x160] sm:$0xff] %vm2129_vm9, %v5504_v55  ;;  %v15417_v55 = vld [vmem:[#allocation70_spill] sm:$0xff] }
 0x7ea   :  { %5705 = vrot.lane.b32.xlu1 %v11088_v53, %s7841_s29  ;;  %5703 = vrot.lane.b32.xlu0 %v11090_v48, %s7841_s29 }
 0x7ec   :  { %v5510_v59 = vpop.permute.xlu1 %5509  ;;  %v5508_v40 = vpop.permute.xlu0 %5507 }
 0x7ed   :  { %5654 = vst.msk [vmem:[#allocation3 + $0x178] sm:$0xff] %vm2129_vm9, %v5510_v59  ;;  %5653 = vst.msk [vmem:[#allocation3 + $0x170] sm:$0xff] %vm2129_vm9, %v5508_v40  ;;  %v15418_v59 = vld [vmem:[#allocation71_spill] sm:$0xff] }
 0x7ee   :  { %5973 = vrot.lane.b32.xlu1 %v15291_v22, %s7842_s30  ;;  %5971 = vrot.lane.b32.xlu0 %v15292_v11, %s7842_s30 }
 0x7f0   :  { %v5514_v9 = vpop.permute.xlu1 %5513  ;;  %v5512_v23 = vpop.permute.xlu0 %5511 }
 0x7f1   :  { %5656 = vst.msk [vmem:[#allocation3 + $0x188] sm:$0xff] %vm2129_vm9, %v5514_v9  ;;  %5655 = vst.msk [vmem:[#allocation3 + $0x180] sm:$0xff] %vm2129_vm9, %v5512_v23  ;;  %v15419_v23 = vld [vmem:[#allocation74_spill] sm:$0xff] }
 0x7f2   :  { %6239 = vrot.lane.b32.xlu1 %v15355_v47, %s7843_s17  ;;  %6237 = vrot.lane.b32.xlu0 %v15356_v27, %s7843_s17  ;;  %v15395_v47 = vld [vmem:[#allocation139_spill] sm:$0xff]  ;;  %v15396_v27 = vld [vmem:[#allocation140_spill] sm:$0xff] }
 0x7f4   :  { %v5518_v53 = vpop.permute.xlu1 %5517  ;;  %v5516_v48 = vpop.permute.xlu0 %5515 }
 0x7f5   :  { %5658 = vst.msk [vmem:[#allocation3 + $0x198] sm:$0xff] %vm2129_vm9, %v5518_v53  ;;  %5657 = vst.msk [vmem:[#allocation3 + $0x190] sm:$0xff] %vm2129_vm9, %v5516_v48  ;;  %v15420_v53 = vld [vmem:[#allocation75_spill] sm:$0xff] }
 0x7f6   :  { %5709 = vrot.lane.b32.xlu1 %v11112_v2, %s7841_s29  ;;  %5707 = vrot.lane.b32.xlu0 %v11114_v58, %s7841_s29  ;;  %v15397_v2 = vld [vmem:[#allocation133_spill] sm:$0xff]  ;;  %v15398_v58 = vld [vmem:[#allocation52_spill] sm:$0xff] }
 0x7f8   :  { %v5522_v22 = vpop.permute.xlu1 %5521  ;;  %v5520_v11 = vpop.permute.xlu0 %5519 }
 0x7f9   :  { %5660 = vst.msk [vmem:[#allocation3 + $0x1a8] sm:$0xff] %vm2129_vm9, %v5522_v22  ;;  %5659 = vst.msk [vmem:[#allocation3 + $0x1a0] sm:$0xff] %vm2129_vm9, %v5520_v11  ;;  %v15421_v11 = vld [vmem:[#allocation137_spill] sm:$0xff] }
 0x7fa   :  { %5977 = vrot.lane.b32.xlu1 %v15395_v47, %s7842_s30  ;;  %5975 = vrot.lane.b32.xlu0 %v15396_v27, %s7842_s30  ;;  %v15422_v47 = vld [vmem:[#allocation65_spill] sm:$0xff] }
 0x7fc   :  { %v5526_v12 = vpop.permute.xlu1 %5525  ;;  %v5524_v56 = vpop.permute.xlu0 %5523 }
 0x7fd   :  { %5662 = vst.msk [vmem:[#allocation3 + $0x1b8] sm:$0xff] %vm2129_vm9, %v5526_v12  ;;  %5661 = vst.msk [vmem:[#allocation3 + $0x1b0] sm:$0xff] %vm2129_vm9, %v5524_v56 }
 0x7fe   :  { %6243 = vrot.lane.b32.xlu1 %v15397_v2, %s7843_s17  ;;  %6241 = vrot.lane.b32.xlu0 %v15398_v58, %s7843_s17  ;;  %v15423_v58 = vld [vmem:[#allocation11_spill] sm:$0xff] }
 0x800   :  { %v5530_v16 = vpop.permute.xlu1 %5529  ;;  %v5528_v18 = vpop.permute.xlu0 %5527 }
 0x801   :  { %5664 = vst.msk [vmem:[#allocation3 + $0x1c8] sm:$0xff] %vm2129_vm9, %v5530_v16  ;;  %5663 = vst.msk [vmem:[#allocation3 + $0x1c0] sm:$0xff] %vm2129_vm9, %v5528_v18  ;;  %v15424_v16 = vld [vmem:[#allocation17_spill] sm:$0xff] }
 0x802   :  { %5713 = vrot.lane.b32.xlu1 %v15399_v26, %s7841_s29  ;;  %5711 = vrot.lane.b32.xlu0 %v15400_v60, %s7841_s29  ;;  %v15425_v60 = vld [vmem:[#allocation21_spill] sm:$0xff] }
 0x804   :  { %v5534_v49 = vpop.permute.xlu1 %5533  ;;  %v5532_v13 = vpop.permute.xlu0 %5531 }
 0x805   :  { %5666 = vst.msk [vmem:[#allocation3 + $0x1d8] sm:$0xff] %vm2129_vm9, %v5534_v49  ;;  %5665 = vst.msk [vmem:[#allocation3 + $0x1d0] sm:$0xff] %vm2129_vm9, %v5532_v13  ;;  %v15426_v49 = vld [vmem:[#allocation29_spill] sm:$0xff] }
 0x806   :  { %5981 = vrot.lane.b32.xlu1 %v15401_v28, %s7842_s30  ;;  %5979 = vrot.lane.b32.xlu0 %v15402_v54, %s7842_s30 }
 0x808   :  { %v5678_v30 = vpop.permute.xlu1 %5677  ;;  %v5676_v1 = vpop.permute.xlu0 %5675 }
 0x809   :  { %5868 = vst.msk [vmem:[#allocation3 + $0x8] sm:$0xff] %vm2390_vm10, %v5678_v30  ;;  %5867 = vst.msk [vmem:[#allocation3] sm:$0xff] %vm2390_vm10, %v5676_v1 }
 0x80a   :  { %6247 = vrot.lane.b32.xlu1 %v15403_v62, %s7843_s17  ;;  %6245 = vrot.lane.b32.xlu0 %v15404_v51, %s7843_s17  ;;  %v7829_v51 = vld [vmem:[#allocation2 + $0x188] sm:$0xff] }
 0x80c   :  { %v5946_v45 = vpop.permute.xlu1 %5945  ;;  %v5944_v5 = vpop.permute.xlu0 %5943 }
 0x80d   :  { %6136 = vst.msk [vmem:[#allocation3 + $0x8] sm:$0xff] %vm2659_vm11, %v5946_v45  ;;  %6135 = vst.msk [vmem:[#allocation3] sm:$0xff] %vm2659_vm11, %v5944_v5  ;;  %v7830_v45 = vld [vmem:[#allocation2 + $0x180] sm:$0xff] }
 0x80e   :  { %5717 = vrot.lane.b32.xlu1 %v15405_v29, %s7841_s29  ;;  %5715 = vrot.lane.b32.xlu0 %v15406_v15, %s7841_s29  ;;  %v15427_v5 = vld [vmem:[#allocation12_spill] sm:$0xff]  ;;  %v15428_v29 = vld [vmem:[#allocation22_spill] sm:$0xff] }
 0x810   :  { %v6212_v31 = vpop.permute.xlu1 %6211  ;;  %v6210_v25 = vpop.permute.xlu0 %6209 }
 0x811   :  { %6402 = vst.msk [vmem:[#allocation3 + $0x8] sm:$0xff] %vm2926_vm13, %v6212_v31  ;;  %6401 = vst.msk [vmem:[#allocation3] sm:$0xff] %vm2926_vm13, %v6210_v25  ;;  %v3829_v25 = vld [vmem:[#allocation2 + $0x1a0] sm:$0xff] }
 0x812   :  { %5985 = vrot.lane.b32.xlu1 %v15407_v0, %s7842_s30  ;;  %5983 = vrot.lane.b32.xlu0 %v15408_v42, %s7842_s30  ;;  %v3828_v0 = vld [vmem:[#allocation2 + $0x198] sm:$0xff]  ;;  %v3830_v42 = vld [vmem:[#allocation2 + $0x1a8] sm:$0x3] }
 0x814   :  { %v5682_v44 = vpop.permute.xlu1 %5681  ;;  %v5680_v38 = vpop.permute.xlu0 %5679 }
 0x815   :  { %5870 = vst.msk [vmem:[#allocation3 + $0x18] sm:$0xff] %vm2390_vm10, %v5682_v44  ;;  %5869 = vst.msk [vmem:[#allocation3 + $0x10] sm:$0xff] %vm2390_vm10, %v5680_v38  ;;  %v5934_v44 = vrot.slane %v3829_v25, 1  ;;  %v5933_v38 = vrot.slane %v3828_v0, 1 }
 0x816   :  { %6251 = vrot.lane.b32.xlu1 %v15409_v7, %s7843_s17  ;;  %6249 = vrot.lane.b32.xlu0 %v15410_v6, %s7843_s17  ;;  %v5936_v7 = vrot.slane %v3830_v42, 1 }
 0x818   :  { %v5950_v46 = vpop.permute.xlu1 %5949  ;;  %v5948_v20 = vpop.permute.xlu0 %5947  ;;  %v6465_v39 = vld [vmem:[#allocation3] sm:$0xff]  ;;  %v6466_v43 = vld [vmem:[#allocation3 + $0x8] sm:$0xff] }
 0x819   :  { %6138 = vst.msk [vmem:[#allocation3 + $0x18] sm:$0xff] %vm2659_vm11, %v5950_v46  ;;  %6137 = vst.msk [vmem:[#allocation3 + $0x10] sm:$0xff] %vm2659_vm11, %v5948_v20  ;;  %7703 = vmatprep.mubr.msk.f32.mxu1 %vm3067_vm14, %v6465_v39 }
 0x81a   :  { %5721 = vrot.lane.b32.xlu1 %v15411_v41, %s7841_s29  ;;  %5719 = vrot.lane.b32.xlu0 %v15412_v57, %s7841_s29  ;;  %v5935_v41 = vsel %vm561_vm2, %v5933_v38, %v5934_v44  ;;  %v6202_v57 = vrot.slane %v3830_v42, 2 }
 0x81b   :  { %7704 = vmatmul.mubr.msk.f32.vlgmr.msra.gmra.mxu1 %vm3067_vm14, %v6466_v43  ;;  %v6200_v43 = vrot.slane %v3829_v25, 2 }
 0x81c   :  { %v6216_v4 = vpop.permute.xlu1 %6215  ;;  %v6214_v37 = vpop.permute.xlu0 %6213 }
 0x81d   :  { %6404 = vst.msk [vmem:[#allocation3 + $0x18] sm:$0xff] %vm2926_vm13, %v6216_v4  ;;  %6403 = vst.msk [vmem:[#allocation3 + $0x10] sm:$0xff] %vm2926_vm13, %v6214_v37 }
 0x81e   :  { %5989 = vrot.lane.b32.xlu1 %v15413_v34, %s7842_s30  ;;  %5987 = vrot.lane.b32.xlu0 %v15414_v3, %s7842_s30  ;;  %v6203_v34 = vsel %vm979_vm4, %v6200_v43, %v6202_v57  ;;  %v15451_v57 = vld [vmem:[#allocation57_spill] sm:$0xff] }
 0x820   :  { %v5686_v33 = vpop.permute.xlu1 %5685  ;;  %v5684_v21 = vpop.permute.xlu0 %5683 }
 0x821   :  { %5872 = vst.msk [vmem:[#allocation3 + $0x28] sm:$0xff] %vm2390_vm10, %v5686_v33  ;;  %5871 = vst.msk [vmem:[#allocation3 + $0x20] sm:$0xff] %vm2390_vm10, %v5684_v21 }
 0x822   :  { %6255 = vrot.lane.b32.xlu1 %v15415_v8, %s7843_s17  ;;  %6253 = vrot.lane.b32.xlu0 %v15416_v24, %s7843_s17 }
 0x824   :  { %v5954_v14 = vpop.permute.xlu1 %5953  ;;  %v5952_v19 = vpop.permute.xlu0 %5951  ;;  %v6467_v10 = vld [vmem:[#allocation3 + $0x10] sm:$0xff]  ;;  %v6468_v35 = vld [vmem:[#allocation3 + $0x18] sm:$0xff] }
 0x825   :  { %6140 = vst.msk [vmem:[#allocation3 + $0x28] sm:$0xff] %vm2659_vm11, %v5954_v14  ;;  %6139 = vst.msk [vmem:[#allocation3 + $0x20] sm:$0xff] %vm2659_vm11, %v5952_v19  ;;  %7706 = vmatprep.mubr.msk.f32.mxu1 %vm3067_vm14, %v6467_v10  ;;  %v15429_v10 = vld [vmem:[#allocation33_spill] sm:$0xff] }
 0x826   :  { %5725 = vrot.lane.b32.xlu1 %v15417_v55, %s7841_s29  ;;  %5723 = vrot.lane.b32.xlu0 %v15418_v59, %s7841_s29 }
 0x827   :  { %7707 = vmatmul.mubr.msk.f32.gmra.mxu1 %vm3067_vm14, %v6468_v35  ;;  %v15430_v35 = vld [vmem:[#allocation34_spill] sm:$0xff] }
 0x828   :  { %v6220_v40 = vpop.permute.xlu1 %6219  ;;  %v6218_v9 = vpop.permute.xlu0 %6217 }
 0x829   :  { %6406 = vst.msk [vmem:[#allocation3 + $0x28] sm:$0xff] %vm2926_vm13, %v6220_v40  ;;  %6405 = vst.msk [vmem:[#allocation3 + $0x20] sm:$0xff] %vm2926_vm13, %v6218_v9  ;;  %v15431_v40 = vld [vmem:[#allocation36_spill] sm:$0xff]  ;;  %v15432_v9 = vld [vmem:[#allocation37_spill] sm:$0xff] }
 0x82a   :  { %5993 = vrot.lane.b32.xlu1 %v15419_v23, %s7842_s30  ;;  %5991 = vrot.lane.b32.xlu0 %v15420_v53, %s7842_s30 }
 0x82c   :  { %v5690_v48 = vpop.permute.xlu1 %5689  ;;  %v5688_v22 = vpop.permute.xlu0 %5687 }
 0x82d   :  { %5874 = vst.msk [vmem:[#allocation3 + $0x38] sm:$0xff] %vm2390_vm10, %v5690_v48  ;;  %5873 = vst.msk [vmem:[#allocation3 + $0x30] sm:$0xff] %vm2390_vm10, %v5688_v22  ;;  %v15433_v48 = vld [vmem:[#allocation145_spill] sm:$0xff]  ;;  %v15434_v22 = vld [vmem:[#allocation146_spill] sm:$0xff] }
 0x82e   :  { %6259 = vrot.lane.b32.xlu1 %v15421_v11, %s7843_s17  ;;  %6257 = vrot.lane.b32.xlu0 %v15422_v47, %s7843_s17 }
 0x830   :  { %v5958_v27 = vpop.permute.xlu1 %5957  ;;  %v5956_v12 = vpop.permute.xlu0 %5955  ;;  %v6469_v56 = vld [vmem:[#allocation3 + $0x20] sm:$0xff]  ;;  %v6470_v2 = vld [vmem:[#allocation3 + $0x28] sm:$0xff] }
 0x831   :  { %6142 = vst.msk [vmem:[#allocation3 + $0x38] sm:$0xff] %vm2659_vm11, %v5958_v27  ;;  %6141 = vst.msk [vmem:[#allocation3 + $0x30] sm:$0xff] %vm2659_vm11, %v5956_v12  ;;  %7709 = vmatprep.mubr.msk.f32.mxu1 %vm3067_vm14, %v6469_v56  ;;  %v15435_v56 = vld [vmem:[#allocation38_spill] sm:$0xff] }
 0x832   :  { %5729 = vrot.lane.b32.xlu1 %v15423_v58, %s7841_s29  ;;  %5727 = vrot.lane.b32.xlu0 %v15424_v16, %s7841_s29 }
 0x833   :  { %7710 = vmatmul.mubr.msk.f32.gmra.mxu1 %vm3067_vm14, %v6470_v2  ;;  %v15436_v2 = vld [vmem:[#allocation44_spill] sm:$0xff] }
 0x834   :  { %v6224_v18 = vpop.permute.xlu1 %6223  ;;  %v6222_v26 = vpop.permute.xlu0 %6221 }
 0x835   :  { %6408 = vst.msk [vmem:[#allocation3 + $0x38] sm:$0xff] %vm2926_vm13, %v6224_v18  ;;  %6407 = vst.msk [vmem:[#allocation3 + $0x30] sm:$0xff] %vm2926_vm13, %v6222_v26  ;;  %v15437_v18 = vld [vmem:[#allocation46_spill] sm:$0xff]  ;;  %v15438_v26 = vld [vmem:[#allocation49_spill] sm:$0xff] }
 0x836   :  { %5997 = vrot.lane.b32.xlu1 %v15425_v60, %s7842_s30  ;;  %5995 = vrot.lane.b32.xlu0 %v15426_v49, %s7842_s30 }
 0x838   :  { %v5694_v13 = vpop.permute.xlu1 %5693  ;;  %v5692_v28 = vpop.permute.xlu0 %5691 }
 0x839   :  { %5876 = vst.msk [vmem:[#allocation3 + $0x48] sm:$0xff] %vm2390_vm10, %v5694_v13  ;;  %5875 = vst.msk [vmem:[#allocation3 + $0x40] sm:$0xff] %vm2390_vm10, %v5692_v28  ;;  %v15439_v13 = vld [vmem:[#allocation147_spill] sm:$0xff]  ;;  %v15440_v28 = vld [vmem:[#allocation148_spill] sm:$0xff] }
 0x83a   :  { %6263 = vrot.lane.b32.xlu1 %v15367_v52, %s7843_s17  ;;  %6261 = vrot.lane.b32.xlu0 %v15368_v63, %s7843_s17 }
 0x83c   :  { %v5962_v54 = vpop.permute.xlu1 %5961  ;;  %v5960_v30 = vpop.permute.xlu0 %5959  ;;  %v6471_v1 = vld [vmem:[#allocation3 + $0x30] sm:$0xff]  ;;  %v6472_v62 = vld [vmem:[#allocation3 + $0x38] sm:$0xff] }
 0x83d   :  { %6144 = vst.msk [vmem:[#allocation3 + $0x48] sm:$0xff] %vm2659_vm11, %v5962_v54  ;;  %6143 = vst.msk [vmem:[#allocation3 + $0x40] sm:$0xff] %vm2659_vm11, %v5960_v30  ;;  %7712 = vmatprep.mubr.msk.f32.mxu1 %vm3067_vm14, %v6471_v1 }
 0x83e   :  { %5733 = vrot.lane.b32.xlu1 %v7829_v51, %s7841_s29  ;;  %5731 = vrot.lane.b32.xlu0 %v7830_v45, %s7841_s29  ;;  %v15441_v51 = vld [vmem:[#allocation51_spill] sm:$0xff] }
 0x83f   :  { %7713 = vmatmul.mubr.msk.f32.gmra.mxu1 %vm3067_vm14, %v6472_v62  ;;  %v15442_v45 = vld [vmem:[#allocation55_spill] sm:$0xff] }
 0x840   :  { %v6228_v52 = vpop.permute.xlu1 %6227  ;;  %v6226_v63 = vpop.permute.xlu0 %6225 }
 0x841   :  { %6410 = vst.msk [vmem:[#allocation3 + $0x48] sm:$0xff] %vm2926_vm13, %v6228_v52  ;;  %6409 = vst.msk [vmem:[#allocation3 + $0x40] sm:$0xff] %vm2926_vm13, %v6226_v63 }
 0x842   :  { %6001 = vrot.lane.b32.xlu1 %v15427_v5, %s7842_s30  ;;  %5999 = vrot.lane.b32.xlu0 %v15428_v29, %s7842_s30  ;;  %v15443_v5 = vld [vmem:[#allocation59_spill] sm:$0xff]  ;;  %v15444_v29 = vld [vmem:[#allocation60_spill] sm:$0xff] }
 0x844   :  { %v5698_v15 = vpop.permute.xlu1 %5697  ;;  %v5696_v31 = vpop.permute.xlu0 %5695 }
 0x845   :  { %5878 = vst.msk [vmem:[#allocation3 + $0x58] sm:$0xff] %vm2390_vm10, %v5698_v15  ;;  %5877 = vst.msk [vmem:[#allocation3 + $0x50] sm:$0xff] %vm2390_vm10, %v5696_v31 }
 0x846   :  { %6267 = vrot.lane.b32.xlu1 %v12646_v17, %s7843_s17  ;;  %6265 = vrot.lane.b32.xlu0 %v12649_v61, %s7843_s17  ;;  %v6199_v17 = vrot.slane %v3828_v0, 2  ;;  %v5937_v61 = vsel %vm561_vm2, %v5934_v44, %v5936_v7 }
 0x848   :  { %v5966_v6 = vpop.permute.xlu1 %5965  ;;  %v5964_v46 = vpop.permute.xlu0 %5963  ;;  %v6473_v20 = vld [vmem:[#allocation3 + $0x40] sm:$0xff]  ;;  %v6474_v39 = vld [vmem:[#allocation3 + $0x48] sm:$0xff]  ;;  %v6201_v3 = vsel %vm979_vm4, %v6199_v17, %v6200_v43 }
 0x849   :  { %6146 = vst.msk [vmem:[#allocation3 + $0x58] sm:$0xff] %vm2659_vm11, %v5966_v6  ;;  %6145 = vst.msk [vmem:[#allocation3 + $0x50] sm:$0xff] %vm2659_vm11, %v5964_v46  ;;  %7715 = vmatprep.mubr.msk.f32.mxu1 %vm3067_vm14, %v6473_v20  ;;  %v15447_v6 = vld [vmem:[#allocation61_spill] sm:$0xff]  ;;  %v15448_v46 = vld [vmem:[#allocation62_spill] sm:$0xff] }
 0x84a   :  { %5737 = vrot.lane.b32.xlu1 %v3829_v25, %s7841_s29  ;;  %5735 = vrot.lane.b32.xlu0 %v3828_v0, %s7841_s29  ;;  %v15445_v25 = vld [vmem:[#allocation149_spill] sm:$0xff]  ;;  %v15446_v0 = vld [vmem:[#allocation150_spill] sm:$0xff]  ;;  %v15449_v43 = vld [vmem:[#allocation64_spill] sm:$0xff] }
 0x84b   :  { %7716 = vmatmul.mubr.msk.f32.gmra.mxu1 %vm3067_vm14, %v6474_v39  ;;  %v15450_v17 = vld [vmem:[#allocation69_spill] sm:$0xff] }
 0x84c   :  { %v6232_v4 = vpop.permute.xlu1 %6231  ;;  %v6230_v37 = vpop.permute.xlu0 %6229 }
 0x84d   :  { %6412 = vst.msk [vmem:[#allocation3 + $0x58] sm:$0xff] %vm2926_vm13, %v6232_v4  ;;  %6411 = vst.msk [vmem:[#allocation3 + $0x50] sm:$0xff] %vm2926_vm13, %v6230_v37  ;;  %v15452_v4 = vld [vmem:[#allocation151_spill] sm:$0xff] }
 0x84e   :  { %6005 = vrot.lane.b32.xlu1 %v5937_v61, %s7842_s30  ;;  %6003 = vrot.lane.b32.xlu0 %v5935_v41, %s7842_s30 }
 0x850   :  { %v5702_v33 = vpop.permute.xlu1 %5701  ;;  %v5700_v21 = vpop.permute.xlu0 %5699 }
 0x851   :  { %5880 = vst.msk [vmem:[#allocation3 + $0x68] sm:$0xff] %vm2390_vm10, %v5702_v33  ;;  %5879 = vst.msk [vmem:[#allocation3 + $0x60] sm:$0xff] %vm2390_vm10, %v5700_v21  ;;  %v15453_v21 = vld [vmem:[#allocation72_spill] sm:$0xff] }
 0x852   :  { %6271 = vrot.lane.b32.xlu1 %v6203_v34, %s7843_s17  ;;  %6269 = vrot.lane.b32.xlu0 %v6201_v3, %s7843_s17 }
 0x854   :  { %v5970_v8 = vpop.permute.xlu1 %5969  ;;  %v5968_v24 = vpop.permute.xlu0 %5967  ;;  %v6475_v14 = vld [vmem:[#allocation3 + $0x50] sm:$0xff]  ;;  %v6476_v19 = vld [vmem:[#allocation3 + $0x58] sm:$0xff] }
 0x855   :  { %6148 = vst.msk [vmem:[#allocation3 + $0x68] sm:$0xff] %vm2659_vm11, %v5970_v8  ;;  %6147 = vst.msk [vmem:[#allocation3 + $0x60] sm:$0xff] %vm2659_vm11, %v5968_v24  ;;  %7718 = vmatprep.mubr.msk.f32.mxu1 %vm3067_vm14, %v6475_v14  ;;  %v15454_v8 = vld [vmem:[#allocation76_spill] sm:$0xff] }
 0x856   :  { %5741 = vrot.lane.b32.xlu1 %v15429_v10, %s7841_s29  ;;  %5739 = vrot.lane.b32.xlu0 %v15430_v35, %s7841_s29  ;;  %v15456_v10 = vld [vmem:[#allocation6_spill] sm:$0xff] }
 0x857   :  { %7719 = vmatmul.mubr.msk.f32.gmra.mxu1 %vm3067_vm14, %v6476_v19  ;;  %v15455_v19 = vld [vmem:[#allocation78_spill] sm:$0xff] }
 0x858   :  { %v6236_v55 = vpop.permute.xlu1 %6235  ;;  %v6234_v59 = vpop.permute.xlu0 %6233 }
 0x859   :  { %6414 = vst.msk [vmem:[#allocation3 + $0x68] sm:$0xff] %vm2926_vm13, %v6236_v55  ;;  %6413 = vst.msk [vmem:[#allocation3 + $0x60] sm:$0xff] %vm2926_vm13, %v6234_v59  ;;  %v15457_v59 = vld [vmem:[#allocation63_spill] sm:$0xff] }
 0x85a   :  { %6009 = vrot.lane.b32.xlu1 %v15431_v40, %s7842_s30  ;;  %6007 = vrot.lane.b32.xlu0 %v15432_v9, %s7842_s30  ;;  %v15458_v40 = vld [vmem:[#allocation152_spill] sm:$0xff] }
 0x85c   :  { %v5706_v23 = vpop.permute.xlu1 %5705  ;;  %v5704_v53 = vpop.permute.xlu0 %5703 }
 0x85d   :  { %5882 = vst.msk [vmem:[#allocation3 + $0x78] sm:$0xff] %vm2390_vm10, %v5706_v23  ;;  %5881 = vst.msk [vmem:[#allocation3 + $0x70] sm:$0xff] %vm2390_vm10, %v5704_v53 }
 0x85e   :  { %6275 = vrot.lane.b32.xlu1 %v15433_v48, %s7843_s17  ;;  %6273 = vrot.lane.b32.xlu0 %v15434_v22, %s7843_s17  ;;  %v15459_v22 = vld [vmem:[#allocation7_spill] sm:$0xff] }
 0x860   :  { %v5974_v11 = vpop.permute.xlu1 %5973  ;;  %v5972_v47 = vpop.permute.xlu0 %5971  ;;  %v6477_v27 = vld [vmem:[#allocation3 + $0x60] sm:$0xff]  ;;  %v6478_v12 = vld [vmem:[#allocation3 + $0x68] sm:$0xff] }
 0x861   :  { %6150 = vst.msk [vmem:[#allocation3 + $0x78] sm:$0xff] %vm2659_vm11, %v5974_v11  ;;  %6149 = vst.msk [vmem:[#allocation3 + $0x70] sm:$0xff] %vm2659_vm11, %v5972_v47  ;;  %7721 = vmatprep.mubr.msk.f32.mxu1 %vm3067_vm14, %v6477_v27  ;;  %v15460_v11 = vld [vmem:[#allocation82_spill] sm:$0xff] }
 0x862   :  { %5745 = vrot.lane.b32.xlu1 %v15435_v56, %s7841_s29  ;;  %5743 = vrot.lane.b32.xlu0 %v15436_v2, %s7841_s29  ;;  %v15462_v56 = vld [vmem:[#allocation85_spill] sm:$0xff] }
 0x863   :  { %7722 = vmatmul.mubr.msk.f32.gmra.mxu1 %vm3067_vm14, %v6478_v12  ;;  %v15461_v12 = vld [vmem:[#allocation84_spill] sm:$0xff] }
 0x864   :  { %v6240_v58 = vpop.permute.xlu1 %6239  ;;  %v6238_v16 = vpop.permute.xlu0 %6237 }
 0x865   :  { %6416 = vst.msk [vmem:[#allocation3 + $0x78] sm:$0xff] %vm2926_vm13, %v6240_v58  ;;  %6415 = vst.msk [vmem:[#allocation3 + $0x70] sm:$0xff] %vm2926_vm13, %v6238_v16  ;;  %v15463_v16 = vld [vmem:[#allocation77_spill] sm:$0xff] }
 0x866   :  { %6013 = vrot.lane.b32.xlu1 %v15437_v18, %s7842_s30  ;;  %6011 = vrot.lane.b32.xlu0 %v15438_v26, %s7842_s30  ;;  %v15464_v18 = vld [vmem:[#allocation153_spill] sm:$0xff] }
 0x868   :  { %v5710_v60 = vpop.permute.xlu1 %5709  ;;  %v5708_v49 = vpop.permute.xlu0 %5707 }
 0x869   :  { %5884 = vst.msk [vmem:[#allocation3 + $0x88] sm:$0xff] %vm2390_vm10, %v5710_v60  ;;  %5883 = vst.msk [vmem:[#allocation3 + $0x80] sm:$0xff] %vm2390_vm10, %v5708_v49 }
 0x86a   :  { %6279 = vrot.lane.b32.xlu1 %v15439_v13, %s7843_s17  ;;  %6277 = vrot.lane.b32.xlu0 %v15440_v28, %s7843_s17  ;;  %v15465_v28 = vld [vmem:[#allocation86_spill] sm:$0xff] }
 0x86c   :  { %v5978_v54 = vpop.permute.xlu1 %5977  ;;  %v5976_v30 = vpop.permute.xlu0 %5975  ;;  %v6479_v1 = vld [vmem:[#allocation3 + $0x70] sm:$0xff]  ;;  %v6480_v62 = vld [vmem:[#allocation3 + $0x78] sm:$0xff] }
 0x86d   :  { %6152 = vst.msk [vmem:[#allocation3 + $0x88] sm:$0xff] %vm2659_vm11, %v5978_v54  ;;  %6151 = vst.msk [vmem:[#allocation3 + $0x80] sm:$0xff] %vm2659_vm11, %v5976_v30  ;;  %7724 = vmatprep.mubr.msk.f32.mxu1 %vm3067_vm14, %v6479_v1  ;;  %v15466_v54 = vld [vmem:[#allocation87_spill] sm:$0xff] }
 0x86e   :  { %5749 = vrot.lane.b32.xlu1 %v15441_v51, %s7841_s29  ;;  %5747 = vrot.lane.b32.xlu0 %v15442_v45, %s7841_s29  ;;  %v15468_v51 = vld [vmem:[#allocation90_spill] sm:$0xff] }
 0x86f   :  { %7725 = vmatmul.mubr.msk.f32.gmra.mxu1 %vm3067_vm14, %v6480_v62  ;;  %v15467_v62 = vld [vmem:[#allocation89_spill] sm:$0xff] }
 0x870   :  { %v6244_v52 = vpop.permute.xlu1 %6243  ;;  %v6242_v63 = vpop.permute.xlu0 %6241 }
 0x871   :  { %6418 = vst.msk [vmem:[#allocation3 + $0x88] sm:$0xff] %vm2926_vm13, %v6244_v52  ;;  %6417 = vst.msk [vmem:[#allocation3 + $0x80] sm:$0xff] %vm2926_vm13, %v6242_v63  ;;  %v15469_v63 = vld [vmem:[#allocation83_spill] sm:$0xff] }
 0x872   :  { %6017 = vrot.lane.b32.xlu1 %v15443_v5, %s7842_s30  ;;  %6015 = vrot.lane.b32.xlu0 %v15444_v29, %s7842_s30  ;;  %v15470_v5 = vld [vmem:[#allocation154_spill] sm:$0xff] }
 0x874   :  { %v5714_v15 = vpop.permute.xlu1 %5713  ;;  %v5712_v31 = vpop.permute.xlu0 %5711 }
 0x875   :  { %5886 = vst.msk [vmem:[#allocation3 + $0x98] sm:$0xff] %vm2390_vm10, %v5714_v15  ;;  %5885 = vst.msk [vmem:[#allocation3 + $0x90] sm:$0xff] %vm2390_vm10, %v5712_v31 }
 0x876   :  { %6283 = vrot.lane.b32.xlu1 %v15445_v25, %s7843_s17  ;;  %6281 = vrot.lane.b32.xlu0 %v15446_v0, %s7843_s17  ;;  %v15471_v0 = vld [vmem:[#allocation91_spill] sm:$0xff] }
 0x878   :  { %v5982_v42 = vpop.permute.xlu1 %5981  ;;  %v5980_v44 = vpop.permute.xlu0 %5979  ;;  %v6481_v38 = vld [vmem:[#allocation3 + $0x80] sm:$0xff]  ;;  %v6482_v7 = vld [vmem:[#allocation3 + $0x88] sm:$0xff] }
 0x879   :  { %6154 = vst.msk [vmem:[#allocation3 + $0x98] sm:$0xff] %vm2659_vm11, %v5982_v42  ;;  %6153 = vst.msk [vmem:[#allocation3 + $0x90] sm:$0xff] %vm2659_vm11, %v5980_v44  ;;  %7727 = vmatprep.mubr.msk.f32.mxu1 %vm3067_vm14, %v6481_v38  ;;  %v15472_v42 = vld [vmem:[#allocation92_spill] sm:$0xff] }
 0x87a   :  { %5753 = vrot.lane.b32.xlu1 %v15447_v6, %s7841_s29  ;;  %5751 = vrot.lane.b32.xlu0 %v15448_v46, %s7841_s29  ;;  %v15474_v6 = vld [vmem:[#allocation95_spill] sm:$0xff] }
 0x87b   :  { %7728 = vmatmul.mubr.msk.f32.gmra.mxu1 %vm3067_vm14, %v6482_v7  ;;  %v15473_v7 = vld [vmem:[#allocation94_spill] sm:$0xff] }
 0x87c   :  { %v6248_v20 = vpop.permute.xlu1 %6247  ;;  %v6246_v39 = vpop.permute.xlu0 %6245 }
 0x87d   :  { %6420 = vst.msk [vmem:[#allocation3 + $0x98] sm:$0xff] %vm2926_vm13, %v6248_v20  ;;  %6419 = vst.msk [vmem:[#allocation3 + $0x90] sm:$0xff] %vm2926_vm13, %v6246_v39  ;;  %v15475_v39 = vld [vmem:[#allocation88_spill] sm:$0xff] }
 0x87e   :  { %6021 = vrot.lane.b32.xlu1 %v15449_v43, %s7842_s30  ;;  %6019 = vrot.lane.b32.xlu0 %v15450_v17, %s7842_s30  ;;  %v15476_v43 = vld [vmem:[#allocation155_spill] sm:$0xff] }
 0x880   :  { %v5718_v61 = vpop.permute.xlu1 %5717  ;;  %v5716_v41 = vpop.permute.xlu0 %5715 }
 0x881   :  { %5888 = vst.msk [vmem:[#allocation3 + $0xa8] sm:$0xff] %vm2390_vm10, %v5718_v61  ;;  %5887 = vst.msk [vmem:[#allocation3 + $0xa0] sm:$0xff] %vm2390_vm10, %v5716_v41 }
 0x882   :  { %6287 = vrot.lane.b32.xlu1 %v15451_v57, %s7843_s17  ;;  %6285 = vrot.lane.b32.xlu0 %v15452_v4, %s7843_s17  ;;  %v15477_v4 = vld [vmem:[#allocation96_spill] sm:$0xff] }
 0x884   :  { %v5986_v37 = vpop.permute.xlu1 %5985  ;;  %v5984_v34 = vpop.permute.xlu0 %5983  ;;  %v6483_v3 = vld [vmem:[#allocation3 + $0x90] sm:$0xff]  ;;  %v6484_v33 = vld [vmem:[#allocation3 + $0x98] sm:$0xff] }
 0x885   :  { %6156 = vst.msk [vmem:[#allocation3 + $0xa8] sm:$0xff] %vm2659_vm11, %v5986_v37  ;;  %6155 = vst.msk [vmem:[#allocation3 + $0xa0] sm:$0xff] %vm2659_vm11, %v5984_v34  ;;  %7730 = vmatprep.mubr.msk.f32.mxu1 %vm3067_vm14, %v6483_v3  ;;  %v15478_v37 = vld [vmem:[#allocation97_spill] sm:$0xff] }
 0x886   :  { %5757 = vrot.lane.b32.xlu1 %v15453_v21, %s7841_s29  ;;  %5755 = vrot.lane.b32.xlu0 %v15454_v8, %s7841_s29  ;;  %v15480_v21 = vld [vmem:[#allocation100_spill] sm:$0xff] }
 0x887   :  { %7731 = vmatmul.mubr.msk.f32.gmra.mxu1 %vm3067_vm14, %v6484_v33  ;;  %v15479_v33 = vld [vmem:[#allocation99_spill] sm:$0xff] }
 0x888   :  { %v6252_v24 = vpop.permute.xlu1 %6251  ;;  %v6250_v14 = vpop.permute.xlu0 %6249 }
 0x889   :  { %6422 = vst.msk [vmem:[#allocation3 + $0xa8] sm:$0xff] %vm2926_vm13, %v6252_v24  ;;  %6421 = vst.msk [vmem:[#allocation3 + $0xa0] sm:$0xff] %vm2926_vm13, %v6250_v14  ;;  %v15481_v14 = vld [vmem:[#allocation93_spill] sm:$0xff] }
 0x88a   :  { %6025 = vrot.lane.b32.xlu1 %v15455_v19, %s7842_s30  ;;  %6023 = vrot.lane.b32.xlu0 %v15456_v10, %s7842_s30  ;;  %v15482_v19 = vld [vmem:[#allocation156_spill] sm:$0xff] }
 0x88c   :  { %v5722_v35 = vpop.permute.xlu1 %5721  ;;  %v5720_v55 = vpop.permute.xlu0 %5719 }
 0x88d   :  { %5890 = vst.msk [vmem:[#allocation3 + $0xb8] sm:$0xff] %vm2390_vm10, %v5722_v35  ;;  %5889 = vst.msk [vmem:[#allocation3 + $0xb0] sm:$0xff] %vm2390_vm10, %v5720_v55 }
 0x88e   :  { %6291 = vrot.lane.b32.xlu1 %v15457_v59, %s7843_s17  ;;  %6289 = vrot.lane.b32.xlu0 %v15458_v40, %s7843_s17  ;;  %v15483_v40 = vld [vmem:[#allocation101_spill] sm:$0xff] }
 0x890   :  { %v5990_v9 = vpop.permute.xlu1 %5989  ;;  %v5988_v23 = vpop.permute.xlu0 %5987  ;;  %v6485_v53 = vld [vmem:[#allocation3 + $0xa0] sm:$0xff]  ;;  %v6486_v48 = vld [vmem:[#allocation3 + $0xa8] sm:$0xff] }
 0x891   :  { %6158 = vst.msk [vmem:[#allocation3 + $0xb8] sm:$0xff] %vm2659_vm11, %v5990_v9  ;;  %6157 = vst.msk [vmem:[#allocation3 + $0xb0] sm:$0xff] %vm2659_vm11, %v5988_v23  ;;  %7733 = vmatprep.mubr.msk.f32.mxu1 %vm3067_vm14, %v6485_v53  ;;  %v15484_v9 = vld [vmem:[#allocation102_spill] sm:$0xff] }
 0x892   :  { %5761 = vrot.lane.b32.xlu1 %v15459_v22, %s7841_s29  ;;  %5759 = vrot.lane.b32.xlu0 %v15460_v11, %s7841_s29  ;;  %v15486_v22 = vld [vmem:[#allocation105_spill] sm:$0xff] }
 0x893   :  { %7734 = vmatmul.mubr.msk.f32.gmra.mxu1 %vm3067_vm14, %v6486_v48  ;;  %v15485_v48 = vld [vmem:[#allocation104_spill] sm:$0xff] }
 0x894   :  { %v6256_v47 = vpop.permute.xlu1 %6255  ;;  %v6254_v27 = vpop.permute.xlu0 %6253 }
 0x895   :  { %6424 = vst.msk [vmem:[#allocation3 + $0xb8] sm:$0xff] %vm2926_vm13, %v6256_v47  ;;  %6423 = vst.msk [vmem:[#allocation3 + $0xb0] sm:$0xff] %vm2926_vm13, %v6254_v27  ;;  %v15487_v27 = vld [vmem:[#allocation98_spill] sm:$0xff] }
 0x896   :  { %6029 = vrot.lane.b32.xlu1 %v15461_v12, %s7842_s30  ;;  %6027 = vrot.lane.b32.xlu0 %v15462_v56, %s7842_s30  ;;  %v15488_v12 = vld [vmem:[#allocation157_spill] sm:$0xff] }
 0x898   :  { %v5726_v2 = vpop.permute.xlu1 %5725  ;;  %v5724_v58 = vpop.permute.xlu0 %5723 }
 0x899   :  { %5892 = vst.msk [vmem:[#allocation3 + $0xc8] sm:$0xff] %vm2390_vm10, %v5726_v2  ;;  %5891 = vst.msk [vmem:[#allocation3 + $0xc0] sm:$0xff] %vm2390_vm10, %v5724_v58 }
 0x89a   :  { %6295 = vrot.lane.b32.xlu1 %v15463_v16, %s7843_s17  ;;  %6293 = vrot.lane.b32.xlu0 %v15464_v18, %s7843_s17  ;;  %v15489_v18 = vld [vmem:[#allocation106_spill] sm:$0xff] }
 0x89c   :  { %v5994_v26 = vpop.permute.xlu1 %5993  ;;  %v5992_v60 = vpop.permute.xlu0 %5991  ;;  %v6487_v49 = vld [vmem:[#allocation3 + $0xb0] sm:$0xff]  ;;  %v6488_v13 = vld [vmem:[#allocation3 + $0xb8] sm:$0xff] }
 0x89d   :  { %6160 = vst.msk [vmem:[#allocation3 + $0xc8] sm:$0xff] %vm2659_vm11, %v5994_v26  ;;  %6159 = vst.msk [vmem:[#allocation3 + $0xc0] sm:$0xff] %vm2659_vm11, %v5992_v60  ;;  %7736 = vmatprep.mubr.msk.f32.mxu1 %vm3067_vm14, %v6487_v49  ;;  %v15490_v26 = vld [vmem:[#allocation107_spill] sm:$0xff] }
 0x89e   :  { %5765 = vrot.lane.b32.xlu1 %v15465_v28, %s7841_s29  ;;  %5763 = vrot.lane.b32.xlu0 %v15466_v54, %s7841_s29  ;;  %v15492_v28 = vld [vmem:[#allocation112_spill] sm:$0xff] }
 0x89f   :  { %7737 = vmatmul.mubr.msk.f32.gmra.mxu1 %vm3067_vm14, %v6488_v13  ;;  %v15491_v13 = vld [vmem:[#allocation9_spill] sm:$0xff] }
 0x8a0   :  { %v6260_v30 = vpop.permute.xlu1 %6259  ;;  %v6258_v1 = vpop.permute.xlu0 %6257 }
 0x8a1   :  { %6426 = vst.msk [vmem:[#allocation3 + $0xc8] sm:$0xff] %vm2926_vm13, %v6260_v30  ;;  %6425 = vst.msk [vmem:[#allocation3 + $0xc0] sm:$0xff] %vm2926_vm13, %v6258_v1  ;;  %v15493_v1 = vld [vmem:[#allocation103_spill] sm:$0xff] }
 0x8a2   :  { %6033 = vrot.lane.b32.xlu1 %v15467_v62, %s7842_s30  ;;  %6031 = vrot.lane.b32.xlu0 %v15468_v51, %s7842_s30 }
 0x8a4   :  { %v5730_v45 = vpop.permute.xlu1 %5729  ;;  %v5728_v52 = vpop.permute.xlu0 %5727 }
 0x8a5   :  { %5894 = vst.msk [vmem:[#allocation3 + $0xd8] sm:$0xff] %vm2390_vm10, %v5730_v45  ;;  %5893 = vst.msk [vmem:[#allocation3 + $0xd0] sm:$0xff] %vm2390_vm10, %v5728_v52 }
 0x8a6   :  { %6299 = vrot.lane.b32.xlu1 %v15469_v63, %s7843_s17  ;;  %6297 = vrot.lane.b32.xlu0 %v15470_v5, %s7843_s17  ;;  %v13276_v63 = vld [vmem:[%s13982_s4] ss:$0 sm:$0xff]  ;;  %v15494_v5 = vld [vmem:[#allocation113_spill] sm:$0xff] }
 0x8a8   :  { %v5998_v29 = vpop.permute.xlu1 %5997  ;;  %v5996_v15 = vpop.permute.xlu0 %5995  ;;  %v6489_v31 = vld [vmem:[#allocation3 + $0xc0] sm:$0xff]  ;;  %v6490_v25 = vld [vmem:[#allocation3 + $0xc8] sm:$0xff] }
 0x8a9   :  { %6162 = vst.msk [vmem:[#allocation3 + $0xd8] sm:$0xff] %vm2659_vm11, %v5998_v29  ;;  %6161 = vst.msk [vmem:[#allocation3 + $0xd0] sm:$0xff] %vm2659_vm11, %v5996_v15  ;;  %7739 = vmatprep.mubr.msk.f32.mxu1 %vm3067_vm14, %v6489_v31  ;;  %v7122_v15 = vld [vmem:[%s13978_s0 + $0x8] sm:$0xff] }
 0x8aa   :  { %5769 = vrot.lane.b32.xlu1 %v15471_v0, %s7841_s29  ;;  %5767 = vrot.lane.b32.xlu0 %v15472_v42, %s7841_s29 }
 0x8ab   :  { %7740 = vmatmul.mubr.msk.f32.gmra.mxu1 %vm3067_vm14, %v6490_v25 }
 0x8ac   :  { %v6264_v44 = vpop.permute.xlu1 %6263  ;;  %v6262_v38 = vpop.permute.xlu0 %6261 }
 0x8ad   :  { %6428 = vst.msk [vmem:[#allocation3 + $0xd8] sm:$0xff] %vm2926_vm13, %v6264_v44  ;;  %6427 = vst.msk [vmem:[#allocation3 + $0xd0] sm:$0xff] %vm2926_vm13, %v6262_v38  ;;  %v7121_v44 = vld [vmem:[%s13978_s0] sm:$0xff] }
 0x8ae   :  { %6037 = vrot.lane.b32.xlu1 %v15473_v7, %s7842_s30  ;;  %6035 = vrot.lane.b32.xlu0 %v15474_v6, %s7842_s30  ;;  %v15496_v6 = vld [vmem:[#allocation18_spill] sm:$0xff] }
 0x8b0   :  { %v5734_v46 = vpop.permute.xlu1 %5733  ;;  %v5732_v20 = vpop.permute.xlu0 %5731 }
 0x8b1   :  { %5896 = vst.msk [vmem:[#allocation3 + $0xe8] sm:$0xff] %vm2390_vm10, %v5734_v46  ;;  %5895 = vst.msk [vmem:[#allocation3 + $0xe0] sm:$0xff] %vm2390_vm10, %v5732_v20  ;;  %v15497_v46 = vld [vmem:[#allocation115_spill] sm:$0xff] }
 0x8b2   :  { %6303 = vrot.lane.b32.xlu1 %v15475_v39, %s7843_s17  ;;  %6301 = vrot.lane.b32.xlu0 %v15476_v43, %s7843_s17 }
 0x8b4   :  { %v6002_v17 = vpop.permute.xlu1 %6001  ;;  %v6000_v61 = vpop.permute.xlu0 %5999  ;;  %v6491_v41 = vld [vmem:[#allocation3 + $0xd0] sm:$0xff]  ;;  %v6492_v57 = vld [vmem:[#allocation3 + $0xd8] sm:$0xff] }
 0x8b5   :  { %6164 = vst.msk [vmem:[#allocation3 + $0xe8] sm:$0xff] %vm2659_vm11, %v6002_v17  ;;  %6163 = vst.msk [vmem:[#allocation3 + $0xe0] sm:$0xff] %vm2659_vm11, %v6000_v61  ;;  %7742 = vmatprep.mubr.msk.f32.mxu1 %vm3067_vm14, %v6491_v41  ;;  %v15498_v17 = vld [vmem:[#allocation159_spill] sm:$0xff] }
 0x8b6   :  { %5773 = vrot.lane.b32.xlu1 %v15477_v4, %s7841_s29  ;;  %5771 = vrot.lane.b32.xlu0 %v15478_v37, %s7841_s29  ;;  %v15499_v37 = vld [vmem:[#allocation26_spill] sm:$0xff] }
 0x8b7   :  { %7743 = vmatmul.mubr.msk.f32.gmra.mxu1 %vm3067_vm14, %v6492_v57 }
 0x8b8   :  { %v6268_v34 = vpop.permute.xlu1 %6267  ;;  %v6266_v3 = vpop.permute.xlu0 %6265 }
 0x8b9   :  { %6430 = vst.msk [vmem:[#allocation3 + $0xe8] sm:$0xff] %vm2926_vm13, %v6268_v34  ;;  %6429 = vst.msk [vmem:[#allocation3 + $0xe0] sm:$0xff] %vm2926_vm13, %v6266_v3  ;;  %v15500_v34 = vld [vmem:[#allocation116_spill] sm:$0xff]  ;;  %v7124_v3 = vld [vmem:[%s13978_s0 + $0x18] sm:$0xff] }
 0x8ba   :  { %6041 = vrot.lane.b32.xlu1 %v15479_v33, %s7842_s30  ;;  %6039 = vrot.lane.b32.xlu0 %v15480_v21, %s7842_s30 }
 0x8bc   :  { %v5738_v8 = vpop.permute.xlu1 %5737  ;;  %v5736_v24 = vpop.permute.xlu0 %5735 }
 0x8bd   :  { %5898 = vst.msk [vmem:[#allocation3 + $0xf8] sm:$0xff] %vm2390_vm10, %v5738_v8  ;;  %5897 = vst.msk [vmem:[#allocation3 + $0xf0] sm:$0xff] %vm2390_vm10, %v5736_v24 }
 0x8be   :  { %6307 = vrot.lane.b32.xlu1 %v15481_v14, %s7843_s17  ;;  %6305 = vrot.lane.b32.xlu0 %v15482_v19, %s7843_s17  ;;  %v7123_v14 = vld [vmem:[%s13978_s0 + $0x10] sm:$0xff] }
 0x8c0   :  { %v6006_v10 = vpop.permute.xlu1 %6005  ;;  %v6004_v35 = vpop.permute.xlu0 %6003  ;;  %v6493_v55 = vld [vmem:[#allocation3 + $0xe0] sm:$0xff]  ;;  %v6494_v59 = vld [vmem:[#allocation3 + $0xe8] sm:$0xff] }
 0x8c1   :  { %6166 = vst.msk [vmem:[#allocation3 + $0xf8] sm:$0xff] %vm2659_vm11, %v6006_v10  ;;  %6165 = vst.msk [vmem:[#allocation3 + $0xf0] sm:$0xff] %vm2659_vm11, %v6004_v35  ;;  %7745 = vmatprep.mubr.msk.f32.mxu1 %vm3067_vm14, %v6493_v55  ;;  %v15501_v35 = vld [vmem:[#allocation117_spill] sm:$0xff]  ;;  %v15502_v55 = vld [vmem:[#allocation35_spill] sm:$0xff] }
 0x8c2   :  { %5777 = vrot.lane.b32.xlu1 %v15483_v40, %s7841_s29  ;;  %5775 = vrot.lane.b32.xlu0 %v15484_v9, %s7841_s29 }
 0x8c3   :  { %7746 = vmatmul.mubr.msk.f32.gmra.mxu1 %vm3067_vm14, %v6494_v59 }
 0x8c4   :  { %v6272_v23 = vpop.permute.xlu1 %6271  ;;  %v6270_v53 = vpop.permute.xlu0 %6269 }
 0x8c5   :  { %6432 = vst.msk [vmem:[#allocation3 + $0xf8] sm:$0xff] %vm2926_vm13, %v6272_v23  ;;  %6431 = vst.msk [vmem:[#allocation3 + $0xf0] sm:$0xff] %vm2926_vm13, %v6270_v53  ;;  %v15503_v23 = vld [vmem:[#allocation5_spill] sm:$0xff] }
 0x8c6   :  { %6045 = vrot.lane.b32.xlu1 %v15485_v48, %s7842_s30  ;;  %6043 = vrot.lane.b32.xlu0 %v15486_v22, %s7842_s30 }
 0x8c8   :  { %v5742_v11 = vpop.permute.xlu1 %5741  ;;  %v5740_v47 = vpop.permute.xlu0 %5739 }
 0x8c9   :  { %5900 = vst.msk [vmem:[#allocation3 + $0x108] sm:$0xff] %vm2390_vm10, %v5742_v11  ;;  %5899 = vst.msk [vmem:[#allocation3 + $0x100] sm:$0xff] %vm2390_vm10, %v5740_v47  ;;  %v15504_v47 = vld [vmem:[#allocation118_spill] sm:$0xff] }
 0x8ca   :  { %6311 = vrot.lane.b32.xlu1 %v15487_v27, %s7843_s17  ;;  %6309 = vrot.lane.b32.xlu0 %v15488_v12, %s7843_s17  ;;  %v15505_v27 = vld [vmem:[#allocation119_spill] sm:$0xff]  ;;  %v7126_v12 = vld [vmem:[%s13978_s0 + $0x28] sm:$0xff] }
 0x8cc   :  { %v6010_v56 = vpop.permute.xlu1 %6009  ;;  %v6008_v2 = vpop.permute.xlu0 %6007  ;;  %v6495_v58 = vld [vmem:[#allocation3 + $0xf0] sm:$0xff]  ;;  %v6496_v16 = vld [vmem:[#allocation3 + $0xf8] sm:$0xff] }
 0x8cd   :  { %6168 = vst.msk [vmem:[#allocation3 + $0x108] sm:$0xff] %vm2659_vm11, %v6010_v56  ;;  %6167 = vst.msk [vmem:[#allocation3 + $0x100] sm:$0xff] %vm2659_vm11, %v6008_v2  ;;  %7748 = vmatprep.mubr.msk.f32.mxu1 %vm3067_vm14, %v6495_v58 }
 0x8ce   :  { %5781 = vrot.lane.b32.xlu1 %v15489_v18, %s7841_s29  ;;  %5779 = vrot.lane.b32.xlu0 %v15490_v26, %s7841_s29  ;;  %v7125_v18 = vld [vmem:[%s13978_s0 + $0x20] sm:$0xff] }
 0x8cf   :  { %7749 = vmatmul.mubr.msk.f32.gmra.mxu1 %vm3067_vm14, %v6496_v16 }
 0x8d0   :  { %v6276_v60 = vpop.permute.xlu1 %6275  ;;  %v6274_v49 = vpop.permute.xlu0 %6273 }
 0x8d1   :  { %6434 = vst.msk [vmem:[#allocation3 + $0x108] sm:$0xff] %vm2926_vm13, %v6276_v60  ;;  %6433 = vst.msk [vmem:[#allocation3 + $0x100] sm:$0xff] %vm2926_vm13, %v6274_v49  ;;  %v15506_v49 = vld [vmem:[#allocation47_spill] sm:$0xff] }
 0x8d2   :  { %6049 = vrot.lane.b32.xlu1 %v15491_v13, %s7842_s30  ;;  %6047 = vrot.lane.b32.xlu0 %v15492_v28, %s7842_s30  ;;  %v15507_v13 = vld [vmem:[#allocation120_spill] sm:$0xff] }
 0x8d4   :  { %v5746_v54 = vpop.permute.xlu1 %5745  ;;  %v5744_v30 = vpop.permute.xlu0 %5743 }
 0x8d5   :  { %5902 = vst.msk [vmem:[#allocation3 + $0x118] sm:$0xff] %vm2390_vm10, %v5746_v54  ;;  %5901 = vst.msk [vmem:[#allocation3 + $0x110] sm:$0xff] %vm2390_vm10, %v5744_v30 }
 0x8d6   :  { %6315 = vrot.lane.b32.xlu1 %v15493_v1, %s7843_s17  ;;  %6313 = vrot.lane.b32.xlu0 %v15392_v36, %s7843_s17  ;;  %v15495_v36 = vld [vmem:[#allocation114_spill] sm:$0xff]  ;;  %v15508_v1 = vld [vmem:[#allocation160_spill] sm:$0xff] }
 0x8d8   :  { %v6014_v62 = vpop.permute.xlu1 %6013  ;;  %v6012_v51 = vpop.permute.xlu0 %6011  ;;  %v6497_v45 = vld [vmem:[#allocation3 + $0x100] sm:$0xff]  ;;  %v6498_v52 = vld [vmem:[#allocation3 + $0x108] sm:$0xff] }
 0x8d9   :  { %6170 = vst.msk [vmem:[#allocation3 + $0x118] sm:$0xff] %vm2659_vm11, %v6014_v62  ;;  %6169 = vst.msk [vmem:[#allocation3 + $0x110] sm:$0xff] %vm2659_vm11, %v6012_v51  ;;  %7751 = vmatprep.mubr.msk.f32.mxu1 %vm3067_vm14, %v6497_v45 }
 0x8da   :  { %5785 = vrot.lane.b32.xlu1 %v15494_v5, %s7841_s29  ;;  %5783 = vrot.lane.b32.xlu0 %v15495_v36, %s7841_s29  ;;  %v15509_v5 = vld [vmem:[#allocation30_spill] sm:$0xff] }
 0x8db   :  { %v7705_v29 = vpop.f32.mrf.mxu1  ;;  %7752 = vmatmul.mubr.msk.f32.gmra.mxu1 %vm3067_vm14, %v6498_v52 }
 0x8dc   :  { %v6808_v31 = vadd.f32 %v7705_v29, %v13276_v63  ;;  %v6280_v25 = vpop.permute.xlu1 %6279  ;;  %v6278_v0 = vpop.permute.xlu0 %6277  ;;  %v7128_v29 = vld [vmem:[%s13978_s0 + $0x38] sm:$0xff] }
 0x8dd   :  { %6436 = vst.msk [vmem:[#allocation3 + $0x118] sm:$0xff] %vm2926_vm13, %v6280_v25  ;;  %v6802_v42 = vpop.f32.mrf.mxu1  ;;  %6435 = vst.msk [vmem:[#allocation3 + $0x110] sm:$0xff] %vm2926_vm13, %v6278_v0 }
 0x8de   :  { %v7186_v38 = vadd.f32 %v7122_v15, %v6808_v31  ;;  %v6803_v7 = vadd.f32 %v13276_v63, %v6802_v42  ;;  %6053 = vrot.lane.b32.xlu1 %v15496_v6, %s7842_s30  ;;  %6051 = vrot.lane.b32.xlu0 %v15497_v46, %s7842_s30  ;;  %v7127_v42 = vld [vmem:[%s13978_s0 + $0x30] sm:$0xff] }
 0x8df   :  { %v7832_v6 = vld [vmem:[#allocation2 + $0x330] sm:$0xff] }
 0x8e0   :  { %7250 = vst.msk [vmem:[%s13983_s5 + $0x8] sm:$0xff] %vm20_vm0, %v7186_v38  ;;  %v7185_v20 = vadd.f32 %v7121_v44, %v6803_v7  ;;  %v5750_v39 = vpop.permute.xlu1 %5749  ;;  %v5748_v43 = vpop.permute.xlu0 %5747  ;;  %v7831_v7 = vld [vmem:[#allocation2 + $0x338] sm:$0xff] }
 0x8e1   :  { %5904 = vst.msk [vmem:[#allocation3 + $0x128] sm:$0xff] %vm2390_vm10, %v5750_v39  ;;  %5903 = vst.msk [vmem:[#allocation3 + $0x120] sm:$0xff] %vm2390_vm10, %v5748_v43  ;;  %v5411_v43 = vrot.slane %v7831_v7, 2 }
 0x8e2   :  { %7249 = vst.msk [vmem:[%s13983_s5] sm:$0xff] %vm20_vm0, %v7185_v20  ;;  %6319 = vrot.lane.b32.xlu1 %v15393_v32, %s7843_s17  ;;  %6317 = vrot.lane.b32.xlu0 %v15498_v17, %s7843_s17  ;;  %v5410_v17 = vrot.slane %v7832_v6, 2 }
 0x8e4   :  { %v6018_v61 = vpop.permute.xlu1 %6017  ;;  %v6016_v41 = vpop.permute.xlu0 %6015  ;;  %v6499_v57 = vld [vmem:[#allocation3 + $0x110] sm:$0xff]  ;;  %v6500_v4 = vld [vmem:[#allocation3 + $0x118] sm:$0xff] }
 0x8e5   :  { %6172 = vst.msk [vmem:[#allocation3 + $0x128] sm:$0xff] %vm2659_vm11, %v6018_v61  ;;  %6171 = vst.msk [vmem:[#allocation3 + $0x120] sm:$0xff] %vm2659_vm11, %v6016_v41  ;;  %7754 = vmatprep.mubr.msk.f32.mxu1 %vm3067_vm14, %v6499_v57  ;;  %v15510_v61 = vld [vmem:[#allocation24_spill] sm:$0xff]  ;;  %v15511_v41 = vld [vmem:[#allocation25_spill] sm:$0xff] }
 0x8e6   :  { %5789 = vrot.lane.b32.xlu1 %v15499_v37, %s7841_s29  ;;  %5787 = vrot.lane.b32.xlu0 %v15500_v34, %s7841_s29 }
 0x8e7   :  { %v7708_v32 = vpop.f32.mrf.mxu1  ;;  %7755 = vmatmul.mubr.msk.f32.gmra.mxu1 %vm3067_vm14, %v6500_v4 }
 0x8e8   :  { %v6818_v33 = vadd.f32 %v7708_v32, %v13276_v63  ;;  %v6284_v21 = vpop.permute.xlu1 %6283  ;;  %v6282_v8 = vpop.permute.xlu0 %6281  ;;  %v5412_v32 = vsel %vm979_vm4, %v5410_v17, %v5411_v43 }
 0x8e9   :  { %6438 = vst.msk [vmem:[#allocation3 + $0x128] sm:$0xff] %vm2926_vm13, %v6284_v21  ;;  %v6812_v24 = vpop.f32.mrf.mxu1  ;;  %6437 = vst.msk [vmem:[#allocation3 + $0x120] sm:$0xff] %vm2926_vm13, %v6282_v8  ;;  %v7130_v8 = vld [vmem:[%s13978_s0 + $0x48] sm:$0xff] }
 0x8ea   :  { %v7188_v19 = vadd.f32 %v7124_v3, %v6818_v33  ;;  %v6813_v10 = vadd.f32 %v13276_v63, %v6812_v24  ;;  %6057 = vrot.lane.b32.xlu1 %v15501_v35, %s7842_s30  ;;  %6055 = vrot.lane.b32.xlu0 %v15502_v55, %s7842_s30  ;;  %v7833_v3 = vld [vmem:[#allocation2 + $0x340] sm:$0x3]  ;;  %v3883_v35 = vld [vmem:[#allocation2 + $0x350] sm:$0xff] }
 0x8eb   :  { %v5413_v33 = vrot.slane %v7833_v3, 2 }
 0x8ec   :  { %7252 = vst.msk [vmem:[%s13983_s5 + $0x18] sm:$0xff] %vm20_vm0, %v7188_v19  ;;  %v7187_v59 = vadd.f32 %v7123_v14, %v6813_v10  ;;  %v5754_v40 = vpop.permute.xlu1 %5753  ;;  %v5752_v9 = vpop.permute.xlu0 %5751  ;;  %v3882_v10 = vld [vmem:[#allocation2 + $0x348] sm:$0xff] }
 0x8ed   :  { %5906 = vst.msk [vmem:[#allocation3 + $0x138] sm:$0xff] %vm2390_vm10, %v5754_v40  ;;  %5905 = vst.msk [vmem:[#allocation3 + $0x130] sm:$0xff] %vm2390_vm10, %v5752_v9  ;;  %v5414_v40 = vsel %vm979_vm4, %v5411_v43, %v5413_v33  ;;  %v3884_v9 = vld [vmem:[#allocation2 + $0x358] sm:$0x3]  ;;  %v7133_v43 = vld [vmem:[%s13978_s0 + $0x60] sm:$0xff] }
 0x8ee   :  { %7251 = vst.msk [vmem:[%s13983_s5 + $0x10] sm:$0xff] %vm20_vm0, %v7187_v59  ;;  %6323 = vrot.lane.b32.xlu1 %v12115_v50, %s7843_s17  ;;  %6321 = vrot.lane.b32.xlu0 %v15503_v23, %s7843_s17  ;;  %v7129_v59 = vld [vmem:[%s13978_s0 + $0x40] sm:$0xff] }
 0x8f0   :  { %v6022_v53 = vpop.permute.xlu1 %6021  ;;  %v6020_v48 = vpop.permute.xlu0 %6019  ;;  %v6501_v22 = vld [vmem:[#allocation3 + $0x120] sm:$0xff]  ;;  %v6502_v11 = vld [vmem:[#allocation3 + $0x128] sm:$0xff] }
 0x8f1   :  { %6174 = vst.msk [vmem:[#allocation3 + $0x138] sm:$0xff] %vm2659_vm11, %v6022_v53  ;;  %6173 = vst.msk [vmem:[#allocation3 + $0x130] sm:$0xff] %vm2659_vm11, %v6020_v48  ;;  %7757 = vmatprep.mubr.msk.f32.mxu1 %vm3067_vm14, %v6501_v22  ;;  %v5938_v48 = vrot.slane %v3882_v10, 1  ;;  %v5939_v22 = vrot.slane %v3883_v35, 1 }
 0x8f2   :  { %5793 = vrot.lane.b32.xlu1 %v15504_v47, %s7841_s29  ;;  %5791 = vrot.lane.b32.xlu0 %v15505_v27, %s7841_s29 }
 0x8f3   :  { %v7711_v50 = vpop.f32.mrf.mxu1  ;;  %7758 = vmatmul.mubr.msk.f32.gmra.mxu1 %vm3067_vm14, %v6502_v11 }
 0x8f4   :  { %v6828_v56 = vadd.f32 %v7711_v50, %v13276_v63  ;;  %v6288_v2 = vpop.permute.xlu1 %6287  ;;  %v6286_v58 = vpop.permute.xlu0 %6285  ;;  %v5941_v50 = vrot.slane %v3884_v9, 1 }
 0x8f5   :  { %6440 = vst.msk [vmem:[#allocation3 + $0x138] sm:$0xff] %vm2926_vm13, %v6288_v2  ;;  %6439 = vst.msk [vmem:[#allocation3 + $0x130] sm:$0xff] %vm2926_vm13, %v6286_v58  ;;  %v6822_v16 = vpop.f32.mrf.mxu1  ;;  %v5940_v2 = vsel %vm561_vm2, %v5938_v48, %v5939_v22 }
 0x8f6   :  { %v7190_v26 = vadd.f32 %v7126_v12, %v6828_v56  ;;  %v6823_v60 = vadd.f32 %v13276_v63, %v6822_v16  ;;  %6061 = vrot.lane.b32.xlu1 %v15506_v49, %s7842_s30  ;;  %6059 = vrot.lane.b32.xlu0 %v15507_v13, %s7842_s30  ;;  %v6204_v12 = vrot.slane %v3882_v10, 2  ;;  %v6205_v56 = vrot.slane %v3883_v35, 2 }
 0x8f7   :  { %v6207_v49 = vrot.slane %v3884_v9, 2 }
 0x8f8   :  { %7254 = vst.msk [vmem:[%s13983_s5 + $0x28] sm:$0xff] %vm20_vm0, %v7190_v26  ;;  %v7189_v28 = vadd.f32 %v7125_v18, %v6823_v60  ;;  %v5758_v54 = vpop.permute.xlu1 %5757  ;;  %v5756_v30 = vpop.permute.xlu0 %5755  ;;  %v5942_v60 = vsel %vm561_vm2, %v5939_v22, %v5941_v50 }
 0x8f9   :  { %5908 = vst.msk [vmem:[#allocation3 + $0x148] sm:$0xff] %vm2390_vm10, %v5758_v54  ;;  %5907 = vst.msk [vmem:[#allocation3 + $0x140] sm:$0xff] %vm2390_vm10, %v5756_v30  ;;  %v6206_v54 = vsel %vm979_vm4, %v6204_v12, %v6205_v56 }
 0x8fa   :  { %7253 = vst.msk [vmem:[%s13983_s5 + $0x20] sm:$0xff] %vm20_vm0, %v7189_v28  ;;  %5535 = vrot.lane.b32.xlu1 %v15508_v1, %s7840_s28  ;;  %6325 = vrot.lane.b32.xlu0 %v15508_v1, %s7843_s17  ;;  %v7132_v28 = vld [vmem:[%s13978_s0 + $0x58] sm:$0xff] }
 0x8fc   :  { %v6026_v62 = vpop.permute.xlu1 %6025  ;;  %v6024_v51 = vpop.permute.xlu0 %6023  ;;  %v6503_v45 = vld [vmem:[#allocation3 + $0x130] sm:$0xff]  ;;  %v6504_v52 = vld [vmem:[#allocation3 + $0x138] sm:$0xff] }
 0x8fd   :  { %6176 = vst.msk [vmem:[#allocation3 + $0x148] sm:$0xff] %vm2659_vm11, %v6026_v62  ;;  %6175 = vst.msk [vmem:[#allocation3 + $0x140] sm:$0xff] %vm2659_vm11, %v6024_v51  ;;  %7760 = vmatprep.mubr.msk.f32.mxu1 %vm3067_vm14, %v6503_v45  ;;  %v6208_v51 = vsel %vm979_vm4, %v6205_v56, %v6207_v49 }
 0x8fe   :  { %5537 = vrot.lane.b32.xlu1 %v15509_v5, %s7840_s28  ;;  %6327 = vrot.lane.b32.xlu0 %v15509_v5, %s7843_s17 }
 0x8ff   :  { %v7714_v36 = vpop.f32.mrf.mxu1  ;;  %7761 = vmatmul.mubr.msk.f32.gmra.mxu1 %vm3067_vm14, %v6504_v52  ;;  %v7131_v52 = vld [vmem:[%s13978_s0 + $0x50] sm:$0xff] }
 0x900   :  { %v6838_v15 = vadd.f32 %v7714_v36, %v13276_v63  ;;  %v6292_v31 = vpop.permute.xlu1 %6291  ;;  %v6290_v25 = vpop.permute.xlu0 %6289 }
 0x901   :  { %6442 = vst.msk [vmem:[#allocation3 + $0x148] sm:$0xff] %vm2926_vm13, %v6292_v31  ;;  %6441 = vst.msk [vmem:[#allocation3 + $0x140] sm:$0xff] %vm2926_vm13, %v6290_v25  ;;  %v6832_v0 = vpop.f32.mrf.mxu1 }
 0x902   :  { %v7192_v44 = vadd.f32 %v7128_v29, %v6838_v15  ;;  %v6833_v38 = vadd.f32 %v13276_v63, %v6832_v0  ;;  %5797 = vrot.lane.b32.xlu1 %v7831_v7, %s7841_s29  ;;  %5795 = vrot.lane.b32.xlu0 %v7832_v6, %s7841_s29  ;;  %v7134_v7 = vld [vmem:[%s13978_s0 + $0x68] sm:$0xff] }
 0x904   :  { %7256 = vst.msk [vmem:[%s13983_s5 + $0x38] sm:$0xff] %vm20_vm0, %v7192_v44  ;;  %v7191_v46 = vadd.f32 %v7127_v42, %v6833_v38  ;;  %v5762_v20 = vpop.permute.xlu1 %5761  ;;  %v5760_v39 = vpop.permute.xlu0 %5759 }
 0x905   :  { %5910 = vst.msk [vmem:[#allocation3 + $0x158] sm:$0xff] %vm2390_vm10, %v5762_v20  ;;  %5909 = vst.msk [vmem:[#allocation3 + $0x150] sm:$0xff] %vm2390_vm10, %v5760_v39 }
 0x906   :  { %7255 = vst.msk [vmem:[%s13983_s5 + $0x30] sm:$0xff] %vm20_vm0, %v7191_v46  ;;  %6065 = vrot.lane.b32.xlu1 %v15510_v61, %s7842_s30  ;;  %6063 = vrot.lane.b32.xlu0 %v15511_v41, %s7842_s30 }
 0x908   :  { %v6030_v57 = vpop.permute.xlu1 %6029  ;;  %v6028_v4 = vpop.permute.xlu0 %6027  ;;  %v6505_v37 = vld [vmem:[#allocation3 + $0x140] sm:$0xff]  ;;  %v6506_v34 = vld [vmem:[#allocation3 + $0x148] sm:$0xff] }
 0x909   :  { %6178 = vst.msk [vmem:[#allocation3 + $0x158] sm:$0xff] %vm2659_vm11, %v6030_v57  ;;  %6177 = vst.msk [vmem:[#allocation3 + $0x150] sm:$0xff] %vm2659_vm11, %v6028_v4  ;;  %7763 = vmatprep.mubr.msk.f32.mxu1 %vm3067_vm14, %v6505_v37 }
 0x90a   :  { %5539 = vrot.lane.b32.xlu1 %v5412_v32, %s7840_s28  ;;  %6329 = vrot.lane.b32.xlu0 %v5412_v32, %s7843_s17 }
 0x90b   :  { %v7717_v21 = vpop.f32.mrf.mxu1  ;;  %7764 = vmatmul.mubr.msk.f32.gmra.mxu1 %vm3067_vm14, %v6506_v34 }
 0x90c   :  { %v6848_v24 = vadd.f32 %v7717_v21, %v13276_v63  ;;  %v6296_v14 = vpop.permute.xlu1 %6295  ;;  %v6294_v19 = vpop.permute.xlu0 %6293  ;;  %v7136_v21 = vld [vmem:[%s13978_s0 + $0x78] sm:$0xff] }
 0x90d   :  { %6444 = vst.msk [vmem:[#allocation3 + $0x158] sm:$0xff] %vm2926_vm13, %v6296_v14  ;;  %6443 = vst.msk [vmem:[#allocation3 + $0x150] sm:$0xff] %vm2926_vm13, %v6294_v19  ;;  %v6842_v55 = vpop.f32.mrf.mxu1 }
 0x90e   :  { %v7194_v23 = vadd.f32 %v7130_v8, %v6848_v24  ;;  %v6843_v53 = vadd.f32 %v13276_v63, %v6842_v55  ;;  %5541 = vrot.lane.b32.xlu1 %v5414_v40, %s7840_s28  ;;  %6331 = vrot.lane.b32.xlu0 %v5414_v40, %s7843_s17 }
 0x910   :  { %7258 = vst.msk [vmem:[%s13983_s5 + $0x48] sm:$0xff] %vm20_vm0, %v7194_v23  ;;  %v7193_v11 = vadd.f32 %v7129_v59, %v6843_v53  ;;  %v5766_v47 = vpop.permute.xlu1 %5765  ;;  %v5764_v27 = vpop.permute.xlu0 %5763 }
 0x911   :  { %5912 = vst.msk [vmem:[#allocation3 + $0x168] sm:$0xff] %vm2390_vm10, %v5766_v47  ;;  %5911 = vst.msk [vmem:[#allocation3 + $0x160] sm:$0xff] %vm2390_vm10, %v5764_v27  ;;  %v7138_v47 = vld [vmem:[%s13978_s0 + $0x88] sm:$0xff] }
 0x912   :  { %7257 = vst.msk [vmem:[%s13983_s5 + $0x40] sm:$0xff] %vm20_vm0, %v7193_v11  ;;  %5799 = vrot.lane.b32.xlu0 %v3882_v10, %s7841_s29  ;;  %5801 = vrot.lane.b32.xlu1 %v3883_v35, %s7841_s29  ;;  %v7135_v10 = vld [vmem:[%s13978_s0 + $0x70] sm:$0xff] }
 0x914   :  { %v6034_v58 = vpop.permute.xlu1 %6033  ;;  %v6032_v16 = vpop.permute.xlu0 %6031  ;;  %v6507_v18 = vld [vmem:[#allocation3 + $0x150] sm:$0xff]  ;;  %v6508_v26 = vld [vmem:[#allocation3 + $0x158] sm:$0xff] }
 0x915   :  { %6180 = vst.msk [vmem:[#allocation3 + $0x168] sm:$0xff] %vm2659_vm11, %v6034_v58  ;;  %6179 = vst.msk [vmem:[#allocation3 + $0x160] sm:$0xff] %vm2659_vm11, %v6032_v16  ;;  %7766 = vmatprep.mubr.msk.f32.mxu1 %vm3067_vm14, %v6507_v18 }
 0x916   :  { %6067 = vrot.lane.b32.xlu0 %v5940_v2, %s7842_s30  ;;  %7767 = vmatmul.mubr.msk.f32.gmra.mxu1 %vm3067_vm14, %v6508_v26  ;;  %v7137_v2 = vld [vmem:[%s13978_s0 + $0x80] sm:$0xff] }
 0x917   :  { %v7720_v13 = vpop.f32.mrf.mxu1  ;;  %6069 = vrot.lane.b32.xlu1 %v5942_v60, %s7842_s30 }
 0x918   :  { %v6858_v30 = vadd.f32 %v7720_v13, %v13276_v63  ;;  %v6300_v1 = vpop.permute.xlu1 %6299  ;;  %v6298_v62 = vpop.permute.xlu0 %6297 }
 0x919   :  { %6446 = vst.msk [vmem:[#allocation3 + $0x168] sm:$0xff] %vm2926_vm13, %v6300_v1  ;;  %6445 = vst.msk [vmem:[#allocation3 + $0x160] sm:$0xff] %vm2926_vm13, %v6298_v62  ;;  %v6852_v45 = vpop.f32.mrf.mxu1  ;;  %v7140_v1 = vld [vmem:[%s13978_s0 + $0x98] sm:$0xff] }
 0x91a   :  { %v7196_v5 = vadd.f32 %v7132_v28, %v6858_v30  ;;  %v6853_v36 = vadd.f32 %v13276_v63, %v6852_v45  ;;  %6333 = vrot.lane.b32.xlu0 %v6206_v54, %s7843_s17 }
 0x91b   :  { %6335 = vrot.lane.b32.xlu1 %v6208_v51, %s7843_s17 }
 0x91c   :  { %7260 = vst.msk [vmem:[%s13983_s5 + $0x58] sm:$0xff] %vm20_vm0, %v7196_v5  ;;  %v7195_v29 = vadd.f32 %v7131_v52, %v6853_v36  ;;  %v5770_v15 = vpop.permute.xlu1 %5769  ;;  %v5768_v31 = vpop.permute.xlu0 %5767  ;;  %v7139_v5 = vld [vmem:[%s13978_s0 + $0x90] sm:$0xff] }
 0x91d   :  { %5914 = vst.msk [vmem:[#allocation3 + $0x178] sm:$0xff] %vm2390_vm10, %v5770_v15  ;;  %5913 = vst.msk [vmem:[#allocation3 + $0x170] sm:$0xff] %vm2390_vm10, %v5768_v31 }
 0x91e   :  { %7259 = vst.msk [vmem:[%s13983_s5 + $0x50] sm:$0xff] %vm20_vm0, %v7195_v29 }
 0x920   :  { %v6038_v25 = vpop.permute.xlu1 %6037  ;;  %v6036_v0 = vpop.permute.xlu0 %6035  ;;  %v6509_v42 = vld [vmem:[#allocation3 + $0x160] sm:$0xff]  ;;  %v6510_v44 = vld [vmem:[#allocation3 + $0x168] sm:$0xff] }
 0x921   :  { %6182 = vst.msk [vmem:[#allocation3 + $0x178] sm:$0xff] %vm2659_vm11, %v6038_v25  ;;  %6181 = vst.msk [vmem:[#allocation3 + $0x170] sm:$0xff] %vm2659_vm11, %v6036_v0  ;;  %7769 = vmatprep.mubr.msk.f32.mxu1 %vm3067_vm14, %v6509_v42 }
 0x922   :  { %7770 = vmatmul.mubr.msk.f32.gmra.mxu1 %vm3067_vm14, %v6510_v44 }
 0x923   :  { %v7723_v38 = vpop.f32.mrf.mxu1 }
 0x924   :  { %v6868_v6 = vadd.f32 %v7723_v38, %v13276_v63  ;;  %v6304_v46 = vpop.permute.xlu1 %6303  ;;  %v6302_v20 = vpop.permute.xlu0 %6301 }
 0x925   :  { %6448 = vst.msk [vmem:[#allocation3 + $0x178] sm:$0xff] %vm2926_vm13, %v6304_v46  ;;  %6447 = vst.msk [vmem:[#allocation3 + $0x170] sm:$0xff] %vm2926_vm13, %v6302_v20  ;;  %v6862_v39 = vpop.f32.mrf.mxu1 }
 0x926   :  { %v7198_v17 = vadd.f32 %v7134_v7, %v6868_v6  ;;  %v6863_v61 = vadd.f32 %v13276_v63, %v6862_v39  ;;  %v7142_v6 = vld [vmem:[%s13978_s0 + $0xa8] sm:$0xff] }
 0x928   :  { %7262 = vst.msk [vmem:[%s13983_s5 + $0x68] sm:$0xff] %vm20_vm0, %v7198_v17  ;;  %v7197_v41 = vadd.f32 %v7133_v43, %v6863_v61  ;;  %v5774_v57 = vpop.permute.xlu1 %5773  ;;  %v5772_v4 = vpop.permute.xlu0 %5771  ;;  %v7141_v17 = vld [vmem:[%s13978_s0 + $0xa0] sm:$0xff] }
 0x929   :  { %5916 = vst.msk [vmem:[#allocation3 + $0x188] sm:$0xff] %vm2390_vm10, %v5774_v57  ;;  %5915 = vst.msk [vmem:[#allocation3 + $0x180] sm:$0xff] %vm2390_vm10, %v5772_v4 }
 0x92a   :  { %7261 = vst.msk [vmem:[%s13983_s5 + $0x60] sm:$0xff] %vm20_vm0, %v7197_v41 }
 0x92c   :  { %v6042_v37 = vpop.permute.xlu1 %6041  ;;  %v6040_v34 = vpop.permute.xlu0 %6039  ;;  %v6511_v32 = vld [vmem:[#allocation3 + $0x170] sm:$0xff]  ;;  %v6512_v3 = vld [vmem:[#allocation3 + $0x178] sm:$0xff] }
 0x92d   :  { %6184 = vst.msk [vmem:[#allocation3 + $0x188] sm:$0xff] %vm2659_vm11, %v6042_v37  ;;  %6183 = vst.msk [vmem:[#allocation3 + $0x180] sm:$0xff] %vm2659_vm11, %v6040_v34  ;;  %7772 = vmatprep.mubr.msk.f32.mxu1 %vm3067_vm14, %v6511_v32 }
 0x92e   :  { %7773 = vmatmul.mubr.msk.f32.gmra.mxu1 %vm3067_vm14, %v6512_v3 }
 0x92f   :  { %v7726_v33 = vpop.f32.mrf.mxu1 }
 0x930   :  { %v6878_v8 = vadd.f32 %v7726_v33, %v13276_v63  ;;  %v6308_v24 = vpop.permute.xlu1 %6307  ;;  %v6306_v14 = vpop.permute.xlu0 %6305 }
 0x931   :  { %6450 = vst.msk [vmem:[#allocation3 + $0x188] sm:$0xff] %vm2926_vm13, %v6308_v24  ;;  %6449 = vst.msk [vmem:[#allocation3 + $0x180] sm:$0xff] %vm2926_vm13, %v6306_v14  ;;  %v6872_v19 = vpop.f32.mrf.mxu1 }
 0x932   :  { %v7200_v35 = vadd.f32 %v7136_v21, %v6878_v8  ;;  %v6873_v55 = vadd.f32 %v13276_v63, %v6872_v19  ;;  %v7144_v8 = vld [vmem:[%s13978_s0 + $0xb8] sm:$0xff] }
 0x934   :  { %7264 = vst.msk [vmem:[%s13983_s5 + $0x78] sm:$0xff] %vm20_vm0, %v7200_v35  ;;  %v7199_v59 = vadd.f32 %v7135_v10, %v6873_v55  ;;  %v5778_v40 = vpop.permute.xlu1 %5777  ;;  %v5776_v9 = vpop.permute.xlu0 %5775  ;;  %v7143_v35 = vld [vmem:[%s13978_s0 + $0xb0] sm:$0xff] }
 0x935   :  { %5918 = vst.msk [vmem:[#allocation3 + $0x198] sm:$0xff] %vm2390_vm10, %v5778_v40  ;;  %5917 = vst.msk [vmem:[#allocation3 + $0x190] sm:$0xff] %vm2390_vm10, %v5776_v9 }
 0x936   :  { %7263 = vst.msk [vmem:[%s13983_s5 + $0x70] sm:$0xff] %vm20_vm0, %v7199_v59 }
 0x938   :  { %v6046_v23 = vpop.permute.xlu1 %6045  ;;  %v6044_v53 = vpop.permute.xlu0 %6043  ;;  %v6513_v48 = vld [vmem:[#allocation3 + $0x180] sm:$0xff]  ;;  %v6514_v22 = vld [vmem:[#allocation3 + $0x188] sm:$0xff] }
 0x939   :  { %6186 = vst.msk [vmem:[#allocation3 + $0x198] sm:$0xff] %vm2659_vm11, %v6046_v23  ;;  %6185 = vst.msk [vmem:[#allocation3 + $0x190] sm:$0xff] %vm2659_vm11, %v6044_v53  ;;  %7775 = vmatprep.mubr.msk.f32.mxu1 %vm3067_vm14, %v6513_v48 }
 0x93a   :  { %7776 = vmatmul.mubr.msk.f32.gmra.mxu1 %vm3067_vm14, %v6514_v22 }
 0x93b   :  { %v7729_v11 = vpop.f32.mrf.mxu1 }
 0x93c   :  { %v6888_v27 = vadd.f32 %v7729_v11, %v13276_v63  ;;  %v6312_v50 = vpop.permute.xlu1 %6311  ;;  %v6310_v12 = vpop.permute.xlu0 %6309 }
 0x93d   :  { %6452 = vst.msk [vmem:[#allocation3 + $0x198] sm:$0xff] %vm2926_vm13, %v6312_v50  ;;  %6451 = vst.msk [vmem:[#allocation3 + $0x190] sm:$0xff] %vm2926_vm13, %v6310_v12  ;;  %v6882_v56 = vpop.f32.mrf.mxu1 }
 0x93e   :  { %v7202_v58 = vadd.f32 %v7138_v47, %v6888_v27  ;;  %v6883_v16 = vadd.f32 %v13276_v63, %v6882_v56  ;;  %v7146_v27 = vld [vmem:[%s13978_s0 + $0xc8] sm:$0xff] }
 0x940   :  { %7266 = vst.msk [vmem:[%s13983_s5 + $0x88] sm:$0xff] %vm20_vm0, %v7202_v58  ;;  %v7201_v18 = vadd.f32 %v7137_v2, %v6883_v16  ;;  %v5782_v26 = vpop.permute.xlu1 %5781  ;;  %v5780_v60 = vpop.permute.xlu0 %5779  ;;  %v7145_v58 = vld [vmem:[%s13978_s0 + $0xc0] sm:$0xff] }
 0x941   :  { %5920 = vst.msk [vmem:[#allocation3 + $0x1a8] sm:$0xff] %vm2390_vm10, %v5782_v26  ;;  %5919 = vst.msk [vmem:[#allocation3 + $0x1a0] sm:$0xff] %vm2390_vm10, %v5780_v60 }
 0x942   :  { %7265 = vst.msk [vmem:[%s13983_s5 + $0x80] sm:$0xff] %vm20_vm0, %v7201_v18 }
 0x944   :  { %v6050_v49 = vpop.permute.xlu1 %6049  ;;  %v6048_v13 = vpop.permute.xlu0 %6047  ;;  %v6515_v28 = vld [vmem:[#allocation3 + $0x190] sm:$0xff]  ;;  %v6516_v54 = vld [vmem:[#allocation3 + $0x198] sm:$0xff] }
 0x945   :  { %6188 = vst.msk [vmem:[#allocation3 + $0x1a8] sm:$0xff] %vm2659_vm11, %v6050_v49  ;;  %6187 = vst.msk [vmem:[#allocation3 + $0x1a0] sm:$0xff] %vm2659_vm11, %v6048_v13  ;;  %7778 = vmatprep.mubr.msk.f32.mxu1 %vm3067_vm14, %v6515_v28 }
 0x946   :  { %7779 = vmatmul.mubr.msk.f32.gmra.mxu1 %vm3067_vm14, %v6516_v54 }
 0x947   :  { %v7732_v30 = vpop.f32.mrf.mxu1 }
 0x948   :  { %v6898_v62 = vadd.f32 %v7732_v30, %v13276_v63  ;;  %v6316_v51 = vpop.permute.xlu1 %6315  ;;  %v6314_v45 = vpop.permute.xlu0 %6313 }
 0x949   :  { %6454 = vst.msk [vmem:[#allocation3 + $0x1a8] sm:$0xff] %vm2926_vm13, %v6316_v51  ;;  %6453 = vst.msk [vmem:[#allocation3 + $0x1a0] sm:$0xff] %vm2926_vm13, %v6314_v45  ;;  %v6892_v52 = vpop.f32.mrf.mxu1 }
 0x94a   :  { %v7204_v36 = vadd.f32 %v7140_v1, %v6898_v62  ;;  %v6893_v29 = vadd.f32 %v13276_v63, %v6892_v52  ;;  %v7148_v1 = vld [vmem:[%s13978_s0 + $0xd8] sm:$0xff] }
 0x94c   :  { %7268 = vst.msk [vmem:[%s13983_s5 + $0x98] sm:$0xff] %vm20_vm0, %v7204_v36  ;;  %v7203_v15 = vadd.f32 %v7139_v5, %v6893_v29  ;;  %v5786_v31 = vpop.permute.xlu1 %5785  ;;  %v5784_v25 = vpop.permute.xlu0 %5783  ;;  %v7147_v36 = vld [vmem:[%s13978_s0 + $0xd0] sm:$0xff] }
 0x94d   :  { %5922 = vst.msk [vmem:[#allocation3 + $0x1b8] sm:$0xff] %vm2390_vm10, %v5786_v31  ;;  %5921 = vst.msk [vmem:[#allocation3 + $0x1b0] sm:$0xff] %vm2390_vm10, %v5784_v25 }
 0x94e   :  { %7267 = vst.msk [vmem:[%s13983_s5 + $0x90] sm:$0xff] %vm20_vm0, %v7203_v15 }
 0x950   :  { %v6054_v0 = vpop.permute.xlu1 %6053  ;;  %v6052_v42 = vpop.permute.xlu0 %6051  ;;  %v6517_v44 = vld [vmem:[#allocation3 + $0x1a0] sm:$0xff]  ;;  %v6518_v38 = vld [vmem:[#allocation3 + $0x1a8] sm:$0xff] }
 0x951   :  { %6190 = vst.msk [vmem:[#allocation3 + $0x1b8] sm:$0xff] %vm2659_vm11, %v6054_v0  ;;  %6189 = vst.msk [vmem:[#allocation3 + $0x1b0] sm:$0xff] %vm2659_vm11, %v6052_v42  ;;  %7781 = vmatprep.mubr.msk.f32.mxu1 %vm3067_vm14, %v6517_v44 }
 0x952   :  { %7782 = vmatmul.mubr.msk.f32.gmra.mxu1 %vm3067_vm14, %v6518_v38 }
 0x953   :  { %v7735_v7 = vpop.f32.mrf.mxu1 }
 0x954   :  { %v6908_v46 = vadd.f32 %v7735_v7, %v13276_v63  ;;  %v6320_v20 = vpop.permute.xlu1 %6319  ;;  %v6318_v39 = vpop.permute.xlu0 %6317  ;;  %v7150_v7 = vld [vmem:[%s13978_s0 + $0xe8] sm:$0xff] }
 0x955   :  { %6456 = vst.msk [vmem:[#allocation3 + $0x1b8] sm:$0xff] %vm2926_vm13, %v6320_v20  ;;  %6455 = vst.msk [vmem:[#allocation3 + $0x1b0] sm:$0xff] %vm2926_vm13, %v6318_v39  ;;  %v6902_v43 = vpop.f32.mrf.mxu1 }
 0x956   :  { %v7206_v61 = vadd.f32 %v7142_v6, %v6908_v46  ;;  %v6903_v41 = vadd.f32 %v13276_v63, %v6902_v43 }
 0x958   :  { %7270 = vst.msk [vmem:[%s13983_s5 + $0xa8] sm:$0xff] %vm20_vm0, %v7206_v61  ;;  %v7205_v57 = vadd.f32 %v7141_v17, %v6903_v41  ;;  %v5790_v4 = vpop.permute.xlu1 %5789  ;;  %v5788_v37 = vpop.permute.xlu0 %5787  ;;  %v7149_v17 = vld [vmem:[%s13978_s0 + $0xe0] sm:$0xff] }
 0x959   :  { %5924 = vst.msk [vmem:[#allocation3 + $0x1c8] sm:$0xff] %vm2390_vm10, %v5790_v4  ;;  %5923 = vst.msk [vmem:[#allocation3 + $0x1c0] sm:$0xff] %vm2390_vm10, %v5788_v37 }
 0x95a   :  { %7269 = vst.msk [vmem:[%s13983_s5 + $0xa0] sm:$0xff] %vm20_vm0, %v7205_v57 }
 0x95c   :  { %v6058_v34 = vpop.permute.xlu1 %6057  ;;  %v6056_v32 = vpop.permute.xlu0 %6055  ;;  %v6519_v3 = vld [vmem:[#allocation3 + $0x1b0] sm:$0xff]  ;;  %v6520_v33 = vld [vmem:[#allocation3 + $0x1b8] sm:$0xff] }
 0x95d   :  { %6192 = vst.msk [vmem:[#allocation3 + $0x1c8] sm:$0xff] %vm2659_vm11, %v6058_v34  ;;  %6191 = vst.msk [vmem:[#allocation3 + $0x1c0] sm:$0xff] %vm2659_vm11, %v6056_v32  ;;  %7784 = vmatprep.mubr.msk.f32.mxu1 %vm3067_vm14, %v6519_v3 }
 0x95e   :  { %7785 = vmatmul.mubr.msk.f32.gmra.mxu1 %vm3067_vm14, %v6520_v33 }
 0x95f   :  { %v7738_v21 = vpop.f32.mrf.mxu1 }
 0x960   :  { %v6918_v24 = vadd.f32 %v7738_v21, %v13276_v63  ;;  %v6324_v14 = vpop.permute.xlu1 %6323  ;;  %v6322_v19 = vpop.permute.xlu0 %6321  ;;  %v7152_v21 = vld [vmem:[%s13978_s0 + $0xf8] sm:$0xff] }
 0x961   :  { %6458 = vst.msk [vmem:[#allocation3 + $0x1c8] sm:$0xff] %vm2926_vm13, %v6324_v14  ;;  %6457 = vst.msk [vmem:[#allocation3 + $0x1c0] sm:$0xff] %vm2926_vm13, %v6322_v19  ;;  %v6912_v10 = vpop.f32.mrf.mxu1  ;;  %v7151_v14 = vld [vmem:[%s13978_s0 + $0xf0] sm:$0xff] }
 0x962   :  { %v7208_v55 = vadd.f32 %v7144_v8, %v6918_v24  ;;  %v6913_v59 = vadd.f32 %v13276_v63, %v6912_v10 }
 0x964   :  { %7272 = vst.msk [vmem:[%s13983_s5 + $0xb8] sm:$0xff] %vm20_vm0, %v7208_v55  ;;  %v7207_v40 = vadd.f32 %v7143_v35, %v6913_v59  ;;  %v5794_v9 = vpop.permute.xlu1 %5793  ;;  %v5792_v23 = vpop.permute.xlu0 %5791 }
 0x965   :  { %5926 = vst.msk [vmem:[#allocation3 + $0x1d8] sm:$0xff] %vm2390_vm10, %v5794_v9  ;;  %5925 = vst.msk [vmem:[#allocation3 + $0x1d0] sm:$0xff] %vm2390_vm10, %v5792_v23  ;;  %v7154_v9 = vld [vmem:[%s13978_s0 + $0x108] sm:$0xff] }
 0x966   :  { %7271 = vst.msk [vmem:[%s13983_s5 + $0xb0] sm:$0xff] %vm20_vm0, %v7207_v40 }
 0x968   :  { %v6062_v53 = vpop.permute.xlu1 %6061  ;;  %v6060_v48 = vpop.permute.xlu0 %6059  ;;  %v6521_v22 = vld [vmem:[#allocation3 + $0x1c0] sm:$0xff]  ;;  %v6522_v11 = vld [vmem:[#allocation3 + $0x1c8] sm:$0xff] }
 0x969   :  { %6194 = vst.msk [vmem:[#allocation3 + $0x1d8] sm:$0xff] %vm2659_vm11, %v6062_v53  ;;  %6193 = vst.msk [vmem:[#allocation3 + $0x1d0] sm:$0xff] %vm2659_vm11, %v6060_v48  ;;  %7787 = vmatprep.mubr.msk.f32.mxu1 %vm3067_vm14, %v6521_v22  ;;  %v7153_v48 = vld [vmem:[%s13978_s0 + $0x100] sm:$0xff] }
 0x96a   :  { %7788 = vmatmul.mubr.msk.f32.gmra.mxu1 %vm3067_vm14, %v6522_v11 }
 0x96b   :  { %v7741_v47 = vpop.f32.mrf.mxu1 }
 0x96c   :  { %v6928_v50 = vadd.f32 %v7741_v47, %v13276_v63  ;;  %v5536_v12 = vpop.permute.xlu1 %5535  ;;  %v6326_v56 = vpop.permute.xlu0 %6325 }
 0x96d   :  { %5667 = vst.msk [vmem:[#allocation3 + $0x1e0] sm:$0xff] %vm2129_vm9, %v5536_v12  ;;  %v6922_v2 = vpop.f32.mrf.mxu1 }
 0x96e   :  { %6459 = vst.msk [vmem:[#allocation3 + $0x1d0] sm:$0xff] %vm2926_vm13, %v6326_v56  ;;  %v7210_v16 = vadd.f32 %v7146_v27, %v6928_v50  ;;  %v6923_v18 = vadd.f32 %v13276_v63, %v6922_v2  ;;  %v7156_v50 = vld [vmem:[%s13978_s0 + $0x118] sm:$0xff]  ;;  %v7155_v2 = vld [vmem:[%s13978_s0 + $0x110] sm:$0xff] }
 0x970   :  { %7274 = vst.msk [vmem:[%s13983_s5 + $0xc8] sm:$0xff] %vm20_vm0, %v7210_v16  ;;  %v7209_v26 = vadd.f32 %v7145_v58, %v6923_v18  ;;  %v5538_v60 = vpop.permute.xlu1 %5537  ;;  %v6328_v49 = vpop.permute.xlu0 %6327 }
 0x971   :  { %5668 = vst.msk [vmem:[#allocation3 + $0x1e8] sm:$0xff] %vm2129_vm9, %v5538_v60  ;;  %v7158_v60 = vld [vmem:[%s13978_s0 + $0x128] sm:$0xff] }
 0x972   :  { %6460 = vst.msk [vmem:[#allocation3 + $0x1d8] sm:$0xff] %vm2926_vm13, %v6328_v49 }
 0x973   :  { %7273 = vst.msk [vmem:[%s13983_s5 + $0xc0] sm:$0xff] %vm20_vm0, %v7209_v26 }
 0x974   :  { %v5798_v13 = vpop.permute.xlu1 %5797  ;;  %v5796_v28 = vpop.permute.xlu0 %5795 }
 0x975   :  { %v6523_v54 = vld [vmem:[#allocation3 + $0x1d0] sm:$0xff]  ;;  %5928 = vst.msk [vmem:[#allocation3 + $0x1e8] sm:$0xff] %vm2390_vm10, %v5798_v13  ;;  %5927 = vst.msk [vmem:[#allocation3 + $0x1e0] sm:$0xff] %vm2390_vm10, %v5796_v28  ;;  %v7157_v28 = vld [vmem:[%s13978_s0 + $0x120] sm:$0xff] }
 0x976   :  { %7790 = vmatprep.mubr.msk.f32.mxu1 %vm3067_vm14, %v6523_v54 }
 0x977   :  { %v7744_v30 = vpop.f32.mrf.mxu1 }
 0x978   :  { %v6938_v62 = vadd.f32 %v7744_v30, %v13276_v63  ;;  %v6066_v51 = vpop.permute.xlu1 %6065  ;;  %v6064_v45 = vpop.permute.xlu0 %6063 }
 0x979   :  { %v6524_v52 = vld [vmem:[#allocation3 + $0x1d8] sm:$0xff]  ;;  %6196 = vst.msk [vmem:[#allocation3 + $0x1e8] sm:$0xff] %vm2659_vm11, %v6066_v51  ;;  %6195 = vst.msk [vmem:[#allocation3 + $0x1e0] sm:$0xff] %vm2659_vm11, %v6064_v45  ;;  %v6932_v5 = vpop.f32.mrf.mxu1 }
 0x97a   :  { %7791 = vmatmul.mubr.msk.f32.gmra.mxu1 %vm3067_vm14, %v6524_v52  ;;  %v7212_v29 = vadd.f32 %v7148_v1, %v6938_v62  ;;  %v6933_v15 = vadd.f32 %v13276_v63, %v6932_v5  ;;  %v7160_v51 = vld [vmem:[%s13978_s0 + $0x138] sm:$0xff]  ;;  %v7159_v5 = vld [vmem:[%s13978_s0 + $0x130] sm:$0xff] }
 0x97c   :  { %7276 = vst.msk [vmem:[%s13983_s5 + $0xd8] sm:$0xff] %vm20_vm0, %v7212_v29  ;;  %v7211_v31 = vadd.f32 %v7147_v36, %v6933_v15  ;;  %v5540_v25 = vpop.permute.xlu1 %5539  ;;  %v6330_v0 = vpop.permute.xlu0 %6329 }
 0x97d   :  { %5669 = vst.msk [vmem:[#allocation3 + $0x1f0] sm:$0xff] %vm2129_vm9, %v5540_v25  ;;  %v7162_v25 = vld [vmem:[%s13978_s0 + $0x148] sm:$0xff] }
 0x97e   :  { %6461 = vst.msk [vmem:[#allocation3 + $0x1e0] sm:$0xff] %vm2926_vm13, %v6330_v0 }
 0x97f   :  { %7275 = vst.msk [vmem:[%s13983_s5 + $0xd0] sm:$0xff] %vm20_vm0, %v7211_v31 }
 0x980   :  { %v5542_v42 = vpop.permute.xlu1 %5541  ;;  %v6332_v44 = vpop.permute.xlu0 %6331 }
 0x981   :  { %5670 = vst.msk [vmem:[#allocation3 + $0x1f8] sm:$0xff] %vm2129_vm9, %v5542_v42 }
 0x982   :  { %6462 = vst.msk [vmem:[#allocation3 + $0x1e8] sm:$0xff] %vm2926_vm13, %v6332_v44  ;;  %v7161_v44 = vld [vmem:[%s13978_s0 + $0x140] sm:$0xff] }
 0x983   :  { %v7747_v38 = vpop.f32.mrf.mxu1 }
 0x984   :  { %v6948_v6 = vadd.f32 %v7747_v38, %v13276_v63  ;;  %v5800_v46 = vpop.permute.xlu0 %5799  ;;  %v5802_v20 = vpop.permute.xlu1 %5801 }
 0x985   :  { %v6525_v39 = vld [vmem:[#allocation3 + $0x1e0] sm:$0xff]  ;;  %5929 = vst.msk [vmem:[#allocation3 + $0x1f0] sm:$0xff] %vm2390_vm10, %v5800_v46  ;;  %v6942_v43 = vpop.f32.mrf.mxu1  ;;  %5930 = vst.msk [vmem:[#allocation3 + $0x1f8] sm:$0xff] %vm2390_vm10, %v5802_v20  ;;  %v7164_v20 = vld [vmem:[%s13978_s0 + $0x158] sm:$0xff] }
 0x986   :  { %7793 = vmatprep.mubr.msk.f32.mxu1 %vm3067_vm14, %v6525_v39  ;;  %v7214_v61 = vadd.f32 %v7150_v7, %v6948_v6  ;;  %v6943_v41 = vadd.f32 %v13276_v63, %v6942_v43 }
 0x988   :  { %7278 = vst.msk [vmem:[%s13983_s5 + $0xe8] sm:$0xff] %vm20_vm0, %v7214_v61  ;;  %v7213_v57 = vadd.f32 %v7149_v17, %v6943_v41  ;;  %v6068_v4 = vpop.permute.xlu0 %6067  ;;  %v7163_v17 = vld [vmem:[%s13978_s0 + $0x150] sm:$0xff] }
 0x989   :  { %v6526_v37 = vld [vmem:[#allocation3 + $0x1e8] sm:$0xff]  ;;  %6197 = vst.msk [vmem:[#allocation3 + $0x1f0] sm:$0xff] %vm2659_vm11, %v6068_v4  ;;  %v6070_v34 = vpop.permute.xlu1 %6069 }
 0x98a   :  { %7794 = vmatmul.mubr.msk.f32.gmra.mxu1 %vm3067_vm14, %v6526_v37  ;;  %7277 = vst.msk [vmem:[%s13983_s5 + $0xe0] sm:$0xff] %vm20_vm0, %v7213_v57  ;;  %v7166_v37 = vld [vmem:[%s13978_s0 + $0x168] sm:$0xff] }
 0x98b   :  { %6198 = vst.msk [vmem:[#allocation3 + $0x1f8] sm:$0xff] %vm2659_vm11, %v6070_v34 }
 0x98c   :  { %v6334_v32 = vpop.permute.xlu0 %6333 }
 0x98d   :  { %6463 = vst.msk [vmem:[#allocation3 + $0x1f0] sm:$0xff] %vm2926_vm13, %v6334_v32  ;;  %v6336_v3 = vpop.permute.xlu1 %6335 }
 0x98e   :  { %6464 = vst.msk [vmem:[#allocation3 + $0x1f8] sm:$0xff] %vm2926_vm13, %v6336_v3  ;;  %v7165_v3 = vld [vmem:[%s13978_s0 + $0x160] sm:$0xff] }
 0x98f   :  { %v7750_v33 = vpop.f32.mrf.mxu1 }
 0x990   :  { %v6958_v8 = vadd.f32 %v7750_v33, %v13276_v63 }
 0x991   :  { %v6952_v24 = vpop.f32.mrf.mxu1 }
 0x992   :  { %v7216_v19 = vadd.f32 %v7152_v21, %v6958_v8  ;;  %v6953_v10 = vadd.f32 %v13276_v63, %v6952_v24 }
 0x994   :  { %7280 = vst.msk [vmem:[%s13983_s5 + $0xf8] sm:$0xff] %vm20_vm0, %v7216_v19  ;;  %v7215_v35 = vadd.f32 %v7151_v14, %v6953_v10  ;;  %v6527_v55 = vld [vmem:[#allocation3 + $0x1f0] sm:$0xff]  ;;  %v7168_v14 = vld [vmem:[%s13978_s0 + $0x178] sm:$0xff] }
 0x995   :  { %7796 = vmatprep.mubr.msk.f32.mxu1 %vm3067_vm14, %v6527_v55  ;;  %v6528_v59 = vld [vmem:[#allocation3 + $0x1f8] sm:$0xff] }
 0x996   :  { %7279 = vst.msk [vmem:[%s13983_s5 + $0xf0] sm:$0xff] %vm20_vm0, %v7215_v35  ;;  %7797 = vmatmul.mubr.msk.f32.gmra.mxu1 %vm3067_vm14, %v6528_v59  ;;  %v7167_v35 = vld [vmem:[%s13978_s0 + $0x170] sm:$0xff] }
 0x99b   :  { %v7753_v40 = vpop.f32.mrf.mxu1 }
 0x99c   :  { %v6968_v23 = vadd.f32 %v7753_v40, %v13276_v63 }
 0x99d   :  { %v6962_v53 = vpop.f32.mrf.mxu1 }
 0x99e   :  { %v7218_v22 = vadd.f32 %v7154_v9, %v6968_v23  ;;  %v6963_v11 = vadd.f32 %v13276_v63, %v6962_v53  ;;  %v7170_v23 = vld [vmem:[%s13978_s0 + $0x188] sm:$0xff] }
 0x9a0   :  { %7282 = vst.msk [vmem:[%s13983_s5 + $0x108] sm:$0xff] %vm20_vm0, %v7218_v22  ;;  %v7217_v47 = vadd.f32 %v7153_v48, %v6963_v11  ;;  %v7169_v22 = vld [vmem:[%s13978_s0 + $0x180] sm:$0xff] }
 0x9a2   :  { %7281 = vst.msk [vmem:[%s13983_s5 + $0x100] sm:$0xff] %vm20_vm0, %v7217_v47 }
 0x9a7   :  { %v7756_v27 = vpop.f32.mrf.mxu1 }
 0x9a8   :  { %v6978_v12 = vadd.f32 %v7756_v27, %v13276_v63 }
 0x9a9   :  { %v6972_v56 = vpop.f32.mrf.mxu1 }
 0x9aa   :  { %v7220_v58 = vadd.f32 %v7156_v50, %v6978_v12  ;;  %v6973_v16 = vadd.f32 %v13276_v63, %v6972_v56  ;;  %v7172_v12 = vld [vmem:[%s13978_s0 + $0x198] sm:$0xff] }
 0x9ac   :  { %7284 = vst.msk [vmem:[%s13983_s5 + $0x118] sm:$0xff] %vm20_vm0, %v7220_v58  ;;  %v7219_v18 = vadd.f32 %v7155_v2, %v6973_v16  ;;  %v7171_v58 = vld [vmem:[%s13978_s0 + $0x190] sm:$0xff] }
 0x9ae   :  { %7283 = vst.msk [vmem:[%s13983_s5 + $0x110] sm:$0xff] %vm20_vm0, %v7219_v18 }
 0x9b3   :  { %v7759_v26 = vpop.f32.mrf.mxu1 }
 0x9b4   :  { %v6988_v49 = vadd.f32 %v7759_v26, %v13276_v63 }
 0x9b5   :  { %v6982_v13 = vpop.f32.mrf.mxu1 }
 0x9b6   :  { %v7222_v54 = vadd.f32 %v7158_v60, %v6988_v49  ;;  %v6983_v30 = vadd.f32 %v13276_v63, %v6982_v13  ;;  %v7174_v49 = vld [vmem:[%s13978_s0 + $0x1a8] sm:$0xff] }
 0x9b8   :  { %7286 = vst.msk [vmem:[%s13983_s5 + $0x128] sm:$0xff] %vm20_vm0, %v7222_v54  ;;  %v7221_v1 = vadd.f32 %v7157_v28, %v6983_v30  ;;  %v7173_v54 = vld [vmem:[%s13978_s0 + $0x1a0] sm:$0xff] }
 0x9ba   :  { %7285 = vst.msk [vmem:[%s13983_s5 + $0x120] sm:$0xff] %vm20_vm0, %v7221_v1 }
 0x9bf   :  { %v7762_v62 = vpop.f32.mrf.mxu1 }
 0x9c0   :  { %v6998_v45 = vadd.f32 %v7762_v62, %v13276_v63 }
 0x9c1   :  { %v6992_v52 = vpop.f32.mrf.mxu1 }
 0x9c2   :  { %v7224_v36 = vadd.f32 %v7160_v51, %v6998_v45  ;;  %v6993_v29 = vadd.f32 %v13276_v63, %v6992_v52  ;;  %v7176_v45 = vld [vmem:[%s13978_s0 + $0x1b8] sm:$0xff] }
 0x9c4   :  { %7288 = vst.msk [vmem:[%s13983_s5 + $0x138] sm:$0xff] %vm20_vm0, %v7224_v36  ;;  %v7223_v15 = vadd.f32 %v7159_v5, %v6993_v29  ;;  %v7175_v36 = vld [vmem:[%s13978_s0 + $0x1b0] sm:$0xff] }
 0x9c6   :  { %7287 = vst.msk [vmem:[%s13983_s5 + $0x130] sm:$0xff] %vm20_vm0, %v7223_v15 }
 0x9cb   :  { %v7765_v31 = vpop.f32.mrf.mxu1 }
 0x9cc   :  { %v7008_v0 = vadd.f32 %v7765_v31, %v13276_v63 }
 0x9cd   :  { %v7002_v42 = vpop.f32.mrf.mxu1 }
 0x9ce   :  { %v7226_v38 = vadd.f32 %v7162_v25, %v7008_v0  ;;  %v7003_v7 = vadd.f32 %v13276_v63, %v7002_v42  ;;  %v7178_v0 = vld [vmem:[%s13978_s0 + $0x1c8] sm:$0xff] }
 0x9d0   :  { %7290 = vst.msk [vmem:[%s13983_s5 + $0x148] sm:$0xff] %vm20_vm0, %v7226_v38  ;;  %v7225_v6 = vadd.f32 %v7161_v44, %v7003_v7  ;;  %v7177_v38 = vld [vmem:[%s13978_s0 + $0x1c0] sm:$0xff] }
 0x9d2   :  { %7289 = vst.msk [vmem:[%s13983_s5 + $0x140] sm:$0xff] %vm20_vm0, %v7225_v6 }
 0x9d6   :  { %v7768_v46 = vpop.f32.mrf.mxu1 }
 0x9d7   :  { %v7018_v39 = vadd.f32 %v7768_v46, %v13276_v63 }
 0x9d8   :  { %v7012_v43 = vpop.f32.mrf.mxu1 }
 0x9d9   :  { %v7228_v61 = vadd.f32 %v7164_v20, %v7018_v39  ;;  %v7013_v41 = vadd.f32 %v13276_v63, %v7012_v43  ;;  %v13819_v63 = vld [vmem:[%s13982_s4] ss:$0 sm:$0xff]  ;;  %v7180_v39 = vld [vmem:[%s13978_s0 + $0x1d8] sm:$0xff] }
 0x9db   :  { %7292 = vst.msk [vmem:[%s13983_s5 + $0x158] sm:$0xff] %vm20_vm0, %v7228_v61  ;;  %v7227_v57 = vadd.f32 %v7163_v17, %v7013_v41  ;;  %v7179_v61 = vld [vmem:[%s13978_s0 + $0x1d0] sm:$0xff] }
 0x9dd   :  { %7291 = vst.msk [vmem:[%s13983_s5 + $0x150] sm:$0xff] %vm20_vm0, %v7227_v57 }
 0x9e2   :  { %v7771_v4 = vpop.f32.mrf.mxu1 }
 0x9e3   :  { %v7028_v34 = vadd.f32 %v13819_v63, %v7771_v4 }
 0x9e4   :  { %v7022_v32 = vpop.f32.mrf.mxu1 }
 0x9e5   :  { %v7230_v33 = vadd.f32 %v7166_v37, %v7028_v34  ;;  %v7023_v21 = vadd.f32 %v13819_v63, %v7022_v32  ;;  %v7182_v34 = vld [vmem:[%s13978_s0 + $0x1e8] sm:$0xff] }
 0x9e7   :  { %7294 = vst.msk [vmem:[%s13983_s5 + $0x168] sm:$0xff] %vm20_vm0, %v7230_v33  ;;  %v7229_v8 = vadd.f32 %v7165_v3, %v7023_v21  ;;  %v7181_v33 = vld [vmem:[%s13978_s0 + $0x1e0] sm:$0xff] }
 0x9e9   :  { %7293 = vst.msk [vmem:[%s13983_s5 + $0x160] sm:$0xff] %vm20_vm0, %v7229_v8 }
 0x9ee   :  { %v7774_v24 = vpop.f32.mrf.mxu1 }
 0x9ef   :  { %v7038_v19 = vadd.f32 %v13819_v63, %v7774_v24 }
 0x9f0   :  { %v7032_v10 = vpop.f32.mrf.mxu1 }
 0x9f1   :  { %v7232_v55 = vadd.f32 %v7168_v14, %v7038_v19  ;;  %v7033_v59 = vadd.f32 %v13819_v63, %v7032_v10  ;;  %v7184_v19 = vld [vmem:[%s13978_s0 + $0x1f8] sm:$0xff] }
 0x9f3   :  { %7296 = vst.msk [vmem:[%s13983_s5 + $0x178] sm:$0xff] %vm20_vm0, %v7232_v55  ;;  %v7231_v40 = vadd.f32 %v7167_v35, %v7033_v59  ;;  %v7183_v55 = vld [vmem:[%s13978_s0 + $0x1f0] sm:$0xff] }
 0x9f5   :  { %7295 = vst.msk [vmem:[%s13983_s5 + $0x170] sm:$0xff] %vm20_vm0, %v7231_v40 }
 0x9fa   :  { %v7777_v9 = vpop.f32.mrf.mxu1 }
 0x9fb   :  { %v7048_v53 = vadd.f32 %v13819_v63, %v7777_v9 }
 0x9fc   :  { %v7042_v48 = vpop.f32.mrf.mxu1 }
 0x9fd   :  { %v7234_v11 = vadd.f32 %v7170_v23, %v7048_v53  ;;  %v7043_v47 = vadd.f32 %v13819_v63, %v7042_v48 }
 0x9ff   :  { %7298 = vst.msk [vmem:[%s13983_s5 + $0x188] sm:$0xff] %vm20_vm0, %v7234_v11  ;;  %v7233_v27 = vadd.f32 %v7169_v22, %v7043_v47 }
 0xa01   :  { %7297 = vst.msk [vmem:[%s13983_s5 + $0x180] sm:$0xff] %vm20_vm0, %v7233_v27 }
 0xa06   :  { %v7780_v50 = vpop.f32.mrf.mxu1 }
 0xa07   :  { %v7058_v56 = vadd.f32 %v13819_v63, %v7780_v50 }
 0xa08   :  { %v7052_v2 = vpop.f32.mrf.mxu1 }
 0xa09   :  { %v7236_v16 = vadd.f32 %v7172_v12, %v7058_v56  ;;  %v7053_v18 = vadd.f32 %v13819_v63, %v7052_v2 }
 0xa0b   :  { %7300 = vst.msk [vmem:[%s13983_s5 + $0x198] sm:$0xff] %vm20_vm0, %v7236_v16  ;;  %v7235_v26 = vadd.f32 %v7171_v58, %v7053_v18 }
 0xa0d   :  { %7299 = vst.msk [vmem:[%s13983_s5 + $0x190] sm:$0xff] %vm20_vm0, %v7235_v26 }
 0xa12   :  { %v7783_v60 = vpop.f32.mrf.mxu1 }
 0xa13   :  { %v7068_v13 = vadd.f32 %v13819_v63, %v7783_v60 }
 0xa14   :  { %v7062_v28 = vpop.f32.mrf.mxu1 }
 0xa15   :  { %v7238_v30 = vadd.f32 %v7174_v49, %v7068_v13  ;;  %v7063_v1 = vadd.f32 %v13819_v63, %v7062_v28 }
 0xa17   :  { %7302 = vst.msk [vmem:[%s13983_s5 + $0x1a8] sm:$0xff] %vm20_vm0, %v7238_v30  ;;  %v7237_v62 = vadd.f32 %v7173_v54, %v7063_v1 }
 0xa19   :  { %7301 = vst.msk [vmem:[%s13983_s5 + $0x1a0] sm:$0xff] %vm20_vm0, %v7237_v62 }
 0xa1e   :  { %v7786_v51 = vpop.f32.mrf.mxu1 }
 0xa1f   :  { %v7078_v52 = vadd.f32 %v13819_v63, %v7786_v51 }
 0xa20   :  { %v7072_v5 = vpop.f32.mrf.mxu1 }
 0xa21   :  { %v7240_v29 = vadd.f32 %v7176_v45, %v7078_v52  ;;  %v7073_v15 = vadd.f32 %v13819_v63, %v7072_v5 }
 0xa23   :  { %7304 = vst.msk [vmem:[%s13983_s5 + $0x1b8] sm:$0xff] %vm20_vm0, %v7240_v29  ;;  %v7239_v31 = vadd.f32 %v7175_v36, %v7073_v15 }
 0xa25   :  { %7303 = vst.msk [vmem:[%s13983_s5 + $0x1b0] sm:$0xff] %vm20_vm0, %v7239_v31 }
 0xa2a   :  { %v7789_v25 = vpop.f32.mrf.mxu1 }
 0xa2b   :  { %v7088_v42 = vadd.f32 %v13819_v63, %v7789_v25 }
 0xa2c   :  { %v7082_v44 = vpop.f32.mrf.mxu1 }
 0xa2d   :  { %v7242_v7 = vadd.f32 %v7178_v0, %v7088_v42  ;;  %v7083_v6 = vadd.f32 %v13819_v63, %v7082_v44 }
 0xa2f   :  { %7306 = vst.msk [vmem:[%s13983_s5 + $0x1c8] sm:$0xff] %vm20_vm0, %v7242_v7  ;;  %v7241_v46 = vadd.f32 %v7177_v38, %v7083_v6 }
 0xa31   :  { %7305 = vst.msk [vmem:[%s13983_s5 + $0x1c0] sm:$0xff] %vm20_vm0, %v7241_v46 }
 0xa3a   :  { %v7792_v20 = vpop.f32.mrf.mxu1 }
 0xa3b   :  { %v7098_v43 = vadd.f32 %v13819_v63, %v7792_v20 }
 0xa3c   :  { %v7092_v17 = vpop.f32.mrf.mxu1 }
 0xa3d   :  { %v7244_v41 = vadd.f32 %v7180_v39, %v7098_v43  ;;  %v7093_v57 = vadd.f32 %v13819_v63, %v7092_v17 }
 0xa3f   :  { %7308 = vst.msk [vmem:[%s13983_s5 + $0x1d8] sm:$0xff] %vm20_vm0, %v7244_v41  ;;  %v7243_v4 = vadd.f32 %v7179_v61, %v7093_v57 }
 0xa41   :  { %7307 = vst.msk [vmem:[%s13983_s5 + $0x1d0] sm:$0xff] %vm20_vm0, %v7243_v4 }
 0xa4a   :  { %v7795_v37 = vpop.f32.mrf.mxu1 }
 0xa4b   :  { %v7108_v32 = vadd.f32 %v13819_v63, %v7795_v37 }
 0xa4c   :  { %v7102_v3 = vpop.f32.mrf.mxu1 }
 0xa4d   :  { %v7246_v21 = vadd.f32 %v7182_v34, %v7108_v32  ;;  %v7103_v8 = vadd.f32 %v13819_v63, %v7102_v3 }
 0xa4f   :  { %7310 = vst.msk [vmem:[%s13983_s5 + $0x1e8] sm:$0xff] %vm20_vm0, %v7246_v21  ;;  %v7245_v24 = vadd.f32 %v7181_v33, %v7103_v8 }
 0xa51   :  { %7309 = vst.msk [vmem:[%s13983_s5 + $0x1e0] sm:$0xff] %vm20_vm0, %v7245_v24 }
 0xa56   :  { %v7798_v14 = vpop.f32.mrf.mxu1 }
 0xa57   :  { %v7118_v10 = vadd.f32 %v13819_v63, %v7798_v14 }
 0xa58   :  { %v7112_v35 = vpop.f32.mrf.mxu1 }
 0xa59   :  { %v7248_v59 = vadd.f32 %v7184_v19, %v7118_v10  ;;  %v7113_v40 = vadd.f32 %v13819_v63, %v7112_v35 }
 0xa5b   :  { %7312 = vst.msk [vmem:[%s13983_s5 + $0x1f8] sm:$0xff] %vm20_vm0, %v7248_v59  ;;  %v7247_v9 = vadd.f32 %v7183_v55, %v7113_v40 }
 0xa5d   :  { %7311 = vst.msk [vmem:[%s13983_s5 + $0x1f0] sm:$0xff] %vm20_vm0, %v7247_v9 }

</bundles_post_ra>
